<compile_context>
chip_gen: v7x
topology: tpu7x:2x2x1
jax: 0.10.0
libtpu: 0.0.40
codegen_flags: <defaults>
</compile_context>

<pallas_src>
import functools

import numpy as np
import jax
import jax.numpy as jnp
from jax.experimental import pallas as pl
from jax.experimental.pallas import tpu as pltpu

H = 128                                    # hidden width of the ResNet blocks
XR_DIM, XR_PAD = 67 * 3, 256               # marker features 201 -> 256 lanes
XB_DIM, XB_PAD = 3 + 6 + 21 * 6 + 24, 256  # body params 159 -> 256 lanes
BET_DIM, BET_PAD = 10, 128                 # betas 10 -> 128 lanes
XIN_PAD = XR_PAD + BET_PAD                 # merged pnet static input (384)

VMEM_LIMIT = 32 * 1024 * 1024


def _round_up(x, m):
    return ((x + m - 1) // m) * m


def _choose_row_tiles(n):
    """Row tiling for the pnet grid.

    Tiny inputs (<=128 rows) run as a single tile (no forced split: the
    per-grid-step overhead dominates and v5e/v6e have a single TensorCore).
    Larger inputs use 128-row tiles: the MXU sublane dim stays full, VMEM per
    tile is bounded, and on v7x the "parallel" grid shards across both cores
    only when each core gets >= 128 rows of real work.
    """
    n8 = _round_up(max(n, 1), 8)
    tm = n8 if n8 <= 128 else 128
    n_pad = _round_up(n8, tm)
    return n_pad, tm


def _choose_beta_batch_tile(B, T):
    """Group batch elements so each beta-kernel tile has ~128 rows."""
    bt = max(1, 128 // max(T, 1))
    return min(B, bt)


# --------------------------------------------------------------------------
# In-kernel ResNet block chain (shared by both kernels).
#   h -> for each block: t = relu(h@W0+b0); t = relu(t@W1+b1); h = t + h
# Matmul operands bf16, bias/ReLU/residual accumulation in f32 (portable to
# v5e which has no bf16 VALU).
# --------------------------------------------------------------------------
def _res_blocks(h, w_blks, b_blks):
    for (w0, w1), (b0, b1) in zip(w_blks, b_blks):
        t = jnp.maximum(
            jnp.dot(h.astype(jnp.bfloat16), w0,
                    preferred_element_type=jnp.float32) + b0, 0.0)
        t = jnp.maximum(
            jnp.dot(t.astype(jnp.bfloat16), w1,
                    preferred_element_type=jnp.float32) + b1, 0.0)
        h = t + h
    return h


# --------------------------------------------------------------------------
# Fused pnet kernel: the full n_recur recurrence
#   xb_0 = 0
#   repeat n_recur: xb = pnet(cat([xr, xb, betas])) + xb
# with the feedback path folded:
#   xb_r @ W_xb = (sum_{s<r} h_s) @ (W_out W_xb) + r * (b_out W_xb)
#   xb_final    = (sum_s h_s) @ W_out + n_recur * b_out
# Weights are DMA'd into VMEM once per tile and the recurrent state never
# leaves vregs/VMEM.
# --------------------------------------------------------------------------
def _pnet_kernel(xin_ref, w_static_ref, b_in_ref, w_ox_ref, bo_x_ref,
                 w_blk_ref, b_blk_ref, w_out_ref, b_out_ref, y_ref,
                 *, n_blocks, n_recur):
    f32, bf16 = jnp.float32, jnp.bfloat16
    # Iteration-invariant part of in_fc: merged xr+betas contribution + bias.
    static = (jnp.dot(xin_ref[...], w_static_ref[...],
                      preferred_element_type=f32) + b_in_ref[...])
    # Hoist all weight/bias loads out of the unrolled recurrence.
    w_ox = w_ox_ref[...]
    bo_x = bo_x_ref[...]
    w_blks = [(w_blk_ref[i, 0], w_blk_ref[i, 1]) for i in range(n_blocks)]
    b_blks = [(b_blk_ref[i, 0], b_blk_ref[i, 1]) for i in range(n_blocks)]

    tm = y_ref.shape[0]
    h_acc = jnp.zeros((tm, H), f32)          # sum of per-iteration block outputs
    for r in range(n_recur):                 # static unroll (n_recur == 3)
        if r == 0:
            h = static                       # xb == 0  =>  feedback term == 0
        else:
            h = (static
                 + jnp.dot(h_acc.astype(bf16), w_ox,
                           preferred_element_type=f32)
                 + float(r) * bo_x)
        h = _res_blocks(h, w_blks, b_blks)
        h_acc = h_acc + h
    y_ref[...] = (jnp.dot(h_acc.astype(bf16), w_out_ref[...],
                          preferred_element_type=f32)
                  + float(n_recur) * b_out_ref[...])


# --------------------------------------------------------------------------
# Fused beta-net kernel (one tile = `bt` batch elements of T frames each):
#   rep_0 = 0
#   repeat n_recur:
#     y   = beta_net(cat([xr, rep]))
#     rep = broadcast_T( weighted_mean_T(y + rep) )       # per batch element
# The masked mean is a per-batch weighted sum over T (weights pre-normalised
# in the wrapper), NOT a dense averaging-matrix matmul.
# --------------------------------------------------------------------------
def _beta_kernel(xr_ref, wn_ref, w_xr_ref, w_rep_ref, b_in_ref,
                 w_blk_ref, b_blk_ref, w_out_ref, b_out_ref, rep_ref,
                 *, n_blocks, n_recur):
    f32, bf16 = jnp.float32, jnp.bfloat16
    bt, T, _ = xr_ref.shape
    rows = bt * T

    xr2 = xr_ref[...].reshape(rows, XR_PAD)          # bf16, layout-preserving
    static = (jnp.dot(xr2, w_xr_ref[...], preferred_element_type=f32)
              + b_in_ref[...])
    wn = wn_ref[...]                                 # (bt, T, 1) f32, rows sum to 1
    w_rep = w_rep_ref[...]
    w_blks = [(w_blk_ref[i, 0], w_blk_ref[i, 1]) for i in range(n_blocks)]
    b_blks = [(b_blk_ref[i, 0], b_blk_ref[i, 1]) for i in range(n_blocks)]
    w_out = w_out_ref[...]
    b_out = b_out_ref[...]

    rep = jnp.zeros((bt, T, BET_PAD), f32)           # initial betas are zeros
    for r in range(n_recur):                         # static unroll (n_recur == 3)
        if r == 0:
            h = static
        else:
            h = static + jnp.dot(rep.reshape(rows, BET_PAD).astype(bf16),
                                 w_rep, preferred_element_type=f32)
        h = _res_blocks(h, w_blks, b_blks)
        y = jnp.dot(h.astype(bf16), w_out, preferred_element_type=f32) + b_out
        tmp = y.reshape(bt, T, BET_PAD) + rep
        # (masked) mean over T within each batch element + broadcast back.
        mean = jnp.sum(tmp * wn, axis=1, keepdims=True)      # (bt, 1, BET_PAD)
        rep = jnp.broadcast_to(mean, (bt, T, BET_PAD))
    rep_ref[...] = rep


# --------------------------------------------------------------------------
# pallas_call wrappers
# --------------------------------------------------------------------------
def _full_spec(shape):
    zeros = (0,) * len(shape)
    return pl.BlockSpec(shape, lambda i, _z=zeros: _z)


def pnet_apply(xin, p, tm, n_recur):
    n_pad = xin.shape[0]
    nb = p["w_blk"].shape[0]
    kernel = functools.partial(_pnet_kernel, n_blocks=nb, n_recur=n_recur)
    return pl.pallas_call(
        kernel,
        out_shape=jax.ShapeDtypeStruct((n_pad, XB_PAD), jnp.float32),
        grid_spec=pltpu.PrefetchScalarGridSpec(
            num_scalar_prefetch=0,
            grid=(n_pad // tm,),
            in_specs=[
                pl.BlockSpec((tm, XIN_PAD), lambda i: (i, 0)),  # xin (bf16)
                _full_spec((XIN_PAD, H)),        # w_static (bf16)
                _full_spec((1, H)),              # b_in     (f32)
                _full_spec((H, H)),              # w_ox = W_out@W_xb (bf16)
                _full_spec((1, H)),              # bo_x = b_out@W_xb (f32)
                _full_spec((nb, 2, H, H)),       # w_blk    (bf16)
                _full_spec((nb, 2, 1, H)),       # b_blk    (f32)
                _full_spec((H, XB_PAD)),         # w_out    (bf16)
                _full_spec((1, XB_PAD)),         # b_out    (f32)
            ],
            out_specs=pl.BlockSpec((tm, XB_PAD), lambda i: (i, 0)),
        ),
        compiler_params=pltpu.CompilerParams(
            dimension_semantics=("parallel",),
            vmem_limit_bytes=VMEM_LIMIT),
    )(xin, p["w_static"], p["b_in"], p["w_ox"], p["bo_x"],
      p["w_blk"], p["b_blk"], p["w_out"], p["b_out"])


def beta_apply(xr3, wn3, p, n_recur, bt):
    B_pad, T, _ = xr3.shape
    nb = p["w_blk"].shape[0]
    kernel = functools.partial(_beta_kernel, n_blocks=nb, n_recur=n_recur)
    return pl.pallas_call(
        kernel,
        out_shape=jax.ShapeDtypeStruct((B_pad, T, BET_PAD), jnp.float32),
        grid_spec=pltpu.PrefetchScalarGridSpec(
            num_scalar_prefetch=0,
            grid=(B_pad // bt,),
            in_specs=[
                pl.BlockSpec((bt, T, XR_PAD), lambda i: (i, 0, 0)),  # xr (bf16)
                pl.BlockSpec((bt, T, 1), lambda i: (i, 0, 0)),       # wn (f32)
                _full_spec((XR_PAD, H)),         # w_xr  (bf16)
                _full_spec((BET_PAD, H)),        # w_rep (bf16)
                _full_spec((1, H)),              # b_in
                _full_spec((nb, 2, H, H)),       # w_blk
                _full_spec((nb, 2, 1, H)),       # b_blk
                _full_spec((H, BET_PAD)),        # w_out
                _full_spec((1, BET_PAD)),        # b_out
            ],
            out_specs=pl.BlockSpec((bt, T, BET_PAD), lambda i: (i, 0, 0)),
        ),
        compiler_params=pltpu.CompilerParams(
            dimension_semantics=("parallel",),
            vmem_limit_bytes=VMEM_LIMIT),
    )(xr3, wn3, p["w_xr"], p["w_rep"], p["b_in"],
      p["w_blk"], p["b_blk"], p["w_out"], p["b_out"])


# --------------------------------------------------------------------------
# Parameters (nn.Linear-style uniform init), stored pre-padded / pre-split:
# matmul weights in bf16, biases in f32.  The pnet feedback fold (W_out@W_xb)
# is composed in f32 and cast to bf16 once.
# --------------------------------------------------------------------------
def _init_linear(key, fan_in, fan_out):
    kw, kb = jax.random.split(key)
    bound = 1.0 / float(np.sqrt(fan_in))
    w = jax.random.uniform(kw, (fan_in, fan_out), jnp.float32, -bound, bound)
    b = jax.random.uniform(kb, (fan_out,), jnp.float32, -bound, bound)
    return w, b


def _make_raw_resnet(key, in_splits, in_pads, h_dim, out_dim, out_pad,
                     n_blocks):
    keys = jax.random.split(key, 2 + 2 * n_blocks)
    in_dim = int(sum(in_splits))
    w_in, b_in = _init_linear(keys[0], in_dim, h_dim)
    w_out, b_out = _init_linear(keys[1], h_dim, out_dim)

    chunks, off = [], 0
    for d, dp in zip(in_splits, in_pads):
        wc = jnp.zeros((dp, h_dim), jnp.float32).at[:d, :].set(
            w_in[off:off + d])
        chunks.append(wc)                                 # f32, padded
        off += d

    wb, bb = [], []
    for i in range(n_blocks):
        w0, b0 = _init_linear(keys[2 + 2 * i], h_dim, h_dim)
        w1, b1 = _init_linear(keys[3 + 2 * i], h_dim, h_dim)
        wb.append(jnp.stack([w0, w1]).astype(jnp.bfloat16))
        bb.append(jnp.stack([b0[None, :], b1[None, :]]))

    w_out_pad = jnp.zeros((h_dim, out_pad), jnp.float32).at[:, :out_dim].set(
        w_out)
    b_out_pad = jnp.zeros((1, out_pad), jnp.float32).at[0, :out_dim].set(b_out)
    return dict(chunks_f32=chunks, b_in=b_in[None, :],
                w_blk=jnp.stack(wb), b_blk=jnp.stack(bb),
                w_out_f32=w_out_pad, b_out=b_out_pad)


def make_beta_params(key, n_blocks):
    raw = _make_raw_resnet(key, [XR_DIM, BET_DIM], [XR_PAD, BET_PAD],
                           H, BET_DIM, BET_PAD, n_blocks)
    return dict(
        w_xr=raw["chunks_f32"][0].astype(jnp.bfloat16),   # (256, H)
        w_rep=raw["chunks_f32"][1].astype(jnp.bfloat16),  # (128, H)
        b_in=raw["b_in"],
        w_blk=raw["w_blk"], b_blk=raw["b_blk"],
        w_out=raw["w_out_f32"].astype(jnp.bfloat16),      # (H, 128)
        b_out=raw["b_out"])


def make_pnet_params(key, n_blocks):
    raw = _make_raw_resnet(key, [XR_DIM, XB_DIM, BET_DIM],
                           [XR_PAD, XB_PAD, BET_PAD],
                           H, XB_DIM, XB_PAD, n_blocks)
    w_xr, w_xb, w_bet = raw["chunks_f32"]
    # Merged static input weight: rows [0:256] act on xr, rows [256:384] on betas.
    w_static = jnp.concatenate([w_xr, w_bet], axis=0).astype(jnp.bfloat16)
    # Feedback fold, composed in f32 before the single bf16 cast.
    w_ox = jnp.dot(raw["w_out_f32"], w_xb).astype(jnp.bfloat16)   # (H, H)
    bo_x = jnp.dot(raw["b_out"], w_xb)                            # (1, H) f32
    return dict(
        w_static=w_static,                                 # (384, H) bf16
        b_in=raw["b_in"],
        w_ox=w_ox, bo_x=bo_x,
        w_blk=raw["w_blk"], b_blk=raw["b_blk"],
        w_out=raw["w_out_f32"].astype(jnp.bfloat16),       # (H, 256)
        b_out=raw["b_out"])


# --------------------------------------------------------------------------
# Rotation post-processing (RotConverter.cont2aa), plain-JAX glue.
# Faithful port of torchgeometry rotation_matrix_to_angle_axis semantics.
# --------------------------------------------------------------------------
def _normalize(x, axis, eps=1e-12):
    n = jnp.sqrt(jnp.sum(x * x, axis=axis, keepdims=True))
    return x / jnp.maximum(n, eps)


def _cont2rotmat(cont6):  # (M, 6) -> (M, 3, 3) with columns b1, b2, b3
    m = cont6.reshape(-1, 3, 2)
    a1, a2 = m[:, :, 0], m[:, :, 1]
    b1 = _normalize(a1, 1)
    dot = jnp.sum(b1 * a2, axis=1, keepdims=True)
    b2 = _normalize(a2 - dot * b1, 1)
    b3 = jnp.cross(b1, b2, axis=1)
    return jnp.stack([b1, b2, b3], axis=-1)


def _rotmat2aa(R):  # (M, 3, 3) -> (M, 3)
    rt = jnp.transpose(R, (0, 2, 1))  # torchgeometry transposes first
    eps = 1e-6
    r = lambda i, j: rt[:, i, j]

    t0 = 1 + r(0, 0) - r(1, 1) - r(2, 2)
    q0 = jnp.stack([r(1, 2) - r(2, 1), t0,
                    r(0, 1) + r(1, 0), r(2, 0) + r(0, 2)], -1)
    t1 = 1 - r(0, 0) + r(1, 1) - r(2, 2)
    q1 = jnp.stack([r(2, 0) - r(0, 2), r(0, 1) + r(1, 0),
                    t1, r(1, 2) + r(2, 1)], -1)
    t2 = 1 - r(0, 0) - r(1, 1) + r(2, 2)
    q2 = jnp.stack([r(0, 1) - r(1, 0), r(2, 0) + r(0, 2),
                    r(1, 2) + r(2, 1), t2], -1)
    t3 = 1 + r(0, 0) + r(1, 1) + r(2, 2)
    q3 = jnp.stack([t3, r(1, 2) - r(2, 1),
                    r(2, 0) - r(0, 2), r(0, 1) - r(1, 0)], -1)

    d2 = r(2, 2) < eps
    d01 = r(0, 0) > r(1, 1)
    nd01 = r(0, 0) < -r(1, 1)
    c0 = d2 & d01
    c1 = d2 & (~d01)
    c2 = (~d2) & nd01

    q = jnp.where(c0[:, None], q0,
                  jnp.where(c1[:, None], q1,
                            jnp.where(c2[:, None], q2, q3)))
    t = jnp.where(c0, t0, jnp.where(c1, t1, jnp.where(c2, t2, t3)))
    q = q * (0.5 / jnp.sqrt(t))[:, None]

    # quaternion -> angle-axis
    sin_sq = q[:, 1] ** 2 + q[:, 2] ** 2 + q[:, 3] ** 2
    sin_t = jnp.sqrt(sin_sq)
    cos_t = q[:, 0]
    two_theta = 2.0 * jnp.where(cos_t < 0.0,
                                jnp.arctan2(-sin_t, -cos_t),
                                jnp.arctan2(sin_t, cos_t))
    safe_sin = jnp.where(sin_sq > 0.0, sin_t, 1.0)
    k = jnp.where(sin_sq > 0.0, two_theta / safe_sin, 2.0)
    return q[:, 1:4] * k[:, None]


def _cont2aa_post(xb):
    """xb: (N, 159) -> (N, 93)  (transl, glorot_aa, body_pose_aa, lh, rh)."""
    N = xb.shape[0]
    transl = xb[:, :3]
    cont = xb[:, 3:3 + 22 * 6]
    R = _cont2rotmat(cont.reshape(N * 22, 6))
    aa = _rotmat2aa(R).reshape(N, 22 * 3)
    glorot = aa[:, :3]
    body_pose = aa[:, 3:]
    lh = xb[:, 3 + 22 * 6:3 + 22 * 6 + 12]
    rh = xb[:, 3 + 22 * 6 + 12:]
    return jnp.concatenate([transl, glorot, body_pose, lh, rh], axis=-1)


# --------------------------------------------------------------------------
# MoshRegressor forward (beta_net and pnet each run as ONE fused Pallas call)
# --------------------------------------------------------------------------
class MoshRegressorPallas:
    def __init__(self, key):
        self.in_dim = XR_DIM           # 201
        self.h_dim = H                 # 128
        self.n_blocks = 10
        self.n_recur = 3
        self.body_shape_dim = BET_DIM  # 10
        self.body_dim = XB_DIM         # 159 (use_cont=True)
        kb, kp = jax.random.split(key)
        self.beta_params = make_beta_params(kb, self.n_blocks // 4)
        self.pnet_params = make_pnet_params(kp, self.n_blocks)

    def _betas_from_markers(self, xr, B, T, mask):
        """Fused beta_net recurrence; returns repeated betas (B*T, 10) f32."""
        bt = _choose_beta_batch_tile(B, T)
        B_pad = _round_up(B, bt)
        xr3 = (jnp.zeros((B_pad, T, XR_PAD), jnp.float32)
               .at[:B, :, :XR_DIM].set(xr.reshape(B, T, XR_DIM))
               .astype(jnp.bfloat16))
        if mask is None:
            w = jnp.ones((B, T), jnp.float32)
        else:
            w = jnp.asarray(mask, jnp.float32).reshape(B, T)
        s = w.sum(axis=1, keepdims=True)
        # Guarded normalisation (PyTorch would NaN on an all-zero mask row).
        wn = jnp.where(s > 0, w / jnp.maximum(s, 1e-12), 0.0)
        wn3 = jnp.zeros((B_pad, T, 1), jnp.float32).at[:B, :, 0].set(wn)
        rep = beta_apply(xr3, wn3, self.beta_params, self.n_recur, bt)
        return rep[:B, :, :BET_DIM].reshape(B * T, BET_DIM)

    def forward(self, marker_ref, B, T, mask=None, cur_betas=None):
        n = marker_ref.shape[0]                        # B * T
        xr = marker_ref.reshape(n, self.in_dim).astype(jnp.float32)

        if cur_betas is not None:
            betas = jnp.broadcast_to(
                cur_betas.astype(jnp.float32).reshape(B, 1, BET_DIM),
                (B, T, BET_DIM)).reshape(n, BET_DIM)
        else:
            betas = self._betas_from_markers(xr, B, T, mask)   # (n, 10) f32

        # Merged pnet static input [xr | betas], padded + pre-cast to bf16.
        n_pad, tm = _choose_row_tiles(n)
        xin = (jnp.zeros((n_pad, XIN_PAD), jnp.float32)
               .at[:n, :self.in_dim].set(xr)
               .at[:n, XR_PAD:XR_PAD + BET_DIM].set(betas)
               .astype(jnp.bfloat16))

        xb_pad = pnet_apply(xin, self.pnet_params, tm, self.n_recur)
        xb = xb_pad[:n, :self.body_dim]                # (n, 159)
        out = _cont2aa_post(xb)                        # (n, 93)
        return jnp.concatenate([out, betas], axis=-1)  # (n, 103)


if __name__ == "__main__":
    key = jax.random.PRNGKey(0)
    kparam, kdata = jax.random.split(key)

    model = MoshRegressorPallas(kparam)

    B, T, nk = 2, 8, 67
    marker_ref = jax.random.normal(kdata, (B * T, nk, 3), dtype=jnp.float32)

    fwd = jax.jit(lambda m: model.forward(m, B, T))
    out = jax.block_until_ready(fwd(marker_ref))

    assert out.shape == (B * T, 103), out.shape
    assert bool(jnp.all(jnp.isfinite(out)))
    print("KERNEL_OK")
</pallas_src>

<mosaic_0001>
module attributes {stable_mosaic.version = 11 : i64} {
  func.func @_beta_kernel(%arg0: i32, %arg1: memref<2x8x256xbf16, #tpu.memory_space<vmem>>, %arg2: memref<2x8x1xf32, #tpu.memory_space<vmem>>, %arg3: memref<256x128xbf16, #tpu.memory_space<vmem>>, %arg4: memref<128x128xbf16, #tpu.memory_space<vmem>>, %arg5: memref<1x128xf32, #tpu.memory_space<vmem>>, %arg6: memref<2x2x128x128xbf16, #tpu.memory_space<vmem>>, %arg7: memref<2x2x1x128xf32, #tpu.memory_space<vmem>>, %arg8: memref<128x128xbf16, #tpu.memory_space<vmem>>, %arg9: memref<1x128xf32, #tpu.memory_space<vmem>>, %arg10: memref<2x8x128xf32, #tpu.memory_space<vmem>>) attributes {dimension_semantics = [#tpu.dimension_semantics<parallel>], iteration_bounds = array<i64: 1>, scalar_prefetch = 0 : i64, scratch_operands = 0 : i64, tpu.core_type = #tpu.core_type<tc>, window_params = [{transform_indices = @transform_0, window_bounds = array<i64: 2, 8, 256>}, {transform_indices = @transform_1, window_bounds = array<i64: 2, 8, 1>}, {pipeline_mode = #tpu.pipeline_mode<synchronous>, transform_indices = @transform_2, window_bounds = array<i64: 256, 128>}, {pipeline_mode = #tpu.pipeline_mode<synchronous>, transform_indices = @transform_3, window_bounds = array<i64: 128, 128>}, {pipeline_mode = #tpu.pipeline_mode<synchronous>, transform_indices = @transform_4, window_bounds = array<i64: 1, 128>}, {pipeline_mode = #tpu.pipeline_mode<synchronous>, transform_indices = @transform_5, window_bounds = array<i64: 2, 2, 128, 128>}, {pipeline_mode = #tpu.pipeline_mode<synchronous>, transform_indices = @transform_6, window_bounds = array<i64: 2, 2, 1, 128>}, {pipeline_mode = #tpu.pipeline_mode<synchronous>, transform_indices = @transform_7, window_bounds = array<i64: 128, 128>}, {pipeline_mode = #tpu.pipeline_mode<synchronous>, transform_indices = @transform_8, window_bounds = array<i64: 1, 128>}, {transform_indices = @transform_9, window_bounds = array<i64: 2, 8, 128>}]} {
    %c0 = arith.constant 0 : index
    %c0_0 = arith.constant 0 : index
    %c0_1 = arith.constant 0 : index
    %0 = vector.load %arg1[%c0, %c0_0, %c0_1] : memref<2x8x256xbf16, #tpu.memory_space<vmem>>, vector<2x8x256xbf16>
    %1 = vector.shape_cast %0 : vector<2x8x256xbf16> to vector<16x256xbf16>
    %c0_2 = arith.constant 0 : index
    %c0_3 = arith.constant 0 : index
    %2 = vector.load %arg3[%c0_2, %c0_3] : memref<256x128xbf16, #tpu.memory_space<vmem>>, vector<256x128xbf16>
    %cst = arith.constant dense<0.000000e+00> : vector<16x128xf32>
    %3 = tpu.matmul %1, %2, %cst {dimension_numbers = #tpu.dot_dimension_numbers<[1], [0], [0], [1], [0, 0, 1, 1], [], []>} : vector<16x256xbf16>, vector<256x128xbf16>, vector<16x128xf32> -> vector<16x128xf32>
    %c0_4 = arith.constant 0 : index
    %c0_5 = arith.constant 0 : index
    %4 = vector.load %arg5[%c0_4, %c0_5] : memref<1x128xf32, #tpu.memory_space<vmem>>, vector<1x128xf32>
    %5 = vector.broadcast %4 : vector<1x128xf32> to vector<16x128xf32>
    %6 = arith.addf %3, %5 : vector<16x128xf32>
    %c0_6 = arith.constant 0 : index
    %c0_7 = arith.constant 0 : index
    %c0_8 = arith.constant 0 : index
    %7 = vector.load %arg2[%c0_6, %c0_7, %c0_8] : memref<2x8x1xf32, #tpu.memory_space<vmem>>, vector<2x8x1xf32>
    %c0_9 = arith.constant 0 : index
    %c0_10 = arith.constant 0 : index
    %8 = vector.load %arg4[%c0_9, %c0_10] : memref<128x128xbf16, #tpu.memory_space<vmem>>, vector<128x128xbf16>
    %c0_11 = arith.constant 0 : index
    %c0_12 = arith.constant 0 : index
    %c0_13 = arith.constant 0 : index
    %c0_14 = arith.constant 0 : index
    %9 = vector.load %arg6[%c0_11, %c0_12, %c0_13, %c0_14] : memref<2x2x128x128xbf16, #tpu.memory_space<vmem>>, vector<1x1x128x128xbf16>
    %10 = vector.shape_cast %9 : vector<1x1x128x128xbf16> to vector<128x128xbf16>
    %c0_15 = arith.constant 0 : index
    %c1 = arith.constant 1 : index
    %c0_16 = arith.constant 0 : index
    %c0_17 = arith.constant 0 : index
    %11 = vector.load %arg6[%c0_15, %c1, %c0_16, %c0_17] : memref<2x2x128x128xbf16, #tpu.memory_space<vmem>>, vector<1x1x128x128xbf16>
    %12 = vector.shape_cast %11 : vector<1x1x128x128xbf16> to vector<128x128xbf16>
    %c1_18 = arith.constant 1 : index
    %c0_19 = arith.constant 0 : index
    %c0_20 = arith.constant 0 : index
    %c0_21 = arith.constant 0 : index
    %13 = vector.load %arg6[%c1_18, %c0_19, %c0_20, %c0_21] : memref<2x2x128x128xbf16, #tpu.memory_space<vmem>>, vector<1x1x128x128xbf16>
    %14 = vector.shape_cast %13 : vector<1x1x128x128xbf16> to vector<128x128xbf16>
    %c1_22 = arith.constant 1 : index
    %c1_23 = arith.constant 1 : index
    %c0_24 = arith.constant 0 : index
    %c0_25 = arith.constant 0 : index
    %15 = vector.load %arg6[%c1_22, %c1_23, %c0_24, %c0_25] : memref<2x2x128x128xbf16, #tpu.memory_space<vmem>>, vector<1x1x128x128xbf16>
    %16 = vector.shape_cast %15 : vector<1x1x128x128xbf16> to vector<128x128xbf16>
    %c0_26 = arith.constant 0 : index
    %c0_27 = arith.constant 0 : index
    %c0_28 = arith.constant 0 : index
    %c0_29 = arith.constant 0 : index
    %17 = vector.load %arg7[%c0_26, %c0_27, %c0_28, %c0_29] : memref<2x2x1x128xf32, #tpu.memory_space<vmem>>, vector<1x1x1x128xf32>
    %18 = vector.shape_cast %17 : vector<1x1x1x128xf32> to vector<1x128xf32>
    %c0_30 = arith.constant 0 : index
    %c1_31 = arith.constant 1 : index
    %c0_32 = arith.constant 0 : index
    %c0_33 = arith.constant 0 : index
    %19 = vector.load %arg7[%c0_30, %c1_31, %c0_32, %c0_33] : memref<2x2x1x128xf32, #tpu.memory_space<vmem>>, vector<1x1x1x128xf32>
    %20 = vector.shape_cast %19 : vector<1x1x1x128xf32> to vector<1x128xf32>
    %c1_34 = arith.constant 1 : index
    %c0_35 = arith.constant 0 : index
    %c0_36 = arith.constant 0 : index
    %c0_37 = arith.constant 0 : index
    %21 = vector.load %arg7[%c1_34, %c0_35, %c0_36, %c0_37] : memref<2x2x1x128xf32, #tpu.memory_space<vmem>>, vector<1x1x1x128xf32>
    %22 = vector.shape_cast %21 : vector<1x1x1x128xf32> to vector<1x128xf32>
    %c1_38 = arith.constant 1 : index
    %c1_39 = arith.constant 1 : index
    %c0_40 = arith.constant 0 : index
    %c0_41 = arith.constant 0 : index
    %23 = vector.load %arg7[%c1_38, %c1_39, %c0_40, %c0_41] : memref<2x2x1x128xf32, #tpu.memory_space<vmem>>, vector<1x1x1x128xf32>
    %24 = vector.shape_cast %23 : vector<1x1x1x128xf32> to vector<1x128xf32>
    %c0_42 = arith.constant 0 : index
    %c0_43 = arith.constant 0 : index
    %25 = vector.load %arg8[%c0_42, %c0_43] : memref<128x128xbf16, #tpu.memory_space<vmem>>, vector<128x128xbf16>
    %c0_44 = arith.constant 0 : index
    %c0_45 = arith.constant 0 : index
    %26 = vector.load %arg9[%c0_44, %c0_45] : memref<1x128xf32, #tpu.memory_space<vmem>>, vector<1x128xf32>
    %cst_46 = arith.constant 0.000000e+00 : f32
    %27 = vector.broadcast %cst_46 : f32 to vector<2x8x128xf32>
    %28 = arith.truncf %6 : vector<16x128xf32> to vector<16x128xbf16>
    %cst_47 = arith.constant dense<0.000000e+00> : vector<16x128xf32>
    %29 = tpu.matmul %28, %10, %cst_47 {dimension_numbers = #tpu.dot_dimension_numbers<[1], [0], [0], [1], [0, 0, 1, 1], [], []>} : vector<16x128xbf16>, vector<128x128xbf16>, vector<16x128xf32> -> vector<16x128xf32>
    %30 = vector.broadcast %18 : vector<1x128xf32> to vector<16x128xf32>
    %31 = arith.addf %29, %30 : vector<16x128xf32>
    %cst_48 = arith.constant 0.000000e+00 : f32
    %32 = vector.broadcast %cst_48 : f32 to vector<16x128xf32>
    %33 = arith.maximumf %31, %32 : vector<16x128xf32>
    %34 = arith.truncf %33 : vector<16x128xf32> to vector<16x128xbf16>
    %cst_49 = arith.constant dense<0.000000e+00> : vector<16x128xf32>
    %35 = tpu.matmul %34, %12, %cst_49 {dimension_numbers = #tpu.dot_dimension_numbers<[1], [0], [0], [1], [0, 0, 1, 1], [], []>} : vector<16x128xbf16>, vector<128x128xbf16>, vector<16x128xf32> -> vector<16x128xf32>
    %36 = vector.broadcast %20 : vector<1x128xf32> to vector<16x128xf32>
    %37 = arith.addf %35, %36 : vector<16x128xf32>
    %cst_50 = arith.constant 0.000000e+00 : f32
    %38 = vector.broadcast %cst_50 : f32 to vector<16x128xf32>
    %39 = arith.maximumf %37, %38 : vector<16x128xf32>
    %40 = arith.addf %39, %6 : vector<16x128xf32>
    %41 = arith.truncf %40 : vector<16x128xf32> to vector<16x128xbf16>
    %cst_51 = arith.constant dense<0.000000e+00> : vector<16x128xf32>
    %42 = tpu.matmul %41, %14, %cst_51 {dimension_numbers = #tpu.dot_dimension_numbers<[1], [0], [0], [1], [0, 0, 1, 1], [], []>} : vector<16x128xbf16>, vector<128x128xbf16>, vector<16x128xf32> -> vector<16x128xf32>
    %43 = vector.broadcast %22 : vector<1x128xf32> to vector<16x128xf32>
    %44 = arith.addf %42, %43 : vector<16x128xf32>
    %cst_52 = arith.constant 0.000000e+00 : f32
    %45 = vector.broadcast %cst_52 : f32 to vector<16x128xf32>
    %46 = arith.maximumf %44, %45 : vector<16x128xf32>
    %47 = arith.truncf %46 : vector<16x128xf32> to vector<16x128xbf16>
    %cst_53 = arith.constant dense<0.000000e+00> : vector<16x128xf32>
    %48 = tpu.matmul %47, %16, %cst_53 {dimension_numbers = #tpu.dot_dimension_numbers<[1], [0], [0], [1], [0, 0, 1, 1], [], []>} : vector<16x128xbf16>, vector<128x128xbf16>, vector<16x128xf32> -> vector<16x128xf32>
    %49 = vector.broadcast %24 : vector<1x128xf32> to vector<16x128xf32>
    %50 = arith.addf %48, %49 : vector<16x128xf32>
    %cst_54 = arith.constant 0.000000e+00 : f32
    %51 = vector.broadcast %cst_54 : f32 to vector<16x128xf32>
    %52 = arith.maximumf %50, %51 : vector<16x128xf32>
    %53 = arith.addf %52, %40 : vector<16x128xf32>
    %54 = arith.truncf %53 : vector<16x128xf32> to vector<16x128xbf16>
    %cst_55 = arith.constant dense<0.000000e+00> : vector<16x128xf32>
    %55 = tpu.matmul %54, %25, %cst_55 {dimension_numbers = #tpu.dot_dimension_numbers<[1], [0], [0], [1], [0, 0, 1, 1], [], []>} : vector<16x128xbf16>, vector<128x128xbf16>, vector<16x128xf32> -> vector<16x128xf32>
    %56 = vector.broadcast %26 : vector<1x128xf32> to vector<16x128xf32>
    %57 = arith.addf %55, %56 : vector<16x128xf32>
    %58 = vector.shape_cast %57 : vector<16x128xf32> to vector<2x8x128xf32>
    %59 = arith.addf %58, %27 : vector<2x8x128xf32>
    %60 = vector.broadcast %7 : vector<2x8x1xf32> to vector<2x8x128xf32>
    %61 = arith.mulf %59, %60 : vector<2x8x128xf32>
    %cst_56 = arith.constant dense<0.000000e+00> : vector<2x128xf32>
    %62 = vector.multi_reduction <add>, %61, %cst_56 [1] : vector<2x8x128xf32> to vector<2x128xf32>
    %63 = vector.shape_cast %62 : vector<2x128xf32> to vector<2x1x128xf32>
    %64 = vector.shape_cast %63 : vector<2x1x128xf32> to vector<2x1x128xf32>
    %65 = vector.broadcast %64 : vector<2x1x128xf32> to vector<2x8x128xf32>
    %66 = vector.shape_cast %65 : vector<2x8x128xf32> to vector<16x128xf32>
    %67 = arith.truncf %66 : vector<16x128xf32> to vector<16x128xbf16>
    %cst_57 = arith.constant dense<0.000000e+00> : vector<16x128xf32>
    %68 = tpu.matmul %67, %8, %cst_57 {dimension_numbers = #tpu.dot_dimension_numbers<[1], [0], [0], [1], [0, 0, 1, 1], [], []>} : vector<16x128xbf16>, vector<128x128xbf16>, vector<16x128xf32> -> vector<16x128xf32>
    %69 = arith.addf %6, %68 : vector<16x128xf32>
    %70 = arith.truncf %69 : vector<16x128xf32> to vector<16x128xbf16>
    %cst_58 = arith.constant dense<0.000000e+00> : vector<16x128xf32>
    %71 = tpu.matmul %70, %10, %cst_58 {dimension_numbers = #tpu.dot_dimension_numbers<[1], [0], [0], [1], [0, 0, 1, 1], [], []>} : vector<16x128xbf16>, vector<128x128xbf16>, vector<16x128xf32> -> vector<16x128xf32>
    %72 = vector.broadcast %18 : vector<1x128xf32> to vector<16x128xf32>
    %73 = arith.addf %71, %72 : vector<16x128xf32>
    %cst_59 = arith.constant 0.000000e+00 : f32
    %74 = vector.broadcast %cst_59 : f32 to vector<16x128xf32>
    %75 = arith.maximumf %73, %74 : vector<16x128xf32>
    %76 = arith.truncf %75 : vector<16x128xf32> to vector<16x128xbf16>
    %cst_60 = arith.constant dense<0.000000e+00> : vector<16x128xf32>
    %77 = tpu.matmul %76, %12, %cst_60 {dimension_numbers = #tpu.dot_dimension_numbers<[1], [0], [0], [1], [0, 0, 1, 1], [], []>} : vector<16x128xbf16>, vector<128x128xbf16>, vector<16x128xf32> -> vector<16x128xf32>
    %78 = vector.broadcast %20 : vector<1x128xf32> to vector<16x128xf32>
    %79 = arith.addf %77, %78 : vector<16x128xf32>
    %cst_61 = arith.constant 0.000000e+00 : f32
    %80 = vector.broadcast %cst_61 : f32 to vector<16x128xf32>
    %81 = arith.maximumf %79, %80 : vector<16x128xf32>
    %82 = arith.addf %81, %69 : vector<16x128xf32>
    %83 = arith.truncf %82 : vector<16x128xf32> to vector<16x128xbf16>
    %cst_62 = arith.constant dense<0.000000e+00> : vector<16x128xf32>
    %84 = tpu.matmul %83, %14, %cst_62 {dimension_numbers = #tpu.dot_dimension_numbers<[1], [0], [0], [1], [0, 0, 1, 1], [], []>} : vector<16x128xbf16>, vector<128x128xbf16>, vector<16x128xf32> -> vector<16x128xf32>
    %85 = vector.broadcast %22 : vector<1x128xf32> to vector<16x128xf32>
    %86 = arith.addf %84, %85 : vector<16x128xf32>
    %cst_63 = arith.constant 0.000000e+00 : f32
    %87 = vector.broadcast %cst_63 : f32 to vector<16x128xf32>
    %88 = arith.maximumf %86, %87 : vector<16x128xf32>
    %89 = arith.truncf %88 : vector<16x128xf32> to vector<16x128xbf16>
    %cst_64 = arith.constant dense<0.000000e+00> : vector<16x128xf32>
    %90 = tpu.matmul %89, %16, %cst_64 {dimension_numbers = #tpu.dot_dimension_numbers<[1], [0], [0], [1], [0, 0, 1, 1], [], []>} : vector<16x128xbf16>, vector<128x128xbf16>, vector<16x128xf32> -> vector<16x128xf32>
    %91 = vector.broadcast %24 : vector<1x128xf32> to vector<16x128xf32>
    %92 = arith.addf %90, %91 : vector<16x128xf32>
    %cst_65 = arith.constant 0.000000e+00 : f32
    %93 = vector.broadcast %cst_65 : f32 to vector<16x128xf32>
    %94 = arith.maximumf %92, %93 : vector<16x128xf32>
    %95 = arith.addf %94, %82 : vector<16x128xf32>
    %96 = arith.truncf %95 : vector<16x128xf32> to vector<16x128xbf16>
    %cst_66 = arith.constant dense<0.000000e+00> : vector<16x128xf32>
    %97 = tpu.matmul %96, %25, %cst_66 {dimension_numbers = #tpu.dot_dimension_numbers<[1], [0], [0], [1], [0, 0, 1, 1], [], []>} : vector<16x128xbf16>, vector<128x128xbf16>, vector<16x128xf32> -> vector<16x128xf32>
    %98 = vector.broadcast %26 : vector<1x128xf32> to vector<16x128xf32>
    %99 = arith.addf %97, %98 : vector<16x128xf32>
    %100 = vector.shape_cast %99 : vector<16x128xf32> to vector<2x8x128xf32>
    %101 = arith.addf %100, %65 : vector<2x8x128xf32>
    %102 = vector.broadcast %7 : vector<2x8x1xf32> to vector<2x8x128xf32>
    %103 = arith.mulf %101, %102 : vector<2x8x128xf32>
    %cst_67 = arith.constant dense<0.000000e+00> : vector<2x128xf32>
    %104 = vector.multi_reduction <add>, %103, %cst_67 [1] : vector<2x8x128xf32> to vector<2x128xf32>
    %105 = vector.shape_cast %104 : vector<2x128xf32> to vector<2x1x128xf32>
    %106 = vector.shape_cast %105 : vector<2x1x128xf32> to vector<2x1x128xf32>
    %107 = vector.broadcast %106 : vector<2x1x128xf32> to vector<2x8x128xf32>
    %108 = vector.shape_cast %107 : vector<2x8x128xf32> to vector<16x128xf32>
    %109 = arith.truncf %108 : vector<16x128xf32> to vector<16x128xbf16>
    %cst_68 = arith.constant dense<0.000000e+00> : vector<16x128xf32>
    %110 = tpu.matmul %109, %8, %cst_68 {dimension_numbers = #tpu.dot_dimension_numbers<[1], [0], [0], [1], [0, 0, 1, 1], [], []>} : vector<16x128xbf16>, vector<128x128xbf16>, vector<16x128xf32> -> vector<16x128xf32>
    %111 = arith.addf %6, %110 : vector<16x128xf32>
    %112 = arith.truncf %111 : vector<16x128xf32> to vector<16x128xbf16>
    %cst_69 = arith.constant dense<0.000000e+00> : vector<16x128xf32>
    %113 = tpu.matmul %112, %10, %cst_69 {dimension_numbers = #tpu.dot_dimension_numbers<[1], [0], [0], [1], [0, 0, 1, 1], [], []>} : vector<16x128xbf16>, vector<128x128xbf16>, vector<16x128xf32> -> vector<16x128xf32>
    %114 = vector.broadcast %18 : vector<1x128xf32> to vector<16x128xf32>
    %115 = arith.addf %113, %114 : vector<16x128xf32>
    %cst_70 = arith.constant 0.000000e+00 : f32
    %116 = vector.broadcast %cst_70 : f32 to vector<16x128xf32>
    %117 = arith.maximumf %115, %116 : vector<16x128xf32>
    %118 = arith.truncf %117 : vector<16x128xf32> to vector<16x128xbf16>
    %cst_71 = arith.constant dense<0.000000e+00> : vector<16x128xf32>
    %119 = tpu.matmul %118, %12, %cst_71 {dimension_numbers = #tpu.dot_dimension_numbers<[1], [0], [0], [1], [0, 0, 1, 1], [], []>} : vector<16x128xbf16>, vector<128x128xbf16>, vector<16x128xf32> -> vector<16x128xf32>
    %120 = vector.broadcast %20 : vector<1x128xf32> to vector<16x128xf32>
    %121 = arith.addf %119, %120 : vector<16x128xf32>
    %cst_72 = arith.constant 0.000000e+00 : f32
    %122 = vector.broadcast %cst_72 : f32 to vector<16x128xf32>
    %123 = arith.maximumf %121, %122 : vector<16x128xf32>
    %124 = arith.addf %123, %111 : vector<16x128xf32>
    %125 = arith.truncf %124 : vector<16x128xf32> to vector<16x128xbf16>
    %cst_73 = arith.constant dense<0.000000e+00> : vector<16x128xf32>
    %126 = tpu.matmul %125, %14, %cst_73 {dimension_numbers = #tpu.dot_dimension_numbers<[1], [0], [0], [1], [0, 0, 1, 1], [], []>} : vector<16x128xbf16>, vector<128x128xbf16>, vector<16x128xf32> -> vector<16x128xf32>
    %127 = vector.broadcast %22 : vector<1x128xf32> to vector<16x128xf32>
    %128 = arith.addf %126, %127 : vector<16x128xf32>
    %cst_74 = arith.constant 0.000000e+00 : f32
    %129 = vector.broadcast %cst_74 : f32 to vector<16x128xf32>
    %130 = arith.maximumf %128, %129 : vector<16x128xf32>
    %131 = arith.truncf %130 : vector<16x128xf32> to vector<16x128xbf16>
    %cst_75 = arith.constant dense<0.000000e+00> : vector<16x128xf32>
    %132 = tpu.matmul %131, %16, %cst_75 {dimension_numbers = #tpu.dot_dimension_numbers<[1], [0], [0], [1], [0, 0, 1, 1], [], []>} : vector<16x128xbf16>, vector<128x128xbf16>, vector<16x128xf32> -> vector<16x128xf32>
    %133 = vector.broadcast %24 : vector<1x128xf32> to vector<16x128xf32>
    %134 = arith.addf %132, %133 : vector<16x128xf32>
    %cst_76 = arith.constant 0.000000e+00 : f32
    %135 = vector.broadcast %cst_76 : f32 to vector<16x128xf32>
    %136 = arith.maximumf %134, %135 : vector<16x128xf32>
    %137 = arith.addf %136, %124 : vector<16x128xf32>
    %138 = arith.truncf %137 : vector<16x128xf32> to vector<16x128xbf16>
    %cst_77 = arith.constant dense<0.000000e+00> : vector<16x128xf32>
    %139 = tpu.matmul %138, %25, %cst_77 {dimension_numbers = #tpu.dot_dimension_numbers<[1], [0], [0], [1], [0, 0, 1, 1], [], []>} : vector<16x128xbf16>, vector<128x128xbf16>, vector<16x128xf32> -> vector<16x128xf32>
    %140 = vector.broadcast %26 : vector<1x128xf32> to vector<16x128xf32>
    %141 = arith.addf %139, %140 : vector<16x128xf32>
    %142 = vector.shape_cast %141 : vector<16x128xf32> to vector<2x8x128xf32>
    %143 = arith.addf %142, %107 : vector<2x8x128xf32>
    %144 = vector.broadcast %7 : vector<2x8x1xf32> to vector<2x8x128xf32>
    %145 = arith.mulf %143, %144 : vector<2x8x128xf32>
    %cst_78 = arith.constant dense<0.000000e+00> : vector<2x128xf32>
    %146 = vector.multi_reduction <add>, %145, %cst_78 [1] : vector<2x8x128xf32> to vector<2x128xf32>
    %147 = vector.shape_cast %146 : vector<2x128xf32> to vector<2x1x128xf32>
    %148 = vector.shape_cast %147 : vector<2x1x128xf32> to vector<2x1x128xf32>
    %149 = vector.broadcast %148 : vector<2x1x128xf32> to vector<2x8x128xf32>
    %c0_79 = arith.constant 0 : index
    %c0_80 = arith.constant 0 : index
    %c0_81 = arith.constant 0 : index
    %150 = vector.load %arg10[%c0_79, %c0_80, %c0_81] : memref<2x8x128xf32, #tpu.memory_space<vmem>>, vector<2x8x128xf32>
    tpu.vector_store %arg10[%c0_79, %c0_80, %c0_81], %149 {strides = array<i32>} : memref<2x8x128xf32, #tpu.memory_space<vmem>>, vector<2x8x128xf32>,
    return
  }
  func.func @transform_0(%arg0: i32) -> (i32, i32, i32) {
    %c0_i32 = arith.constant 0 : i32
    %c0_i32_0 = arith.constant 0 : i32
    %c0_i32_1 = arith.constant 0 : i32
    return %arg0, %c0_i32, %c0_i32_0 : i32, i32, i32
  }
  func.func @transform_1(%arg0: i32) -> (i32, i32, i32) {
    %c0_i32 = arith.constant 0 : i32
    %c0_i32_0 = arith.constant 0 : i32
    %c0_i32_1 = arith.constant 0 : i32
    return %arg0, %c0_i32, %c0_i32_0 : i32, i32, i32
  }
  func.func @transform_2(%arg0: i32) -> (i32, i32) {
    %c0_i32 = arith.constant 0 : i32
    %c0_i32_0 = arith.constant 0 : i32
    %c0_i32_1 = arith.constant 0 : i32
    return %c0_i32, %c0_i32_0 : i32, i32
  }
  func.func @transform_3(%arg0: i32) -> (i32, i32) {
    %c0_i32 = arith.constant 0 : i32
    %c0_i32_0 = arith.constant 0 : i32
    %c0_i32_1 = arith.constant 0 : i32
    return %c0_i32, %c0_i32_0 : i32, i32
  }
  func.func @transform_4(%arg0: i32) -> (i32, i32) {
    %c0_i32 = arith.constant 0 : i32
    %c0_i32_0 = arith.constant 0 : i32
    %c0_i32_1 = arith.constant 0 : i32
    return %c0_i32, %c0_i32_0 : i32, i32
  }
  func.func @transform_5(%arg0: i32) -> (i32, i32, i32, i32) {
    %c0_i32 = arith.constant 0 : i32
    %c0_i32_0 = arith.constant 0 : i32
    %c0_i32_1 = arith.constant 0 : i32
    %c0_i32_2 = arith.constant 0 : i32
    %c0_i32_3 = arith.constant 0 : i32
    return %c0_i32, %c0_i32_0, %c0_i32_1, %c0_i32_2 : i32, i32, i32, i32
  }
  func.func @transform_6(%arg0: i32) -> (i32, i32, i32, i32) {
    %c0_i32 = arith.constant 0 : i32
    %c0_i32_0 = arith.constant 0 : i32
    %c0_i32_1 = arith.constant 0 : i32
    %c0_i32_2 = arith.constant 0 : i32
    %c0_i32_3 = arith.constant 0 : i32
    return %c0_i32, %c0_i32_0, %c0_i32_1, %c0_i32_2 : i32, i32, i32, i32
  }
  func.func @transform_7(%arg0: i32) -> (i32, i32) {
    %c0_i32 = arith.constant 0 : i32
    %c0_i32_0 = arith.constant 0 : i32
    %c0_i32_1 = arith.constant 0 : i32
    return %c0_i32, %c0_i32_0 : i32, i32
  }
  func.func @transform_8(%arg0: i32) -> (i32, i32) {
    %c0_i32 = arith.constant 0 : i32
    %c0_i32_0 = arith.constant 0 : i32
    %c0_i32_1 = arith.constant 0 : i32
    return %c0_i32, %c0_i32_0 : i32, i32
  }
  func.func @transform_9(%arg0: i32) -> (i32, i32, i32) {
    %c0_i32 = arith.constant 0 : i32
    %c0_i32_0 = arith.constant 0 : i32
    %c0_i32_1 = arith.constant 0 : i32
    return %arg0, %c0_i32, %c0_i32_0 : i32, i32, i32
  }
}

module attributes {stable_mosaic.version = 11 : i64} {
  func.func @_pnet_kernel(%arg0: i32, %arg1: memref<16x384xbf16, #tpu.memory_space<vmem>>, %arg2: memref<384x128xbf16, #tpu.memory_space<vmem>>, %arg3: memref<1x128xf32, #tpu.memory_space<vmem>>, %arg4: memref<128x128xbf16, #tpu.memory_space<vmem>>, %arg5: memref<1x128xf32, #tpu.memory_space<vmem>>, %arg6: memref<10x2x128x128xbf16, #tpu.memory_space<vmem>>, %arg7: memref<10x2x1x128xf32, #tpu.memory_space<vmem>>, %arg8: memref<128x256xbf16, #tpu.memory_space<vmem>>, %arg9: memref<1x256xf32, #tpu.memory_space<vmem>>, %arg10: memref<16x256xf32, #tpu.memory_space<vmem>>) attributes {dimension_semantics = [#tpu.dimension_semantics<parallel>], iteration_bounds = array<i64: 1>, scalar_prefetch = 0 : i64, scratch_operands = 0 : i64, tpu.core_type = #tpu.core_type<tc>, window_params = [{transform_indices = @transform_0, window_bounds = array<i64: 16, 384>}, {pipeline_mode = #tpu.pipeline_mode<synchronous>, transform_indices = @transform_1, window_bounds = array<i64: 384, 128>}, {pipeline_mode = #tpu.pipeline_mode<synchronous>, transform_indices = @transform_2, window_bounds = array<i64: 1, 128>}, {pipeline_mode = #tpu.pipeline_mode<synchronous>, transform_indices = @transform_3, window_bounds = array<i64: 128, 128>}, {pipeline_mode = #tpu.pipeline_mode<synchronous>, transform_indices = @transform_4, window_bounds = array<i64: 1, 128>}, {pipeline_mode = #tpu.pipeline_mode<synchronous>, transform_indices = @transform_5, window_bounds = array<i64: 10, 2, 128, 128>}, {pipeline_mode = #tpu.pipeline_mode<synchronous>, transform_indices = @transform_6, window_bounds = array<i64: 10, 2, 1, 128>}, {pipeline_mode = #tpu.pipeline_mode<synchronous>, transform_indices = @transform_7, window_bounds = array<i64: 128, 256>}, {pipeline_mode = #tpu.pipeline_mode<synchronous>, transform_indices = @transform_8, window_bounds = array<i64: 1, 256>}, {transform_indices = @transform_9, window_bounds = array<i64: 16, 256>}]} {
    %c0 = arith.constant 0 : index
    %c0_0 = arith.constant 0 : index
    %0 = vector.load %arg1[%c0, %c0_0] : memref<16x384xbf16, #tpu.memory_space<vmem>>, vector<16x384xbf16>
    %c0_1 = arith.constant 0 : index
    %c0_2 = arith.constant 0 : index
    %1 = vector.load %arg2[%c0_1, %c0_2] : memref<384x128xbf16, #tpu.memory_space<vmem>>, vector<384x128xbf16>
    %cst = arith.constant dense<0.000000e+00> : vector<16x128xf32>
    %2 = tpu.matmul %0, %1, %cst {dimension_numbers = #tpu.dot_dimension_numbers<[1], [0], [0], [1], [0, 0, 1, 1], [], []>} : vector<16x384xbf16>, vector<384x128xbf16>, vector<16x128xf32> -> vector<16x128xf32>
    %c0_3 = arith.constant 0 : index
    %c0_4 = arith.constant 0 : index
    %3 = vector.load %arg3[%c0_3, %c0_4] : memref<1x128xf32, #tpu.memory_space<vmem>>, vector<1x128xf32>
    %4 = vector.broadcast %3 : vector<1x128xf32> to vector<16x128xf32>
    %5 = arith.addf %2, %4 : vector<16x128xf32>
    %c0_5 = arith.constant 0 : index
    %c0_6 = arith.constant 0 : index
    %6 = vector.load %arg4[%c0_5, %c0_6] : memref<128x128xbf16, #tpu.memory_space<vmem>>, vector<128x128xbf16>
    %c0_7 = arith.constant 0 : index
    %c0_8 = arith.constant 0 : index
    %7 = vector.load %arg5[%c0_7, %c0_8] : memref<1x128xf32, #tpu.memory_space<vmem>>, vector<1x128xf32>
    %c0_9 = arith.constant 0 : index
    %c0_10 = arith.constant 0 : index
    %c0_11 = arith.constant 0 : index
    %c0_12 = arith.constant 0 : index
    %8 = vector.load %arg6[%c0_9, %c0_10, %c0_11, %c0_12] : memref<10x2x128x128xbf16, #tpu.memory_space<vmem>>, vector<1x1x128x128xbf16>
    %9 = vector.shape_cast %8 : vector<1x1x128x128xbf16> to vector<128x128xbf16>
    %c0_13 = arith.constant 0 : index
    %c1 = arith.constant 1 : index
    %c0_14 = arith.constant 0 : index
    %c0_15 = arith.constant 0 : index
    %10 = vector.load %arg6[%c0_13, %c1, %c0_14, %c0_15] : memref<10x2x128x128xbf16, #tpu.memory_space<vmem>>, vector<1x1x128x128xbf16>
    %11 = vector.shape_cast %10 : vector<1x1x128x128xbf16> to vector<128x128xbf16>
    %c1_16 = arith.constant 1 : index
    %c0_17 = arith.constant 0 : index
    %c0_18 = arith.constant 0 : index
    %c0_19 = arith.constant 0 : index
    %12 = vector.load %arg6[%c1_16, %c0_17, %c0_18, %c0_19] : memref<10x2x128x128xbf16, #tpu.memory_space<vmem>>, vector<1x1x128x128xbf16>
    %13 = vector.shape_cast %12 : vector<1x1x128x128xbf16> to vector<128x128xbf16>
    %c1_20 = arith.constant 1 : index
    %c1_21 = arith.constant 1 : index
    %c0_22 = arith.constant 0 : index
    %c0_23 = arith.constant 0 : index
    %14 = vector.load %arg6[%c1_20, %c1_21, %c0_22, %c0_23] : memref<10x2x128x128xbf16, #tpu.memory_space<vmem>>, vector<1x1x128x128xbf16>
    %15 = vector.shape_cast %14 : vector<1x1x128x128xbf16> to vector<128x128xbf16>
    %c2 = arith.constant 2 : index
    %c0_24 = arith.constant 0 : index
    %c0_25 = arith.constant 0 : index
    %c0_26 = arith.constant 0 : index
    %16 = vector.load %arg6[%c2, %c0_24, %c0_25, %c0_26] : memref<10x2x128x128xbf16, #tpu.memory_space<vmem>>, vector<1x1x128x128xbf16>
    %17 = vector.shape_cast %16 : vector<1x1x128x128xbf16> to vector<128x128xbf16>
    %c2_27 = arith.constant 2 : index
    %c1_28 = arith.constant 1 : index
    %c0_29 = arith.constant 0 : index
    %c0_30 = arith.constant 0 : index
    %18 = vector.load %arg6[%c2_27, %c1_28, %c0_29, %c0_30] : memref<10x2x128x128xbf16, #tpu.memory_space<vmem>>, vector<1x1x128x128xbf16>
    %19 = vector.shape_cast %18 : vector<1x1x128x128xbf16> to vector<128x128xbf16>
    %c3 = arith.constant 3 : index
    %c0_31 = arith.constant 0 : index
    %c0_32 = arith.constant 0 : index
    %c0_33 = arith.constant 0 : index
    %20 = vector.load %arg6[%c3, %c0_31, %c0_32, %c0_33] : memref<10x2x128x128xbf16, #tpu.memory_space<vmem>>, vector<1x1x128x128xbf16>
    %21 = vector.shape_cast %20 : vector<1x1x128x128xbf16> to vector<128x128xbf16>
    %c3_34 = arith.constant 3 : index
    %c1_35 = arith.constant 1 : index
    %c0_36 = arith.constant 0 : index
    %c0_37 = arith.constant 0 : index
    %22 = vector.load %arg6[%c3_34, %c1_35, %c0_36, %c0_37] : memref<10x2x128x128xbf16, #tpu.memory_space<vmem>>, vector<1x1x128x128xbf16>
    %23 = vector.shape_cast %22 : vector<1x1x128x128xbf16> to vector<128x128xbf16>
    %c4 = arith.constant 4 : index
    %c0_38 = arith.constant 0 : index
    %c0_39 = arith.constant 0 : index
    %c0_40 = arith.constant 0 : index
    %24 = vector.load %arg6[%c4, %c0_38, %c0_39, %c0_40] : memref<10x2x128x128xbf16, #tpu.memory_space<vmem>>, vector<1x1x128x128xbf16>
    %25 = vector.shape_cast %24 : vector<1x1x128x128xbf16> to vector<128x128xbf16>
    %c4_41 = arith.constant 4 : index
    %c1_42 = arith.constant 1 : index
    %c0_43 = arith.constant 0 : index
    %c0_44 = arith.constant 0 : index
    %26 = vector.load %arg6[%c4_41, %c1_42, %c0_43, %c0_44] : memref<10x2x128x128xbf16, #tpu.memory_space<vmem>>, vector<1x1x128x128xbf16>
    %27 = vector.shape_cast %26 : vector<1x1x128x128xbf16> to vector<128x128xbf16>
    %c5 = arith.constant 5 : index
    %c0_45 = arith.constant 0 : index
    %c0_46 = arith.constant 0 : index
    %c0_47 = arith.constant 0 : index
    %28 = vector.load %arg6[%c5, %c0_45, %c0_46, %c0_47] : memref<10x2x128x128xbf16, #tpu.memory_space<vmem>>, vector<1x1x128x128xbf16>
    %29 = vector.shape_cast %28 : vector<1x1x128x128xbf16> to vector<128x128xbf16>
    %c5_48 = arith.constant 5 : index
    %c1_49 = arith.constant 1 : index
    %c0_50 = arith.constant 0 : index
    %c0_51 = arith.constant 0 : index
    %30 = vector.load %arg6[%c5_48, %c1_49, %c0_50, %c0_51] : memref<10x2x128x128xbf16, #tpu.memory_space<vmem>>, vector<1x1x128x128xbf16>
    %31 = vector.shape_cast %30 : vector<1x1x128x128xbf16> to vector<128x128xbf16>
    %c6 = arith.constant 6 : index
    %c0_52 = arith.constant 0 : index
    %c0_53 = arith.constant 0 : index
    %c0_54 = arith.constant 0 : index
    %32 = vector.load %arg6[%c6, %c0_52, %c0_53, %c0_54] : memref<10x2x128x128xbf16, #tpu.memory_space<vmem>>, vector<1x1x128x128xbf16>
    %33 = vector.shape_cast %32 : vector<1x1x128x128xbf16> to vector<128x128xbf16>
    %c6_55 = arith.constant 6 : index
    %c1_56 = arith.constant 1 : index
    %c0_57 = arith.constant 0 : index
    %c0_58 = arith.constant 0 : index
    %34 = vector.load %arg6[%c6_55, %c1_56, %c0_57, %c0_58] : memref<10x2x128x128xbf16, #tpu.memory_space<vmem>>, vector<1x1x128x128xbf16>
    %35 = vector.shape_cast %34 : vector<1x1x128x128xbf16> to vector<128x128xbf16>
    %c7 = arith.constant 7 : index
    %c0_59 = arith.constant 0 : index
    %c0_60 = arith.constant 0 : index
    %c0_61 = arith.constant 0 : index
    %36 = vector.load %arg6[%c7, %c0_59, %c0_60, %c0_61] : memref<10x2x128x128xbf16, #tpu.memory_space<vmem>>, vector<1x1x128x128xbf16>
    %37 = vector.shape_cast %36 : vector<1x1x128x128xbf16> to vector<128x128xbf16>
    %c7_62 = arith.constant 7 : index
    %c1_63 = arith.constant 1 : index
    %c0_64 = arith.constant 0 : index
    %c0_65 = arith.constant 0 : index
    %38 = vector.load %arg6[%c7_62, %c1_63, %c0_64, %c0_65] : memref<10x2x128x128xbf16, #tpu.memory_space<vmem>>, vector<1x1x128x128xbf16>
    %39 = vector.shape_cast %38 : vector<1x1x128x128xbf16> to vector<128x128xbf16>
    %c8 = arith.constant 8 : index
    %c0_66 = arith.constant 0 : index
    %c0_67 = arith.constant 0 : index
    %c0_68 = arith.constant 0 : index
    %40 = vector.load %arg6[%c8, %c0_66, %c0_67, %c0_68] : memref<10x2x128x128xbf16, #tpu.memory_space<vmem>>, vector<1x1x128x128xbf16>
    %41 = vector.shape_cast %40 : vector<1x1x128x128xbf16> to vector<128x128xbf16>
    %c8_69 = arith.constant 8 : index
    %c1_70 = arith.constant 1 : index
    %c0_71 = arith.constant 0 : index
    %c0_72 = arith.constant 0 : index
    %42 = vector.load %arg6[%c8_69, %c1_70, %c0_71, %c0_72] : memref<10x2x128x128xbf16, #tpu.memory_space<vmem>>, vector<1x1x128x128xbf16>
    %43 = vector.shape_cast %42 : vector<1x1x128x128xbf16> to vector<128x128xbf16>
    %c9 = arith.constant 9 : index
    %c0_73 = arith.constant 0 : index
    %c0_74 = arith.constant 0 : index
    %c0_75 = arith.constant 0 : index
    %44 = vector.load %arg6[%c9, %c0_73, %c0_74, %c0_75] : memref<10x2x128x128xbf16, #tpu.memory_space<vmem>>, vector<1x1x128x128xbf16>
    %45 = vector.shape_cast %44 : vector<1x1x128x128xbf16> to vector<128x128xbf16>
    %c9_76 = arith.constant 9 : index
    %c1_77 = arith.constant 1 : index
    %c0_78 = arith.constant 0 : index
    %c0_79 = arith.constant 0 : index
    %46 = vector.load %arg6[%c9_76, %c1_77, %c0_78, %c0_79] : memref<10x2x128x128xbf16, #tpu.memory_space<vmem>>, vector<1x1x128x128xbf16>
    %47 = vector.shape_cast %46 : vector<1x1x128x128xbf16> to vector<128x128xbf16>
    %c0_80 = arith.constant 0 : index
    %c0_81 = arith.constant 0 : index
    %c0_82 = arith.constant 0 : index
    %c0_83 = arith.constant 0 : index
    %48 = vector.load %arg7[%c0_80, %c0_81, %c0_82, %c0_83] : memref<10x2x1x128xf32, #tpu.memory_space<vmem>>, vector<1x1x1x128xf32>
    %49 = vector.shape_cast %48 : vector<1x1x1x128xf32> to vector<1x128xf32>
    %c0_84 = arith.constant 0 : index
    %c1_85 = arith.constant 1 : index
    %c0_86 = arith.constant 0 : index
    %c0_87 = arith.constant 0 : index
    %50 = vector.load %arg7[%c0_84, %c1_85, %c0_86, %c0_87] : memref<10x2x1x128xf32, #tpu.memory_space<vmem>>, vector<1x1x1x128xf32>
    %51 = vector.shape_cast %50 : vector<1x1x1x128xf32> to vector<1x128xf32>
    %c1_88 = arith.constant 1 : index
    %c0_89 = arith.constant 0 : index
    %c0_90 = arith.constant 0 : index
    %c0_91 = arith.constant 0 : index
    %52 = vector.load %arg7[%c1_88, %c0_89, %c0_90, %c0_91] : memref<10x2x1x128xf32, #tpu.memory_space<vmem>>, vector<1x1x1x128xf32>
    %53 = vector.shape_cast %52 : vector<1x1x1x128xf32> to vector<1x128xf32>
    %c1_92 = arith.constant 1 : index
    %c1_93 = arith.constant 1 : index
    %c0_94 = arith.constant 0 : index
    %c0_95 = arith.constant 0 : index
    %54 = vector.load %arg7[%c1_92, %c1_93, %c0_94, %c0_95] : memref<10x2x1x128xf32, #tpu.memory_space<vmem>>, vector<1x1x1x128xf32>
    %55 = vector.shape_cast %54 : vector<1x1x1x128xf32> to vector<1x128xf32>
    %c2_96 = arith.constant 2 : index
    %c0_97 = arith.constant 0 : index
    %c0_98 = arith.constant 0 : index
    %c0_99 = arith.constant 0 : index
    %56 = vector.load %arg7[%c2_96, %c0_97, %c0_98, %c0_99] : memref<10x2x1x128xf32, #tpu.memory_space<vmem>>, vector<1x1x1x128xf32>
    %57 = vector.shape_cast %56 : vector<1x1x1x128xf32> to vector<1x128xf32>
    %c2_100 = arith.constant 2 : index
    %c1_101 = arith.constant 1 : index
    %c0_102 = arith.constant 0 : index
    %c0_103 = arith.constant 0 : index
    %58 = vector.load %arg7[%c2_100, %c1_101, %c0_102, %c0_103] : memref<10x2x1x128xf32, #tpu.memory_space<vmem>>, vector<1x1x1x128xf32>
    %59 = vector.shape_cast %58 : vector<1x1x1x128xf32> to vector<1x128xf32>
    %c3_104 = arith.constant 3 : index
    %c0_105 = arith.constant 0 : index
    %c0_106 = arith.constant 0 : index
    %c0_107 = arith.constant 0 : index
    %60 = vector.load %arg7[%c3_104, %c0_105, %c0_106, %c0_107] : memref<10x2x1x128xf32, #tpu.memory_space<vmem>>, vector<1x1x1x128xf32>
    %61 = vector.shape_cast %60 : vector<1x1x1x128xf32> to vector<1x128xf32>
    %c3_108 = arith.constant 3 : index
    %c1_109 = arith.constant 1 : index
    %c0_110 = arith.constant 0 : index
    %c0_111 = arith.constant 0 : index
    %62 = vector.load %arg7[%c3_108, %c1_109, %c0_110, %c0_111] : memref<10x2x1x128xf32, #tpu.memory_space<vmem>>, vector<1x1x1x128xf32>
    %63 = vector.shape_cast %62 : vector<1x1x1x128xf32> to vector<1x128xf32>
    %c4_112 = arith.constant 4 : index
    %c0_113 = arith.constant 0 : index
    %c0_114 = arith.constant 0 : index
    %c0_115 = arith.constant 0 : index
    %64 = vector.load %arg7[%c4_112, %c0_113, %c0_114, %c0_115] : memref<10x2x1x128xf32, #tpu.memory_space<vmem>>, vector<1x1x1x128xf32>
    %65 = vector.shape_cast %64 : vector<1x1x1x128xf32> to vector<1x128xf32>
    %c4_116 = arith.constant 4 : index
    %c1_117 = arith.constant 1 : index
    %c0_118 = arith.constant 0 : index
    %c0_119 = arith.constant 0 : index
    %66 = vector.load %arg7[%c4_116, %c1_117, %c0_118, %c0_119] : memref<10x2x1x128xf32, #tpu.memory_space<vmem>>, vector<1x1x1x128xf32>
    %67 = vector.shape_cast %66 : vector<1x1x1x128xf32> to vector<1x128xf32>
    %c5_120 = arith.constant 5 : index
    %c0_121 = arith.constant 0 : index
    %c0_122 = arith.constant 0 : index
    %c0_123 = arith.constant 0 : index
    %68 = vector.load %arg7[%c5_120, %c0_121, %c0_122, %c0_123] : memref<10x2x1x128xf32, #tpu.memory_space<vmem>>, vector<1x1x1x128xf32>
    %69 = vector.shape_cast %68 : vector<1x1x1x128xf32> to vector<1x128xf32>
    %c5_124 = arith.constant 5 : index
    %c1_125 = arith.constant 1 : index
    %c0_126 = arith.constant 0 : index
    %c0_127 = arith.constant 0 : index
    %70 = vector.load %arg7[%c5_124, %c1_125, %c0_126, %c0_127] : memref<10x2x1x128xf32, #tpu.memory_space<vmem>>, vector<1x1x1x128xf32>
    %71 = vector.shape_cast %70 : vector<1x1x1x128xf32> to vector<1x128xf32>
    %c6_128 = arith.constant 6 : index
    %c0_129 = arith.constant 0 : index
    %c0_130 = arith.constant 0 : index
    %c0_131 = arith.constant 0 : index
    %72 = vector.load %arg7[%c6_128, %c0_129, %c0_130, %c0_131] : memref<10x2x1x128xf32, #tpu.memory_space<vmem>>, vector<1x1x1x128xf32>
    %73 = vector.shape_cast %72 : vector<1x1x1x128xf32> to vector<1x128xf32>
    %c6_132 = arith.constant 6 : index
    %c1_133 = arith.constant 1 : index
    %c0_134 = arith.constant 0 : index
    %c0_135 = arith.constant 0 : index
    %74 = vector.load %arg7[%c6_132, %c1_133, %c0_134, %c0_135] : memref<10x2x1x128xf32, #tpu.memory_space<vmem>>, vector<1x1x1x128xf32>
    %75 = vector.shape_cast %74 : vector<1x1x1x128xf32> to vector<1x128xf32>
    %c7_136 = arith.constant 7 : index
    %c0_137 = arith.constant 0 : index
    %c0_138 = arith.constant 0 : index
    %c0_139 = arith.constant 0 : index
    %76 = vector.load %arg7[%c7_136, %c0_137, %c0_138, %c0_139] : memref<10x2x1x128xf32, #tpu.memory_space<vmem>>, vector<1x1x1x128xf32>
    %77 = vector.shape_cast %76 : vector<1x1x1x128xf32> to vector<1x128xf32>
    %c7_140 = arith.constant 7 : index
    %c1_141 = arith.constant 1 : index
    %c0_142 = arith.constant 0 : index
    %c0_143 = arith.constant 0 : index
    %78 = vector.load %arg7[%c7_140, %c1_141, %c0_142, %c0_143] : memref<10x2x1x128xf32, #tpu.memory_space<vmem>>, vector<1x1x1x128xf32>
    %79 = vector.shape_cast %78 : vector<1x1x1x128xf32> to vector<1x128xf32>
    %c8_144 = arith.constant 8 : index
    %c0_145 = arith.constant 0 : index
    %c0_146 = arith.constant 0 : index
    %c0_147 = arith.constant 0 : index
    %80 = vector.load %arg7[%c8_144, %c0_145, %c0_146, %c0_147] : memref<10x2x1x128xf32, #tpu.memory_space<vmem>>, vector<1x1x1x128xf32>
    %81 = vector.shape_cast %80 : vector<1x1x1x128xf32> to vector<1x128xf32>
    %c8_148 = arith.constant 8 : index
    %c1_149 = arith.constant 1 : index
    %c0_150 = arith.constant 0 : index
    %c0_151 = arith.constant 0 : index
    %82 = vector.load %arg7[%c8_148, %c1_149, %c0_150, %c0_151] : memref<10x2x1x128xf32, #tpu.memory_space<vmem>>, vector<1x1x1x128xf32>
    %83 = vector.shape_cast %82 : vector<1x1x1x128xf32> to vector<1x128xf32>
    %c9_152 = arith.constant 9 : index
    %c0_153 = arith.constant 0 : index
    %c0_154 = arith.constant 0 : index
    %c0_155 = arith.constant 0 : index
    %84 = vector.load %arg7[%c9_152, %c0_153, %c0_154, %c0_155] : memref<10x2x1x128xf32, #tpu.memory_space<vmem>>, vector<1x1x1x128xf32>
    %85 = vector.shape_cast %84 : vector<1x1x1x128xf32> to vector<1x128xf32>
    %c9_156 = arith.constant 9 : index
    %c1_157 = arith.constant 1 : index
    %c0_158 = arith.constant 0 : index
    %c0_159 = arith.constant 0 : index
    %86 = vector.load %arg7[%c9_156, %c1_157, %c0_158, %c0_159] : memref<10x2x1x128xf32, #tpu.memory_space<vmem>>, vector<1x1x1x128xf32>
    %87 = vector.shape_cast %86 : vector<1x1x1x128xf32> to vector<1x128xf32>
    %cst_160 = arith.constant 0.000000e+00 : f32
    %88 = vector.broadcast %cst_160 : f32 to vector<16x128xf32>
    %89 = arith.truncf %5 : vector<16x128xf32> to vector<16x128xbf16>
    %cst_161 = arith.constant dense<0.000000e+00> : vector<16x128xf32>
    %90 = tpu.matmul %89, %9, %cst_161 {dimension_numbers = #tpu.dot_dimension_numbers<[1], [0], [0], [1], [0, 0, 1, 1], [], []>} : vector<16x128xbf16>, vector<128x128xbf16>, vector<16x128xf32> -> vector<16x128xf32>
    %91 = vector.broadcast %49 : vector<1x128xf32> to vector<16x128xf32>
    %92 = arith.addf %90, %91 : vector<16x128xf32>
    %cst_162 = arith.constant 0.000000e+00 : f32
    %93 = vector.broadcast %cst_162 : f32 to vector<16x128xf32>
    %94 = arith.maximumf %92, %93 : vector<16x128xf32>
    %95 = arith.truncf %94 : vector<16x128xf32> to vector<16x128xbf16>
    %cst_163 = arith.constant dense<0.000000e+00> : vector<16x128xf32>
    %96 = tpu.matmul %95, %11, %cst_163 {dimension_numbers = #tpu.dot_dimension_numbers<[1], [0], [0], [1], [0, 0, 1, 1], [], []>} : vector<16x128xbf16>, vector<128x128xbf16>, vector<16x128xf32> -> vector<16x128xf32>
    %97 = vector.broadcast %51 : vector<1x128xf32> to vector<16x128xf32>
    %98 = arith.addf %96, %97 : vector<16x128xf32>
    %cst_164 = arith.constant 0.000000e+00 : f32
    %99 = vector.broadcast %cst_164 : f32 to vector<16x128xf32>
    %100 = arith.maximumf %98, %99 : vector<16x128xf32>
    %101 = arith.addf %100, %5 : vector<16x128xf32>
    %102 = arith.truncf %101 : vector<16x128xf32> to vector<16x128xbf16>
    %cst_165 = arith.constant dense<0.000000e+00> : vector<16x128xf32>
    %103 = tpu.matmul %102, %13, %cst_165 {dimension_numbers = #tpu.dot_dimension_numbers<[1], [0], [0], [1], [0, 0, 1, 1], [], []>} : vector<16x128xbf16>, vector<128x128xbf16>, vector<16x128xf32> -> vector<16x128xf32>
    %104 = vector.broadcast %53 : vector<1x128xf32> to vector<16x128xf32>
    %105 = arith.addf %103, %104 : vector<16x128xf32>
    %cst_166 = arith.constant 0.000000e+00 : f32
    %106 = vector.broadcast %cst_166 : f32 to vector<16x128xf32>
    %107 = arith.maximumf %105, %106 : vector<16x128xf32>
    %108 = arith.truncf %107 : vector<16x128xf32> to vector<16x128xbf16>
    %cst_167 = arith.constant dense<0.000000e+00> : vector<16x128xf32>
    %109 = tpu.matmul %108, %15, %cst_167 {dimension_numbers = #tpu.dot_dimension_numbers<[1], [0], [0], [1], [0, 0, 1, 1], [], []>} : vector<16x128xbf16>, vector<128x128xbf16>, vector<16x128xf32> -> vector<16x128xf32>
    %110 = vector.broadcast %55 : vector<1x128xf32> to vector<16x128xf32>
    %111 = arith.addf %109, %110 : vector<16x128xf32>
    %cst_168 = arith.constant 0.000000e+00 : f32
    %112 = vector.broadcast %cst_168 : f32 to vector<16x128xf32>
    %113 = arith.maximumf %111, %112 : vector<16x128xf32>
    %114 = arith.addf %113, %101 : vector<16x128xf32>
    %115 = arith.truncf %114 : vector<16x128xf32> to vector<16x128xbf16>
    %cst_169 = arith.constant dense<0.000000e+00> : vector<16x128xf32>
    %116 = tpu.matmul %115, %17, %cst_169 {dimension_numbers = #tpu.dot_dimension_numbers<[1], [0], [0], [1], [0, 0, 1, 1], [], []>} : vector<16x128xbf16>, vector<128x128xbf16>, vector<16x128xf32> -> vector<16x128xf32>
    %117 = vector.broadcast %57 : vector<1x128xf32> to vector<16x128xf32>
    %118 = arith.addf %116, %117 : vector<16x128xf32>
    %cst_170 = arith.constant 0.000000e+00 : f32
    %119 = vector.broadcast %cst_170 : f32 to vector<16x128xf32>
    %120 = arith.maximumf %118, %119 : vector<16x128xf32>
    %121 = arith.truncf %120 : vector<16x128xf32> to vector<16x128xbf16>
    %cst_171 = arith.constant dense<0.000000e+00> : vector<16x128xf32>
    %122 = tpu.matmul %121, %19, %cst_171 {dimension_numbers = #tpu.dot_dimension_numbers<[1], [0], [0], [1], [0, 0, 1, 1], [], []>} : vector<16x128xbf16>, vector<128x128xbf16>, vector<16x128xf32> -> vector<16x128xf32>
    %123 = vector.broadcast %59 : vector<1x128xf32> to vector<16x128xf32>
    %124 = arith.addf %122, %123 : vector<16x128xf32>
    %cst_172 = arith.constant 0.000000e+00 : f32
    %125 = vector.broadcast %cst_172 : f32 to vector<16x128xf32>
    %126 = arith.maximumf %124, %125 : vector<16x128xf32>
    %127 = arith.addf %126, %114 : vector<16x128xf32>
    %128 = arith.truncf %127 : vector<16x128xf32> to vector<16x128xbf16>
    %cst_173 = arith.constant dense<0.000000e+00> : vector<16x128xf32>
    %129 = tpu.matmul %128, %21, %cst_173 {dimension_numbers = #tpu.dot_dimension_numbers<[1], [0], [0], [1], [0, 0, 1, 1], [], []>} : vector<16x128xbf16>, vector<128x128xbf16>, vector<16x128xf32> -> vector<16x128xf32>
    %130 = vector.broadcast %61 : vector<1x128xf32> to vector<16x128xf32>
    %131 = arith.addf %129, %130 : vector<16x128xf32>
    %cst_174 = arith.constant 0.000000e+00 : f32
    %132 = vector.broadcast %cst_174 : f32 to vector<16x128xf32>
    %133 = arith.maximumf %131, %132 : vector<16x128xf32>
    %134 = arith.truncf %133 : vector<16x128xf32> to vector<16x128xbf16>
    %cst_175 = arith.constant dense<0.000000e+00> : vector<16x128xf32>
    %135 = tpu.matmul %134, %23, %cst_175 {dimension_numbers = #tpu.dot_dimension_numbers<[1], [0], [0], [1], [0, 0, 1, 1], [], []>} : vector<16x128xbf16>, vector<128x128xbf16>, vector<16x128xf32> -> vector<16x128xf32>
    %136 = vector.broadcast %63 : vector<1x128xf32> to vector<16x128xf32>
    %137 = arith.addf %135, %136 : vector<16x128xf32>
    %cst_176 = arith.constant 0.000000e+00 : f32
    %138 = vector.broadcast %cst_176 : f32 to vector<16x128xf32>
    %139 = arith.maximumf %137, %138 : vector<16x128xf32>
    %140 = arith.addf %139, %127 : vector<16x128xf32>
    %141 = arith.truncf %140 : vector<16x128xf32> to vector<16x128xbf16>
    %cst_177 = arith.constant dense<0.000000e+00> : vector<16x128xf32>
    %142 = tpu.matmul %141, %25, %cst_177 {dimension_numbers = #tpu.dot_dimension_numbers<[1], [0], [0], [1], [0, 0, 1, 1], [], []>} : vector<16x128xbf16>, vector<128x128xbf16>, vector<16x128xf32> -> vector<16x128xf32>
    %143 = vector.broadcast %65 : vector<1x128xf32> to vector<16x128xf32>
    %144 = arith.addf %142, %143 : vector<16x128xf32>
    %cst_178 = arith.constant 0.000000e+00 : f32
    %145 = vector.broadcast %cst_178 : f32 to vector<16x128xf32>
    %146 = arith.maximumf %144, %145 : vector<16x128xf32>
    %147 = arith.truncf %146 : vector<16x128xf32> to vector<16x128xbf16>
    %cst_179 = arith.constant dense<0.000000e+00> : vector<16x128xf32>
    %148 = tpu.matmul %147, %27, %cst_179 {dimension_numbers = #tpu.dot_dimension_numbers<[1], [0], [0], [1], [0, 0, 1, 1], [], []>} : vector<16x128xbf16>, vector<128x128xbf16>, vector<16x128xf32> -> vector<16x128xf32>
    %149 = vector.broadcast %67 : vector<1x128xf32> to vector<16x128xf32>
    %150 = arith.addf %148, %149 : vector<16x128xf32>
    %cst_180 = arith.constant 0.000000e+00 : f32
    %151 = vector.broadcast %cst_180 : f32 to vector<16x128xf32>
    %152 = arith.maximumf %150, %151 : vector<16x128xf32>
    %153 = arith.addf %152, %140 : vector<16x128xf32>
    %154 = arith.truncf %153 : vector<16x128xf32> to vector<16x128xbf16>
    %cst_181 = arith.constant dense<0.000000e+00> : vector<16x128xf32>
    %155 = tpu.matmul %154, %29, %cst_181 {dimension_numbers = #tpu.dot_dimension_numbers<[1], [0], [0], [1], [0, 0, 1, 1], [], []>} : vector<16x128xbf16>, vector<128x128xbf16>, vector<16x128xf32> -> vector<16x128xf32>
    %156 = vector.broadcast %69 : vector<1x128xf32> to vector<16x128xf32>
    %157 = arith.addf %155, %156 : vector<16x128xf32>
    %cst_182 = arith.constant 0.000000e+00 : f32
    %158 = vector.broadcast %cst_182 : f32 to vector<16x128xf32>
    %159 = arith.maximumf %157, %158 : vector<16x128xf32>
    %160 = arith.truncf %159 : vector<16x128xf32> to vector<16x128xbf16>
    %cst_183 = arith.constant dense<0.000000e+00> : vector<16x128xf32>
    %161 = tpu.matmul %160, %31, %cst_183 {dimension_numbers = #tpu.dot_dimension_numbers<[1], [0], [0], [1], [0, 0, 1, 1], [], []>} : vector<16x128xbf16>, vector<128x128xbf16>, vector<16x128xf32> -> vector<16x128xf32>
    %162 = vector.broadcast %71 : vector<1x128xf32> to vector<16x128xf32>
    %163 = arith.addf %161, %162 : vector<16x128xf32>
    %cst_184 = arith.constant 0.000000e+00 : f32
    %164 = vector.broadcast %cst_184 : f32 to vector<16x128xf32>
    %165 = arith.maximumf %163, %164 : vector<16x128xf32>
    %166 = arith.addf %165, %153 : vector<16x128xf32>
    %167 = arith.truncf %166 : vector<16x128xf32> to vector<16x128xbf16>
    %cst_185 = arith.constant dense<0.000000e+00> : vector<16x128xf32>
    %168 = tpu.matmul %167, %33, %cst_185 {dimension_numbers = #tpu.dot_dimension_numbers<[1], [0], [0], [1], [0, 0, 1, 1], [], []>} : vector<16x128xbf16>, vector<128x128xbf16>, vector<16x128xf32> -> vector<16x128xf32>
    %169 = vector.broadcast %73 : vector<1x128xf32> to vector<16x128xf32>
    %170 = arith.addf %168, %169 : vector<16x128xf32>
    %cst_186 = arith.constant 0.000000e+00 : f32
    %171 = vector.broadcast %cst_186 : f32 to vector<16x128xf32>
    %172 = arith.maximumf %170, %171 : vector<16x128xf32>
    %173 = arith.truncf %172 : vector<16x128xf32> to vector<16x128xbf16>
    %cst_187 = arith.constant dense<0.000000e+00> : vector<16x128xf32>
    %174 = tpu.matmul %173, %35, %cst_187 {dimension_numbers = #tpu.dot_dimension_numbers<[1], [0], [0], [1], [0, 0, 1, 1], [], []>} : vector<16x128xbf16>, vector<128x128xbf16>, vector<16x128xf32> -> vector<16x128xf32>
    %175 = vector.broadcast %75 : vector<1x128xf32> to vector<16x128xf32>
    %176 = arith.addf %174, %175 : vector<16x128xf32>
    %cst_188 = arith.constant 0.000000e+00 : f32
    %177 = vector.broadcast %cst_188 : f32 to vector<16x128xf32>
    %178 = arith.maximumf %176, %177 : vector<16x128xf32>
    %179 = arith.addf %178, %166 : vector<16x128xf32>
    %180 = arith.truncf %179 : vector<16x128xf32> to vector<16x128xbf16>
    %cst_189 = arith.constant dense<0.000000e+00> : vector<16x128xf32>
    %181 = tpu.matmul %180, %37, %cst_189 {dimension_numbers = #tpu.dot_dimension_numbers<[1], [0], [0], [1], [0, 0, 1, 1], [], []>} : vector<16x128xbf16>, vector<128x128xbf16>, vector<16x128xf32> -> vector<16x128xf32>
    %182 = vector.broadcast %77 : vector<1x128xf32> to vector<16x128xf32>
    %183 = arith.addf %181, %182 : vector<16x128xf32>
    %cst_190 = arith.constant 0.000000e+00 : f32
    %184 = vector.broadcast %cst_190 : f32 to vector<16x128xf32>
    %185 = arith.maximumf %183, %184 : vector<16x128xf32>
    %186 = arith.truncf %185 : vector<16x128xf32> to vector<16x128xbf16>
    %cst_191 = arith.constant dense<0.000000e+00> : vector<16x128xf32>
    %187 = tpu.matmul %186, %39, %cst_191 {dimension_numbers = #tpu.dot_dimension_numbers<[1], [0], [0], [1], [0, 0, 1, 1], [], []>} : vector<16x128xbf16>, vector<128x128xbf16>, vector<16x128xf32> -> vector<16x128xf32>
    %188 = vector.broadcast %79 : vector<1x128xf32> to vector<16x128xf32>
    %189 = arith.addf %187, %188 : vector<16x128xf32>
    %cst_192 = arith.constant 0.000000e+00 : f32
    %190 = vector.broadcast %cst_192 : f32 to vector<16x128xf32>
    %191 = arith.maximumf %189, %190 : vector<16x128xf32>
    %192 = arith.addf %191, %179 : vector<16x128xf32>
    %193 = arith.truncf %192 : vector<16x128xf32> to vector<16x128xbf16>
    %cst_193 = arith.constant dense<0.000000e+00> : vector<16x128xf32>
    %194 = tpu.matmul %193, %41, %cst_193 {dimension_numbers = #tpu.dot_dimension_numbers<[1], [0], [0], [1], [0, 0, 1, 1], [], []>} : vector<16x128xbf16>, vector<128x128xbf16>, vector<16x128xf32> -> vector<16x128xf32>
    %195 = vector.broadcast %81 : vector<1x128xf32> to vector<16x128xf32>
    %196 = arith.addf %194, %195 : vector<16x128xf32>
    %cst_194 = arith.constant 0.000000e+00 : f32
    %197 = vector.broadcast %cst_194 : f32 to vector<16x128xf32>
    %198 = arith.maximumf %196, %197 : vector<16x128xf32>
    %199 = arith.truncf %198 : vector<16x128xf32> to vector<16x128xbf16>
    %cst_195 = arith.constant dense<0.000000e+00> : vector<16x128xf32>
    %200 = tpu.matmul %199, %43, %cst_195 {dimension_numbers = #tpu.dot_dimension_numbers<[1], [0], [0], [1], [0, 0, 1, 1], [], []>} : vector<16x128xbf16>, vector<128x128xbf16>, vector<16x128xf32> -> vector<16x128xf32>
    %201 = vector.broadcast %83 : vector<1x128xf32> to vector<16x128xf32>
    %202 = arith.addf %200, %201 : vector<16x128xf32>
    %cst_196 = arith.constant 0.000000e+00 : f32
    %203 = vector.broadcast %cst_196 : f32 to vector<16x128xf32>
    %204 = arith.maximumf %202, %203 : vector<16x128xf32>
    %205 = arith.addf %204, %192 : vector<16x128xf32>
    %206 = arith.truncf %205 : vector<16x128xf32> to vector<16x128xbf16>
    %cst_197 = arith.constant dense<0.000000e+00> : vector<16x128xf32>
    %207 = tpu.matmul %206, %45, %cst_197 {dimension_numbers = #tpu.dot_dimension_numbers<[1], [0], [0], [1], [0, 0, 1, 1], [], []>} : vector<16x128xbf16>, vector<128x128xbf16>, vector<16x128xf32> -> vector<16x128xf32>
    %208 = vector.broadcast %85 : vector<1x128xf32> to vector<16x128xf32>
    %209 = arith.addf %207, %208 : vector<16x128xf32>
    %cst_198 = arith.constant 0.000000e+00 : f32
    %210 = vector.broadcast %cst_198 : f32 to vector<16x128xf32>
    %211 = arith.maximumf %209, %210 : vector<16x128xf32>
    %212 = arith.truncf %211 : vector<16x128xf32> to vector<16x128xbf16>
    %cst_199 = arith.constant dense<0.000000e+00> : vector<16x128xf32>
    %213 = tpu.matmul %212, %47, %cst_199 {dimension_numbers = #tpu.dot_dimension_numbers<[1], [0], [0], [1], [0, 0, 1, 1], [], []>} : vector<16x128xbf16>, vector<128x128xbf16>, vector<16x128xf32> -> vector<16x128xf32>
    %214 = vector.broadcast %87 : vector<1x128xf32> to vector<16x128xf32>
    %215 = arith.addf %213, %214 : vector<16x128xf32>
    %cst_200 = arith.constant 0.000000e+00 : f32
    %216 = vector.broadcast %cst_200 : f32 to vector<16x128xf32>
    %217 = arith.maximumf %215, %216 : vector<16x128xf32>
    %218 = arith.addf %217, %205 : vector<16x128xf32>
    %219 = arith.addf %88, %218 : vector<16x128xf32>
    %220 = arith.truncf %219 : vector<16x128xf32> to vector<16x128xbf16>
    %cst_201 = arith.constant dense<0.000000e+00> : vector<16x128xf32>
    %221 = tpu.matmul %220, %6, %cst_201 {dimension_numbers = #tpu.dot_dimension_numbers<[1], [0], [0], [1], [0, 0, 1, 1], [], []>} : vector<16x128xbf16>, vector<128x128xbf16>, vector<16x128xf32> -> vector<16x128xf32>
    %222 = arith.addf %5, %221 : vector<16x128xf32>
    %cst_202 = arith.constant 1.000000e+00 : f32
    %223 = vector.broadcast %cst_202 : f32 to vector<1x128xf32>
    %224 = arith.mulf %223, %7 : vector<1x128xf32>
    %225 = vector.broadcast %224 : vector<1x128xf32> to vector<16x128xf32>
    %226 = arith.addf %222, %225 : vector<16x128xf32>
    %227 = arith.truncf %226 : vector<16x128xf32> to vector<16x128xbf16>
    %cst_203 = arith.constant dense<0.000000e+00> : vector<16x128xf32>
    %228 = tpu.matmul %227, %9, %cst_203 {dimension_numbers = #tpu.dot_dimension_numbers<[1], [0], [0], [1], [0, 0, 1, 1], [], []>} : vector<16x128xbf16>, vector<128x128xbf16>, vector<16x128xf32> -> vector<16x128xf32>
    %229 = vector.broadcast %49 : vector<1x128xf32> to vector<16x128xf32>
    %230 = arith.addf %228, %229 : vector<16x128xf32>
    %cst_204 = arith.constant 0.000000e+00 : f32
    %231 = vector.broadcast %cst_204 : f32 to vector<16x128xf32>
    %232 = arith.maximumf %230, %231 : vector<16x128xf32>
    %233 = arith.truncf %232 : vector<16x128xf32> to vector<16x128xbf16>
    %cst_205 = arith.constant dense<0.000000e+00> : vector<16x128xf32>
    %234 = tpu.matmul %233, %11, %cst_205 {dimension_numbers = #tpu.dot_dimension_numbers<[1], [0], [0], [1], [0, 0, 1, 1], [], []>} : vector<16x128xbf16>, vector<128x128xbf16>, vector<16x128xf32> -> vector<16x128xf32>
    %235 = vector.broadcast %51 : vector<1x128xf32> to vector<16x128xf32>
    %236 = arith.addf %234, %235 : vector<16x128xf32>
    %cst_206 = arith.constant 0.000000e+00 : f32
    %237 = vector.broadcast %cst_206 : f32 to vector<16x128xf32>
    %238 = arith.maximumf %236, %237 : vector<16x128xf32>
    %239 = arith.addf %238, %226 : vector<16x128xf32>
    %240 = arith.truncf %239 : vector<16x128xf32> to vector<16x128xbf16>
    %cst_207 = arith.constant dense<0.000000e+00> : vector<16x128xf32>
    %241 = tpu.matmul %240, %13, %cst_207 {dimension_numbers = #tpu.dot_dimension_numbers<[1], [0], [0], [1], [0, 0, 1, 1], [], []>} : vector<16x128xbf16>, vector<128x128xbf16>, vector<16x128xf32> -> vector<16x128xf32>
    %242 = vector.broadcast %53 : vector<1x128xf32> to vector<16x128xf32>
    %243 = arith.addf %241, %242 : vector<16x128xf32>
    %cst_208 = arith.constant 0.000000e+00 : f32
    %244 = vector.broadcast %cst_208 : f32 to vector<16x128xf32>
    %245 = arith.maximumf %243, %244 : vector<16x128xf32>
    %246 = arith.truncf %245 : vector<16x128xf32> to vector<16x128xbf16>
    %cst_209 = arith.constant dense<0.000000e+00> : vector<16x128xf32>
    %247 = tpu.matmul %246, %15, %cst_209 {dimension_numbers = #tpu.dot_dimension_numbers<[1], [0], [0], [1], [0, 0, 1, 1], [], []>} : vector<16x128xbf16>, vector<128x128xbf16>, vector<16x128xf32> -> vector<16x128xf32>
    %248 = vector.broadcast %55 : vector<1x128xf32> to vector<16x128xf32>
    %249 = arith.addf %247, %248 : vector<16x128xf32>
    %cst_210 = arith.constant 0.000000e+00 : f32
    %250 = vector.broadcast %cst_210 : f32 to vector<16x128xf32>
    %251 = arith.maximumf %249, %250 : vector<16x128xf32>
    %252 = arith.addf %251, %239 : vector<16x128xf32>
    %253 = arith.truncf %252 : vector<16x128xf32> to vector<16x128xbf16>
    %cst_211 = arith.constant dense<0.000000e+00> : vector<16x128xf32>
    %254 = tpu.matmul %253, %17, %cst_211 {dimension_numbers = #tpu.dot_dimension_numbers<[1], [0], [0], [1], [0, 0, 1, 1], [], []>} : vector<16x128xbf16>, vector<128x128xbf16>, vector<16x128xf32> -> vector<16x128xf32>
    %255 = vector.broadcast %57 : vector<1x128xf32> to vector<16x128xf32>
    %256 = arith.addf %254, %255 : vector<16x128xf32>
    %cst_212 = arith.constant 0.000000e+00 : f32
    %257 = vector.broadcast %cst_212 : f32 to vector<16x128xf32>
    %258 = arith.maximumf %256, %257 : vector<16x128xf32>
    %259 = arith.truncf %258 : vector<16x128xf32> to vector<16x128xbf16>
    %cst_213 = arith.constant dense<0.000000e+00> : vector<16x128xf32>
    %260 = tpu.matmul %259, %19, %cst_213 {dimension_numbers = #tpu.dot_dimension_numbers<[1], [0], [0], [1], [0, 0, 1, 1], [], []>} : vector<16x128xbf16>, vector<128x128xbf16>, vector<16x128xf32> -> vector<16x128xf32>
    %261 = vector.broadcast %59 : vector<1x128xf32> to vector<16x128xf32>
    %262 = arith.addf %260, %261 : vector<16x128xf32>
    %cst_214 = arith.constant 0.000000e+00 : f32
    %263 = vector.broadcast %cst_214 : f32 to vector<16x128xf32>
    %264 = arith.maximumf %262, %263 : vector<16x128xf32>
    %265 = arith.addf %264, %252 : vector<16x128xf32>
    %266 = arith.truncf %265 : vector<16x128xf32> to vector<16x128xbf16>
    %cst_215 = arith.constant dense<0.000000e+00> : vector<16x128xf32>
    %267 = tpu.matmul %266, %21, %cst_215 {dimension_numbers = #tpu.dot_dimension_numbers<[1], [0], [0], [1], [0, 0, 1, 1], [], []>} : vector<16x128xbf16>, vector<128x128xbf16>, vector<16x128xf32> -> vector<16x128xf32>
    %268 = vector.broadcast %61 : vector<1x128xf32> to vector<16x128xf32>
    %269 = arith.addf %267, %268 : vector<16x128xf32>
    %cst_216 = arith.constant 0.000000e+00 : f32
    %270 = vector.broadcast %cst_216 : f32 to vector<16x128xf32>
    %271 = arith.maximumf %269, %270 : vector<16x128xf32>
    %272 = arith.truncf %271 : vector<16x128xf32> to vector<16x128xbf16>
    %cst_217 = arith.constant dense<0.000000e+00> : vector<16x128xf32>
    %273 = tpu.matmul %272, %23, %cst_217 {dimension_numbers = #tpu.dot_dimension_numbers<[1], [0], [0], [1], [0, 0, 1, 1], [], []>} : vector<16x128xbf16>, vector<128x128xbf16>, vector<16x128xf32> -> vector<16x128xf32>
    %274 = vector.broadcast %63 : vector<1x128xf32> to vector<16x128xf32>
    %275 = arith.addf %273, %274 : vector<16x128xf32>
    %cst_218 = arith.constant 0.000000e+00 : f32
    %276 = vector.broadcast %cst_218 : f32 to vector<16x128xf32>
    %277 = arith.maximumf %275, %276 : vector<16x128xf32>
    %278 = arith.addf %277, %265 : vector<16x128xf32>
    %279 = arith.truncf %278 : vector<16x128xf32> to vector<16x128xbf16>
    %cst_219 = arith.constant dense<0.000000e+00> : vector<16x128xf32>
    %280 = tpu.matmul %279, %25, %cst_219 {dimension_numbers = #tpu.dot_dimension_numbers<[1], [0], [0], [1], [0, 0, 1, 1], [], []>} : vector<16x128xbf16>, vector<128x128xbf16>, vector<16x128xf32> -> vector<16x128xf32>
    %281 = vector.broadcast %65 : vector<1x128xf32> to vector<16x128xf32>
    %282 = arith.addf %280, %281 : vector<16x128xf32>
    %cst_220 = arith.constant 0.000000e+00 : f32
    %283 = vector.broadcast %cst_220 : f32 to vector<16x128xf32>
    %284 = arith.maximumf %282, %283 : vector<16x128xf32>
    %285 = arith.truncf %284 : vector<16x128xf32> to vector<16x128xbf16>
    %cst_221 = arith.constant dense<0.000000e+00> : vector<16x128xf32>
    %286 = tpu.matmul %285, %27, %cst_221 {dimension_numbers = #tpu.dot_dimension_numbers<[1], [0], [0], [1], [0, 0, 1, 1], [], []>} : vector<16x128xbf16>, vector<128x128xbf16>, vector<16x128xf32> -> vector<16x128xf32>
    %287 = vector.broadcast %67 : vector<1x128xf32> to vector<16x128xf32>
    %288 = arith.addf %286, %287 : vector<16x128xf32>
    %cst_222 = arith.constant 0.000000e+00 : f32
    %289 = vector.broadcast %cst_222 : f32 to vector<16x128xf32>
    %290 = arith.maximumf %288, %289 : vector<16x128xf32>
    %291 = arith.addf %290, %278 : vector<16x128xf32>
    %292 = arith.truncf %291 : vector<16x128xf32> to vector<16x128xbf16>
    %cst_223 = arith.constant dense<0.000000e+00> : vector<16x128xf32>
    %293 = tpu.matmul %292, %29, %cst_223 {dimension_numbers = #tpu.dot_dimension_numbers<[1], [0], [0], [1], [0, 0, 1, 1], [], []>} : vector<16x128xbf16>, vector<128x128xbf16>, vector<16x128xf32> -> vector<16x128xf32>
    %294 = vector.broadcast %69 : vector<1x128xf32> to vector<16x128xf32>
    %295 = arith.addf %293, %294 : vector<16x128xf32>
    %cst_224 = arith.constant 0.000000e+00 : f32
    %296 = vector.broadcast %cst_224 : f32 to vector<16x128xf32>
    %297 = arith.maximumf %295, %296 : vector<16x128xf32>
    %298 = arith.truncf %297 : vector<16x128xf32> to vector<16x128xbf16>
    %cst_225 = arith.constant dense<0.000000e+00> : vector<16x128xf32>
    %299 = tpu.matmul %298, %31, %cst_225 {dimension_numbers = #tpu.dot_dimension_numbers<[1], [0], [0], [1], [0, 0, 1, 1], [], []>} : vector<16x128xbf16>, vector<128x128xbf16>, vector<16x128xf32> -> vector<16x128xf32>
    %300 = vector.broadcast %71 : vector<1x128xf32> to vector<16x128xf32>
    %301 = arith.addf %299, %300 : vector<16x128xf32>
    %cst_226 = arith.constant 0.000000e+00 : f32
    %302 = vector.broadcast %cst_226 : f32 to vector<16x128xf32>
    %303 = arith.maximumf %301, %302 : vector<16x128xf32>
    %304 = arith.addf %303, %291 : vector<16x128xf32>
    %305 = arith.truncf %304 : vector<16x128xf32> to vector<16x128xbf16>
    %cst_227 = arith.constant dense<0.000000e+00> : vector<16x128xf32>
    %306 = tpu.matmul %305, %33, %cst_227 {dimension_numbers = #tpu.dot_dimension_numbers<[1], [0], [0], [1], [0, 0, 1, 1], [], []>} : vector<16x128xbf16>, vector<128x128xbf16>, vector<16x128xf32> -> vector<16x128xf32>
    %307 = vector.broadcast %73 : vector<1x128xf32> to vector<16x128xf32>
    %308 = arith.addf %306, %307 : vector<16x128xf32>
    %cst_228 = arith.constant 0.000000e+00 : f32
    %309 = vector.broadcast %cst_228 : f32 to vector<16x128xf32>
    %310 = arith.maximumf %308, %309 : vector<16x128xf32>
    %311 = arith.truncf %310 : vector<16x128xf32> to vector<16x128xbf16>
    %cst_229 = arith.constant dense<0.000000e+00> : vector<16x128xf32>
    %312 = tpu.matmul %311, %35, %cst_229 {dimension_numbers = #tpu.dot_dimension_numbers<[1], [0], [0], [1], [0, 0, 1, 1], [], []>} : vector<16x128xbf16>, vector<128x128xbf16>, vector<16x128xf32> -> vector<16x128xf32>
    %313 = vector.broadcast %75 : vector<1x128xf32> to vector<16x128xf32>
    %314 = arith.addf %312, %313 : vector<16x128xf32>
    %cst_230 = arith.constant 0.000000e+00 : f32
    %315 = vector.broadcast %cst_230 : f32 to vector<16x128xf32>
    %316 = arith.maximumf %314, %315 : vector<16x128xf32>
    %317 = arith.addf %316, %304 : vector<16x128xf32>
    %318 = arith.truncf %317 : vector<16x128xf32> to vector<16x128xbf16>
    %cst_231 = arith.constant dense<0.000000e+00> : vector<16x128xf32>
    %319 = tpu.matmul %318, %37, %cst_231 {dimension_numbers = #tpu.dot_dimension_numbers<[1], [0], [0], [1], [0, 0, 1, 1], [], []>} : vector<16x128xbf16>, vector<128x128xbf16>, vector<16x128xf32> -> vector<16x128xf32>
    %320 = vector.broadcast %77 : vector<1x128xf32> to vector<16x128xf32>
    %321 = arith.addf %319, %320 : vector<16x128xf32>
    %cst_232 = arith.constant 0.000000e+00 : f32
    %322 = vector.broadcast %cst_232 : f32 to vector<16x128xf32>
    %323 = arith.maximumf %321, %322 : vector<16x128xf32>
    %324 = arith.truncf %323 : vector<16x128xf32> to vector<16x128xbf16>
    %cst_233 = arith.constant dense<0.000000e+00> : vector<16x128xf32>
    %325 = tpu.matmul %324, %39, %cst_233 {dimension_numbers = #tpu.dot_dimension_numbers<[1], [0], [0], [1], [0, 0, 1, 1], [], []>} : vector<16x128xbf16>, vector<128x128xbf16>, vector<16x128xf32> -> vector<16x128xf32>
    %326 = vector.broadcast %79 : vector<1x128xf32> to vector<16x128xf32>
    %327 = arith.addf %325, %326 : vector<16x128xf32>
    %cst_234 = arith.constant 0.000000e+00 : f32
    %328 = vector.broadcast %cst_234 : f32 to vector<16x128xf32>
    %329 = arith.maximumf %327, %328 : vector<16x128xf32>
    %330 = arith.addf %329, %317 : vector<16x128xf32>
    %331 = arith.truncf %330 : vector<16x128xf32> to vector<16x128xbf16>
    %cst_235 = arith.constant dense<0.000000e+00> : vector<16x128xf32>
    %332 = tpu.matmul %331, %41, %cst_235 {dimension_numbers = #tpu.dot_dimension_numbers<[1], [0], [0], [1], [0, 0, 1, 1], [], []>} : vector<16x128xbf16>, vector<128x128xbf16>, vector<16x128xf32> -> vector<16x128xf32>
    %333 = vector.broadcast %81 : vector<1x128xf32> to vector<16x128xf32>
    %334 = arith.addf %332, %333 : vector<16x128xf32>
    %cst_236 = arith.constant 0.000000e+00 : f32
    %335 = vector.broadcast %cst_236 : f32 to vector<16x128xf32>
    %336 = arith.maximumf %334, %335 : vector<16x128xf32>
    %337 = arith.truncf %336 : vector<16x128xf32> to vector<16x128xbf16>
    %cst_237 = arith.constant dense<0.000000e+00> : vector<16x128xf32>
    %338 = tpu.matmul %337, %43, %cst_237 {dimension_numbers = #tpu.dot_dimension_numbers<[1], [0], [0], [1], [0, 0, 1, 1], [], []>} : vector<16x128xbf16>, vector<128x128xbf16>, vector<16x128xf32> -> vector<16x128xf32>
    %339 = vector.broadcast %83 : vector<1x128xf32> to vector<16x128xf32>
    %340 = arith.addf %338, %339 : vector<16x128xf32>
    %cst_238 = arith.constant 0.000000e+00 : f32
    %341 = vector.broadcast %cst_238 : f32 to vector<16x128xf32>
    %342 = arith.maximumf %340, %341 : vector<16x128xf32>
    %343 = arith.addf %342, %330 : vector<16x128xf32>
    %344 = arith.truncf %343 : vector<16x128xf32> to vector<16x128xbf16>
    %cst_239 = arith.constant dense<0.000000e+00> : vector<16x128xf32>
    %345 = tpu.matmul %344, %45, %cst_239 {dimension_numbers = #tpu.dot_dimension_numbers<[1], [0], [0], [1], [0, 0, 1, 1], [], []>} : vector<16x128xbf16>, vector<128x128xbf16>, vector<16x128xf32> -> vector<16x128xf32>
    %346 = vector.broadcast %85 : vector<1x128xf32> to vector<16x128xf32>
    %347 = arith.addf %345, %346 : vector<16x128xf32>
    %cst_240 = arith.constant 0.000000e+00 : f32
    %348 = vector.broadcast %cst_240 : f32 to vector<16x128xf32>
    %349 = arith.maximumf %347, %348 : vector<16x128xf32>
    %350 = arith.truncf %349 : vector<16x128xf32> to vector<16x128xbf16>
    %cst_241 = arith.constant dense<0.000000e+00> : vector<16x128xf32>
    %351 = tpu.matmul %350, %47, %cst_241 {dimension_numbers = #tpu.dot_dimension_numbers<[1], [0], [0], [1], [0, 0, 1, 1], [], []>} : vector<16x128xbf16>, vector<128x128xbf16>, vector<16x128xf32> -> vector<16x128xf32>
    %352 = vector.broadcast %87 : vector<1x128xf32> to vector<16x128xf32>
    %353 = arith.addf %351, %352 : vector<16x128xf32>
    %cst_242 = arith.constant 0.000000e+00 : f32
    %354 = vector.broadcast %cst_242 : f32 to vector<16x128xf32>
    %355 = arith.maximumf %353, %354 : vector<16x128xf32>
    %356 = arith.addf %355, %343 : vector<16x128xf32>
    %357 = arith.addf %219, %356 : vector<16x128xf32>
    %358 = arith.truncf %357 : vector<16x128xf32> to vector<16x128xbf16>
    %cst_243 = arith.constant dense<0.000000e+00> : vector<16x128xf32>
    %359 = tpu.matmul %358, %6, %cst_243 {dimension_numbers = #tpu.dot_dimension_numbers<[1], [0], [0], [1], [0, 0, 1, 1], [], []>} : vector<16x128xbf16>, vector<128x128xbf16>, vector<16x128xf32> -> vector<16x128xf32>
    %360 = arith.addf %5, %359 : vector<16x128xf32>
    %cst_244 = arith.constant 2.000000e+00 : f32
    %361 = vector.broadcast %cst_244 : f32 to vector<1x128xf32>
    %362 = arith.mulf %361, %7 : vector<1x128xf32>
    %363 = vector.broadcast %362 : vector<1x128xf32> to vector<16x128xf32>
    %364 = arith.addf %360, %363 : vector<16x128xf32>
    %365 = arith.truncf %364 : vector<16x128xf32> to vector<16x128xbf16>
    %cst_245 = arith.constant dense<0.000000e+00> : vector<16x128xf32>
    %366 = tpu.matmul %365, %9, %cst_245 {dimension_numbers = #tpu.dot_dimension_numbers<[1], [0], [0], [1], [0, 0, 1, 1], [], []>} : vector<16x128xbf16>, vector<128x128xbf16>, vector<16x128xf32> -> vector<16x128xf32>
    %367 = vector.broadcast %49 : vector<1x128xf32> to vector<16x128xf32>
    %368 = arith.addf %366, %367 : vector<16x128xf32>
    %cst_246 = arith.constant 0.000000e+00 : f32
    %369 = vector.broadcast %cst_246 : f32 to vector<16x128xf32>
    %370 = arith.maximumf %368, %369 : vector<16x128xf32>
    %371 = arith.truncf %370 : vector<16x128xf32> to vector<16x128xbf16>
    %cst_247 = arith.constant dense<0.000000e+00> : vector<16x128xf32>
    %372 = tpu.matmul %371, %11, %cst_247 {dimension_numbers = #tpu.dot_dimension_numbers<[1], [0], [0], [1], [0, 0, 1, 1], [], []>} : vector<16x128xbf16>, vector<128x128xbf16>, vector<16x128xf32> -> vector<16x128xf32>
    %373 = vector.broadcast %51 : vector<1x128xf32> to vector<16x128xf32>
    %374 = arith.addf %372, %373 : vector<16x128xf32>
    %cst_248 = arith.constant 0.000000e+00 : f32
    %375 = vector.broadcast %cst_248 : f32 to vector<16x128xf32>
    %376 = arith.maximumf %374, %375 : vector<16x128xf32>
    %377 = arith.addf %376, %364 : vector<16x128xf32>
    %378 = arith.truncf %377 : vector<16x128xf32> to vector<16x128xbf16>
    %cst_249 = arith.constant dense<0.000000e+00> : vector<16x128xf32>
    %379 = tpu.matmul %378, %13, %cst_249 {dimension_numbers = #tpu.dot_dimension_numbers<[1], [0], [0], [1], [0, 0, 1, 1], [], []>} : vector<16x128xbf16>, vector<128x128xbf16>, vector<16x128xf32> -> vector<16x128xf32>
    %380 = vector.broadcast %53 : vector<1x128xf32> to vector<16x128xf32>
    %381 = arith.addf %379, %380 : vector<16x128xf32>
    %cst_250 = arith.constant 0.000000e+00 : f32
    %382 = vector.broadcast %cst_250 : f32 to vector<16x128xf32>
    %383 = arith.maximumf %381, %382 : vector<16x128xf32>
    %384 = arith.truncf %383 : vector<16x128xf32> to vector<16x128xbf16>
    %cst_251 = arith.constant dense<0.000000e+00> : vector<16x128xf32>
    %385 = tpu.matmul %384, %15, %cst_251 {dimension_numbers = #tpu.dot_dimension_numbers<[1], [0], [0], [1], [0, 0, 1, 1], [], []>} : vector<16x128xbf16>, vector<128x128xbf16>, vector<16x128xf32> -> vector<16x128xf32>
    %386 = vector.broadcast %55 : vector<1x128xf32> to vector<16x128xf32>
    %387 = arith.addf %385, %386 : vector<16x128xf32>
    %cst_252 = arith.constant 0.000000e+00 : f32
    %388 = vector.broadcast %cst_252 : f32 to vector<16x128xf32>
    %389 = arith.maximumf %387, %388 : vector<16x128xf32>
    %390 = arith.addf %389, %377 : vector<16x128xf32>
    %391 = arith.truncf %390 : vector<16x128xf32> to vector<16x128xbf16>
    %cst_253 = arith.constant dense<0.000000e+00> : vector<16x128xf32>
    %392 = tpu.matmul %391, %17, %cst_253 {dimension_numbers = #tpu.dot_dimension_numbers<[1], [0], [0], [1], [0, 0, 1, 1], [], []>} : vector<16x128xbf16>, vector<128x128xbf16>, vector<16x128xf32> -> vector<16x128xf32>
    %393 = vector.broadcast %57 : vector<1x128xf32> to vector<16x128xf32>
    %394 = arith.addf %392, %393 : vector<16x128xf32>
    %cst_254 = arith.constant 0.000000e+00 : f32
    %395 = vector.broadcast %cst_254 : f32 to vector<16x128xf32>
    %396 = arith.maximumf %394, %395 : vector<16x128xf32>
    %397 = arith.truncf %396 : vector<16x128xf32> to vector<16x128xbf16>
    %cst_255 = arith.constant dense<0.000000e+00> : vector<16x128xf32>
    %398 = tpu.matmul %397, %19, %cst_255 {dimension_numbers = #tpu.dot_dimension_numbers<[1], [0], [0], [1], [0, 0, 1, 1], [], []>} : vector<16x128xbf16>, vector<128x128xbf16>, vector<16x128xf32> -> vector<16x128xf32>
    %399 = vector.broadcast %59 : vector<1x128xf32> to vector<16x128xf32>
    %400 = arith.addf %398, %399 : vector<16x128xf32>
    %cst_256 = arith.constant 0.000000e+00 : f32
    %401 = vector.broadcast %cst_256 : f32 to vector<16x128xf32>
    %402 = arith.maximumf %400, %401 : vector<16x128xf32>
    %403 = arith.addf %402, %390 : vector<16x128xf32>
    %404 = arith.truncf %403 : vector<16x128xf32> to vector<16x128xbf16>
    %cst_257 = arith.constant dense<0.000000e+00> : vector<16x128xf32>
    %405 = tpu.matmul %404, %21, %cst_257 {dimension_numbers = #tpu.dot_dimension_numbers<[1], [0], [0], [1], [0, 0, 1, 1], [], []>} : vector<16x128xbf16>, vector<128x128xbf16>, vector<16x128xf32> -> vector<16x128xf32>
    %406 = vector.broadcast %61 : vector<1x128xf32> to vector<16x128xf32>
    %407 = arith.addf %405, %406 : vector<16x128xf32>
    %cst_258 = arith.constant 0.000000e+00 : f32
    %408 = vector.broadcast %cst_258 : f32 to vector<16x128xf32>
    %409 = arith.maximumf %407, %408 : vector<16x128xf32>
    %410 = arith.truncf %409 : vector<16x128xf32> to vector<16x128xbf16>
    %cst_259 = arith.constant dense<0.000000e+00> : vector<16x128xf32>
    %411 = tpu.matmul %410, %23, %cst_259 {dimension_numbers = #tpu.dot_dimension_numbers<[1], [0], [0], [1], [0, 0, 1, 1], [], []>} : vector<16x128xbf16>, vector<128x128xbf16>, vector<16x128xf32> -> vector<16x128xf32>
    %412 = vector.broadcast %63 : vector<1x128xf32> to vector<16x128xf32>
    %413 = arith.addf %411, %412 : vector<16x128xf32>
    %cst_260 = arith.constant 0.000000e+00 : f32
    %414 = vector.broadcast %cst_260 : f32 to vector<16x128xf32>
    %415 = arith.maximumf %413, %414 : vector<16x128xf32>
    %416 = arith.addf %415, %403 : vector<16x128xf32>
    %417 = arith.truncf %416 : vector<16x128xf32> to vector<16x128xbf16>
    %cst_261 = arith.constant dense<0.000000e+00> : vector<16x128xf32>
    %418 = tpu.matmul %417, %25, %cst_261 {dimension_numbers = #tpu.dot_dimension_numbers<[1], [0], [0], [1], [0, 0, 1, 1], [], []>} : vector<16x128xbf16>, vector<128x128xbf16>, vector<16x128xf32> -> vector<16x128xf32>
    %419 = vector.broadcast %65 : vector<1x128xf32> to vector<16x128xf32>
    %420 = arith.addf %418, %419 : vector<16x128xf32>
    %cst_262 = arith.constant 0.000000e+00 : f32
    %421 = vector.broadcast %cst_262 : f32 to vector<16x128xf32>
    %422 = arith.maximumf %420, %421 : vector<16x128xf32>
    %423 = arith.truncf %422 : vector<16x128xf32> to vector<16x128xbf16>
    %cst_263 = arith.constant dense<0.000000e+00> : vector<16x128xf32>
    %424 = tpu.matmul %423, %27, %cst_263 {dimension_numbers = #tpu.dot_dimension_numbers<[1], [0], [0], [1], [0, 0, 1, 1], [], []>} : vector<16x128xbf16>, vector<128x128xbf16>, vector<16x128xf32> -> vector<16x128xf32>
    %425 = vector.broadcast %67 : vector<1x128xf32> to vector<16x128xf32>
    %426 = arith.addf %424, %425 : vector<16x128xf32>
    %cst_264 = arith.constant 0.000000e+00 : f32
    %427 = vector.broadcast %cst_264 : f32 to vector<16x128xf32>
    %428 = arith.maximumf %426, %427 : vector<16x128xf32>
    %429 = arith.addf %428, %416 : vector<16x128xf32>
    %430 = arith.truncf %429 : vector<16x128xf32> to vector<16x128xbf16>
    %cst_265 = arith.constant dense<0.000000e+00> : vector<16x128xf32>
    %431 = tpu.matmul %430, %29, %cst_265 {dimension_numbers = #tpu.dot_dimension_numbers<[1], [0], [0], [1], [0, 0, 1, 1], [], []>} : vector<16x128xbf16>, vector<128x128xbf16>, vector<16x128xf32> -> vector<16x128xf32>
    %432 = vector.broadcast %69 : vector<1x128xf32> to vector<16x128xf32>
    %433 = arith.addf %431, %432 : vector<16x128xf32>
    %cst_266 = arith.constant 0.000000e+00 : f32
    %434 = vector.broadcast %cst_266 : f32 to vector<16x128xf32>
    %435 = arith.maximumf %433, %434 : vector<16x128xf32>
    %436 = arith.truncf %435 : vector<16x128xf32> to vector<16x128xbf16>
    %cst_267 = arith.constant dense<0.000000e+00> : vector<16x128xf32>
    %437 = tpu.matmul %436, %31, %cst_267 {dimension_numbers = #tpu.dot_dimension_numbers<[1], [0], [0], [1], [0, 0, 1, 1], [], []>} : vector<16x128xbf16>, vector<128x128xbf16>, vector<16x128xf32> -> vector<16x128xf32>
    %438 = vector.broadcast %71 : vector<1x128xf32> to vector<16x128xf32>
    %439 = arith.addf %437, %438 : vector<16x128xf32>
    %cst_268 = arith.constant 0.000000e+00 : f32
    %440 = vector.broadcast %cst_268 : f32 to vector<16x128xf32>
    %441 = arith.maximumf %439, %440 : vector<16x128xf32>
    %442 = arith.addf %441, %429 : vector<16x128xf32>
    %443 = arith.truncf %442 : vector<16x128xf32> to vector<16x128xbf16>
    %cst_269 = arith.constant dense<0.000000e+00> : vector<16x128xf32>
    %444 = tpu.matmul %443, %33, %cst_269 {dimension_numbers = #tpu.dot_dimension_numbers<[1], [0], [0], [1], [0, 0, 1, 1], [], []>} : vector<16x128xbf16>, vector<128x128xbf16>, vector<16x128xf32> -> vector<16x128xf32>
    %445 = vector.broadcast %73 : vector<1x128xf32> to vector<16x128xf32>
    %446 = arith.addf %444, %445 : vector<16x128xf32>
    %cst_270 = arith.constant 0.000000e+00 : f32
    %447 = vector.broadcast %cst_270 : f32 to vector<16x128xf32>
    %448 = arith.maximumf %446, %447 : vector<16x128xf32>
    %449 = arith.truncf %448 : vector<16x128xf32> to vector<16x128xbf16>
    %cst_271 = arith.constant dense<0.000000e+00> : vector<16x128xf32>
    %450 = tpu.matmul %449, %35, %cst_271 {dimension_numbers = #tpu.dot_dimension_numbers<[1], [0], [0], [1], [0, 0, 1, 1], [], []>} : vector<16x128xbf16>, vector<128x128xbf16>, vector<16x128xf32> -> vector<16x128xf32>
    %451 = vector.broadcast %75 : vector<1x128xf32> to vector<16x128xf32>
    %452 = arith.addf %450, %451 : vector<16x128xf32>
    %cst_272 = arith.constant 0.000000e+00 : f32
    %453 = vector.broadcast %cst_272 : f32 to vector<16x128xf32>
    %454 = arith.maximumf %452, %453 : vector<16x128xf32>
    %455 = arith.addf %454, %442 : vector<16x128xf32>
    %456 = arith.truncf %455 : vector<16x128xf32> to vector<16x128xbf16>
    %cst_273 = arith.constant dense<0.000000e+00> : vector<16x128xf32>
    %457 = tpu.matmul %456, %37, %cst_273 {dimension_numbers = #tpu.dot_dimension_numbers<[1], [0], [0], [1], [0, 0, 1, 1], [], []>} : vector<16x128xbf16>, vector<128x128xbf16>, vector<16x128xf32> -> vector<16x128xf32>
    %458 = vector.broadcast %77 : vector<1x128xf32> to vector<16x128xf32>
    %459 = arith.addf %457, %458 : vector<16x128xf32>
    %cst_274 = arith.constant 0.000000e+00 : f32
    %460 = vector.broadcast %cst_274 : f32 to vector<16x128xf32>
    %461 = arith.maximumf %459, %460 : vector<16x128xf32>
    %462 = arith.truncf %461 : vector<16x128xf32> to vector<16x128xbf16>
    %cst_275 = arith.constant dense<0.000000e+00> : vector<16x128xf32>
    %463 = tpu.matmul %462, %39, %cst_275 {dimension_numbers = #tpu.dot_dimension_numbers<[1], [0], [0], [1], [0, 0, 1, 1], [], []>} : vector<16x128xbf16>, vector<128x128xbf16>, vector<16x128xf32> -> vector<16x128xf32>
    %464 = vector.broadcast %79 : vector<1x128xf32> to vector<16x128xf32>
    %465 = arith.addf %463, %464 : vector<16x128xf32>
    %cst_276 = arith.constant 0.000000e+00 : f32
    %466 = vector.broadcast %cst_276 : f32 to vector<16x128xf32>
    %467 = arith.maximumf %465, %466 : vector<16x128xf32>
    %468 = arith.addf %467, %455 : vector<16x128xf32>
    %469 = arith.truncf %468 : vector<16x128xf32> to vector<16x128xbf16>
    %cst_277 = arith.constant dense<0.000000e+00> : vector<16x128xf32>
    %470 = tpu.matmul %469, %41, %cst_277 {dimension_numbers = #tpu.dot_dimension_numbers<[1], [0], [0], [1], [0, 0, 1, 1], [], []>} : vector<16x128xbf16>, vector<128x128xbf16>, vector<16x128xf32> -> vector<16x128xf32>
    %471 = vector.broadcast %81 : vector<1x128xf32> to vector<16x128xf32>
    %472 = arith.addf %470, %471 : vector<16x128xf32>
    %cst_278 = arith.constant 0.000000e+00 : f32
    %473 = vector.broadcast %cst_278 : f32 to vector<16x128xf32>
    %474 = arith.maximumf %472, %473 : vector<16x128xf32>
    %475 = arith.truncf %474 : vector<16x128xf32> to vector<16x128xbf16>
    %cst_279 = arith.constant dense<0.000000e+00> : vector<16x128xf32>
    %476 = tpu.matmul %475, %43, %cst_279 {dimension_numbers = #tpu.dot_dimension_numbers<[1], [0], [0], [1], [0, 0, 1, 1], [], []>} : vector<16x128xbf16>, vector<128x128xbf16>, vector<16x128xf32> -> vector<16x128xf32>
    %477 = vector.broadcast %83 : vector<1x128xf32> to vector<16x128xf32>
    %478 = arith.addf %476, %477 : vector<16x128xf32>
    %cst_280 = arith.constant 0.000000e+00 : f32
    %479 = vector.broadcast %cst_280 : f32 to vector<16x128xf32>
    %480 = arith.maximumf %478, %479 : vector<16x128xf32>
    %481 = arith.addf %480, %468 : vector<16x128xf32>
    %482 = arith.truncf %481 : vector<16x128xf32> to vector<16x128xbf16>
    %cst_281 = arith.constant dense<0.000000e+00> : vector<16x128xf32>
    %483 = tpu.matmul %482, %45, %cst_281 {dimension_numbers = #tpu.dot_dimension_numbers<[1], [0], [0], [1], [0, 0, 1, 1], [], []>} : vector<16x128xbf16>, vector<128x128xbf16>, vector<16x128xf32> -> vector<16x128xf32>
    %484 = vector.broadcast %85 : vector<1x128xf32> to vector<16x128xf32>
    %485 = arith.addf %483, %484 : vector<16x128xf32>
    %cst_282 = arith.constant 0.000000e+00 : f32
    %486 = vector.broadcast %cst_282 : f32 to vector<16x128xf32>
    %487 = arith.maximumf %485, %486 : vector<16x128xf32>
    %488 = arith.truncf %487 : vector<16x128xf32> to vector<16x128xbf16>
    %cst_283 = arith.constant dense<0.000000e+00> : vector<16x128xf32>
    %489 = tpu.matmul %488, %47, %cst_283 {dimension_numbers = #tpu.dot_dimension_numbers<[1], [0], [0], [1], [0, 0, 1, 1], [], []>} : vector<16x128xbf16>, vector<128x128xbf16>, vector<16x128xf32> -> vector<16x128xf32>
    %490 = vector.broadcast %87 : vector<1x128xf32> to vector<16x128xf32>
    %491 = arith.addf %489, %490 : vector<16x128xf32>
    %cst_284 = arith.constant 0.000000e+00 : f32
    %492 = vector.broadcast %cst_284 : f32 to vector<16x128xf32>
    %493 = arith.maximumf %491, %492 : vector<16x128xf32>
    %494 = arith.addf %493, %481 : vector<16x128xf32>
    %495 = arith.addf %357, %494 : vector<16x128xf32>
    %496 = arith.truncf %495 : vector<16x128xf32> to vector<16x128xbf16>
    %c0_285 = arith.constant 0 : index
    %c0_286 = arith.constant 0 : index
    %497 = vector.load %arg8[%c0_285, %c0_286] : memref<128x256xbf16, #tpu.memory_space<vmem>>, vector<128x256xbf16>
    %cst_287 = arith.constant dense<0.000000e+00> : vector<16x256xf32>
    %498 = tpu.matmul %496, %497, %cst_287 {dimension_numbers = #tpu.dot_dimension_numbers<[1], [0], [0], [1], [0, 0, 1, 1], [], []>} : vector<16x128xbf16>, vector<128x256xbf16>, vector<16x256xf32> -> vector<16x256xf32>
    %c0_288 = arith.constant 0 : index
    %c0_289 = arith.constant 0 : index
    %499 = vector.load %arg9[%c0_288, %c0_289] : memref<1x256xf32, #tpu.memory_space<vmem>>, vector<1x256xf32>
    %cst_290 = arith.constant 3.000000e+00 : f32
    %500 = vector.broadcast %cst_290 : f32 to vector<1x256xf32>
    %501 = arith.mulf %500, %499 : vector<1x256xf32>
    %502 = vector.broadcast %501 : vector<1x256xf32> to vector<16x256xf32>
    %503 = arith.addf %498, %502 : vector<16x256xf32>
    %c0_291 = arith.constant 0 : index
    %c0_292 = arith.constant 0 : index
    %504 = vector.load %arg10[%c0_291, %c0_292] : memref<16x256xf32, #tpu.memory_space<vmem>>, vector<16x256xf32>
    tpu.vector_store %arg10[%c0_291, %c0_292], %503 {strides = array<i32>} : memref<16x256xf32, #tpu.memory_space<vmem>>, vector<16x256xf32>,
    return
  }
  func.func @transform_0(%arg0: i32) -> (i32, i32) {
    %c0_i32 = arith.constant 0 : i32
    %c0_i32_0 = arith.constant 0 : i32
    return %arg0, %c0_i32 : i32, i32
  }
  func.func @transform_1(%arg0: i32) -> (i32, i32) {
    %c0_i32 = arith.constant 0 : i32
    %c0_i32_0 = arith.constant 0 : i32
    %c0_i32_1 = arith.constant 0 : i32
    return %c0_i32, %c0_i32_0 : i32, i32
  }
  func.func @transform_2(%arg0: i32) -> (i32, i32) {
    %c0_i32 = arith.constant 0 : i32
    %c0_i32_0 = arith.constant 0 : i32
    %c0_i32_1 = arith.constant 0 : i32
    return %c0_i32, %c0_i32_0 : i32, i32
  }
  func.func @transform_3(%arg0: i32) -> (i32, i32) {
    %c0_i32 = arith.constant 0 : i32
    %c0_i32_0 = arith.constant 0 : i32
    %c0_i32_1 = arith.constant 0 : i32
    return %c0_i32, %c0_i32_0 : i32, i32
  }
  func.func @transform_4(%arg0: i32) -> (i32, i32) {
    %c0_i32 = arith.constant 0 : i32
    %c0_i32_0 = arith.constant 0 : i32
    %c0_i32_1 = arith.constant 0 : i32
    return %c0_i32, %c0_i32_0 : i32, i32
  }
  func.func @transform_5(%arg0: i32) -> (i32, i32, i32, i32) {
    %c0_i32 = arith.constant 0 : i32
    %c0_i32_0 = arith.constant 0 : i32
    %c0_i32_1 = arith.constant 0 : i32
    %c0_i32_2 = arith.constant 0 : i32
    %c0_i32_3 = arith.constant 0 : i32
    return %c0_i32, %c0_i32_0, %c0_i32_1, %c0_i32_2 : i32, i32, i32, i32
  }
  func.func @transform_6(%arg0: i32) -> (i32, i32, i32, i32) {
    %c0_i32 = arith.constant 0 : i32
    %c0_i32_0 = arith.constant 0 : i32
    %c0_i32_1 = arith.constant 0 : i32
    %c0_i32_2 = arith.constant 0 : i32
    %c0_i32_3 = arith.constant 0 : i32
    return %c0_i32, %c0_i32_0, %c0_i32_1, %c0_i32_2 : i32, i32, i32, i32
  }
  func.func @transform_7(%arg0: i32) -> (i32, i32) {
    %c0_i32 = arith.constant 0 : i32
    %c0_i32_0 = arith.constant 0 : i32
    %c0_i32_1 = arith.constant 0 : i32
    return %c0_i32, %c0_i32_0 : i32, i32
  }
  func.func @transform_8(%arg0: i32) -> (i32, i32) {
    %c0_i32 = arith.constant 0 : i32
    %c0_i32_0 = arith.constant 0 : i32
    %c0_i32_1 = arith.constant 0 : i32
    return %c0_i32, %c0_i32_0 : i32, i32
  }
  func.func @transform_9(%arg0: i32) -> (i32, i32) {
    %c0_i32 = arith.constant 0 : i32
    %c0_i32_0 = arith.constant 0 : i32
    return %arg0, %c0_i32 : i32, i32
  }
}

</mosaic_0001>

<bundles_post_ra>
// kernel: _lambda_.2
= control target key start
LH: loop header
LB: loop body
LE: loop exit
PB: predicated region body
PF: predicated region fallthrough
CT: control target
= control target key end

     0   :  { %14 = vsyncpa [#allocation3], 0  ;;  %s3079_s0 = inlined_call_operand.vmem [shape: bf16[2,8,256], index: 0, kind: input, shape index: {}]   ;;  %s3080_s1 = inlined_call_operand.vmem [shape: f32[2,8,1], index: 1, kind: input, shape index: {}]   ;;  %s3081_s2 = inlined_call_operand.hbm [shape: bf16[256,128], index: 2, kind: input, shape index: {}]   ;;  %s3082_s3 = inlined_call_operand.hbm [shape: bf16[128,128], index: 3, kind: input, shape index: {}]   ;;  %s3083_s4 = inlined_call_operand.hbm [shape: f32[1,128], index: 4, kind: input, shape index: {}]   ;;  %s3084_s5 = inlined_call_operand.hbm [shape: bf16[2,2,128,128], index: 5, kind: input, shape index: {}]   ;;  %s3085_s6 = inlined_call_operand.hbm [shape: f32[2,2,1,128], index: 6, kind: input, shape index: {}]   ;;  %s3086_s7 = inlined_call_operand.hbm [shape: bf16[128,128], index: 7, kind: input, shape index: {}]   ;;  %s3087_s8 = inlined_call_operand.hbm [shape: f32[1,128], index: 8, kind: input, shape index: {}]   ;;  %s3088_s9 = inlined_call_operand.vmem [shape: f32[2,8,128], index: 9, kind: output, shape index: {}]  }
   0x1   :  { %15 = vsyncpa [#allocation5], 0 }
   0x2   :  { %16 = vsyncpa [#allocation8], 0 }
   0x3   :  { %17 = vsyncpa [#allocation11], 0  ;;  %s2392_s30 = smov [#allocation4]   ;;  %s2393_s11 = smov [#allocation7]  }
   0x4   :  { %s39_s10 = sshll.u32 %s2392_s30, 4  ;;  %s61_s12 = sshll.u32 %s2393_s11, 4  ;;  %s40_s10 = int_to_ptr.vmem [resolvable:$true] %s39_s10  ;;  %s2456_s12 = int_to_ptr.vmem [resolvable:$true] %s61_s12 }
   0x5   :  { %s2230_s15 = scalar_lea.hbm %s3082_s3, 1024 }
   0x6   :  { %p2231_p0 = scmp.ne.s32.totalorder %s3082_s3, %s2230_s15  ;;  %p2234_p1 = scmp.lt.u32.totalorder %s2230_s15, %s3082_s3 }
   0x8   :  { %p2236_p2 = pnand %p2234_p1, %p2231_p0 }
   0xa   :  { %2239 = shalt.err (!%p2236_p2)
}
   0xb   :  { %s2240_s20 = scalar_lea.vmem %s40_s10, 1024  ;;  %p2245_p4 = scmp.lt.s32.totalorder %s40_s10, %s40_s10 }
   0xc   :  { %p2241_p3 = scmp.ne.s32.totalorder %s40_s10, %s2240_s20  ;;  %p2246_p5 = scmp.lt.s32.totalorder %s2240_s20, %s2240_s20 }
   0xe   :  { %p2247_p6 = por %p2246_p5, %p2245_p4 }
  0x10   :  { %p2248_p7 = pnand %p2247_p6, %p2241_p3 }
  0x12   :  { %2251 = shalt.err (!%p2248_p7)
}
  0x13   :  { %s2394_s21 = smov 64   ;;  %s2395_s22 = smov 4  }
  0x14   :  { %45 = dma.hbm_to_vmem [thread:$0]  %s3082_s3, 1024, %s40_s10, [#allocation5], %s2394_s21, %s2394_s21, %s2395_s22  }
  0x15   :  { %s2252_s27 = scalar_lea.hbm %s3084_s5, 4096 }
  0x16   :  { %p2253_p8 = scmp.ne.s32.totalorder %s3084_s5, %s2252_s27  ;;  %p2256_p9 = scmp.lt.u32.totalorder %s2252_s27, %s3084_s5 }
  0x18   :  { %p2258_p10 = pnand %p2256_p9, %p2253_p8 }
  0x1a   :  { %2261 = shalt.err (!%p2258_p10)
}
  0x1b   :  { %s2262_s13 = scalar_lea.vmem %s2456_s12, 4096  ;;  %p2267_p12 = scmp.lt.s32.totalorder %s2456_s12, %s2456_s12 }
  0x1c   :  { %p2263_p11 = scmp.ne.s32.totalorder %s2456_s12, %s2262_s13  ;;  %p2268_p13 = scmp.lt.s32.totalorder %s2262_s13, %s2262_s13 }
  0x1e   :  { %p2269_p0 = por %p2268_p13, %p2267_p12 }
  0x20   :  { %p2270_p1 = pnand %p2269_p0, %p2263_p11 }
  0x22   :  { %2273 = shalt.err (!%p2270_p1)
}
  0x23   :  { %67 = dma.hbm_to_vmem [thread:$0]  %s3084_s5, 4096, %s2456_s12, [#allocation8], %s2394_s21, %s2394_s21, %s2395_s22  }
  0x24   :  { %s2396_s14 = smov [#allocation10]   ;;  %s2397_s16 = smov [#allocation2]  }
  0x25   :  { %s85_s15 = sshll.u32 %s2396_s14, 4  ;;  %s27_s17 = sshll.u32 %s2397_s16, 4  ;;  %s86_s15 = int_to_ptr.vmem [resolvable:$true] %s85_s15  ;;  %s2493_s17 = int_to_ptr.vmem [resolvable:$true] %s27_s17 }
  0x26   :  { %s2274_s20 = scalar_lea.hbm %s3086_s7, 1024 }
  0x27   :  { %p2275_p2 = scmp.ne.s32.totalorder %s3086_s7, %s2274_s20  ;;  %p2278_p3 = scmp.lt.u32.totalorder %s2274_s20, %s3086_s7 }
  0x29   :  { %p2280_p4 = pnand %p2278_p3, %p2275_p2 }
  0x2b   :  { %2283 = shalt.err (!%p2280_p4)
}
  0x2c   :  { %s2284_s5 = scalar_lea.vmem %s86_s15, 1024  ;;  %p2289_p6 = scmp.lt.s32.totalorder %s86_s15, %s86_s15 }
  0x2d   :  { %p2285_p5 = scmp.ne.s32.totalorder %s86_s15, %s2284_s5  ;;  %p2290_p7 = scmp.lt.s32.totalorder %s2284_s5, %s2284_s5 }
  0x2f   :  { %p2291_p8 = por %p2290_p7, %p2289_p6 }
  0x31   :  { %p2292_p9 = pnand %p2291_p8, %p2285_p5 }
  0x33   :  { %2295 = shalt.err (!%p2292_p9)
}
  0x34   :  { %91 = dma.hbm_to_vmem [thread:$0]  %s3086_s7, 1024, %s86_s15, [#allocation11], %s2394_s21, %s2394_s21, %s2395_s22  }
  0x35   :  { %s2296_s30 = scalar_lea.hbm %s3081_s2, 2048 }
  0x36   :  { %p2297_p10 = scmp.ne.s32.totalorder %s3081_s2, %s2296_s30  ;;  %p2300_p11 = scmp.lt.u32.totalorder %s2296_s30, %s3081_s2 }
  0x38   :  { %p2302_p12 = pnand %p2300_p11, %p2297_p10 }
  0x3a   :  { %2305 = shalt.err (!%p2302_p12)
}
  0x3b   :  { %s2306_s14 = scalar_lea.vmem %s2493_s17, 2048  ;;  %p2311_p0 = scmp.lt.s32.totalorder %s2493_s17, %s2493_s17 }
  0x3c   :  { %p2307_p13 = scmp.ne.s32.totalorder %s2493_s17, %s2306_s14  ;;  %p2312_p1 = scmp.lt.s32.totalorder %s2306_s14, %s2306_s14 }
  0x3e   :  { %p2313_p2 = por %p2312_p1, %p2311_p0 }
  0x40   :  { %p2314_p3 = pnand %p2313_p2, %p2307_p13 }
  0x42   :  { %2317 = shalt.err (!%p2314_p3)
}
  0x43   :  { %33 = dma.hbm_to_vmem [thread:$0]  %s3081_s2, 2048, %s2493_s17, [#allocation3], %s2394_s21, %s2394_s21, %s2395_s22  }
  0x44   :  { %s2398_s16 = smov [#allocation6]   ;;  %s2399_s19 = smov [#allocation9]  }
  0x45   :  { %s52_s18 = sshll.u32 %s2398_s16, 4  ;;  %s73_s20 = sshll.u32 %s2399_s19, 4  ;;  %s53_s18 = int_to_ptr.vmem [resolvable:$true] %s52_s18  ;;  %s2530_s20 = int_to_ptr.vmem [resolvable:$true] %s73_s20 }
  0x46   :  { %s2318_s25 = scalar_lea.hbm %s3083_s4, 16 }
  0x47   :  { %p2319_p4 = scmp.ne.s32.totalorder %s3083_s4, %s2318_s25  ;;  %p2322_p5 = scmp.lt.u32.totalorder %s2318_s25, %s3083_s4 }
  0x49   :  { %p2324_p6 = pnand %p2322_p5, %p2319_p4 }
  0x4b   :  { %2327 = shalt.err (!%p2324_p6)
}
  0x4c   :  { %s2328_s2 = scalar_lea.vmem %s53_s18, 16  ;;  %s2332_s21 = scalar_lea.vmem %s53_s18, 32 }
  0x4d   :  { %p2329_p7 = scmp.ne.s32.totalorder %s53_s18, %s2328_s2  ;;  %p2333_p8 = scmp.lt.s32.totalorder %s53_s18, %s53_s18 }
  0x4e   :  { %p2334_p9 = scmp.lt.s32.totalorder %s2332_s21, %s2328_s2 }
  0x50   :  { %p2335_p10 = por %p2334_p9, %p2333_p8 }
  0x52   :  { %p2336_p11 = pnand %p2335_p10, %p2329_p7 }
  0x54   :  { %2339 = shalt.err (!%p2336_p11)
}
  0x55   :  { %55 = dma.hbm_to_vmem [thread:$0]  %s3083_s4, 16, %s53_s18, [#allocation5]  }
  0x56   :  { %s2340_s30 = scalar_lea.hbm %s3085_s6, 64 }
  0x57   :  { %p2341_p12 = scmp.ne.s32.totalorder %s3085_s6, %s2340_s30  ;;  %p2344_p13 = scmp.lt.u32.totalorder %s2340_s30, %s3085_s6 }
  0x59   :  { %p2346_p0 = pnand %p2344_p13, %p2341_p12 }
  0x5b   :  { %2349 = shalt.err (!%p2346_p0)
}
  0x5c   :  { %s2350_s14 = scalar_lea.vmem %s2530_s20, 64  ;;  %p2355_p2 = scmp.lt.s32.totalorder %s2530_s20, %s2530_s20 }
  0x5d   :  { %p2351_p1 = scmp.ne.s32.totalorder %s2530_s20, %s2350_s14  ;;  %p2356_p3 = scmp.lt.s32.totalorder %s2350_s14, %s2350_s14 }
  0x5f   :  { %p2357_p4 = por %p2356_p3, %p2355_p2 }
  0x61   :  { %p2358_p5 = pnand %p2357_p4, %p2351_p1 }
  0x63   :  { %2361 = shalt.err (!%p2358_p5)
}
  0x64   :  { %s2400_s4 = smov 16   ;;  %s2401_s7 = smov 1  }
  0x65   :  { %79 = dma.hbm_to_vmem [thread:$0]  %s3085_s6, 64, %s2530_s20, [#allocation8], %s2400_s4, %s2400_s4, %s2401_s7  }
  0x66   :  { %s2402_s18 = smov [#allocation12]   ;;  %s2362_s25 = scalar_lea.hbm %s3087_s8, 16 }
  0x67   :  { %s98_s19 = sshll.u32 %s2402_s18, 4  ;;  %p2363_p6 = scmp.ne.s32.totalorder %s3087_s8, %s2362_s25  ;;  %s99_s19 = int_to_ptr.vmem [resolvable:$true] %s98_s19 }
  0x68   :  { %p2366_p7 = scmp.lt.u32.totalorder %s2362_s25, %s3087_s8 }
  0x6a   :  { %p2368_p8 = pnand %p2366_p7, %p2363_p6 }
  0x6c   :  { %2371 = shalt.err (!%p2368_p8)
}
  0x6d   :  { %s2372_s2 = scalar_lea.vmem %s99_s19, 16  ;;  %s2376_s6 = scalar_lea.vmem %s99_s19, 32 }
  0x6e   :  { %p2373_p9 = scmp.ne.s32.totalorder %s99_s19, %s2372_s2  ;;  %p2377_p10 = scmp.lt.s32.totalorder %s99_s19, %s99_s19 }
  0x6f   :  { %p2378_p11 = scmp.lt.s32.totalorder %s2376_s6, %s2372_s2 }
  0x71   :  { %p2379_p12 = por %p2378_p11, %p2377_p10 }
  0x73   :  { %p2380_p13 = pnand %p2379_p12, %p2373_p9 }
  0x75   :  { %2383 = shalt.err (!%p2380_p13)
}
  0x76   :  { %101 = dma.hbm_to_vmem [thread:$0]  %s3087_s8, 16, %s99_s19, [#allocation11]  }
  0x77   :  { %2384 = dma.done.wait [#allocation3], 2048  }
  0x78   :  { %2385 = vsyncadd [#allocation3], 4294965248 }
  0x79   :  { %2386 = dma.done.wait [#allocation5], 1040  }
  0x7a   :  { %2387 = vsyncadd [#allocation5], 4294966256 }
  0x7b   :  { %2388 = dma.done.wait [#allocation8], 4160  }
  0x7c   :  { %2389 = vsyncadd [#allocation8], 4294963136 }
  0x7d   :  { %2390 = dma.done.wait [#allocation11], 1040  }
  0x7e   :  { %2391 = vsyncadd [#allocation11], 4294966256  ;;  %v3092_v0 = vmov 0.0   ;;  %v2163_v1 = vld [vmem:[#allocation2 + $0x40] sm:$0xff]   ;;  %v2165_v3 = vld [vmem:[#allocation2 + $0x48] sm:$0xff]   ;;  %vm2404_vm0 = vmmov 0  }
  0x7f   :  { %1808 = vmatprep.subr.bf16.mxu1 %v3092_v0  ;;  %v2164_v2 = vld [vmem:[#allocation2] sm:$0xff]   ;;  %1633 = vmatprep.subr.bf16.mxu0 %v2163_v1  ;;  %v2166_v4 = vld [vmem:[#allocation2 + $0x8] sm:$0xff]   ;;  %v2167_v5 = vld [vmem:[#allocation2 + $0x50] sm:$0xff]  }
  0x80   :  { %1634 = vmatpush3.bf16.msra.mxu0 %v2164_v2  ;;  %v2168_v6 = vld [vmem:[#allocation2 + $0x10] sm:$0xff]   ;;  %v2169_v7 = vld [vmem:[#allocation2 + $0x58] sm:$0xff]   ;;  %v2171_v9 = vld [vmem:[#allocation2 + $0x60] sm:$0xff]   ;;  %1824 = vmatprep.mubr.msk.bf16.mxu1 %vm2404_vm0, %v3092_v0 }
  0x81   :  { %1635 = vmatprep.subr.bf16.mxu0 %v2165_v3  ;;  %v2170_v8 = vld [vmem:[#allocation2 + $0x18] sm:$0xff]   ;;  %v2172_v10 = vld [vmem:[#allocation2 + $0x20] sm:$0xff]   ;;  %v2173_v11 = vld [vmem:[#allocation2 + $0x68] sm:$0xff]  }
  0x82   :  { %v2174_v12 = vld [vmem:[#allocation2 + $0x28] sm:$0xff]   ;;  %v2175_v15 = vld [vmem:[#allocation2 + $0x70] sm:$0xff]   ;;  %v2177_v18 = vld [vmem:[#allocation2 + $0x78] sm:$0xff]  }
  0x83   :  { %v2181_v13 = vld [vmem:[%s3079_s0 + $0x4] ss:$8 sps:$4 sm:$0xff]   ;;  %v2176_v17 = vld [vmem:[#allocation2 + $0x30] sm:$0xff]   ;;  %v2178_v20 = vld [vmem:[#allocation2 + $0x38] sm:$0xff]  }
  0x84   :  { %1636 = vmatpush3.bf16.msra.mxu0 %v2166_v4  ;;  %v2577_v14 = vld [vmem:[#allocation7] sm:$0xff]   ;;  %303 = vmatprep.mubr.bf16.mxu0 %v2181_v13  ;;  %v2580_v16 = vld [vmem:[#allocation7 + $0x8] sm:$0xff]   ;;  %v2583_v19 = vld [vmem:[#allocation7 + $0x10] sm:$0xff]  }
  0x85   :  { %1637 = vmatprep.subr.bf16.mxu0 %v2167_v5  ;;  %3102 = vst [vmem:[#allocation17_spill] sm:$0xff] %v2577_v14  ;;  %1809 = vmatpush3.bf16.msra.mxu1 %v2577_v14  ;;  %3103 = vst [vmem:[#allocation18_spill] sm:$0xff] %v2580_v16  ;;  %v2587_v21 = vld [vmem:[#allocation7 + $0x18] sm:$0xff]   ;;  %v2594_v23 = vld [vmem:[#allocation7 + $0x20] sm:$0xff]  }
  0x86   :  { %1810 = vmatprep.subr.bf16.mxu1 %v3092_v0  ;;  %3104 = vst [vmem:[#allocation19_spill] sm:$0xff] %v2583_v19  ;;  %3105 = vst [vmem:[#allocation20_spill] sm:$0xff] %v2587_v21  ;;  %v2179_v22 = vld [vmem:[%s3079_s0] ss:$8 sps:$4 sm:$0xff]   ;;  %v2605_v25 = vld [vmem:[#allocation7 + $0x30] sm:$0xff]  }
  0x87   :  { %3106 = vst [vmem:[#allocation21_spill] sm:$0xff] %v2594_v23  ;;  %v2599_v24 = vld [vmem:[#allocation7 + $0x28] sm:$0xff]   ;;  %3108 = vst [vmem:[#allocation23_spill] sm:$0xff] %v2605_v25  ;;  %v2609_v26 = vld [vmem:[#allocation7 + $0x38] sm:$0xff]  }
  0x88   :  { %1638 = vmatpush3.bf16.msra.mxu0 %v2168_v6  ;;  %3107 = vst [vmem:[#allocation22_spill] sm:$0xff] %v2599_v24  ;;  %3109 = vst [vmem:[#allocation24_spill] sm:$0xff] %v2609_v26  ;;  %v2617_v27 = vld [vmem:[#allocation7 + $0x40] sm:$0xff]   ;;  %v2620_v28 = vld [vmem:[#allocation7 + $0x48] sm:$0xff]  }
  0x89   :  { %1639 = vmatprep.subr.bf16.mxu0 %v2169_v7  ;;  %1811 = vmatpush3.bf16.msra.mxu1 %v2580_v16  ;;  %v2624_v29 = vld [vmem:[#allocation7 + $0x50] sm:$0xff]   ;;  %v2628_v30 = vld [vmem:[#allocation7 + $0x58] sm:$0xff]   ;;  %v2632_v31 = vld [vmem:[#allocation7 + $0x60] sm:$0xff]  }
  0x8a   :  { %1812 = vmatprep.subr.bf16.mxu1 %v3092_v0  ;;  %v2636_v32 = vld [vmem:[#allocation7 + $0x68] sm:$0xff]   ;;  %v1561_v37 = vld [vmem:[#allocation6] ss:$0 sm:$0xff]  ;;  %v2649_v43 = vld [vmem:[#allocation7 + $0x70] sm:$0xff]  }
  0x8b   :  { %v2653_v44 = vld [vmem:[#allocation7 + $0x78] sm:$0xff]   ;;  %v2657_v45 = vld [vmem:[#allocation7 + $0x80] sm:$0xff]   ;;  %v2660_v46 = vld [vmem:[#allocation7 + $0x88] sm:$0xff]  }
  0x8c   :  { %1640 = vmatpush3.bf16.msra.mxu0 %v2170_v8  ;;  %v2664_v47 = vld [vmem:[#allocation7 + $0x90] sm:$0xff]   ;;  %v2668_v48 = vld [vmem:[#allocation7 + $0x98] sm:$0xff]   ;;  %v2672_v49 = vld [vmem:[#allocation7 + $0xa0] sm:$0xff]  }
  0x8d   :  { %1641 = vmatprep.subr.bf16.mxu0 %v2171_v9  ;;  %1813 = vmatpush3.bf16.msra.mxu1 %v2583_v19  ;;  %v2677_v50 = vld [vmem:[#allocation9] ss:$0 sm:$0xff]  ;;  %v2683_v60 = vld [vmem:[#allocation7 + $0xa8] sm:$0xff]   ;;  %v2687_v61 = vld [vmem:[#allocation7 + $0xb0] sm:$0xff]  }
  0x8e   :  { %1814 = vmatprep.subr.bf16.mxu1 %v3092_v0  ;;  %v2691_v62 = vld [vmem:[#allocation7 + $0xb8] sm:$0xff]   ;;  %v2695_v63 = vld [vmem:[#allocation7 + $0xc0] sm:$0xff]   ;;  %v2698_v1 = vld [vmem:[#allocation7 + $0xc8] sm:$0xff]  }
  0x8f   :  { %v2702_v2 = vld [vmem:[#allocation7 + $0xd0] sm:$0xff]   ;;  %v2706_v3 = vld [vmem:[#allocation7 + $0xd8] sm:$0xff]   ;;  %v2710_v4 = vld [vmem:[#allocation7 + $0xe0] sm:$0xff]  }
  0x90   :  { %1642 = vmatpush3.bf16.msra.mxu0 %v2172_v10  ;;  %v2714_v5 = vld [vmem:[#allocation7 + $0xe8] sm:$0xff]   ;;  %v2719_v6 = vld [vmem:[#allocation9 + $0x1] ss:$0 sm:$0xff] }
  0x91   :  { %1643 = vmatprep.subr.bf16.mxu0 %v2173_v11  ;;  %1815 = vmatpush3.bf16.msra.mxu1 %v2587_v21 }
  0x92   :  { %1816 = vmatprep.subr.bf16.mxu1 %v3092_v0 }
  0x94   :  { %1644 = vmatpush3.bf16.msra.mxu0 %v2174_v12 }
  0x95   :  { %1645 = vmatprep.subr.bf16.mxu0 %v2175_v15  ;;  %1817 = vmatpush3.bf16.msra.mxu1 %v2594_v23 }
  0x96   :  { %1818 = vmatprep.subr.bf16.mxu1 %v3092_v0 }
  0x98   :  { %1646 = vmatpush3.bf16.msra.mxu0 %v2176_v17 }
  0x99   :  { %1647 = vmatprep.subr.bf16.mxu0 %v2177_v18  ;;  %1819 = vmatpush3.bf16.msra.mxu1 %v2599_v24 }
  0x9a   :  { %1820 = vmatprep.subr.bf16.mxu1 %v3092_v0 }
  0x9c   :  { %1648 = vmatpush3.bf16.msra.mxu0 %v2178_v20 }
  0x9d   :  { %1828 = vmatprep.subr.bf16.mxu0 %v3092_v0  ;;  %1821 = vmatpush3.bf16.msra.mxu1 %v2605_v25 }
  0x9e   :  { %1822 = vmatprep.subr.bf16.mxu1 %v3092_v0 }
  0x9f   :  { %304 = vmatmul.mubr.bf16.vlgmr.msra.gmra.mrb[0].mxu0 %v2179_v22  ;;  %v2733_v22 = vld [vmem:[#allocation7 + $0xf0] sm:$0xff]  }
  0xa0   :  { %1844 = vmatprep.mubr.msk.bf16.mxu0 %vm2404_vm0, %v3092_v0  ;;  %1829 = vmatpush3.bf16.msra.mxu0 %v2617_v27 }
  0xa1   :  { %1823 = vmatpush3.bf16.msra.mxu1 %v2609_v26  ;;  %1830 = vmatprep.subr.bf16.mxu0 %v3092_v0 }
  0xa2   :  { %1848 = vmatprep.subr.bf16.mxu1 %v3092_v0 }
  0xa4   :  { %1831 = vmatpush3.bf16.msra.mxu0 %v2620_v28 }
  0xa5   :  { %1832 = vmatprep.subr.bf16.mxu0 %v3092_v0 }
  0xa8   :  { %1833 = vmatpush3.bf16.msra.mxu0 %v2624_v29 }
  0xa9   :  { %1834 = vmatprep.subr.bf16.mxu0 %v3092_v0 }
  0xac   :  { %1835 = vmatpush3.bf16.msra.mxu0 %v2628_v30 }
  0xad   :  { %1836 = vmatprep.subr.bf16.mxu0 %v3092_v0 }
  0xb0   :  { %1837 = vmatpush3.bf16.msra.mxu0 %v2632_v31 }
  0xb1   :  { %1838 = vmatprep.subr.bf16.mxu0 %v3092_v0 }
  0xb4   :  { %1839 = vmatpush3.bf16.msra.mxu0 %v2636_v32 }
  0xb5   :  { %1840 = vmatprep.subr.bf16.mxu0 %v3092_v0 }
  0xb8   :  { %1841 = vmatpush3.bf16.msra.mxu0 %v2649_v43 }
  0xb9   :  { %1842 = vmatprep.subr.bf16.mxu0 %v3092_v0 }
  0xbc   :  { %1843 = vmatpush3.bf16.msra.mxu0 %v2653_v44 }
  0xbd   :  { %1868 = vmatprep.subr.bf16.mxu0 %v3092_v0 }
 0x172   :  { %v1649_v33 = vpop.f32.mrb[0].mxu0 }
 0x173   :  { %v1650_v34 = vpop.f32.mrb[1].mxu0 }
 0x174   :  { %v1651_v35 = vadd.f32 %v1650_v34, %v1649_v33  ;;  %v1652_v36 = vpop.f32.mrb[2].mxu0  ;;  %v2737_v33 = vld [vmem:[#allocation7 + $0xf8] sm:$0xff]   ;;  %v2741_v34 = vld [vmem:[#allocation10] sm:$0xff]  }
 0x175   :  { %v1653_v38 = vpop.f32.mrb[3].mxu0 }
 0x176   :  { %v1654_v39 = vadd.f32 %v1653_v38, %v1652_v36  ;;  %v2641_v40 = vadd.f32 %v1651_v35, %v1561_v37  ;;  %v2744_v35 = vld [vmem:[#allocation10 + $0x8] sm:$0xff]   ;;  %v2748_v36 = vld [vmem:[#allocation10 + $0x10] sm:$0xff]   ;;  %v2756_v38 = vld [vmem:[#allocation10 + $0x20] sm:$0xff]  }
 0x178   :  { %v2643_v41 = vadd.f32 %v1654_v39, %v1561_v37  ;;  %v2752_v37 = vld [vmem:[#allocation10 + $0x18] sm:$0xff]  }
 0x179   :  { %v2761_v39 = vld [vmem:[#allocation9 + $0x2] ss:$0 sm:$0xff] }
 0x17a   :  { %v421_v42 = vpack.c.bf16 %v2643_v41, %v2641_v40 }
 0x17c   :  { %1825 = vmatmul.mubr.bf16.vlgmr.msra.gmra.mrb[0].mxu1 %v421_v42 }
 0x17d   :  { %1864 = vmatprep.mubr.msk.bf16.mxu1 %vm2404_vm0, %v3092_v0  ;;  %1849 = vmatpush3.bf16.msra.mxu1 %v2657_v45 }
 0x17e   :  { %1850 = vmatprep.subr.bf16.mxu1 %v3092_v0 }
 0x181   :  { %1851 = vmatpush3.bf16.msra.mxu1 %v2660_v46 }
 0x182   :  { %1852 = vmatprep.subr.bf16.mxu1 %v3092_v0 }
 0x185   :  { %1853 = vmatpush3.bf16.msra.mxu1 %v2664_v47 }
 0x186   :  { %1854 = vmatprep.subr.bf16.mxu1 %v3092_v0 }
 0x189   :  { %1855 = vmatpush3.bf16.msra.mxu1 %v2668_v48 }
 0x18a   :  { %1856 = vmatprep.subr.bf16.mxu1 %v3092_v0 }
 0x18d   :  { %1857 = vmatpush3.bf16.msra.mxu1 %v2672_v49 }
 0x18e   :  { %1858 = vmatprep.subr.bf16.mxu1 %v3092_v0 }
 0x191   :  { %1859 = vmatpush3.bf16.msra.mxu1 %v2683_v60 }
 0x192   :  { %1860 = vmatprep.subr.bf16.mxu1 %v3092_v0 }
 0x195   :  { %1861 = vmatpush3.bf16.msra.mxu1 %v2687_v61 }
 0x196   :  { %1862 = vmatprep.subr.bf16.mxu1 %v3092_v0 }
 0x199   :  { %1863 = vmatpush3.bf16.msra.mxu1 %v2691_v62 }
 0x19a   :  { %1888 = vmatprep.subr.bf16.mxu1 %v3092_v0 }
 0x24f   :  { %v510_v51 = vpop.f32.mrb[0].mxu1 }
 0x250   :  { %v511_v52 = vadd.f32 %v2677_v50, %v510_v51  ;;  %v1826_v53 = vpop.f32.mrb[1].mxu1 }
 0x251   :  { %v513_v54 = vpop.f32.mrb[2].mxu1 }
 0x252   :  { %v514_v55 = vadd.f32 %v2677_v50, %v513_v54  ;;  %v1827_v56 = vpop.f32.mrb[3].mxu1  ;;  %v517_v57 = vmax.f32 %v511_v52, 0.0 }
 0x254   :  { %v518_v58 = vmax.f32 %v514_v55, 0.0 }
 0x256   :  { %v519_v59 = vpack.c.bf16 %v518_v58, %v517_v57 }
 0x258   :  { %1845 = vmatmul.mubr.bf16.vlgmr.msra.gmra.mrb[4].mxu0 %v519_v59  ;;  %v2767_v59 = vld [vmem:[#allocation10 + $0x28] sm:$0xff]  }
 0x259   :  { %1884 = vmatprep.mubr.msk.bf16.mxu0 %vm2404_vm0, %v3092_v0  ;;  %1869 = vmatpush3.bf16.msra.mxu0 %v2695_v63 }
 0x25a   :  { %1870 = vmatprep.subr.bf16.mxu0 %v3092_v0 }
 0x25d   :  { %1871 = vmatpush3.bf16.msra.mxu0 %v2698_v1 }
 0x25e   :  { %1872 = vmatprep.subr.bf16.mxu0 %v3092_v0 }
 0x261   :  { %1873 = vmatpush3.bf16.msra.mxu0 %v2702_v2 }
 0x262   :  { %1874 = vmatprep.subr.bf16.mxu0 %v3092_v0 }
 0x265   :  { %1875 = vmatpush3.bf16.msra.mxu0 %v2706_v3 }
 0x266   :  { %1876 = vmatprep.subr.bf16.mxu0 %v3092_v0 }
 0x269   :  { %1877 = vmatpush3.bf16.msra.mxu0 %v2710_v4 }
 0x26a   :  { %1878 = vmatprep.subr.bf16.mxu0 %v3092_v0 }
 0x26d   :  { %1879 = vmatpush3.bf16.msra.mxu0 %v2714_v5 }
 0x26e   :  { %1880 = vmatprep.subr.bf16.mxu0 %v3092_v0 }
 0x271   :  { %1881 = vmatpush3.bf16.msra.mxu0 %v2733_v22 }
 0x272   :  { %1882 = vmatprep.subr.bf16.mxu0 %v3092_v0 }
 0x275   :  { %1883 = vmatpush3.bf16.msra.mxu0 %v2737_v33 }
 0x276   :  { %1908 = vmatprep.subr.bf16.mxu0 %v3092_v0 }
 0x32b   :  { %v608_v7 = vpop.f32.mrb[4].mxu0 }
 0x32c   :  { %v609_v8 = vadd.f32 %v2719_v6, %v608_v7  ;;  %v1846_v9 = vpop.f32.mrb[5].mxu0  ;;  %v2771_v7 = vld [vmem:[#allocation10 + $0x30] sm:$0xff]  }
 0x32d   :  { %v611_v10 = vpop.f32.mrb[6].mxu0  ;;  %v312_v9 = vld [vmem:[%s3080_s1] sm:$0xff] }
 0x32e   :  { %v615_v11 = vmax.f32 %v609_v8, 0.0  ;;  %v612_v12 = vadd.f32 %v2719_v6, %v611_v10  ;;  %v1847_v13 = vpop.f32.mrb[7].mxu0  ;;  %v2775_v8 = vld [vmem:[#allocation10 + $0x38] sm:$0xff]  }
 0x32f   :  { %v2782_v10 = vld [vmem:[#allocation4] sm:$0xff]   ;;  %v313_v13 = vld [vmem:[%s3080_s1 + $0x8] sm:$0xff] }
 0x330   :  { %v616_v15 = vmax.f32 %v612_v12, 0.0  ;;  %v2724_v17 = vadd.f32 %v615_v11, %v2641_v40  ;;  %v2405_v11 = vmov 0   ;;  %v2785_v12 = vld [vmem:[#allocation4 + $0x8] sm:$0xff]  }
 0x331   :  { %2162 = vset.pattern.permute.xlu0 %v2405_v11 }
 0x332   :  { %v2727_v18 = vadd.f32 %v616_v15, %v2643_v41  ;;  %917 = vperm.xlu0 %2162, %v312_v9   ;;  %v2792_v15 = vld [vmem:[#allocation4 + $0x10] sm:$0xff]  }
 0x334   :  { %v619_v20 = vpack.c.bf16 %v2727_v18, %v2724_v17 }
 0x336   :  { %1865 = vmatmul.mubr.bf16.vlgmr.msra.gmra.mrb[4].mxu1 %v619_v20  ;;  %922 = vperm.xlu0 %2162, %v313_v13   ;;  %v2797_v20 = vld [vmem:[#allocation9 + $0x3] ss:$0 sm:$0xff]  ;;  %v2829_v13 = vld [vmem:[#allocation4 + $0x28] sm:$0xff]  }
 0x337   :  { %1904 = vmatprep.mubr.msk.bf16.mxu1 %vm2404_vm0, %v3092_v0  ;;  %1889 = vmatpush3.bf16.msra.mxu1 %v2741_v34  ;;  %3110 = vst [vmem:[#allocation25_spill] sm:$0xff] %v2797_v20 }
 0x338   :  { %1890 = vmatprep.subr.bf16.mxu1 %v3092_v0 }
 0x33b   :  { %1891 = vmatpush3.bf16.msra.mxu1 %v2744_v35 }
 0x33c   :  { %1892 = vmatprep.subr.bf16.mxu1 %v3092_v0 }
 0x33f   :  { %1893 = vmatpush3.bf16.msra.mxu1 %v2748_v36 }
 0x340   :  { %1894 = vmatprep.subr.bf16.mxu1 %v3092_v0 }
 0x343   :  { %1895 = vmatpush3.bf16.msra.mxu1 %v2752_v37 }
 0x344   :  { %1896 = vmatprep.subr.bf16.mxu1 %v3092_v0 }
 0x347   :  { %1897 = vmatpush3.bf16.msra.mxu1 %v2756_v38 }
 0x348   :  { %1898 = vmatprep.subr.bf16.mxu1 %v3092_v0 }
 0x34b   :  { %1899 = vmatpush3.bf16.msra.mxu1 %v2767_v59 }
 0x34c   :  { %1900 = vmatprep.subr.bf16.mxu1 %v3092_v0 }
 0x34f   :  { %1901 = vmatpush3.bf16.msra.mxu1 %v2771_v7 }
 0x350   :  { %1902 = vmatprep.subr.bf16.mxu1 %v3092_v0 }
 0x353   :  { %1903 = vmatpush3.bf16.msra.mxu1 %v2775_v8 }
 0x354   :  { %1928 = vmatprep.subr.bf16.mxu1 %v3092_v0 }
 0x409   :  { %v708_v42 = vpop.f32.mrb[4].mxu1 }
 0x40a   :  { %v709_v51 = vadd.f32 %v2761_v39, %v708_v42  ;;  %v1866_v52 = vpop.f32.mrb[5].mxu1 }
 0x40b   :  { %v711_v53 = vpop.f32.mrb[6].mxu1 }
 0x40c   :  { %v712_v54 = vadd.f32 %v2761_v39, %v711_v53  ;;  %v1867_v55 = vpop.f32.mrb[7].mxu1  ;;  %v715_v56 = vmax.f32 %v709_v51, 0.0 }
 0x40e   :  { %v716_v57 = vmax.f32 %v712_v54, 0.0 }
 0x410   :  { %v717_v58 = vpack.c.bf16 %v716_v57, %v715_v56 }
 0x412   :  { %1885 = vmatmul.mubr.bf16.vlgmr.msra.gmra.mrb[8].mxu0 %v717_v58 }
 0x413   :  { %1924 = vmatprep.mubr.msk.bf16.mxu0 %vm2404_vm0, %v3092_v0  ;;  %1909 = vmatpush3.bf16.msra.mxu0 %v2782_v10 }
 0x414   :  { %1910 = vmatprep.subr.bf16.mxu0 %v3092_v0 }
 0x417   :  { %1911 = vmatpush3.bf16.msra.mxu0 %v2785_v12 }
 0x418   :  { %1912 = vmatprep.subr.bf16.mxu0 %v3092_v0 }
 0x41b   :  { %1913 = vmatpush3.bf16.msra.mxu0 %v2792_v15 }
 0x41c   :  { %1914 = vmatprep.subr.bf16.mxu0 %v3092_v0 }
 0x4e5   :  { %v806_v42 = vpop.f32.mrb[8].mxu0 }
 0x4e6   :  { %v807_v51 = vadd.f32 %v2797_v20, %v806_v42  ;;  %v1886_v52 = vpop.f32.mrb[9].mxu0  ;;  %v2833_v42 = vld [vmem:[#allocation4 + $0x30] sm:$0xff]  }
 0x4e7   :  { %v809_v53 = vpop.f32.mrb[10].mxu0  ;;  %v2841_v52 = vpop.permute.xlu0 %917 }
 0x4e8   :  { %v813_v54 = vmax.f32 %v807_v51, 0.0  ;;  %v810_v55 = vadd.f32 %v2797_v20, %v809_v53  ;;  %v1887_v56 = vpop.f32.mrb[11].mxu0  ;;  %v2837_v51 = vld [vmem:[#allocation4 + $0x38] sm:$0xff]   ;;  %v2843_v53 = vld [vmem:[#allocation12] ss:$0 sm:$0xff] }
 0x4e9   :  { %3111 = vst [vmem:[#allocation26_spill] sm:$0xff] %v2837_v51 }
 0x4ea   :  { %v814_v57 = vmax.f32 %v810_v55, 0.0  ;;  %v815_v58 = vadd.f32 %v813_v54, %v2724_v17  ;;  %v2821_v17 = vld [vmem:[#allocation4 + $0x18] sm:$0xff]  }
 0x4eb   :  { %1915 = vmatpush3.bf16.msra.mxu0 %v2821_v17 }
 0x4ec   :  { %v816_v9 = vadd.f32 %v814_v57, %v2727_v18  ;;  %1916 = vmatprep.subr.bf16.mxu0 %v3092_v0  ;;  %v2825_v18 = vld [vmem:[#allocation4 + $0x20] sm:$0xff]  }
 0x4ee   :  { %v817_v11 = vpack.c.bf16 %v816_v9, %v815_v58 }
 0x4ef   :  { %1917 = vmatpush3.bf16.msra.mxu0 %v2825_v18 }
 0x4f0   :  { %1905 = vmatmul.mubr.bf16.vlgmr.msra.gmra.mrb[8].mxu1 %v817_v11  ;;  %1918 = vmatprep.subr.bf16.mxu0 %v3092_v0 }
 0x4f1   :  { %1929 = vmatpush3.bf16.msra.mxu1 %v2577_v14  ;;  %1944 = vmatprep.mubr.msk.bf16.mxu1 %vm2404_vm0, %v3092_v0 }
 0x4f2   :  { %1930 = vmatprep.subr.bf16.mxu1 %v3092_v0 }
 0x4f3   :  { %1919 = vmatpush3.bf16.msra.mxu0 %v2829_v13 }
 0x4f4   :  { %1920 = vmatprep.subr.bf16.mxu0 %v3092_v0 }
 0x4f5   :  { %1931 = vmatpush3.bf16.msra.mxu1 %v2580_v16 }
 0x4f6   :  { %1932 = vmatprep.subr.bf16.mxu1 %v3092_v0 }
 0x4f7   :  { %1921 = vmatpush3.bf16.msra.mxu0 %v2833_v42 }
 0x4f8   :  { %1922 = vmatprep.subr.bf16.mxu0 %v3092_v0 }
 0x4f9   :  { %1933 = vmatpush3.bf16.msra.mxu1 %v2583_v19 }
 0x4fa   :  { %1934 = vmatprep.subr.bf16.mxu1 %v3092_v0 }
 0x4fb   :  { %1923 = vmatpush3.bf16.msra.mxu0 %v2837_v51 }
 0x4fc   :  { %1948 = vmatprep.subr.bf16.mxu0 %v3092_v0 }
 0x4fd   :  { %1935 = vmatpush3.bf16.msra.mxu1 %v2587_v21 }
 0x4fe   :  { %1936 = vmatprep.subr.bf16.mxu1 %v3092_v0 }
 0x501   :  { %1937 = vmatpush3.bf16.msra.mxu1 %v2594_v23 }
 0x502   :  { %1938 = vmatprep.subr.bf16.mxu1 %v3092_v0 }
 0x505   :  { %1939 = vmatpush3.bf16.msra.mxu1 %v2599_v24 }
 0x506   :  { %1940 = vmatprep.subr.bf16.mxu1 %v3092_v0 }
 0x509   :  { %1941 = vmatpush3.bf16.msra.mxu1 %v2605_v25 }
 0x50a   :  { %1942 = vmatprep.subr.bf16.mxu1 %v3092_v0 }
 0x50d   :  { %1943 = vmatpush3.bf16.msra.mxu1 %v2609_v26  ;;  %v2848_v26 = vpop.permute.xlu0 %922 }
 0x50e   :  { %1968 = vmatprep.subr.bf16.mxu1 %v3092_v0 }
 0x5c3   :  { %v906_v54 = vpop.f32.mrb[8].mxu1 }
 0x5c4   :  { %v907_v55 = vadd.f32 %v2843_v53, %v906_v54  ;;  %v1906_v56 = vpop.f32.mrb[9].mxu1 }
 0x5c5   :  { %v909_v57 = vpop.f32.mrb[10].mxu1 }
 0x5c6   :  { %v925_v58 = vmul.f32 %v2841_v52, %v907_v55  ;;  %v910_v9 = vadd.f32 %v2843_v53, %v909_v57  ;;  %v1907_v11 = vpop.f32.mrb[11].mxu1 }
 0x5c8   :  { %v927_v25 = vrot.slane %v925_v58, 4  ;;  %v926_v24 = vmul.f32 %v2848_v26, %v910_v9  ;;  %v3112_v9 = vmov 0.0  }
 0x5ca   :  { %v928_v0 = vadd.f32 %v927_v25, %v925_v58  ;;  %v933_v23 = vrot.slane %v926_v24, 4 }
 0x5cc   :  { %v929_v21 = vrot.slane %v928_v0, 2  ;;  %v934_v19 = vadd.f32 %v933_v23, %v926_v24 }
 0x5ce   :  { %v930_v16 = vadd.f32 %v929_v21, %v928_v0  ;;  %v935_v14 = vrot.slane %v934_v19, 2 }
 0x5d0   :  { %v931_v20 = vrot.slane %v930_v16, 1  ;;  %v936_v54 = vadd.f32 %v935_v14, %v934_v19 }
 0x5d2   :  { %v937_v56 = vrot.slane %v936_v54, 1  ;;  %v2851_v51 = vadd.f32 %v931_v20, %v930_v16 }
 0x5d4   :  { %v2853_v55 = vadd.f32 %v937_v56, %v936_v54 }
 0x5d6   :  { %v939_v57 = vpack.c.bf16 %v2853_v55, %v2851_v51 }
 0x5d8   :  { %1925 = vmatmul.mubr.bf16.vlgmr.msra.gmra.mrb[12].mxu0 %v939_v57 }
 0x5d9   :  { %1949 = vmatpush3.bf16.msra.mxu0 %v2617_v27  ;;  %1964 = vmatprep.mubr.msk.bf16.mxu0 %vm2404_vm0, %v3112_v9 }
 0x5da   :  { %1950 = vmatprep.subr.bf16.mxu0 %v3112_v9 }
 0x5dd   :  { %1951 = vmatpush3.bf16.msra.mxu0 %v2620_v28 }
 0x5de   :  { %1952 = vmatprep.subr.bf16.mxu0 %v3112_v9 }
 0x5e1   :  { %1953 = vmatpush3.bf16.msra.mxu0 %v2624_v29 }
 0x5e2   :  { %1954 = vmatprep.subr.bf16.mxu0 %v3112_v9 }
 0x5e5   :  { %1955 = vmatpush3.bf16.msra.mxu0 %v2628_v30 }
 0x5e6   :  { %1956 = vmatprep.subr.bf16.mxu0 %v3112_v9 }
 0x5e9   :  { %1957 = vmatpush3.bf16.msra.mxu0 %v2632_v31 }
 0x5ea   :  { %1958 = vmatprep.subr.bf16.mxu0 %v3112_v9 }
 0x5ed   :  { %1959 = vmatpush3.bf16.msra.mxu0 %v2636_v32 }
 0x5ee   :  { %1960 = vmatprep.subr.bf16.mxu0 %v3112_v9 }
 0x5f1   :  { %1961 = vmatpush3.bf16.msra.mxu0 %v2649_v43 }
 0x5f2   :  { %1962 = vmatprep.subr.bf16.mxu0 %v3112_v9 }
 0x5f5   :  { %1963 = vmatpush3.bf16.msra.mxu0 %v2653_v44 }
 0x5f6   :  { %1988 = vmatprep.subr.bf16.mxu0 %v3112_v9 }
 0x6ab   :  { %v1022_v0 = vpop.f32.mrb[12].mxu0 }
 0x6ac   :  { %v1926_v14 = vpop.f32.mrb[13].mxu0  ;;  %v1029_v19 = vadd.f32 %v1022_v0, %v2641_v40 }
 0x6ad   :  { %v1025_v16 = vpop.f32.mrb[14].mxu0 }
 0x6ae   :  { %v1030_v21 = vadd.f32 %v1025_v16, %v2643_v41  ;;  %v1927_v23 = vpop.f32.mrb[15].mxu0 }
 0x6b0   :  { %v1031_v24 = vpack.c.bf16 %v1030_v21, %v1029_v19 }
 0x6b2   :  { %1945 = vmatmul.mubr.bf16.vlgmr.msra.gmra.mrb[12].mxu1 %v1031_v24 }
 0x6b3   :  { %1969 = vmatpush3.bf16.msra.mxu1 %v2657_v45  ;;  %1984 = vmatprep.mubr.msk.bf16.mxu1 %vm2404_vm0, %v3112_v9 }
 0x6b4   :  { %1970 = vmatprep.subr.bf16.mxu1 %v3112_v9 }
 0x6b7   :  { %1971 = vmatpush3.bf16.msra.mxu1 %v2660_v46 }
 0x6b8   :  { %1972 = vmatprep.subr.bf16.mxu1 %v3112_v9 }
 0x6bb   :  { %1973 = vmatpush3.bf16.msra.mxu1 %v2664_v47 }
 0x6bc   :  { %1974 = vmatprep.subr.bf16.mxu1 %v3112_v9 }
 0x6bf   :  { %1975 = vmatpush3.bf16.msra.mxu1 %v2668_v48 }
 0x6c0   :  { %1976 = vmatprep.subr.bf16.mxu1 %v3112_v9 }
 0x6c3   :  { %1977 = vmatpush3.bf16.msra.mxu1 %v2672_v49 }
 0x6c4   :  { %1978 = vmatprep.subr.bf16.mxu1 %v3112_v9 }
 0x6c7   :  { %1979 = vmatpush3.bf16.msra.mxu1 %v2683_v60 }
 0x6c8   :  { %1980 = vmatprep.subr.bf16.mxu1 %v3112_v9 }
 0x6cb   :  { %1981 = vmatpush3.bf16.msra.mxu1 %v2687_v61 }
 0x6cc   :  { %1982 = vmatprep.subr.bf16.mxu1 %v3112_v9 }
 0x6cf   :  { %1983 = vmatpush3.bf16.msra.mxu1 %v2691_v62 }
 0x6d0   :  { %2008 = vmatprep.subr.bf16.mxu1 %v3112_v9 }
 0x785   :  { %v1066_v25 = vpop.f32.mrb[12].mxu1 }
 0x786   :  { %v1067_v20 = vadd.f32 %v2677_v50, %v1066_v25  ;;  %v1946_v58 = vpop.f32.mrb[13].mxu1 }
 0x787   :  { %v1069_v11 = vpop.f32.mrb[14].mxu1 }
 0x788   :  { %v1070_v54 = vadd.f32 %v2677_v50, %v1069_v11  ;;  %v1947_v56 = vpop.f32.mrb[15].mxu1  ;;  %v1073_v57 = vmax.f32 %v1067_v20, 0.0 }
 0x78a   :  { %v1074_v0 = vmax.f32 %v1070_v54, 0.0 }
 0x78c   :  { %v1075_v14 = vpack.c.bf16 %v1074_v0, %v1073_v57 }
 0x78e   :  { %1965 = vmatmul.mubr.bf16.vlgmr.msra.gmra.mrb[16].mxu0 %v1075_v14 }
 0x78f   :  { %1989 = vmatpush3.bf16.msra.mxu0 %v2695_v63  ;;  %2004 = vmatprep.mubr.msk.bf16.mxu0 %vm2404_vm0, %v3112_v9 }
 0x790   :  { %1990 = vmatprep.subr.bf16.mxu0 %v3112_v9 }
 0x793   :  { %1991 = vmatpush3.bf16.msra.mxu0 %v2698_v1 }
 0x794   :  { %1992 = vmatprep.subr.bf16.mxu0 %v3112_v9 }
 0x797   :  { %1993 = vmatpush3.bf16.msra.mxu0 %v2702_v2 }
 0x798   :  { %1994 = vmatprep.subr.bf16.mxu0 %v3112_v9 }
 0x79b   :  { %1995 = vmatpush3.bf16.msra.mxu0 %v2706_v3 }
 0x79c   :  { %1996 = vmatprep.subr.bf16.mxu0 %v3112_v9 }
 0x79f   :  { %1997 = vmatpush3.bf16.msra.mxu0 %v2710_v4 }
 0x7a0   :  { %1998 = vmatprep.subr.bf16.mxu0 %v3112_v9 }
 0x7a3   :  { %1999 = vmatpush3.bf16.msra.mxu0 %v2714_v5 }
 0x7a4   :  { %2000 = vmatprep.subr.bf16.mxu0 %v3112_v9 }
 0x7a7   :  { %2001 = vmatpush3.bf16.msra.mxu0 %v2733_v22 }
 0x7a8   :  { %2002 = vmatprep.subr.bf16.mxu0 %v3112_v9 }
 0x7ab   :  { %2003 = vmatpush3.bf16.msra.mxu0 %v2737_v33 }
 0x7ac   :  { %2028 = vmatprep.subr.bf16.mxu0 %v3112_v9 }
 0x861   :  { %v1110_v16 = vpop.f32.mrb[16].mxu0 }
 0x862   :  { %v1111_v23 = vadd.f32 %v2719_v6, %v1110_v16  ;;  %v1966_v24 = vpop.f32.mrb[17].mxu0 }
 0x863   :  { %v1113_v25 = vpop.f32.mrb[18].mxu0 }
 0x864   :  { %v1117_v20 = vmax.f32 %v1111_v23, 0.0  ;;  %v1114_v58 = vadd.f32 %v2719_v6, %v1113_v25  ;;  %v1967_v11 = vpop.f32.mrb[19].mxu0 }
 0x866   :  { %v1118_v54 = vmax.f32 %v1114_v58, 0.0  ;;  %v1119_v56 = vadd.f32 %v1117_v20, %v1029_v19 }
 0x868   :  { %v1120_v57 = vadd.f32 %v1118_v54, %v1030_v21 }
 0x86a   :  { %v1121_v0 = vpack.c.bf16 %v1120_v57, %v1119_v56 }
 0x86c   :  { %1985 = vmatmul.mubr.bf16.vlgmr.msra.gmra.mrb[16].mxu1 %v1121_v0 }
 0x86d   :  { %2009 = vmatpush3.bf16.msra.mxu1 %v2741_v34  ;;  %2024 = vmatprep.mubr.msk.bf16.mxu1 %vm2404_vm0, %v3112_v9 }
 0x86e   :  { %2010 = vmatprep.subr.bf16.mxu1 %v3112_v9 }
 0x871   :  { %2011 = vmatpush3.bf16.msra.mxu1 %v2744_v35 }
 0x872   :  { %2012 = vmatprep.subr.bf16.mxu1 %v3112_v9 }
 0x875   :  { %2013 = vmatpush3.bf16.msra.mxu1 %v2748_v36 }
 0x876   :  { %2014 = vmatprep.subr.bf16.mxu1 %v3112_v9 }
 0x879   :  { %2015 = vmatpush3.bf16.msra.mxu1 %v2752_v37 }
 0x87a   :  { %2016 = vmatprep.subr.bf16.mxu1 %v3112_v9 }
 0x87d   :  { %2017 = vmatpush3.bf16.msra.mxu1 %v2756_v38 }
 0x87e   :  { %2018 = vmatprep.subr.bf16.mxu1 %v3112_v9 }
 0x881   :  { %2019 = vmatpush3.bf16.msra.mxu1 %v2767_v59 }
 0x882   :  { %2020 = vmatprep.subr.bf16.mxu1 %v3112_v9 }
 0x885   :  { %2021 = vmatpush3.bf16.msra.mxu1 %v2771_v7 }
 0x886   :  { %2022 = vmatprep.subr.bf16.mxu1 %v3112_v9 }
 0x889   :  { %2023 = vmatpush3.bf16.msra.mxu1 %v2775_v8 }
 0x88a   :  { %2048 = vmatprep.subr.bf16.mxu1 %v3112_v9 }
 0x93f   :  { %v1156_v19 = vpop.f32.mrb[16].mxu1 }
 0x940   :  { %v1157_v21 = vadd.f32 %v2761_v39, %v1156_v19  ;;  %v1986_v14 = vpop.f32.mrb[17].mxu1 }
 0x941   :  { %v1159_v16 = vpop.f32.mrb[18].mxu1 }
 0x942   :  { %v1160_v23 = vadd.f32 %v2761_v39, %v1159_v16  ;;  %v1987_v24 = vpop.f32.mrb[19].mxu1  ;;  %v1163_v25 = vmax.f32 %v1157_v21, 0.0 }
 0x943   :  { %v3117_v24 = vld [vmem:[#allocation19_spill] sm:$0xff] }
 0x944   :  { %v1164_v20 = vmax.f32 %v1160_v23, 0.0  ;;  %v3116_v23 = vld [vmem:[#allocation18_spill] sm:$0xff] }
 0x946   :  { %v1165_v58 = vpack.c.bf16 %v1164_v20, %v1163_v25  ;;  %v3118_v25 = vld [vmem:[#allocation20_spill] sm:$0xff]  ;;  %v3121_v20 = vld [vmem:[#allocation23_spill] sm:$0xff] }
 0x948   :  { %2005 = vmatmul.mubr.bf16.vlgmr.msra.gmra.mrb[20].mxu0 %v1165_v58  ;;  %v3122_v58 = vld [vmem:[#allocation24_spill] sm:$0xff] }
 0x949   :  { %2029 = vmatpush3.bf16.msra.mxu0 %v2782_v10  ;;  %2044 = vmatprep.mubr.msk.bf16.mxu0 %vm2404_vm0, %v3112_v9  ;;  %v3113_v10 = vld [vmem:[#allocation26_spill] sm:$0xff] }
 0x94a   :  { %2030 = vmatprep.subr.bf16.mxu0 %v3112_v9 }
 0x94d   :  { %2031 = vmatpush3.bf16.msra.mxu0 %v2785_v12 }
 0x94e   :  { %2032 = vmatprep.subr.bf16.mxu0 %v3112_v9 }
 0x951   :  { %2033 = vmatpush3.bf16.msra.mxu0 %v2792_v15  ;;  %v3114_v15 = vld [vmem:[#allocation25_spill] sm:$0xff] }
 0x952   :  { %2034 = vmatprep.subr.bf16.mxu0 %v3112_v9 }
 0x955   :  { %2035 = vmatpush3.bf16.msra.mxu0 %v2821_v17 }
 0x956   :  { %2036 = vmatprep.subr.bf16.mxu0 %v3112_v9 }
 0x959   :  { %2037 = vmatpush3.bf16.msra.mxu0 %v2825_v18 }
 0x95a   :  { %2038 = vmatprep.subr.bf16.mxu0 %v3112_v9 }
 0x95d   :  { %2039 = vmatpush3.bf16.msra.mxu0 %v2829_v13 }
 0x95e   :  { %2040 = vmatprep.subr.bf16.mxu0 %v3112_v9 }
 0x961   :  { %2041 = vmatpush3.bf16.msra.mxu0 %v2833_v42  ;;  %v3115_v42 = vld [vmem:[#allocation17_spill] sm:$0xff] }
 0x962   :  { %2042 = vmatprep.subr.bf16.mxu0 %v3112_v9 }
 0x965   :  { %2043 = vmatpush3.bf16.msra.mxu0 %v3113_v10 }
 0x966   :  { %2068 = vmatprep.subr.bf16.mxu0 %v3112_v9 }
 0xa1b   :  { %v1200_v12 = vpop.f32.mrb[20].mxu0 }
 0xa1c   :  { %v1201_v17 = vadd.f32 %v3114_v15, %v1200_v12  ;;  %v2006_v11 = vpop.f32.mrb[21].mxu0 }
 0xa1d   :  { %v1203_v54 = vpop.f32.mrb[22].mxu0 }
 0xa1e   :  { %v1207_v18 = vmax.f32 %v1201_v17, 0.0  ;;  %v1204_v0 = vadd.f32 %v3114_v15, %v1203_v54  ;;  %v2007_v19 = vpop.f32.mrb[23].mxu0 }
 0xa20   :  { %v1208_v13 = vmax.f32 %v1204_v0, 0.0  ;;  %v1209_v21 = vadd.f32 %v1207_v18, %v1119_v56  ;;  %v3119_v56 = vld [vmem:[#allocation21_spill] sm:$0xff] }
 0xa22   :  { %v1210_v14 = vadd.f32 %v1208_v13, %v1120_v57  ;;  %v3120_v57 = vld [vmem:[#allocation22_spill] sm:$0xff] }
 0xa24   :  { %v1211_v16 = vpack.c.bf16 %v1210_v14, %v1209_v21 }
 0xa26   :  { %2025 = vmatmul.mubr.bf16.vlgmr.msra.gmra.mrb[20].mxu1 %v1211_v16 }
 0xa27   :  { %2049 = vmatpush3.bf16.msra.mxu1 %v3115_v42  ;;  %2064 = vmatprep.mubr.msk.bf16.mxu1 %vm2404_vm0, %v3112_v9 }
 0xa28   :  { %2050 = vmatprep.subr.bf16.mxu1 %v3112_v9 }
 0xa2b   :  { %2051 = vmatpush3.bf16.msra.mxu1 %v3116_v23 }
 0xa2c   :  { %2052 = vmatprep.subr.bf16.mxu1 %v3112_v9 }
 0xa2f   :  { %2053 = vmatpush3.bf16.msra.mxu1 %v3117_v24 }
 0xa30   :  { %2054 = vmatprep.subr.bf16.mxu1 %v3112_v9 }
 0xa33   :  { %2055 = vmatpush3.bf16.msra.mxu1 %v3118_v25 }
 0xa34   :  { %2056 = vmatprep.subr.bf16.mxu1 %v3112_v9 }
 0xa37   :  { %2057 = vmatpush3.bf16.msra.mxu1 %v3119_v56 }
 0xa38   :  { %2058 = vmatprep.subr.bf16.mxu1 %v3112_v9 }
 0xa3b   :  { %2059 = vmatpush3.bf16.msra.mxu1 %v3120_v57 }
 0xa3c   :  { %2060 = vmatprep.subr.bf16.mxu1 %v3112_v9 }
 0xa3f   :  { %2061 = vmatpush3.bf16.msra.mxu1 %v3121_v20 }
 0xa40   :  { %2062 = vmatprep.subr.bf16.mxu1 %v3112_v9 }
 0xa43   :  { %2063 = vmatpush3.bf16.msra.mxu1 %v3122_v58 }
 0xa44   :  { %2088 = vmatprep.subr.bf16.mxu1 %v3112_v9 }
 0xaf9   :  { %v1246_v10 = vpop.f32.mrb[20].mxu1 }
 0xafa   :  { %v1247_v12 = vadd.f32 %v2843_v53, %v1246_v10  ;;  %v2026_v17 = vpop.f32.mrb[21].mxu1 }
 0xafb   :  { %v1249_v11 = vpop.f32.mrb[22].mxu1 }
 0xafc   :  { %v1253_v54 = vadd.f32 %v1247_v12, %v2851_v51  ;;  %v1250_v18 = vadd.f32 %v2843_v53, %v1249_v11  ;;  %v2027_v0 = vpop.f32.mrb[23].mxu1 }
 0xafe   :  { %v1255_v19 = vmul.f32 %v1253_v54, %v2841_v52  ;;  %v1254_v13 = vadd.f32 %v1250_v18, %v2853_v55 }
 0xb00   :  { %v1257_v21 = vrot.slane %v1255_v19, 4  ;;  %v1256_v14 = vmul.f32 %v1254_v13, %v2848_v26 }
 0xb02   :  { %v1258_v16 = vadd.f32 %v1257_v21, %v1255_v19  ;;  %v1263_v42 = vrot.slane %v1256_v14, 4 }
 0xb04   :  { %v1259_v23 = vrot.slane %v1258_v16, 2  ;;  %v1264_v24 = vadd.f32 %v1263_v42, %v1256_v14 }
 0xb06   :  { %v1260_v25 = vadd.f32 %v1259_v23, %v1258_v16  ;;  %v1265_v56 = vrot.slane %v1264_v24, 2 }
 0xb08   :  { %v1261_v57 = vrot.slane %v1260_v25, 1  ;;  %v1266_v20 = vadd.f32 %v1265_v56, %v1264_v24 }
 0xb0a   :  { %v1267_v58 = vrot.slane %v1266_v20, 1  ;;  %v2981_v51 = vadd.f32 %v1261_v57, %v1260_v25 }
 0xb0c   :  { %v2983_v10 = vadd.f32 %v1267_v58, %v1266_v20 }
 0xb0e   :  { %v1269_v12 = vpack.c.bf16 %v2983_v10, %v2981_v51 }
 0xb10   :  { %2045 = vmatmul.mubr.bf16.vlgmr.msra.gmra.mrb[24].mxu0 %v1269_v12 }
 0xb11   :  { %2069 = vmatpush3.bf16.msra.mxu0 %v2617_v27  ;;  %2084 = vmatprep.mubr.msk.bf16.mxu0 %vm2404_vm0, %v3112_v9 }
 0xb12   :  { %2070 = vmatprep.subr.bf16.mxu0 %v3112_v9 }
 0xb15   :  { %2071 = vmatpush3.bf16.msra.mxu0 %v2620_v28 }
 0xb16   :  { %2072 = vmatprep.subr.bf16.mxu0 %v3112_v9 }
 0xb19   :  { %2073 = vmatpush3.bf16.msra.mxu0 %v2624_v29 }
 0xb1a   :  { %2074 = vmatprep.subr.bf16.mxu0 %v3112_v9 }
 0xb1d   :  { %2075 = vmatpush3.bf16.msra.mxu0 %v2628_v30 }
 0xb1e   :  { %2076 = vmatprep.subr.bf16.mxu0 %v3112_v9 }
 0xb21   :  { %2077 = vmatpush3.bf16.msra.mxu0 %v2632_v31 }
 0xb22   :  { %2078 = vmatprep.subr.bf16.mxu0 %v3112_v9 }
 0xb25   :  { %2079 = vmatpush3.bf16.msra.mxu0 %v2636_v32 }
 0xb26   :  { %2080 = vmatprep.subr.bf16.mxu0 %v3112_v9 }
 0xb29   :  { %2081 = vmatpush3.bf16.msra.mxu0 %v2649_v43 }
 0xb2a   :  { %2082 = vmatprep.subr.bf16.mxu0 %v3112_v9 }
 0xb2d   :  { %2083 = vmatpush3.bf16.msra.mxu0 %v2653_v44 }
 0xb2e   :  { %2108 = vmatprep.subr.bf16.mxu0 %v3112_v9 }
 0xbe3   :  { %v1304_v27 = vpop.f32.mrb[24].mxu0 }
 0xbe4   :  { %v2046_v28 = vpop.f32.mrb[25].mxu0  ;;  %v1311_v30 = vadd.f32 %v1304_v27, %v2641_v40 }
 0xbe5   :  { %v1307_v29 = vpop.f32.mrb[26].mxu0 }
 0xbe6   :  { %v1312_v31 = vadd.f32 %v1307_v29, %v2643_v41  ;;  %v2047_v55 = vpop.f32.mrb[27].mxu0 }
 0xbe8   :  { %v1313_v17 = vpack.c.bf16 %v1312_v31, %v1311_v30 }
 0xbea   :  { %2065 = vmatmul.mubr.bf16.vlgmr.msra.gmra.mrb[24].mxu1 %v1313_v17 }
 0xbeb   :  { %2089 = vmatpush3.bf16.msra.mxu1 %v2657_v45  ;;  %2104 = vmatprep.mubr.msk.bf16.mxu1 %vm2404_vm0, %v3112_v9 }
 0xbec   :  { %2090 = vmatprep.subr.bf16.mxu1 %v3112_v9 }
 0xbef   :  { %2091 = vmatpush3.bf16.msra.mxu1 %v2660_v46 }
 0xbf0   :  { %2092 = vmatprep.subr.bf16.mxu1 %v3112_v9 }
 0xbf3   :  { %2093 = vmatpush3.bf16.msra.mxu1 %v2664_v47 }
 0xbf4   :  { %2094 = vmatprep.subr.bf16.mxu1 %v3112_v9 }
 0xbf7   :  { %2095 = vmatpush3.bf16.msra.mxu1 %v2668_v48 }
 0xbf8   :  { %2096 = vmatprep.subr.bf16.mxu1 %v3112_v9 }
 0xbfb   :  { %2097 = vmatpush3.bf16.msra.mxu1 %v2672_v49 }
 0xbfc   :  { %2098 = vmatprep.subr.bf16.mxu1 %v3112_v9 }
 0xbff   :  { %2099 = vmatpush3.bf16.msra.mxu1 %v2683_v60 }
 0xc00   :  { %2100 = vmatprep.subr.bf16.mxu1 %v3112_v9 }
 0xc03   :  { %2101 = vmatpush3.bf16.msra.mxu1 %v2687_v61 }
 0xc04   :  { %2102 = vmatprep.subr.bf16.mxu1 %v3112_v9 }
 0xc07   :  { %2103 = vmatpush3.bf16.msra.mxu1 %v2691_v62 }
 0xc08   :  { %2128 = vmatprep.subr.bf16.mxu1 %v3112_v9 }
 0xcbd   :  { %v1348_v32 = vpop.f32.mrb[24].mxu1 }
 0xcbe   :  { %v1349_v40 = vadd.f32 %v2677_v50, %v1348_v32  ;;  %v2066_v41 = vpop.f32.mrb[25].mxu1 }
 0xcbf   :  { %v1351_v43 = vpop.f32.mrb[26].mxu1 }
 0xcc0   :  { %v1352_v44 = vadd.f32 %v2677_v50, %v1351_v43  ;;  %v2067_v45 = vpop.f32.mrb[27].mxu1  ;;  %v1355_v46 = vmax.f32 %v1349_v40, 0.0 }
 0xcc2   :  { %v1356_v47 = vmax.f32 %v1352_v44, 0.0 }
 0xcc4   :  { %v1357_v48 = vpack.c.bf16 %v1356_v47, %v1355_v46 }
 0xcc6   :  { %2085 = vmatmul.mubr.bf16.vlgmr.msra.gmra.mrb[28].mxu0 %v1357_v48 }
 0xcc7   :  { %2109 = vmatpush3.bf16.msra.mxu0 %v2695_v63  ;;  %2124 = vmatprep.mubr.msk.bf16.mxu0 %vm2404_vm0, %v3112_v9 }
 0xcc8   :  { %2110 = vmatprep.subr.bf16.mxu0 %v3112_v9 }
 0xccb   :  { %2111 = vmatpush3.bf16.msra.mxu0 %v2698_v1 }
 0xccc   :  { %2112 = vmatprep.subr.bf16.mxu0 %v3112_v9 }
 0xccf   :  { %2113 = vmatpush3.bf16.msra.mxu0 %v2702_v2 }
 0xcd0   :  { %2114 = vmatprep.subr.bf16.mxu0 %v3112_v9 }
 0xcd3   :  { %2115 = vmatpush3.bf16.msra.mxu0 %v2706_v3 }
 0xcd4   :  { %2116 = vmatprep.subr.bf16.mxu0 %v3112_v9 }
 0xcd7   :  { %2117 = vmatpush3.bf16.msra.mxu0 %v2710_v4 }
 0xcd8   :  { %2118 = vmatprep.subr.bf16.mxu0 %v3112_v9 }
 0xcdb   :  { %2119 = vmatpush3.bf16.msra.mxu0 %v2714_v5 }
 0xcdc   :  { %2120 = vmatprep.subr.bf16.mxu0 %v3112_v9 }
 0xcdf   :  { %2121 = vmatpush3.bf16.msra.mxu0 %v2733_v22 }
 0xce0   :  { %2122 = vmatprep.subr.bf16.mxu0 %v3112_v9 }
 0xce3   :  { %2123 = vmatpush3.bf16.msra.mxu0 %v2737_v33 }
 0xd99   :  { %v1392_v49 = vpop.f32.mrb[28].mxu0 }
 0xd9a   :  { %v1393_v50 = vadd.f32 %v2719_v6, %v1392_v49  ;;  %v2086_v60 = vpop.f32.mrb[29].mxu0 }
 0xd9b   :  { %v1395_v61 = vpop.f32.mrb[30].mxu0 }
 0xd9c   :  { %v1399_v62 = vmax.f32 %v1393_v50, 0.0  ;;  %v1396_v63 = vadd.f32 %v2719_v6, %v1395_v61  ;;  %v2087_v1 = vpop.f32.mrb[31].mxu0 }
 0xd9e   :  { %v1400_v2 = vmax.f32 %v1396_v63, 0.0  ;;  %v1401_v3 = vadd.f32 %v1399_v62, %v1311_v30 }
 0xda0   :  { %v1402_v4 = vadd.f32 %v1400_v2, %v1312_v31 }
 0xda2   :  { %v1403_v5 = vpack.c.bf16 %v1402_v4, %v1401_v3 }
 0xda4   :  { %2105 = vmatmul.mubr.bf16.vlgmr.msra.gmra.mrb[28].mxu1 %v1403_v5 }
 0xda5   :  { %2129 = vmatpush3.bf16.msra.mxu1 %v2741_v34  ;;  %2144 = vmatprep.mubr.msk.bf16.mxu1 %vm2404_vm0, %v3112_v9 }
 0xda6   :  { %2130 = vmatprep.subr.bf16.mxu1 %v3112_v9 }
 0xda9   :  { %2131 = vmatpush3.bf16.msra.mxu1 %v2744_v35 }
 0xdaa   :  { %2132 = vmatprep.subr.bf16.mxu1 %v3112_v9 }
 0xdad   :  { %2133 = vmatpush3.bf16.msra.mxu1 %v2748_v36 }
 0xdae   :  { %2134 = vmatprep.subr.bf16.mxu1 %v3112_v9 }
 0xdb1   :  { %2135 = vmatpush3.bf16.msra.mxu1 %v2752_v37 }
 0xdb2   :  { %2136 = vmatprep.subr.bf16.mxu1 %v3112_v9 }
 0xdb5   :  { %2137 = vmatpush3.bf16.msra.mxu1 %v2756_v38 }
 0xdb6   :  { %2138 = vmatprep.subr.bf16.mxu1 %v3112_v9 }
 0xdb9   :  { %2139 = vmatpush3.bf16.msra.mxu1 %v2767_v59 }
 0xdba   :  { %2140 = vmatprep.subr.bf16.mxu1 %v3112_v9 }
 0xdbd   :  { %2141 = vmatpush3.bf16.msra.mxu1 %v2771_v7 }
 0xdbe   :  { %2142 = vmatprep.subr.bf16.mxu1 %v3112_v9 }
 0xdc1   :  { %2143 = vmatpush3.bf16.msra.mxu1 %v2775_v8 }
 0xe77   :  { %v1438_v6 = vpop.f32.mrb[28].mxu1 }
 0xe78   :  { %v1439_v22 = vadd.f32 %v2761_v39, %v1438_v6  ;;  %v2106_v33 = vpop.f32.mrb[29].mxu1 }
 0xe79   :  { %v1441_v34 = vpop.f32.mrb[30].mxu1 }
 0xe7a   :  { %v1442_v35 = vadd.f32 %v2761_v39, %v1441_v34  ;;  %v2107_v36 = vpop.f32.mrb[31].mxu1  ;;  %v1445_v37 = vmax.f32 %v1439_v22, 0.0 }
 0xe7c   :  { %v1446_v38 = vmax.f32 %v1442_v35, 0.0 }
 0xe7e   :  { %v1447_v11 = vpack.c.bf16 %v1446_v38, %v1445_v37 }
 0xe80   :  { %2125 = vmatmul.mubr.bf16.vlgmr.msra.gmra.mrb[32].mxu0 %v1447_v11 }
 0xf53   :  { %v1482_v59 = vpop.f32.mrb[32].mxu0 }
 0xf54   :  { %v1483_v54 = vadd.f32 %v3114_v15, %v1482_v59  ;;  %v2126_v7 = vpop.f32.mrb[33].mxu0 }
 0xf55   :  { %v1485_v18 = vpop.f32.mrb[34].mxu0 }
 0xf56   :  { %v1489_v9 = vmax.f32 %v1483_v54, 0.0  ;;  %v1486_v8 = vadd.f32 %v3114_v15, %v1485_v18  ;;  %v2127_v0 = vpop.f32.mrb[35].mxu0 }
 0xf58   :  { %v1490_v19 = vmax.f32 %v1486_v8, 0.0  ;;  %v1491_v13 = vadd.f32 %v1489_v9, %v1401_v3 }
 0xf5a   :  { %v1492_v21 = vadd.f32 %v1490_v19, %v1402_v4 }
 0xf5c   :  { %v1493_v14 = vpack.c.bf16 %v1492_v21, %v1491_v13 }
 0xf5e   :  { %2145 = vmatmul.mubr.bf16.vlgmr.msra.gmra.mrb[32].mxu1 %v1493_v14 }
0x1031   :  { %v1528_v39 = vpop.f32.mrb[32].mxu1 }
0x1032   :  { %v1529_v16 = vadd.f32 %v2843_v53, %v1528_v39  ;;  %v2146_v42 = vpop.f32.mrb[33].mxu1 }
0x1033   :  { %v1531_v23 = vpop.f32.mrb[34].mxu1 }
0x1034   :  { %v1535_v24 = vadd.f32 %v1529_v16, %v2981_v51  ;;  %v1532_v25 = vadd.f32 %v2843_v53, %v1531_v23  ;;  %v2147_v56 = vpop.f32.mrb[35].mxu1 }
0x1036   :  { %v1537_v57 = vmul.f32 %v1535_v24, %v2841_v52  ;;  %v1536_v15 = vadd.f32 %v1532_v25, %v2983_v10 }
0x1038   :  { %v1539_v20 = vrot.slane %v1537_v57, 4  ;;  %v1538_v58 = vmul.f32 %v1536_v15, %v2848_v26 }
0x103a   :  { %v1540_v12 = vadd.f32 %v1539_v20, %v1537_v57  ;;  %v1545_v27 = vrot.slane %v1538_v58, 4 }
0x103c   :  { %v1541_v28 = vrot.slane %v1540_v12, 2  ;;  %v1546_v29 = vadd.f32 %v1545_v27, %v1538_v58 }
0x103e   :  { %v1542_v30 = vadd.f32 %v1541_v28, %v1540_v12  ;;  %v1547_v31 = vrot.slane %v1546_v29, 2 }
0x1040   :  { %v1543_v55 = vrot.slane %v1542_v30, 1  ;;  %v1548_v17 = vadd.f32 %v1547_v31, %v1546_v29 }
0x1042   :  { %v1544_v32 = vadd.f32 %v1543_v55, %v1542_v30  ;;  %v1549_v51 = vrot.slane %v1548_v17, 1 }
0x1044   :  { %1551 = vst [vmem:[%s3088_s9] sm:$0xff] %v1544_v32  ;;  %v1550_v52 = vadd.f32 %v1549_v51, %v1548_v17 }
0x1046   :  { %1552 = vst [vmem:[%s3088_s9 + $0x8] sm:$0xff] %v1550_v52 }
0x1047   :  { %1557 = vsyncpa [#allocation3], 1 }
0x1048   :  { %1558 = vsyncpa [#allocation5], 1 }
0x1049   :  { %1559 = vsyncpa [#allocation8], 1 }
0x104a   :  { %1560 = vsyncpa [#allocation11], 1 }

// kernel: _lambda_.3
= control target key start
LH: loop header
LB: loop body
LE: loop exit
PB: predicated region body
PF: predicated region fallthrough
CT: control target
= control target key end

     0   :  { %v7826_v1 = vmov 0.0   ;;  %vm7827_vm0 = vmmov 0   ;;  %s10590_s1 = inlined_call_operand.vmem [shape: bf16[384,128], index: 1, kind: input, shape index: {}]   ;;  %s10591_s0 = inlined_call_operand.vmem [shape: bf16[16,384], index: 0, kind: input, shape index: {}]   ;;  %s10592_s5 = inlined_call_operand.vmem [shape: bf16[10,2,128,128], index: 5, kind: input, shape index: {}]   ;;  %s10593_s2 = inlined_call_operand.vmem [shape: f32[1,128], index: 2, kind: input, shape index: {}]   ;;  %s10594_s6 = inlined_call_operand.vmem [shape: f32[10,2,1,128], index: 6, kind: input, shape index: {}]   ;;  %s10595_s3 = inlined_call_operand.vmem [shape: bf16[128,128], index: 3, kind: input, shape index: {}]   ;;  %s10596_s4 = inlined_call_operand.vmem [shape: f32[1,128], index: 4, kind: input, shape index: {}]   ;;  %s10597_s7 = inlined_call_operand.vmem [shape: bf16[128,256], index: 7, kind: input, shape index: {}]   ;;  %s10598_s8 = inlined_call_operand.vmem [shape: f32[1,256], index: 8, kind: input, shape index: {}]   ;;  %s10599_s9 = inlined_call_operand.vmem [shape: f32[16,256], index: 9, kind: output, shape index: {}]  }
   0x1   :  { %v7236_v0 = vld [vmem:[%s10590_s1 + $0x40] sm:$0xff]   ;;  %5973 = vmatprep.subr.bf16.mxu1 %v7826_v1  ;;  %5989 = vmatprep.mubr.msk.bf16.mxu1 %vm7827_vm0, %v7826_v1  ;;  %v7239_v4 = vld [vmem:[%s10590_s1 + $0x48] sm:$0xff]   ;;  %v7242_v7 = vld [vmem:[%s10590_s1 + $0x50] sm:$0xff]  }
   0x2   :  { %v7237_v2 = vld [vmem:[%s10590_s1] sm:$0xff]   ;;  %5384 = vmatprep.subr.bf16.mxu0 %v7236_v0  ;;  %v7240_v5 = vld [vmem:[%s10590_s1 + $0x8] sm:$0xff]   ;;  %v7243_v8 = vld [vmem:[%s10590_s1 + $0x10] sm:$0xff]  }
   0x3   :  { %v7238_v3 = vld [vmem:[%s10590_s1 + $0x80] sm:$0xff]   ;;  %5385 = vmatpush3.bf16.msra.mxu0 %v7237_v2  ;;  %v7241_v6 = vld [vmem:[%s10590_s1 + $0x88] sm:$0xff]   ;;  %v7244_v9 = vld [vmem:[%s10590_s1 + $0x90] sm:$0xff]  }
   0x4   :  { %5974 = vmatpush3.bf16.msra.mxu1 %v7238_v3  ;;  %5386 = vmatprep.subr.bf16.mxu0 %v7239_v4  ;;  %v7245_v10 = vld [vmem:[%s10590_s1 + $0x58] sm:$0xff]   ;;  %v7248_v13 = vld [vmem:[%s10590_s1 + $0x60] sm:$0xff]   ;;  %v7251_v16 = vld [vmem:[%s10590_s1 + $0x68] sm:$0xff]  }
   0x5   :  { %5975 = vmatprep.subr.bf16.mxu1 %v7826_v1  ;;  %v7246_v11 = vld [vmem:[%s10590_s1 + $0x18] sm:$0xff]   ;;  %v7249_v14 = vld [vmem:[%s10590_s1 + $0x20] sm:$0xff]   ;;  %v7252_v17 = vld [vmem:[%s10590_s1 + $0x28] sm:$0xff]  }
   0x6   :  { %v7247_v12 = vld [vmem:[%s10590_s1 + $0x98] sm:$0xff]   ;;  %v7250_v15 = vld [vmem:[%s10590_s1 + $0xa0] sm:$0xff]   ;;  %v7253_v18 = vld [vmem:[%s10590_s1 + $0xa8] sm:$0xff]  }
   0x7   :  { %5387 = vmatpush3.bf16.msra.mxu0 %v7240_v5  ;;  %v7254_v19 = vld [vmem:[%s10590_s1 + $0x70] sm:$0xff]   ;;  %v7257_v22 = vld [vmem:[%s10590_s1 + $0x78] sm:$0xff]   ;;  %v7259_v26 = vld [vmem:[%s10591_s0] ss:$12 sps:$4 sm:$0xff]  }
   0x8   :  { %5976 = vmatpush3.bf16.msra.mxu1 %v7241_v6  ;;  %5388 = vmatprep.subr.bf16.mxu0 %v7242_v7  ;;  %v7255_v20 = vld [vmem:[%s10590_s1 + $0x30] sm:$0xff]   ;;  %v7258_v24 = vld [vmem:[%s10590_s1 + $0x38] sm:$0xff]   ;;  %v7264_v28 = vld [vmem:[%s10592_s5] sm:$0xff]  }
   0x9   :  { %5977 = vmatprep.subr.bf16.mxu1 %v7826_v1  ;;  %v7256_v21 = vld [vmem:[%s10590_s1 + $0xb0] sm:$0xff]   ;;  %v7262_v25 = vld [vmem:[%s10590_s1 + $0xb8] sm:$0xff]   ;;  %v7265_v29 = vld [vmem:[%s10592_s5 + $0x8] sm:$0xff]  }
   0xa   :  { %v7261_v23 = vld [vmem:[%s10591_s0 + $0x4] ss:$12 sps:$4 sm:$0xff]   ;;  %v7263_v27 = vld [vmem:[%s10591_s0 + $0x8] ss:$12 sps:$4 sm:$0xff]   ;;  %v7267_v31 = vld [vmem:[%s10592_s5 + $0x18] sm:$0xff]  }
   0xb   :  { %5389 = vmatpush3.bf16.msra.mxu0 %v7243_v8  ;;  %284 = vmatprep.mubr.bf16.mxu0 %v7261_v23  ;;  %v7266_v30 = vld [vmem:[%s10592_s5 + $0x10] sm:$0xff]   ;;  %v7268_v32 = vld [vmem:[%s10592_s5 + $0x20] sm:$0xff]   ;;  %v7269_v33 = vld [vmem:[%s10592_s5 + $0x28] sm:$0xff]  }
   0xc   :  { %5978 = vmatpush3.bf16.msra.mxu1 %v7244_v9  ;;  %5390 = vmatprep.subr.bf16.mxu0 %v7245_v10  ;;  %v7270_v34 = vld [vmem:[%s10592_s5 + $0x30] sm:$0xff]   ;;  %v7271_v35 = vld [vmem:[%s10592_s5 + $0x38] sm:$0xff]   ;;  %v7272_v36 = vld [vmem:[%s10592_s5 + $0x40] sm:$0xff]  }
   0xd   :  { %5979 = vmatprep.subr.bf16.mxu1 %v7826_v1  ;;  %v7273_v37 = vld [vmem:[%s10592_s5 + $0x48] sm:$0xff]   ;;  %v7274_v38 = vld [vmem:[%s10592_s5 + $0x50] sm:$0xff]   ;;  %v7275_v39 = vld [vmem:[%s10592_s5 + $0x58] sm:$0xff]  }
   0xe   :  { %v7276_v40 = vld [vmem:[%s10592_s5 + $0x60] sm:$0xff]   ;;  %v7277_v41 = vld [vmem:[%s10592_s5 + $0x68] sm:$0xff]   ;;  %v7278_v58 = vld [vmem:[%s10592_s5 + $0x70] sm:$0xff]  }
   0xf   :  { %5391 = vmatpush3.bf16.msra.mxu0 %v7246_v11  ;;  %v4829_v44 = vld [vmem:[%s10593_s2] ss:$0 sm:$0xff]  ;;  %v7279_v59 = vld [vmem:[%s10592_s5 + $0x78] sm:$0xff]   ;;  %v7281_v61 = vld [vmem:[%s10592_s5 + $0x88] sm:$0xff]  }
  0x10   :  { %5980 = vmatpush3.bf16.msra.mxu1 %v7247_v12  ;;  %5392 = vmatprep.subr.bf16.mxu0 %v7248_v13  ;;  %v7280_v60 = vld [vmem:[%s10592_s5 + $0x80] sm:$0xff]   ;;  %v7282_v62 = vld [vmem:[%s10592_s5 + $0x90] sm:$0xff]   ;;  %v7283_v63 = vld [vmem:[%s10592_s5 + $0x98] sm:$0xff]  }
  0x11   :  { %5981 = vmatprep.subr.bf16.mxu1 %v7826_v1  ;;  %v7284_v0 = vld [vmem:[%s10592_s5 + $0xa0] sm:$0xff]   ;;  %v7285_v12 = vld [vmem:[%s10592_s5 + $0xa8] sm:$0xff]   ;;  %v7286_v13 = vld [vmem:[%s10592_s5 + $0xb0] sm:$0xff]  }
  0x12   :  { %v5180_v2 = vld [vmem:[%s10594_s6] ss:$0 sm:$0xff] }
  0x13   :  { %5393 = vmatpush3.bf16.msra.mxu0 %v7249_v14  ;;  %v7287_v14 = vld [vmem:[%s10592_s5 + $0xb8] sm:$0xff]  }
  0x14   :  { %5982 = vmatpush3.bf16.msra.mxu1 %v7250_v15  ;;  %5394 = vmatprep.subr.bf16.mxu0 %v7251_v16  ;;  %v7288_v15 = vld [vmem:[%s10592_s5 + $0xc0] sm:$0xff]   ;;  %v7289_v16 = vld [vmem:[%s10592_s5 + $0xc8] sm:$0xff]  }
  0x15   :  { %5983 = vmatprep.subr.bf16.mxu1 %v7826_v1 }
  0x17   :  { %5395 = vmatpush3.bf16.msra.mxu0 %v7252_v17  ;;  %v7290_v17 = vld [vmem:[%s10592_s5 + $0xd0] sm:$0xff]  }
  0x18   :  { %5984 = vmatpush3.bf16.msra.mxu1 %v7253_v18  ;;  %5396 = vmatprep.subr.bf16.mxu0 %v7254_v19  ;;  %v7291_v18 = vld [vmem:[%s10592_s5 + $0xd8] sm:$0xff]   ;;  %v7292_v19 = vld [vmem:[%s10592_s5 + $0xe0] sm:$0xff]  }
  0x19   :  { %5985 = vmatprep.subr.bf16.mxu1 %v7826_v1 }
  0x1b   :  { %5397 = vmatpush3.bf16.msra.mxu0 %v7255_v20  ;;  %v7293_v20 = vld [vmem:[%s10592_s5 + $0xe8] sm:$0xff]  }
  0x1c   :  { %5986 = vmatpush3.bf16.msra.mxu1 %v7256_v21  ;;  %5398 = vmatprep.subr.bf16.mxu0 %v7257_v22  ;;  %v5189_v21 = vld [vmem:[%s10594_s6 + $0x1] ss:$0 sm:$0xff] }
  0x1d   :  { %5987 = vmatprep.subr.bf16.mxu1 %v7826_v1 }
  0x1f   :  { %5399 = vmatpush3.bf16.msra.mxu0 %v7258_v24 }
  0x20   :  { %5988 = vmatpush3.bf16.msra.mxu1 %v7262_v25  ;;  %5993 = vmatprep.subr.bf16.mxu0 %v7826_v1 }
  0x21   :  { %6013 = vmatprep.subr.bf16.mxu1 %v7826_v1 }
  0x22   :  { %285 = vmatmul.mubr.bf16.vlgmr.msra.gmra.mrb[0].mxu0 %v7259_v26 }
  0x23   :  { %5990 = vmatmul.mubr.bf16.vlgmr.msra.gmra.mrb[0].mxu1 %v7263_v27  ;;  %5994 = vmatpush3.bf16.msra.mxu0 %v7264_v28 }
  0x24   :  { %5995 = vmatprep.subr.bf16.mxu0 %v7826_v1  ;;  %6009 = vmatprep.mubr.msk.bf16.mxu0 %vm7827_vm0, %v7826_v1 }
  0x25   :  { %6029 = vmatprep.mubr.msk.bf16.mxu1 %vm7827_vm0, %v7826_v1  ;;  %6014 = vmatpush3.bf16.msra.mxu1 %v7272_v36  ;;  %v7297_v36 = vld [vmem:[%s10592_s5 + $0x108] sm:$0xff]  }
  0x26   :  { %6015 = vmatprep.subr.bf16.mxu1 %v7826_v1 }
  0x27   :  { %5996 = vmatpush3.bf16.msra.mxu0 %v7265_v29 }
  0x28   :  { %5997 = vmatprep.subr.bf16.mxu0 %v7826_v1 }
  0x29   :  { %6016 = vmatpush3.bf16.msra.mxu1 %v7273_v37  ;;  %v7298_v37 = vld [vmem:[%s10592_s5 + $0x110] sm:$0xff]  }
  0x2a   :  { %6017 = vmatprep.subr.bf16.mxu1 %v7826_v1 }
  0x2b   :  { %5998 = vmatpush3.bf16.msra.mxu0 %v7266_v30 }
  0x2c   :  { %5999 = vmatprep.subr.bf16.mxu0 %v7826_v1 }
  0x2d   :  { %6018 = vmatpush3.bf16.msra.mxu1 %v7274_v38  ;;  %v7299_v38 = vld [vmem:[%s10592_s5 + $0x118] sm:$0xff]  }
  0x2e   :  { %6019 = vmatprep.subr.bf16.mxu1 %v7826_v1 }
  0x2f   :  { %6000 = vmatpush3.bf16.msra.mxu0 %v7267_v31 }
  0x30   :  { %6001 = vmatprep.subr.bf16.mxu0 %v7826_v1 }
  0x31   :  { %6020 = vmatpush3.bf16.msra.mxu1 %v7275_v39  ;;  %v7300_v39 = vld [vmem:[%s10592_s5 + $0x120] sm:$0xff]  }
  0x32   :  { %6021 = vmatprep.subr.bf16.mxu1 %v7826_v1 }
  0x33   :  { %6002 = vmatpush3.bf16.msra.mxu0 %v7268_v32 }
  0x34   :  { %6003 = vmatprep.subr.bf16.mxu0 %v7826_v1 }
  0x35   :  { %6022 = vmatpush3.bf16.msra.mxu1 %v7276_v40  ;;  %v5198_v40 = vld [vmem:[%s10594_s6 + $0x2] ss:$0 sm:$0xff] }
  0x36   :  { %6023 = vmatprep.subr.bf16.mxu1 %v7826_v1 }
  0x37   :  { %6004 = vmatpush3.bf16.msra.mxu0 %v7269_v33  ;;  %v7294_v33 = vld [vmem:[%s10592_s5 + $0xf0] sm:$0xff]  }
  0x38   :  { %6005 = vmatprep.subr.bf16.mxu0 %v7826_v1 }
  0x39   :  { %6024 = vmatpush3.bf16.msra.mxu1 %v7277_v41 }
  0x3a   :  { %6025 = vmatprep.subr.bf16.mxu1 %v7826_v1 }
  0x3b   :  { %6006 = vmatpush3.bf16.msra.mxu0 %v7270_v34  ;;  %v7295_v34 = vld [vmem:[%s10592_s5 + $0xf8] sm:$0xff]  }
  0x3c   :  { %6007 = vmatprep.subr.bf16.mxu0 %v7826_v1 }
  0x3d   :  { %6026 = vmatpush3.bf16.msra.mxu1 %v7278_v58  ;;  %v7307_v58 = vld [vmem:[%s10592_s5 + $0x158] sm:$0xff]  }
  0x3e   :  { %6027 = vmatprep.subr.bf16.mxu1 %v7826_v1 }
  0x3f   :  { %6008 = vmatpush3.bf16.msra.mxu0 %v7271_v35  ;;  %v7296_v35 = vld [vmem:[%s10592_s5 + $0x100] sm:$0xff]  }
  0x40   :  { %6033 = vmatprep.subr.bf16.mxu0 %v7826_v1 }
  0x41   :  { %6028 = vmatpush3.bf16.msra.mxu1 %v7279_v59  ;;  %v7308_v59 = vld [vmem:[%s10592_s5 + $0x160] sm:$0xff]  }
  0x42   :  { %6053 = vmatprep.subr.bf16.mxu1 %v7826_v1 }
  0xf5   :  { %v5400_v42 = vpop.f32.mrb[0].mxu0 }
  0xf6   :  { %v5401_v43 = vpop.f32.mrb[1].mxu0  ;;  %v327_v45 = vpop.f32.mrb[0].mxu1 }
  0xf7   :  { %v5402_v46 = vadd.f32 %v5401_v43, %v5400_v42  ;;  %v5403_v47 = vpop.f32.mrb[2].mxu0  ;;  %v5991_v48 = vpop.f32.mrb[1].mxu1 }
  0xf8   :  { %v5404_v49 = vpop.f32.mrb[3].mxu0  ;;  %v330_v50 = vpop.f32.mrb[2].mxu1 }
  0xf9   :  { %v287_v51 = vadd.f32 %v5402_v46, %v4829_v44  ;;  %v5405_v52 = vadd.f32 %v5404_v49, %v5403_v47  ;;  %v5992_v53 = vpop.f32.mrb[3].mxu1 }
  0xfa   :  { %v7304_v53 = vld [vmem:[%s10592_s5 + $0x140] sm:$0xff]  }
  0xfb   :  { %v8035_v54 = vadd.f32 %v327_v45, %v287_v51  ;;  %v290_v55 = vadd.f32 %v5405_v52, %v4829_v44  ;;  %v7302_v51 = vld [vmem:[%s10592_s5 + $0x130] sm:$0xff]   ;;  %v7303_v52 = vld [vmem:[%s10592_s5 + $0x138] sm:$0xff]  }
  0xfd   :  { %v8037_v56 = vadd.f32 %v330_v50, %v290_v55  ;;  %v7301_v50 = vld [vmem:[%s10592_s5 + $0x128] sm:$0xff]  }
  0xfe   :  { %v7305_v55 = vld [vmem:[%s10592_s5 + $0x148] sm:$0xff]  }
  0xff   :  { %v729_v57 = vpack.c.bf16 %v8037_v56, %v8035_v54 }
 0x101   :  { %6010 = vmatmul.mubr.bf16.vlgmr.msra.gmra.mrb[4].mxu0 %v729_v57  ;;  %v7306_v57 = vld [vmem:[%s10592_s5 + $0x150] sm:$0xff]  }
 0x102   :  { %6049 = vmatprep.mubr.msk.bf16.mxu0 %vm7827_vm0, %v7826_v1  ;;  %6034 = vmatpush3.bf16.msra.mxu0 %v7280_v60  ;;  %v7309_v60 = vld [vmem:[%s10592_s5 + $0x168] sm:$0xff]  }
 0x103   :  { %6035 = vmatprep.subr.bf16.mxu0 %v7826_v1 }
 0x106   :  { %6036 = vmatpush3.bf16.msra.mxu0 %v7281_v61  ;;  %v5207_v61 = vld [vmem:[%s10594_s6 + $0x3] ss:$0 sm:$0xff] }
 0x107   :  { %6037 = vmatprep.subr.bf16.mxu0 %v7826_v1 }
 0x10a   :  { %6038 = vmatpush3.bf16.msra.mxu0 %v7282_v62 }
 0x10b   :  { %6039 = vmatprep.subr.bf16.mxu0 %v7826_v1 }
 0x10e   :  { %6040 = vmatpush3.bf16.msra.mxu0 %v7283_v63 }
 0x10f   :  { %6041 = vmatprep.subr.bf16.mxu0 %v7826_v1 }
 0x112   :  { %6042 = vmatpush3.bf16.msra.mxu0 %v7284_v0 }
 0x113   :  { %6043 = vmatprep.subr.bf16.mxu0 %v7826_v1 }
 0x116   :  { %6044 = vmatpush3.bf16.msra.mxu0 %v7285_v12  ;;  %v7312_v12 = vld [vmem:[%s10592_s5 + $0x180] sm:$0xff]  }
 0x117   :  { %6045 = vmatprep.subr.bf16.mxu0 %v7826_v1 }
 0x11a   :  { %6046 = vmatpush3.bf16.msra.mxu0 %v7286_v13  ;;  %v7313_v13 = vld [vmem:[%s10592_s5 + $0x188] sm:$0xff]  }
 0x11b   :  { %6047 = vmatprep.subr.bf16.mxu0 %v7826_v1 }
 0x11e   :  { %6048 = vmatpush3.bf16.msra.mxu0 %v7287_v14  ;;  %v7314_v14 = vld [vmem:[%s10592_s5 + $0x190] sm:$0xff]  }
 0x11f   :  { %6073 = vmatprep.subr.bf16.mxu0 %v7826_v1 }
 0x1d4   :  { %v818_v3 = vpop.f32.mrb[4].mxu0 }
 0x1d5   :  { %v819_v4 = vadd.f32 %v5180_v2, %v818_v3  ;;  %v6011_v5 = vpop.f32.mrb[5].mxu0 }
 0x1d6   :  { %v821_v6 = vpop.f32.mrb[6].mxu0 }
 0x1d7   :  { %v822_v7 = vadd.f32 %v5180_v2, %v821_v6  ;;  %v6012_v8 = vpop.f32.mrb[7].mxu0  ;;  %v825_v9 = vmax.f32 %v819_v4, 0.0 }
 0x1d9   :  { %v826_v10 = vmax.f32 %v822_v7, 0.0 }
 0x1db   :  { %v827_v11 = vpack.c.bf16 %v826_v10, %v825_v9  ;;  %v7310_v10 = vld [vmem:[%s10592_s5 + $0x170] sm:$0xff]  }
 0x1dd   :  { %6030 = vmatmul.mubr.bf16.vlgmr.msra.gmra.mrb[4].mxu1 %v827_v11  ;;  %v7311_v11 = vld [vmem:[%s10592_s5 + $0x178] sm:$0xff]  }
 0x1de   :  { %6069 = vmatprep.mubr.msk.bf16.mxu1 %vm7827_vm0, %v7826_v1  ;;  %6054 = vmatpush3.bf16.msra.mxu1 %v7288_v15  ;;  %v7315_v15 = vld [vmem:[%s10592_s5 + $0x198] sm:$0xff]  }
 0x1df   :  { %6055 = vmatprep.subr.bf16.mxu1 %v7826_v1 }
 0x1e2   :  { %6056 = vmatpush3.bf16.msra.mxu1 %v7289_v16  ;;  %v7316_v16 = vld [vmem:[%s10592_s5 + $0x1a0] sm:$0xff]  }
 0x1e3   :  { %6057 = vmatprep.subr.bf16.mxu1 %v7826_v1 }
 0x1e6   :  { %6058 = vmatpush3.bf16.msra.mxu1 %v7290_v17  ;;  %v5216_v17 = vld [vmem:[%s10594_s6 + $0x4] ss:$0 sm:$0xff] }
 0x1e7   :  { %6059 = vmatprep.subr.bf16.mxu1 %v7826_v1 }
 0x1ea   :  { %6060 = vmatpush3.bf16.msra.mxu1 %v7291_v18 }
 0x1eb   :  { %6061 = vmatprep.subr.bf16.mxu1 %v7826_v1 }
 0x1ee   :  { %6062 = vmatpush3.bf16.msra.mxu1 %v7292_v19 }
 0x1ef   :  { %6063 = vmatprep.subr.bf16.mxu1 %v7826_v1 }
 0x1f2   :  { %6064 = vmatpush3.bf16.msra.mxu1 %v7293_v20 }
 0x1f3   :  { %6065 = vmatprep.subr.bf16.mxu1 %v7826_v1 }
 0x1f6   :  { %6066 = vmatpush3.bf16.msra.mxu1 %v7294_v33  ;;  %v7323_v33 = vld [vmem:[%s10592_s5 + $0x1d8] sm:$0xff]  }
 0x1f7   :  { %6067 = vmatprep.subr.bf16.mxu1 %v7826_v1 }
 0x1fa   :  { %6068 = vmatpush3.bf16.msra.mxu1 %v7295_v34  ;;  %v7324_v34 = vld [vmem:[%s10592_s5 + $0x1e0] sm:$0xff]  }
 0x1fb   :  { %6093 = vmatprep.subr.bf16.mxu1 %v7826_v1 }
 0x2b0   :  { %v916_v22 = vpop.f32.mrb[4].mxu1 }
 0x2b1   :  { %v917_v23 = vadd.f32 %v5189_v21, %v916_v22  ;;  %v6031_v24 = vpop.f32.mrb[5].mxu1 }
 0x2b2   :  { %v919_v25 = vpop.f32.mrb[6].mxu1 }
 0x2b3   :  { %v923_v26 = vmax.f32 %v917_v23, 0.0  ;;  %v920_v27 = vadd.f32 %v5189_v21, %v919_v25  ;;  %v6032_v28 = vpop.f32.mrb[7].mxu1 }
 0x2b4   :  { %v7318_v28 = vld [vmem:[%s10592_s5 + $0x1b0] sm:$0xff]  }
 0x2b5   :  { %v924_v29 = vmax.f32 %v920_v27, 0.0  ;;  %v8116_v30 = vadd.f32 %v923_v26, %v8035_v54  ;;  %v7317_v27 = vld [vmem:[%s10592_s5 + $0x1a8] sm:$0xff]  }
 0x2b7   :  { %v8119_v31 = vadd.f32 %v924_v29, %v8037_v56  ;;  %v7319_v29 = vld [vmem:[%s10592_s5 + $0x1b8] sm:$0xff]  }
 0x2b9   :  { %v927_v32 = vpack.c.bf16 %v8119_v31, %v8116_v30 }
 0x2bb   :  { %6050 = vmatmul.mubr.bf16.vlgmr.msra.gmra.mrb[8].mxu0 %v927_v32  ;;  %v7322_v32 = vld [vmem:[%s10592_s5 + $0x1d0] sm:$0xff]  }
 0x2bc   :  { %6089 = vmatprep.mubr.msk.bf16.mxu0 %vm7827_vm0, %v7826_v1  ;;  %6074 = vmatpush3.bf16.msra.mxu0 %v7296_v35  ;;  %v7325_v35 = vld [vmem:[%s10592_s5 + $0x1e8] sm:$0xff]  }
 0x2bd   :  { %6075 = vmatprep.subr.bf16.mxu0 %v7826_v1 }
 0x2c0   :  { %6076 = vmatpush3.bf16.msra.mxu0 %v7297_v36  ;;  %v5225_v36 = vld [vmem:[%s10594_s6 + $0x5] ss:$0 sm:$0xff] }
 0x2c1   :  { %6077 = vmatprep.subr.bf16.mxu0 %v7826_v1 }
 0x2c4   :  { %6078 = vmatpush3.bf16.msra.mxu0 %v7298_v37 }
 0x2c5   :  { %6079 = vmatprep.subr.bf16.mxu0 %v7826_v1 }
 0x2c8   :  { %6080 = vmatpush3.bf16.msra.mxu0 %v7299_v38 }
 0x2c9   :  { %6081 = vmatprep.subr.bf16.mxu0 %v7826_v1 }
 0x2cc   :  { %6082 = vmatpush3.bf16.msra.mxu0 %v7300_v39 }
 0x2cd   :  { %6083 = vmatprep.subr.bf16.mxu0 %v7826_v1 }
 0x2d0   :  { %6084 = vmatpush3.bf16.msra.mxu0 %v7301_v50  ;;  %v7328_v50 = vld [vmem:[%s10592_s5 + $0x200] sm:$0xff]  }
 0x2d1   :  { %6085 = vmatprep.subr.bf16.mxu0 %v7826_v1 }
 0x2d4   :  { %6086 = vmatpush3.bf16.msra.mxu0 %v7302_v51  ;;  %v7329_v51 = vld [vmem:[%s10592_s5 + $0x208] sm:$0xff]  }
 0x2d5   :  { %6087 = vmatprep.subr.bf16.mxu0 %v7826_v1 }
 0x2d8   :  { %6088 = vmatpush3.bf16.msra.mxu0 %v7303_v52  ;;  %v7330_v52 = vld [vmem:[%s10592_s5 + $0x210] sm:$0xff]  }
 0x2d9   :  { %6113 = vmatprep.subr.bf16.mxu0 %v7826_v1 }
 0x38e   :  { %v1016_v41 = vpop.f32.mrb[8].mxu0 }
 0x38f   :  { %v1017_v42 = vadd.f32 %v5198_v40, %v1016_v41  ;;  %v6051_v43 = vpop.f32.mrb[9].mxu0 }
 0x390   :  { %v1019_v44 = vpop.f32.mrb[10].mxu0 }
 0x391   :  { %v1020_v45 = vadd.f32 %v5198_v40, %v1019_v44  ;;  %v6052_v46 = vpop.f32.mrb[11].mxu0  ;;  %v1023_v47 = vmax.f32 %v1017_v42, 0.0 }
 0x393   :  { %v1024_v48 = vmax.f32 %v1020_v45, 0.0 }
 0x395   :  { %v1025_v49 = vpack.c.bf16 %v1024_v48, %v1023_v47  ;;  %v7326_v48 = vld [vmem:[%s10592_s5 + $0x1f0] sm:$0xff]  }
 0x397   :  { %6070 = vmatmul.mubr.bf16.vlgmr.msra.gmra.mrb[8].mxu1 %v1025_v49  ;;  %v7327_v49 = vld [vmem:[%s10592_s5 + $0x1f8] sm:$0xff]  }
 0x398   :  { %6109 = vmatprep.mubr.msk.bf16.mxu1 %vm7827_vm0, %v7826_v1  ;;  %6094 = vmatpush3.bf16.msra.mxu1 %v7304_v53  ;;  %v7331_v53 = vld [vmem:[%s10592_s5 + $0x218] sm:$0xff]  }
 0x399   :  { %6095 = vmatprep.subr.bf16.mxu1 %v7826_v1 }
 0x39c   :  { %6096 = vmatpush3.bf16.msra.mxu1 %v7305_v55  ;;  %v7332_v55 = vld [vmem:[%s10592_s5 + $0x220] sm:$0xff]  }
 0x39d   :  { %6097 = vmatprep.subr.bf16.mxu1 %v7826_v1 }
 0x3a0   :  { %6098 = vmatpush3.bf16.msra.mxu1 %v7306_v57  ;;  %v5234_v57 = vld [vmem:[%s10594_s6 + $0x6] ss:$0 sm:$0xff] }
 0x3a1   :  { %6099 = vmatprep.subr.bf16.mxu1 %v7826_v1 }
 0x3a4   :  { %6100 = vmatpush3.bf16.msra.mxu1 %v7307_v58 }
 0x3a5   :  { %6101 = vmatprep.subr.bf16.mxu1 %v7826_v1 }
 0x3a8   :  { %6102 = vmatpush3.bf16.msra.mxu1 %v7308_v59 }
 0x3a9   :  { %6103 = vmatprep.subr.bf16.mxu1 %v7826_v1 }
 0x3ac   :  { %6104 = vmatpush3.bf16.msra.mxu1 %v7309_v60 }
 0x3ad   :  { %6105 = vmatprep.subr.bf16.mxu1 %v7826_v1 }
 0x3b0   :  { %6106 = vmatpush3.bf16.msra.mxu1 %v7310_v10  ;;  %v7339_v10 = vld [vmem:[%s10592_s5 + $0x258] sm:$0xff]  }
 0x3b1   :  { %6107 = vmatprep.subr.bf16.mxu1 %v7826_v1 }
 0x3b4   :  { %6108 = vmatpush3.bf16.msra.mxu1 %v7311_v11  ;;  %v7340_v11 = vld [vmem:[%s10592_s5 + $0x260] sm:$0xff]  }
 0x3b5   :  { %6133 = vmatprep.subr.bf16.mxu1 %v7826_v1 }
 0x46a   :  { %v1114_v62 = vpop.f32.mrb[8].mxu1 }
 0x46b   :  { %v1115_v63 = vadd.f32 %v5207_v61, %v1114_v62  ;;  %v6071_v0 = vpop.f32.mrb[9].mxu1 }
 0x46c   :  { %v1117_v2 = vpop.f32.mrb[10].mxu1 }
 0x46d   :  { %v1121_v3 = vmax.f32 %v1115_v63, 0.0  ;;  %v1118_v4 = vadd.f32 %v5207_v61, %v1117_v2  ;;  %v6072_v5 = vpop.f32.mrb[11].mxu1 }
 0x46e   :  { %v7334_v5 = vld [vmem:[%s10592_s5 + $0x230] sm:$0xff]  }
 0x46f   :  { %v1122_v6 = vmax.f32 %v1118_v4, 0.0  ;;  %v8198_v7 = vadd.f32 %v1121_v3, %v8116_v30  ;;  %v7320_v30 = vld [vmem:[%s10592_s5 + $0x1c0] sm:$0xff]   ;;  %v7333_v4 = vld [vmem:[%s10592_s5 + $0x228] sm:$0xff]  }
 0x471   :  { %v8201_v8 = vadd.f32 %v1122_v6, %v8119_v31  ;;  %v7321_v31 = vld [vmem:[%s10592_s5 + $0x1c8] sm:$0xff]   ;;  %v7335_v6 = vld [vmem:[%s10592_s5 + $0x238] sm:$0xff]  }
 0x473   :  { %v1125_v9 = vpack.c.bf16 %v8201_v8, %v8198_v7 }
 0x475   :  { %6090 = vmatmul.mubr.bf16.vlgmr.msra.gmra.mrb[12].mxu0 %v1125_v9  ;;  %v7338_v9 = vld [vmem:[%s10592_s5 + $0x250] sm:$0xff]  }
 0x476   :  { %6129 = vmatprep.mubr.msk.bf16.mxu0 %vm7827_vm0, %v7826_v1  ;;  %6114 = vmatpush3.bf16.msra.mxu0 %v7312_v12  ;;  %v7341_v12 = vld [vmem:[%s10592_s5 + $0x268] sm:$0xff]  }
 0x477   :  { %6115 = vmatprep.subr.bf16.mxu0 %v7826_v1 }
 0x47a   :  { %6116 = vmatpush3.bf16.msra.mxu0 %v7313_v13  ;;  %v5243_v13 = vld [vmem:[%s10594_s6 + $0x7] ss:$0 sm:$0xff] }
 0x47b   :  { %6117 = vmatprep.subr.bf16.mxu0 %v7826_v1 }
 0x47e   :  { %6118 = vmatpush3.bf16.msra.mxu0 %v7314_v14 }
 0x47f   :  { %6119 = vmatprep.subr.bf16.mxu0 %v7826_v1 }
 0x482   :  { %6120 = vmatpush3.bf16.msra.mxu0 %v7315_v15 }
 0x483   :  { %6121 = vmatprep.subr.bf16.mxu0 %v7826_v1 }
 0x486   :  { %6122 = vmatpush3.bf16.msra.mxu0 %v7316_v16 }
 0x487   :  { %6123 = vmatprep.subr.bf16.mxu0 %v7826_v1 }
 0x48a   :  { %6124 = vmatpush3.bf16.msra.mxu0 %v7317_v27  ;;  %v7344_v27 = vld [vmem:[%s10592_s5 + $0x280] sm:$0xff]  }
 0x48b   :  { %6125 = vmatprep.subr.bf16.mxu0 %v7826_v1 }
 0x48e   :  { %6126 = vmatpush3.bf16.msra.mxu0 %v7318_v28  ;;  %v7345_v28 = vld [vmem:[%s10592_s5 + $0x288] sm:$0xff]  }
 0x48f   :  { %6127 = vmatprep.subr.bf16.mxu0 %v7826_v1 }
 0x492   :  { %6128 = vmatpush3.bf16.msra.mxu0 %v7319_v29  ;;  %v7346_v29 = vld [vmem:[%s10592_s5 + $0x290] sm:$0xff]  }
 0x493   :  { %6153 = vmatprep.subr.bf16.mxu0 %v7826_v1 }
 0x548   :  { %v1214_v18 = vpop.f32.mrb[12].mxu0 }
 0x549   :  { %v1215_v19 = vadd.f32 %v5216_v17, %v1214_v18  ;;  %v6091_v20 = vpop.f32.mrb[13].mxu0 }
 0x54a   :  { %v1217_v21 = vpop.f32.mrb[14].mxu0 }
 0x54b   :  { %v1218_v22 = vadd.f32 %v5216_v17, %v1217_v21  ;;  %v6092_v23 = vpop.f32.mrb[15].mxu0  ;;  %v1221_v24 = vmax.f32 %v1215_v19, 0.0 }
 0x54d   :  { %v1222_v25 = vmax.f32 %v1218_v22, 0.0 }
 0x54f   :  { %v1223_v26 = vpack.c.bf16 %v1222_v25, %v1221_v24  ;;  %v7342_v25 = vld [vmem:[%s10592_s5 + $0x270] sm:$0xff]  }
 0x551   :  { %6110 = vmatmul.mubr.bf16.vlgmr.msra.gmra.mrb[12].mxu1 %v1223_v26  ;;  %v7343_v26 = vld [vmem:[%s10592_s5 + $0x278] sm:$0xff]  }
 0x552   :  { %6149 = vmatprep.mubr.msk.bf16.mxu1 %vm7827_vm0, %v7826_v1  ;;  %6134 = vmatpush3.bf16.msra.mxu1 %v7320_v30  ;;  %v7347_v30 = vld [vmem:[%s10592_s5 + $0x298] sm:$0xff]  }
 0x553   :  { %6135 = vmatprep.subr.bf16.mxu1 %v7826_v1 }
 0x556   :  { %6136 = vmatpush3.bf16.msra.mxu1 %v7321_v31  ;;  %v7348_v31 = vld [vmem:[%s10592_s5 + $0x2a0] sm:$0xff]  }
 0x557   :  { %6137 = vmatprep.subr.bf16.mxu1 %v7826_v1 }
 0x55a   :  { %6138 = vmatpush3.bf16.msra.mxu1 %v7322_v32  ;;  %v5252_v32 = vld [vmem:[%s10594_s6 + $0x8] ss:$0 sm:$0xff] }
 0x55b   :  { %6139 = vmatprep.subr.bf16.mxu1 %v7826_v1 }
 0x55e   :  { %6140 = vmatpush3.bf16.msra.mxu1 %v7323_v33 }
 0x55f   :  { %6141 = vmatprep.subr.bf16.mxu1 %v7826_v1 }
 0x562   :  { %6142 = vmatpush3.bf16.msra.mxu1 %v7324_v34 }
 0x563   :  { %6143 = vmatprep.subr.bf16.mxu1 %v7826_v1 }
 0x566   :  { %6144 = vmatpush3.bf16.msra.mxu1 %v7325_v35 }
 0x567   :  { %6145 = vmatprep.subr.bf16.mxu1 %v7826_v1 }
 0x56a   :  { %6146 = vmatpush3.bf16.msra.mxu1 %v7326_v48  ;;  %v7355_v48 = vld [vmem:[%s10592_s5 + $0x2d8] sm:$0xff]  }
 0x56b   :  { %6147 = vmatprep.subr.bf16.mxu1 %v7826_v1 }
 0x56e   :  { %6148 = vmatpush3.bf16.msra.mxu1 %v7327_v49  ;;  %v7356_v49 = vld [vmem:[%s10592_s5 + $0x2e0] sm:$0xff]  }
 0x56f   :  { %6173 = vmatprep.subr.bf16.mxu1 %v7826_v1 }
 0x624   :  { %v1312_v37 = vpop.f32.mrb[12].mxu1 }
 0x625   :  { %v1313_v38 = vadd.f32 %v5225_v36, %v1312_v37  ;;  %v6111_v39 = vpop.f32.mrb[13].mxu1 }
 0x626   :  { %v1315_v40 = vpop.f32.mrb[14].mxu1 }
 0x627   :  { %v1319_v41 = vmax.f32 %v1313_v38, 0.0  ;;  %v1316_v42 = vadd.f32 %v5225_v36, %v1315_v40  ;;  %v6112_v43 = vpop.f32.mrb[15].mxu1 }
 0x628   :  { %v7350_v43 = vld [vmem:[%s10592_s5 + $0x2b0] sm:$0xff]  }
 0x629   :  { %v1320_v44 = vmax.f32 %v1316_v42, 0.0  ;;  %v8280_v45 = vadd.f32 %v1319_v41, %v8198_v7  ;;  %v7336_v7 = vld [vmem:[%s10592_s5 + $0x240] sm:$0xff]   ;;  %v7349_v42 = vld [vmem:[%s10592_s5 + $0x2a8] sm:$0xff]  }
 0x62b   :  { %v8283_v46 = vadd.f32 %v1320_v44, %v8201_v8  ;;  %v7337_v8 = vld [vmem:[%s10592_s5 + $0x248] sm:$0xff]   ;;  %v7351_v44 = vld [vmem:[%s10592_s5 + $0x2b8] sm:$0xff]  }
 0x62d   :  { %v1323_v47 = vpack.c.bf16 %v8283_v46, %v8280_v45 }
 0x62f   :  { %6130 = vmatmul.mubr.bf16.vlgmr.msra.gmra.mrb[16].mxu0 %v1323_v47  ;;  %v7354_v47 = vld [vmem:[%s10592_s5 + $0x2d0] sm:$0xff]  }
 0x630   :  { %6169 = vmatprep.mubr.msk.bf16.mxu0 %vm7827_vm0, %v7826_v1  ;;  %6154 = vmatpush3.bf16.msra.mxu0 %v7328_v50  ;;  %v7357_v50 = vld [vmem:[%s10592_s5 + $0x2e8] sm:$0xff]  }
 0x631   :  { %6155 = vmatprep.subr.bf16.mxu0 %v7826_v1 }
 0x634   :  { %6156 = vmatpush3.bf16.msra.mxu0 %v7329_v51  ;;  %v5261_v51 = vld [vmem:[%s10594_s6 + $0x9] ss:$0 sm:$0xff] }
 0x635   :  { %6157 = vmatprep.subr.bf16.mxu0 %v7826_v1 }
 0x638   :  { %6158 = vmatpush3.bf16.msra.mxu0 %v7330_v52 }
 0x639   :  { %6159 = vmatprep.subr.bf16.mxu0 %v7826_v1 }
 0x63c   :  { %6160 = vmatpush3.bf16.msra.mxu0 %v7331_v53 }
 0x63d   :  { %6161 = vmatprep.subr.bf16.mxu0 %v7826_v1 }
 0x640   :  { %6162 = vmatpush3.bf16.msra.mxu0 %v7332_v55 }
 0x641   :  { %6163 = vmatprep.subr.bf16.mxu0 %v7826_v1 }
 0x644   :  { %6164 = vmatpush3.bf16.msra.mxu0 %v7333_v4  ;;  %v7360_v4 = vld [vmem:[%s10592_s5 + $0x300] sm:$0xff]  }
 0x645   :  { %6165 = vmatprep.subr.bf16.mxu0 %v7826_v1 }
 0x648   :  { %6166 = vmatpush3.bf16.msra.mxu0 %v7334_v5  ;;  %v7361_v5 = vld [vmem:[%s10592_s5 + $0x308] sm:$0xff]  }
 0x649   :  { %6167 = vmatprep.subr.bf16.mxu0 %v7826_v1 }
 0x64c   :  { %6168 = vmatpush3.bf16.msra.mxu0 %v7335_v6  ;;  %v7362_v6 = vld [vmem:[%s10592_s5 + $0x310] sm:$0xff]  }
 0x64d   :  { %6193 = vmatprep.subr.bf16.mxu0 %v7826_v1 }
 0x702   :  { %v1412_v58 = vpop.f32.mrb[16].mxu0 }
 0x703   :  { %v1413_v59 = vadd.f32 %v5234_v57, %v1412_v58  ;;  %v6131_v60 = vpop.f32.mrb[17].mxu0 }
 0x704   :  { %v1415_v61 = vpop.f32.mrb[18].mxu0 }
 0x705   :  { %v1416_v62 = vadd.f32 %v5234_v57, %v1415_v61  ;;  %v6132_v63 = vpop.f32.mrb[19].mxu0  ;;  %v1419_v0 = vmax.f32 %v1413_v59, 0.0 }
 0x707   :  { %v1420_v2 = vmax.f32 %v1416_v62, 0.0 }
 0x709   :  { %v1421_v3 = vpack.c.bf16 %v1420_v2, %v1419_v0  ;;  %v7358_v2 = vld [vmem:[%s10592_s5 + $0x2f0] sm:$0xff]  }
 0x70b   :  { %6150 = vmatmul.mubr.bf16.vlgmr.msra.gmra.mrb[16].mxu1 %v1421_v3  ;;  %v7359_v3 = vld [vmem:[%s10592_s5 + $0x2f8] sm:$0xff]  }
 0x70c   :  { %6189 = vmatprep.mubr.msk.bf16.mxu1 %vm7827_vm0, %v7826_v1  ;;  %6174 = vmatpush3.bf16.msra.mxu1 %v7336_v7  ;;  %v7363_v7 = vld [vmem:[%s10592_s5 + $0x318] sm:$0xff]  }
 0x70d   :  { %6175 = vmatprep.subr.bf16.mxu1 %v7826_v1 }
 0x710   :  { %6176 = vmatpush3.bf16.msra.mxu1 %v7337_v8  ;;  %v7364_v8 = vld [vmem:[%s10592_s5 + $0x320] sm:$0xff]  }
 0x711   :  { %6177 = vmatprep.subr.bf16.mxu1 %v7826_v1 }
 0x714   :  { %6178 = vmatpush3.bf16.msra.mxu1 %v7338_v9  ;;  %v5270_v9 = vld [vmem:[%s10594_s6 + $0xa] ss:$0 sm:$0xff] }
 0x715   :  { %6179 = vmatprep.subr.bf16.mxu1 %v7826_v1 }
 0x718   :  { %6180 = vmatpush3.bf16.msra.mxu1 %v7339_v10 }
 0x719   :  { %6181 = vmatprep.subr.bf16.mxu1 %v7826_v1 }
 0x71c   :  { %6182 = vmatpush3.bf16.msra.mxu1 %v7340_v11 }
 0x71d   :  { %6183 = vmatprep.subr.bf16.mxu1 %v7826_v1 }
 0x720   :  { %6184 = vmatpush3.bf16.msra.mxu1 %v7341_v12 }
 0x721   :  { %6185 = vmatprep.subr.bf16.mxu1 %v7826_v1 }
 0x724   :  { %6186 = vmatpush3.bf16.msra.mxu1 %v7342_v25  ;;  %v7371_v25 = vld [vmem:[%s10592_s5 + $0x358] sm:$0xff]  }
 0x725   :  { %6187 = vmatprep.subr.bf16.mxu1 %v7826_v1 }
 0x728   :  { %6188 = vmatpush3.bf16.msra.mxu1 %v7343_v26  ;;  %v7372_v26 = vld [vmem:[%s10592_s5 + $0x360] sm:$0xff]  }
 0x729   :  { %6213 = vmatprep.subr.bf16.mxu1 %v7826_v1 }
 0x7de   :  { %v1510_v14 = vpop.f32.mrb[16].mxu1 }
 0x7df   :  { %v1511_v15 = vadd.f32 %v5243_v13, %v1510_v14  ;;  %v6151_v16 = vpop.f32.mrb[17].mxu1 }
 0x7e0   :  { %v1513_v17 = vpop.f32.mrb[18].mxu1 }
 0x7e1   :  { %v1517_v18 = vmax.f32 %v1511_v15, 0.0  ;;  %v1514_v19 = vadd.f32 %v5243_v13, %v1513_v17  ;;  %v6152_v20 = vpop.f32.mrb[19].mxu1 }
 0x7e2   :  { %v7366_v20 = vld [vmem:[%s10592_s5 + $0x330] sm:$0xff]  }
 0x7e3   :  { %v1518_v21 = vmax.f32 %v1514_v19, 0.0  ;;  %v8362_v22 = vadd.f32 %v1517_v18, %v8280_v45  ;;  %v7352_v45 = vld [vmem:[%s10592_s5 + $0x2c0] sm:$0xff]   ;;  %v7365_v19 = vld [vmem:[%s10592_s5 + $0x328] sm:$0xff]  }
 0x7e5   :  { %v8365_v23 = vadd.f32 %v1518_v21, %v8283_v46  ;;  %v7353_v46 = vld [vmem:[%s10592_s5 + $0x2c8] sm:$0xff]   ;;  %v7367_v21 = vld [vmem:[%s10592_s5 + $0x338] sm:$0xff]  }
 0x7e7   :  { %v1521_v24 = vpack.c.bf16 %v8365_v23, %v8362_v22 }
 0x7e9   :  { %6170 = vmatmul.mubr.bf16.vlgmr.msra.gmra.mrb[20].mxu0 %v1521_v24  ;;  %v7370_v24 = vld [vmem:[%s10592_s5 + $0x350] sm:$0xff]  }
 0x7ea   :  { %6209 = vmatprep.mubr.msk.bf16.mxu0 %vm7827_vm0, %v7826_v1  ;;  %6194 = vmatpush3.bf16.msra.mxu0 %v7344_v27  ;;  %v7373_v27 = vld [vmem:[%s10592_s5 + $0x368] sm:$0xff]  }
 0x7eb   :  { %6195 = vmatprep.subr.bf16.mxu0 %v7826_v1 }
 0x7ee   :  { %6196 = vmatpush3.bf16.msra.mxu0 %v7345_v28  ;;  %v5279_v28 = vld [vmem:[%s10594_s6 + $0xb] ss:$0 sm:$0xff] }
 0x7ef   :  { %6197 = vmatprep.subr.bf16.mxu0 %v7826_v1 }
 0x7f2   :  { %6198 = vmatpush3.bf16.msra.mxu0 %v7346_v29 }
 0x7f3   :  { %6199 = vmatprep.subr.bf16.mxu0 %v7826_v1 }
 0x7f6   :  { %6200 = vmatpush3.bf16.msra.mxu0 %v7347_v30 }
 0x7f7   :  { %6201 = vmatprep.subr.bf16.mxu0 %v7826_v1 }
 0x7fa   :  { %6202 = vmatpush3.bf16.msra.mxu0 %v7348_v31 }
 0x7fb   :  { %6203 = vmatprep.subr.bf16.mxu0 %v7826_v1 }
 0x7fe   :  { %6204 = vmatpush3.bf16.msra.mxu0 %v7349_v42  ;;  %v7376_v42 = vld [vmem:[%s10592_s5 + $0x380] sm:$0xff]  }
 0x7ff   :  { %6205 = vmatprep.subr.bf16.mxu0 %v7826_v1 }
 0x802   :  { %6206 = vmatpush3.bf16.msra.mxu0 %v7350_v43  ;;  %v7377_v43 = vld [vmem:[%s10592_s5 + $0x388] sm:$0xff]  }
 0x803   :  { %6207 = vmatprep.subr.bf16.mxu0 %v7826_v1 }
 0x806   :  { %6208 = vmatpush3.bf16.msra.mxu0 %v7351_v44  ;;  %v7378_v44 = vld [vmem:[%s10592_s5 + $0x390] sm:$0xff]  }
 0x807   :  { %6233 = vmatprep.subr.bf16.mxu0 %v7826_v1 }
 0x8bc   :  { %v1610_v33 = vpop.f32.mrb[20].mxu0 }
 0x8bd   :  { %v1611_v34 = vadd.f32 %v5252_v32, %v1610_v33  ;;  %v6171_v35 = vpop.f32.mrb[21].mxu0 }
 0x8be   :  { %v1613_v36 = vpop.f32.mrb[22].mxu0 }
 0x8bf   :  { %v1614_v37 = vadd.f32 %v5252_v32, %v1613_v36  ;;  %v6172_v38 = vpop.f32.mrb[23].mxu0  ;;  %v1617_v39 = vmax.f32 %v1611_v34, 0.0 }
 0x8c1   :  { %v1618_v40 = vmax.f32 %v1614_v37, 0.0 }
 0x8c3   :  { %v1619_v41 = vpack.c.bf16 %v1618_v40, %v1617_v39  ;;  %v7374_v40 = vld [vmem:[%s10592_s5 + $0x370] sm:$0xff]  }
 0x8c5   :  { %6190 = vmatmul.mubr.bf16.vlgmr.msra.gmra.mrb[20].mxu1 %v1619_v41  ;;  %v7375_v41 = vld [vmem:[%s10592_s5 + $0x378] sm:$0xff]  }
 0x8c6   :  { %6229 = vmatprep.mubr.msk.bf16.mxu1 %vm7827_vm0, %v7826_v1  ;;  %6214 = vmatpush3.bf16.msra.mxu1 %v7352_v45  ;;  %v7379_v45 = vld [vmem:[%s10592_s5 + $0x398] sm:$0xff]  }
 0x8c7   :  { %6215 = vmatprep.subr.bf16.mxu1 %v7826_v1 }
 0x8ca   :  { %6216 = vmatpush3.bf16.msra.mxu1 %v7353_v46  ;;  %v7380_v46 = vld [vmem:[%s10592_s5 + $0x3a0] sm:$0xff]  }
 0x8cb   :  { %6217 = vmatprep.subr.bf16.mxu1 %v7826_v1 }
 0x8ce   :  { %6218 = vmatpush3.bf16.msra.mxu1 %v7354_v47  ;;  %v5288_v47 = vld [vmem:[%s10594_s6 + $0xc] ss:$0 sm:$0xff] }
 0x8cf   :  { %6219 = vmatprep.subr.bf16.mxu1 %v7826_v1 }
 0x8d2   :  { %6220 = vmatpush3.bf16.msra.mxu1 %v7355_v48 }
 0x8d3   :  { %6221 = vmatprep.subr.bf16.mxu1 %v7826_v1 }
 0x8d6   :  { %6222 = vmatpush3.bf16.msra.mxu1 %v7356_v49 }
 0x8d7   :  { %6223 = vmatprep.subr.bf16.mxu1 %v7826_v1 }
 0x8da   :  { %6224 = vmatpush3.bf16.msra.mxu1 %v7357_v50 }
 0x8db   :  { %6225 = vmatprep.subr.bf16.mxu1 %v7826_v1 }
 0x8de   :  { %6226 = vmatpush3.bf16.msra.mxu1 %v7358_v2  ;;  %v7387_v2 = vld [vmem:[%s10592_s5 + $0x3d8] sm:$0xff]  }
 0x8df   :  { %6227 = vmatprep.subr.bf16.mxu1 %v7826_v1 }
 0x8e2   :  { %6228 = vmatpush3.bf16.msra.mxu1 %v7359_v3  ;;  %v7388_v3 = vld [vmem:[%s10592_s5 + $0x3e0] sm:$0xff]  }
 0x8e3   :  { %6253 = vmatprep.subr.bf16.mxu1 %v7826_v1 }
 0x998   :  { %v1708_v52 = vpop.f32.mrb[20].mxu1 }
 0x999   :  { %v1709_v53 = vadd.f32 %v5261_v51, %v1708_v52  ;;  %v6191_v55 = vpop.f32.mrb[21].mxu1 }
 0x99a   :  { %v1711_v57 = vpop.f32.mrb[22].mxu1 }
 0x99b   :  { %v1715_v58 = vmax.f32 %v1709_v53, 0.0  ;;  %v1712_v59 = vadd.f32 %v5261_v51, %v1711_v57  ;;  %v6192_v60 = vpop.f32.mrb[23].mxu1 }
 0x99c   :  { %v7382_v60 = vld [vmem:[%s10592_s5 + $0x3b0] sm:$0xff]  }
 0x99d   :  { %v1716_v61 = vmax.f32 %v1712_v59, 0.0  ;;  %v8444_v62 = vadd.f32 %v1715_v58, %v8362_v22  ;;  %v7368_v22 = vld [vmem:[%s10592_s5 + $0x340] sm:$0xff]   ;;  %v7381_v59 = vld [vmem:[%s10592_s5 + $0x3a8] sm:$0xff]  }
 0x99f   :  { %v8447_v63 = vadd.f32 %v1716_v61, %v8365_v23  ;;  %v7369_v23 = vld [vmem:[%s10592_s5 + $0x348] sm:$0xff]   ;;  %v7383_v61 = vld [vmem:[%s10592_s5 + $0x3b8] sm:$0xff]  }
 0x9a1   :  { %v1719_v0 = vpack.c.bf16 %v8447_v63, %v8444_v62 }
 0x9a3   :  { %6210 = vmatmul.mubr.bf16.vlgmr.msra.gmra.mrb[24].mxu0 %v1719_v0  ;;  %v7386_v0 = vld [vmem:[%s10592_s5 + $0x3d0] sm:$0xff]  }
 0x9a4   :  { %6249 = vmatprep.mubr.msk.bf16.mxu0 %vm7827_vm0, %v7826_v1  ;;  %6234 = vmatpush3.bf16.msra.mxu0 %v7360_v4  ;;  %v7389_v4 = vld [vmem:[%s10592_s5 + $0x3e8] sm:$0xff]  }
 0x9a5   :  { %6235 = vmatprep.subr.bf16.mxu0 %v7826_v1 }
 0x9a8   :  { %6236 = vmatpush3.bf16.msra.mxu0 %v7361_v5  ;;  %v5297_v5 = vld [vmem:[%s10594_s6 + $0xd] ss:$0 sm:$0xff] }
 0x9a9   :  { %6237 = vmatprep.subr.bf16.mxu0 %v7826_v1 }
 0x9ac   :  { %6238 = vmatpush3.bf16.msra.mxu0 %v7362_v6 }
 0x9ad   :  { %6239 = vmatprep.subr.bf16.mxu0 %v7826_v1 }
 0x9b0   :  { %6240 = vmatpush3.bf16.msra.mxu0 %v7363_v7 }
 0x9b1   :  { %6241 = vmatprep.subr.bf16.mxu0 %v7826_v1 }
 0x9b4   :  { %6242 = vmatpush3.bf16.msra.mxu0 %v7364_v8 }
 0x9b5   :  { %6243 = vmatprep.subr.bf16.mxu0 %v7826_v1 }
 0x9b8   :  { %6244 = vmatpush3.bf16.msra.mxu0 %v7365_v19  ;;  %v7392_v19 = vld [vmem:[%s10592_s5 + $0x400] sm:$0xff]  }
 0x9b9   :  { %6245 = vmatprep.subr.bf16.mxu0 %v7826_v1 }
 0x9bc   :  { %6246 = vmatpush3.bf16.msra.mxu0 %v7366_v20  ;;  %v7393_v20 = vld [vmem:[%s10592_s5 + $0x408] sm:$0xff]  }
 0x9bd   :  { %6247 = vmatprep.subr.bf16.mxu0 %v7826_v1 }
 0x9c0   :  { %6248 = vmatpush3.bf16.msra.mxu0 %v7367_v21  ;;  %v7394_v21 = vld [vmem:[%s10592_s5 + $0x410] sm:$0xff]  }
 0x9c1   :  { %6273 = vmatprep.subr.bf16.mxu0 %v7826_v1 }
 0xa76   :  { %v1808_v10 = vpop.f32.mrb[24].mxu0 }
 0xa77   :  { %v1809_v11 = vadd.f32 %v5270_v9, %v1808_v10  ;;  %v6211_v12 = vpop.f32.mrb[25].mxu0 }
 0xa78   :  { %v1811_v13 = vpop.f32.mrb[26].mxu0 }
 0xa79   :  { %v1812_v14 = vadd.f32 %v5270_v9, %v1811_v13  ;;  %v6212_v15 = vpop.f32.mrb[27].mxu0  ;;  %v1815_v16 = vmax.f32 %v1809_v11, 0.0 }
 0xa7b   :  { %v1816_v17 = vmax.f32 %v1812_v14, 0.0 }
 0xa7d   :  { %v1817_v18 = vpack.c.bf16 %v1816_v17, %v1815_v16  ;;  %v7390_v17 = vld [vmem:[%s10592_s5 + $0x3f0] sm:$0xff]  }
 0xa7f   :  { %6230 = vmatmul.mubr.bf16.vlgmr.msra.gmra.mrb[24].mxu1 %v1817_v18  ;;  %v7391_v18 = vld [vmem:[%s10592_s5 + $0x3f8] sm:$0xff]  }
 0xa80   :  { %6269 = vmatprep.mubr.msk.bf16.mxu1 %vm7827_vm0, %v7826_v1  ;;  %6254 = vmatpush3.bf16.msra.mxu1 %v7368_v22  ;;  %v7395_v22 = vld [vmem:[%s10592_s5 + $0x418] sm:$0xff]  }
 0xa81   :  { %6255 = vmatprep.subr.bf16.mxu1 %v7826_v1 }
 0xa84   :  { %6256 = vmatpush3.bf16.msra.mxu1 %v7369_v23  ;;  %v7396_v23 = vld [vmem:[%s10592_s5 + $0x420] sm:$0xff]  }
 0xa85   :  { %6257 = vmatprep.subr.bf16.mxu1 %v7826_v1 }
 0xa88   :  { %6258 = vmatpush3.bf16.msra.mxu1 %v7370_v24  ;;  %v5306_v24 = vld [vmem:[%s10594_s6 + $0xe] ss:$0 sm:$0xff] }
 0xa89   :  { %6259 = vmatprep.subr.bf16.mxu1 %v7826_v1 }
 0xa8c   :  { %6260 = vmatpush3.bf16.msra.mxu1 %v7371_v25 }
 0xa8d   :  { %6261 = vmatprep.subr.bf16.mxu1 %v7826_v1 }
 0xa90   :  { %6262 = vmatpush3.bf16.msra.mxu1 %v7372_v26 }
 0xa91   :  { %6263 = vmatprep.subr.bf16.mxu1 %v7826_v1 }
 0xa94   :  { %6264 = vmatpush3.bf16.msra.mxu1 %v7373_v27 }
 0xa95   :  { %6265 = vmatprep.subr.bf16.mxu1 %v7826_v1 }
 0xa98   :  { %6266 = vmatpush3.bf16.msra.mxu1 %v7374_v40  ;;  %v7403_v40 = vld [vmem:[%s10592_s5 + $0x458] sm:$0xff]  }
 0xa99   :  { %6267 = vmatprep.subr.bf16.mxu1 %v7826_v1 }
 0xa9c   :  { %6268 = vmatpush3.bf16.msra.mxu1 %v7375_v41  ;;  %v7404_v41 = vld [vmem:[%s10592_s5 + $0x460] sm:$0xff]  }
 0xa9d   :  { %6293 = vmatprep.subr.bf16.mxu1 %v7826_v1 }
 0xb52   :  { %v1906_v29 = vpop.f32.mrb[24].mxu1 }
 0xb53   :  { %v1907_v30 = vadd.f32 %v5279_v28, %v1906_v29  ;;  %v6231_v31 = vpop.f32.mrb[25].mxu1 }
 0xb54   :  { %v1909_v32 = vpop.f32.mrb[26].mxu1 }
 0xb55   :  { %v1913_v33 = vmax.f32 %v1907_v30, 0.0  ;;  %v1910_v34 = vadd.f32 %v5279_v28, %v1909_v32  ;;  %v6232_v35 = vpop.f32.mrb[27].mxu1 }
 0xb56   :  { %v7398_v35 = vld [vmem:[%s10592_s5 + $0x430] sm:$0xff]  }
 0xb57   :  { %v1914_v36 = vmax.f32 %v1910_v34, 0.0  ;;  %v8526_v37 = vadd.f32 %v1913_v33, %v8444_v62  ;;  %v7384_v62 = vld [vmem:[%s10592_s5 + $0x3c0] sm:$0xff]   ;;  %v7397_v34 = vld [vmem:[%s10592_s5 + $0x428] sm:$0xff]  }
 0xb59   :  { %v8529_v38 = vadd.f32 %v1914_v36, %v8447_v63  ;;  %v7385_v63 = vld [vmem:[%s10592_s5 + $0x3c8] sm:$0xff]   ;;  %v7399_v36 = vld [vmem:[%s10592_s5 + $0x438] sm:$0xff]  }
 0xb5b   :  { %v1917_v39 = vpack.c.bf16 %v8529_v38, %v8526_v37 }
 0xb5d   :  { %6250 = vmatmul.mubr.bf16.vlgmr.msra.gmra.mrb[28].mxu0 %v1917_v39  ;;  %v7402_v39 = vld [vmem:[%s10592_s5 + $0x450] sm:$0xff]  }
 0xb5e   :  { %6289 = vmatprep.mubr.msk.bf16.mxu0 %vm7827_vm0, %v7826_v1  ;;  %6274 = vmatpush3.bf16.msra.mxu0 %v7376_v42  ;;  %v7405_v42 = vld [vmem:[%s10592_s5 + $0x468] sm:$0xff]  }
 0xb5f   :  { %6275 = vmatprep.subr.bf16.mxu0 %v7826_v1 }
 0xb62   :  { %6276 = vmatpush3.bf16.msra.mxu0 %v7377_v43  ;;  %v5315_v43 = vld [vmem:[%s10594_s6 + $0xf] ss:$0 sm:$0xff] }
 0xb63   :  { %6277 = vmatprep.subr.bf16.mxu0 %v7826_v1 }
 0xb66   :  { %6278 = vmatpush3.bf16.msra.mxu0 %v7378_v44 }
 0xb67   :  { %6279 = vmatprep.subr.bf16.mxu0 %v7826_v1 }
 0xb6a   :  { %6280 = vmatpush3.bf16.msra.mxu0 %v7379_v45 }
 0xb6b   :  { %6281 = vmatprep.subr.bf16.mxu0 %v7826_v1 }
 0xb6e   :  { %6282 = vmatpush3.bf16.msra.mxu0 %v7380_v46 }
 0xb6f   :  { %6283 = vmatprep.subr.bf16.mxu0 %v7826_v1 }
 0xb72   :  { %6284 = vmatpush3.bf16.msra.mxu0 %v7381_v59  ;;  %v7408_v59 = vld [vmem:[%s10592_s5 + $0x480] sm:$0xff]  }
 0xb73   :  { %6285 = vmatprep.subr.bf16.mxu0 %v7826_v1 }
 0xb76   :  { %6286 = vmatpush3.bf16.msra.mxu0 %v7382_v60  ;;  %v7409_v60 = vld [vmem:[%s10592_s5 + $0x488] sm:$0xff]  }
 0xb77   :  { %6287 = vmatprep.subr.bf16.mxu0 %v7826_v1 }
 0xb7a   :  { %6288 = vmatpush3.bf16.msra.mxu0 %v7383_v61  ;;  %v7410_v61 = vld [vmem:[%s10592_s5 + $0x490] sm:$0xff]  }
 0xb7b   :  { %6313 = vmatprep.subr.bf16.mxu0 %v7826_v1 }
 0xc30   :  { %v2006_v48 = vpop.f32.mrb[28].mxu0 }
 0xc31   :  { %v2007_v49 = vadd.f32 %v5288_v47, %v2006_v48  ;;  %v6251_v50 = vpop.f32.mrb[29].mxu0 }
 0xc32   :  { %v2009_v51 = vpop.f32.mrb[30].mxu0 }
 0xc33   :  { %v2010_v52 = vadd.f32 %v5288_v47, %v2009_v51  ;;  %v6252_v53 = vpop.f32.mrb[31].mxu0  ;;  %v2013_v55 = vmax.f32 %v2007_v49, 0.0 }
 0xc35   :  { %v2014_v57 = vmax.f32 %v2010_v52, 0.0 }
 0xc37   :  { %v2015_v58 = vpack.c.bf16 %v2014_v57, %v2013_v55  ;;  %v7406_v57 = vld [vmem:[%s10592_s5 + $0x470] sm:$0xff]  }
 0xc39   :  { %6270 = vmatmul.mubr.bf16.vlgmr.msra.gmra.mrb[28].mxu1 %v2015_v58  ;;  %v7407_v58 = vld [vmem:[%s10592_s5 + $0x478] sm:$0xff]  }
 0xc3a   :  { %6309 = vmatprep.mubr.msk.bf16.mxu1 %vm7827_vm0, %v7826_v1  ;;  %6294 = vmatpush3.bf16.msra.mxu1 %v7384_v62  ;;  %v7411_v62 = vld [vmem:[%s10592_s5 + $0x498] sm:$0xff]  }
 0xc3b   :  { %6295 = vmatprep.subr.bf16.mxu1 %v7826_v1 }
 0xc3e   :  { %6296 = vmatpush3.bf16.msra.mxu1 %v7385_v63  ;;  %v7412_v63 = vld [vmem:[%s10592_s5 + $0x4a0] sm:$0xff]  }
 0xc3f   :  { %6297 = vmatprep.subr.bf16.mxu1 %v7826_v1 }
 0xc42   :  { %6298 = vmatpush3.bf16.msra.mxu1 %v7386_v0  ;;  %v5324_v0 = vld [vmem:[%s10594_s6 + $0x10] ss:$0 sm:$0xff] }
 0xc43   :  { %6299 = vmatprep.subr.bf16.mxu1 %v7826_v1 }
 0xc46   :  { %6300 = vmatpush3.bf16.msra.mxu1 %v7387_v2 }
 0xc47   :  { %6301 = vmatprep.subr.bf16.mxu1 %v7826_v1 }
 0xc4a   :  { %6302 = vmatpush3.bf16.msra.mxu1 %v7388_v3 }
 0xc4b   :  { %6303 = vmatprep.subr.bf16.mxu1 %v7826_v1 }
 0xc4e   :  { %6304 = vmatpush3.bf16.msra.mxu1 %v7389_v4 }
 0xc4f   :  { %6305 = vmatprep.subr.bf16.mxu1 %v7826_v1 }
 0xc52   :  { %6306 = vmatpush3.bf16.msra.mxu1 %v7390_v17  ;;  %v7419_v17 = vld [vmem:[%s10592_s5 + $0x4d8] sm:$0xff]  }
 0xc53   :  { %6307 = vmatprep.subr.bf16.mxu1 %v7826_v1 }
 0xc56   :  { %6308 = vmatpush3.bf16.msra.mxu1 %v7391_v18  ;;  %v7420_v18 = vld [vmem:[%s10592_s5 + $0x4e0] sm:$0xff]  }
 0xc57   :  { %6333 = vmatprep.subr.bf16.mxu1 %v7826_v1 }
 0xd0c   :  { %v2104_v6 = vpop.f32.mrb[28].mxu1 }
 0xd0d   :  { %v2105_v7 = vadd.f32 %v5297_v5, %v2104_v6  ;;  %v6271_v8 = vpop.f32.mrb[29].mxu1 }
 0xd0e   :  { %v2107_v9 = vpop.f32.mrb[30].mxu1 }
 0xd0f   :  { %v2111_v10 = vmax.f32 %v2105_v7, 0.0  ;;  %v2108_v11 = vadd.f32 %v5297_v5, %v2107_v9  ;;  %v6272_v12 = vpop.f32.mrb[31].mxu1 }
 0xd10   :  { %v7414_v12 = vld [vmem:[%s10592_s5 + $0x4b0] sm:$0xff]  }
 0xd11   :  { %v2112_v13 = vmax.f32 %v2108_v11, 0.0  ;;  %v8608_v14 = vadd.f32 %v2111_v10, %v8526_v37  ;;  %v7400_v37 = vld [vmem:[%s10592_s5 + $0x440] sm:$0xff]   ;;  %v7413_v11 = vld [vmem:[%s10592_s5 + $0x4a8] sm:$0xff]  }
 0xd13   :  { %v8611_v15 = vadd.f32 %v2112_v13, %v8529_v38  ;;  %v7401_v38 = vld [vmem:[%s10592_s5 + $0x448] sm:$0xff]   ;;  %v7415_v13 = vld [vmem:[%s10592_s5 + $0x4b8] sm:$0xff]  }
 0xd15   :  { %v2115_v16 = vpack.c.bf16 %v8611_v15, %v8608_v14 }
 0xd17   :  { %6290 = vmatmul.mubr.bf16.vlgmr.msra.gmra.mrb[32].mxu0 %v2115_v16  ;;  %v7418_v16 = vld [vmem:[%s10592_s5 + $0x4d0] sm:$0xff]  }
 0xd18   :  { %6329 = vmatprep.mubr.msk.bf16.mxu0 %vm7827_vm0, %v7826_v1  ;;  %6314 = vmatpush3.bf16.msra.mxu0 %v7392_v19  ;;  %v7421_v19 = vld [vmem:[%s10592_s5 + $0x4e8] sm:$0xff]  }
 0xd19   :  { %6315 = vmatprep.subr.bf16.mxu0 %v7826_v1 }
 0xd1c   :  { %6316 = vmatpush3.bf16.msra.mxu0 %v7393_v20  ;;  %v5333_v20 = vld [vmem:[%s10594_s6 + $0x11] ss:$0 sm:$0xff] }
 0xd1d   :  { %6317 = vmatprep.subr.bf16.mxu0 %v7826_v1 }
 0xd20   :  { %6318 = vmatpush3.bf16.msra.mxu0 %v7394_v21 }
 0xd21   :  { %6319 = vmatprep.subr.bf16.mxu0 %v7826_v1 }
 0xd24   :  { %6320 = vmatpush3.bf16.msra.mxu0 %v7395_v22 }
 0xd25   :  { %6321 = vmatprep.subr.bf16.mxu0 %v7826_v1 }
 0xd28   :  { %6322 = vmatpush3.bf16.msra.mxu0 %v7396_v23 }
 0xd29   :  { %6323 = vmatprep.subr.bf16.mxu0 %v7826_v1 }
 0xd2c   :  { %6324 = vmatpush3.bf16.msra.mxu0 %v7397_v34  ;;  %v7424_v34 = vld [vmem:[%s10595_s3] sm:$0xff]  }
 0xd2d   :  { %6325 = vmatprep.subr.bf16.mxu0 %v7826_v1 }
 0xd30   :  { %6326 = vmatpush3.bf16.msra.mxu0 %v7398_v35  ;;  %v7425_v35 = vld [vmem:[%s10595_s3 + $0x8] sm:$0xff]  }
 0xd31   :  { %6327 = vmatprep.subr.bf16.mxu0 %v7826_v1 }
 0xd34   :  { %6328 = vmatpush3.bf16.msra.mxu0 %v7399_v36  ;;  %v7426_v36 = vld [vmem:[%s10595_s3 + $0x10] sm:$0xff]  }
 0xd35   :  { %6353 = vmatprep.subr.bf16.mxu0 %v7826_v1 }
 0xdea   :  { %v2204_v25 = vpop.f32.mrb[32].mxu0 }
 0xdeb   :  { %v2205_v26 = vadd.f32 %v5306_v24, %v2204_v25  ;;  %v6291_v27 = vpop.f32.mrb[33].mxu0 }
 0xdec   :  { %v2207_v28 = vpop.f32.mrb[34].mxu0 }
 0xded   :  { %v2208_v29 = vadd.f32 %v5306_v24, %v2207_v28  ;;  %v6292_v30 = vpop.f32.mrb[35].mxu0  ;;  %v2211_v31 = vmax.f32 %v2205_v26, 0.0 }
 0xdef   :  { %v2212_v32 = vmax.f32 %v2208_v29, 0.0 }
 0xdf1   :  { %v2213_v33 = vpack.c.bf16 %v2212_v32, %v2211_v31  ;;  %v7422_v32 = vld [vmem:[%s10592_s5 + $0x4f0] sm:$0xff]  }
 0xdf3   :  { %6310 = vmatmul.mubr.bf16.vlgmr.msra.gmra.mrb[32].mxu1 %v2213_v33  ;;  %v7423_v33 = vld [vmem:[%s10592_s5 + $0x4f8] sm:$0xff]  }
 0xdf4   :  { %6349 = vmatprep.mubr.msk.bf16.mxu1 %vm7827_vm0, %v7826_v1  ;;  %6334 = vmatpush3.bf16.msra.mxu1 %v7400_v37  ;;  %v7427_v37 = vld [vmem:[%s10595_s3 + $0x18] sm:$0xff]  }
 0xdf5   :  { %6335 = vmatprep.subr.bf16.mxu1 %v7826_v1 }
 0xdf8   :  { %6336 = vmatpush3.bf16.msra.mxu1 %v7401_v38  ;;  %v7428_v38 = vld [vmem:[%s10595_s3 + $0x20] sm:$0xff]  }
 0xdf9   :  { %6337 = vmatprep.subr.bf16.mxu1 %v7826_v1 }
 0xdfc   :  { %6338 = vmatpush3.bf16.msra.mxu1 %v7402_v39  ;;  %v5342_v39 = vld [vmem:[%s10594_s6 + $0x12] ss:$0 sm:$0xff] }
 0xdfd   :  { %6339 = vmatprep.subr.bf16.mxu1 %v7826_v1 }
 0xe00   :  { %6340 = vmatpush3.bf16.msra.mxu1 %v7403_v40 }
 0xe01   :  { %6341 = vmatprep.subr.bf16.mxu1 %v7826_v1 }
 0xe04   :  { %6342 = vmatpush3.bf16.msra.mxu1 %v7404_v41 }
 0xe05   :  { %6343 = vmatprep.subr.bf16.mxu1 %v7826_v1 }
 0xe08   :  { %6344 = vmatpush3.bf16.msra.mxu1 %v7405_v42 }
 0xe09   :  { %6345 = vmatprep.subr.bf16.mxu1 %v7826_v1 }
 0xe0c   :  { %6346 = vmatpush3.bf16.msra.mxu1 %v7406_v57  ;;  %v7462_v57 = vld [vmem:[%s10592_s5 + $0x30] sm:$0xff]  }
 0xe0d   :  { %6347 = vmatprep.subr.bf16.mxu1 %v7826_v1 }
 0xe10   :  { %6348 = vmatpush3.bf16.msra.mxu1 %v7407_v58  ;;  %v7463_v58 = vld [vmem:[%s10592_s5 + $0x38] sm:$0xff]  }
 0xe11   :  { %6373 = vmatprep.subr.bf16.mxu1 %v7826_v1 }
 0xec6   :  { %v2302_v44 = vpop.f32.mrb[32].mxu1 }
 0xec7   :  { %v2303_v45 = vadd.f32 %v5315_v43, %v2302_v44  ;;  %v6311_v46 = vpop.f32.mrb[33].mxu1 }
 0xec8   :  { %v2305_v47 = vpop.f32.mrb[34].mxu1 }
 0xec9   :  { %v2309_v48 = vmax.f32 %v2303_v45, 0.0  ;;  %v2306_v49 = vadd.f32 %v5315_v43, %v2305_v47  ;;  %v6312_v50 = vpop.f32.mrb[35].mxu1 }
 0xeca   :  { %v7457_v50 = vld [vmem:[%s10592_s5 + $0x8] sm:$0xff]  }
 0xecb   :  { %v2310_v51 = vmax.f32 %v2306_v49, 0.0  ;;  %v8690_v52 = vadd.f32 %v2309_v48, %v8608_v14  ;;  %v7416_v14 = vld [vmem:[%s10592_s5 + $0x4c0] sm:$0xff]  }
 0xecc   :  { %v7456_v49 = vld [vmem:[%s10592_s5] sm:$0xff]  }
 0xecd   :  { %v8693_v53 = vadd.f32 %v2310_v51, %v8611_v15  ;;  %v7417_v15 = vld [vmem:[%s10592_s5 + $0x4c8] sm:$0xff]   ;;  %v7458_v51 = vld [vmem:[%s10592_s5 + $0x10] sm:$0xff]  }
 0xecf   :  { %v2313_v55 = vpack.c.bf16 %v8693_v53, %v8690_v52 }
 0xed1   :  { %6330 = vmatmul.mubr.bf16.vlgmr.msra.gmra.mrb[36].mxu0 %v2313_v55  ;;  %v7461_v55 = vld [vmem:[%s10592_s5 + $0x28] sm:$0xff]  }
 0xed2   :  { %6369 = vmatprep.mubr.msk.bf16.mxu0 %vm7827_vm0, %v7826_v1  ;;  %6354 = vmatpush3.bf16.msra.mxu0 %v7408_v59  ;;  %v7429_v59 = vld [vmem:[%s10595_s3 + $0x28] sm:$0xff]  }
 0xed3   :  { %6355 = vmatprep.subr.bf16.mxu0 %v7826_v1 }
 0xed6   :  { %6356 = vmatpush3.bf16.msra.mxu0 %v7409_v60  ;;  %v7430_v60 = vld [vmem:[%s10595_s3 + $0x30] sm:$0xff]  }
 0xed7   :  { %6357 = vmatprep.subr.bf16.mxu0 %v7826_v1 }
 0xeda   :  { %6358 = vmatpush3.bf16.msra.mxu0 %v7410_v61  ;;  %v7431_v61 = vld [vmem:[%s10595_s3 + $0x38] sm:$0xff]  }
 0xedb   :  { %6359 = vmatprep.subr.bf16.mxu0 %v7826_v1 }
 0xede   :  { %6360 = vmatpush3.bf16.msra.mxu0 %v7411_v62  ;;  %v5351_v62 = vld [vmem:[%s10594_s6 + $0x13] ss:$0 sm:$0xff] }
 0xedf   :  { %6361 = vmatprep.subr.bf16.mxu0 %v7826_v1 }
 0xee2   :  { %6362 = vmatpush3.bf16.msra.mxu0 %v7412_v63 }
 0xee3   :  { %6363 = vmatprep.subr.bf16.mxu0 %v7826_v1 }
 0xee6   :  { %6364 = vmatpush3.bf16.msra.mxu0 %v7413_v11  ;;  %v7464_v11 = vld [vmem:[%s10592_s5 + $0x40] sm:$0xff]  }
 0xee7   :  { %6365 = vmatprep.subr.bf16.mxu0 %v7826_v1 }
 0xeea   :  { %6366 = vmatpush3.bf16.msra.mxu0 %v7414_v12  ;;  %v7465_v12 = vld [vmem:[%s10592_s5 + $0x48] sm:$0xff]  }
 0xeeb   :  { %6367 = vmatprep.subr.bf16.mxu0 %v7826_v1 }
 0xeee   :  { %6368 = vmatpush3.bf16.msra.mxu0 %v7415_v13  ;;  %v7466_v13 = vld [vmem:[%s10592_s5 + $0x50] sm:$0xff]  }
 0xeef   :  { %6393 = vmatprep.subr.bf16.mxu0 %v7826_v1 }
 0xfa4   :  { %v2402_v2 = vpop.f32.mrb[36].mxu0 }
 0xfa5   :  { %v2403_v3 = vadd.f32 %v5324_v0, %v2402_v2  ;;  %v6331_v4 = vpop.f32.mrb[37].mxu0 }
 0xfa6   :  { %v2405_v5 = vpop.f32.mrb[38].mxu0 }
 0xfa7   :  { %v2406_v6 = vadd.f32 %v5324_v0, %v2405_v5  ;;  %v6332_v7 = vpop.f32.mrb[39].mxu0  ;;  %v2409_v8 = vmax.f32 %v2403_v3, 0.0 }
 0xfa9   :  { %v2410_v9 = vmax.f32 %v2406_v6, 0.0 }
 0xfab   :  { %v2411_v10 = vpack.c.bf16 %v2410_v9, %v2409_v8 }
 0xfad   :  { %6350 = vmatmul.mubr.bf16.vlgmr.msra.gmra.mrb[36].mxu1 %v2411_v10 }
 0xfae   :  { %6389 = vmatprep.mubr.msk.bf16.mxu1 %vm7827_vm0, %v7826_v1  ;;  %6374 = vmatpush3.bf16.msra.mxu1 %v7416_v14  ;;  %v7467_v14 = vld [vmem:[%s10592_s5 + $0x58] sm:$0xff]  }
 0xfaf   :  { %6375 = vmatprep.subr.bf16.mxu1 %v7826_v1 }
 0xfb2   :  { %6376 = vmatpush3.bf16.msra.mxu1 %v7417_v15  ;;  %v7468_v15 = vld [vmem:[%s10592_s5 + $0x60] sm:$0xff]  }
 0xfb3   :  { %6377 = vmatprep.subr.bf16.mxu1 %v7826_v1 }
 0xfb6   :  { %6378 = vmatpush3.bf16.msra.mxu1 %v7418_v16  ;;  %v7469_v16 = vld [vmem:[%s10592_s5 + $0x68] sm:$0xff]  }
 0xfb7   :  { %6379 = vmatprep.subr.bf16.mxu1 %v7826_v1 }
 0xfba   :  { %6380 = vmatpush3.bf16.msra.mxu1 %v7419_v17  ;;  %v7470_v17 = vld [vmem:[%s10592_s5 + $0x70] sm:$0xff]  }
 0xfbb   :  { %6381 = vmatprep.subr.bf16.mxu1 %v7826_v1 }
 0xfbe   :  { %6382 = vmatpush3.bf16.msra.mxu1 %v7420_v18  ;;  %v7471_v18 = vld [vmem:[%s10592_s5 + $0x78] sm:$0xff]  }
 0xfbf   :  { %6383 = vmatprep.subr.bf16.mxu1 %v7826_v1 }
 0xfc2   :  { %6384 = vmatpush3.bf16.msra.mxu1 %v7421_v19  ;;  %v2804_v19 = vlaneseq }
 0xfc3   :  { %6385 = vmatprep.subr.bf16.mxu1 %v7826_v1 }
 0xfc6   :  { %6386 = vmatpush3.bf16.msra.mxu1 %v7422_v32  ;;  %v7472_v32 = vld [vmem:[%s10592_s5 + $0x80] sm:$0xff]  }
 0xfc7   :  { %6387 = vmatprep.subr.bf16.mxu1 %v7826_v1 }
 0xfca   :  { %6388 = vmatpush3.bf16.msra.mxu1 %v7423_v33  ;;  %v7473_v33 = vld [vmem:[%s10592_s5 + $0x88] sm:$0xff]  }
 0xfcb   :  { %6413 = vmatprep.subr.bf16.mxu1 %v7826_v1 }
0x1080   :  { %v2500_v21 = vpop.f32.mrb[36].mxu1 }
0x1081   :  { %v2501_v22 = vadd.f32 %v5333_v20, %v2500_v21  ;;  %v6351_v23 = vpop.f32.mrb[37].mxu1 }
0x1082   :  { %v2503_v24 = vpop.f32.mrb[38].mxu1 }
0x1083   :  { %v2507_v25 = vmax.f32 %v2501_v22, 0.0  ;;  %v2504_v26 = vadd.f32 %v5333_v20, %v2503_v24  ;;  %v6352_v27 = vpop.f32.mrb[39].mxu1  ;;  %v8903_v20 = vshrl.u32 %v2804_v19, 7  ;;  %v7825_v22 = vld [vmem:[%s10596_s4] ss:$0 sm:$0xff] }
0x1085   :  { %v2508_v28 = vmax.f32 %v2504_v26, 0.0  ;;  %v8772_v29 = vadd.f32 %v2507_v25, %v8690_v52  ;;  %v7459_v52 = vld [vmem:[%s10592_s5 + $0x18] sm:$0xff]   ;;  %v2806_v21 = vsub.s32 0, %v8903_v20 }
0x1087   :  { %v8775_v30 = vadd.f32 %v2508_v28, %v8693_v53  ;;  %v7460_v53 = vld [vmem:[%s10592_s5 + $0x20] sm:$0xff]  }
0x1089   :  { %v2511_v31 = vpack.c.bf16 %v8775_v30, %v8772_v29 }
0x108b   :  { %6370 = vmatmul.mubr.bf16.vlgmr.msra.gmra.mrb[40].mxu0 %v2511_v31 }
0x108c   :  { %6409 = vmatprep.mubr.msk.bf16.mxu0 %vm7827_vm0, %v7826_v1  ;;  %6394 = vmatpush3.bf16.msra.mxu0 %v7424_v34  ;;  %v7474_v34 = vld [vmem:[%s10592_s5 + $0x90] sm:$0xff]  }
0x108d   :  { %6395 = vmatprep.subr.bf16.mxu0 %v7826_v1 }
0x1090   :  { %6396 = vmatpush3.bf16.msra.mxu0 %v7425_v35  ;;  %v7475_v35 = vld [vmem:[%s10592_s5 + $0x98] sm:$0xff]  }
0x1091   :  { %6397 = vmatprep.subr.bf16.mxu0 %v7826_v1 }
0x1094   :  { %6398 = vmatpush3.bf16.msra.mxu0 %v7426_v36  ;;  %v7476_v36 = vld [vmem:[%s10592_s5 + $0xa0] sm:$0xff]  }
0x1095   :  { %6399 = vmatprep.subr.bf16.mxu0 %v7826_v1 }
0x1098   :  { %6400 = vmatpush3.bf16.msra.mxu0 %v7427_v37  ;;  %v7477_v37 = vld [vmem:[%s10592_s5 + $0xa8] sm:$0xff]  }
0x1099   :  { %6401 = vmatprep.subr.bf16.mxu0 %v7826_v1 }
0x109c   :  { %6402 = vmatpush3.bf16.msra.mxu0 %v7428_v38  ;;  %v7478_v38 = vld [vmem:[%s10592_s5 + $0xb0] sm:$0xff]  }
0x109d   :  { %6403 = vmatprep.subr.bf16.mxu0 %v7826_v1 }
0x10a0   :  { %6404 = vmatpush3.bf16.msra.mxu0 %v7429_v59  ;;  %v7488_v59 = vld [vmem:[%s10592_s5 + $0xf8] sm:$0xff]  }
0x10a1   :  { %6405 = vmatprep.subr.bf16.mxu0 %v7826_v1 }
0x10a4   :  { %6406 = vmatpush3.bf16.msra.mxu0 %v7430_v60 }
0x10a5   :  { %6407 = vmatprep.subr.bf16.mxu0 %v7826_v1 }
0x10a8   :  { %6408 = vmatpush3.bf16.msra.mxu0 %v7431_v61  ;;  %v7489_v61 = vld [vmem:[%s10594_s6 + $0x1] ss:$0 sm:$0xff] }
0x10a9   :  { %6433 = vmatprep.subr.bf16.mxu0 %v7826_v1 }
0x115e   :  { %v2600_v40 = vpop.f32.mrb[40].mxu0 }
0x115f   :  { %v2601_v41 = vadd.f32 %v5342_v39, %v2600_v40  ;;  %v6371_v42 = vpop.f32.mrb[41].mxu0 }
0x1160   :  { %v2603_v43 = vpop.f32.mrb[42].mxu0 }
0x1161   :  { %v2604_v44 = vadd.f32 %v5342_v39, %v2603_v43  ;;  %v6372_v45 = vpop.f32.mrb[43].mxu0  ;;  %v2607_v46 = vmax.f32 %v2601_v41, 0.0  ;;  %v7479_v39 = vld [vmem:[%s10592_s5 + $0xb8] sm:$0xff]   ;;  %v7480_v41 = vld [vmem:[%s10594_s6] ss:$0 sm:$0xff] }
0x1163   :  { %v2608_v47 = vmax.f32 %v2604_v44, 0.0 }
0x1165   :  { %v2609_v48 = vpack.c.bf16 %v2608_v47, %v2607_v46 }
0x1167   :  { %6390 = vmatmul.mubr.bf16.vlgmr.msra.gmra.mrb[40].mxu1 %v2609_v48 }
0x1168   :  { %6414 = vmatpush3.bf16.msra.mxu1 %v7456_v49  ;;  %6429 = vmatprep.mubr.msk.bf16.mxu1 %vm7827_vm0, %v7826_v1 }
0x1169   :  { %6415 = vmatprep.subr.bf16.mxu1 %v7826_v1 }
0x116c   :  { %6416 = vmatpush3.bf16.msra.mxu1 %v7457_v50  ;;  %v7481_v50 = vld [vmem:[%s10592_s5 + $0xc0] sm:$0xff]  }
0x116d   :  { %6417 = vmatprep.subr.bf16.mxu1 %v7826_v1 }
0x1170   :  { %6418 = vmatpush3.bf16.msra.mxu1 %v7458_v51  ;;  %v7482_v51 = vld [vmem:[%s10592_s5 + $0xc8] sm:$0xff]  }
0x1171   :  { %6419 = vmatprep.subr.bf16.mxu1 %v7826_v1 }
0x1174   :  { %6420 = vmatpush3.bf16.msra.mxu1 %v7459_v52  ;;  %v7483_v52 = vld [vmem:[%s10592_s5 + $0xd0] sm:$0xff]  }
0x1175   :  { %6421 = vmatprep.subr.bf16.mxu1 %v7826_v1 }
0x1178   :  { %6422 = vmatpush3.bf16.msra.mxu1 %v7460_v53  ;;  %v7484_v53 = vld [vmem:[%s10592_s5 + $0xd8] sm:$0xff]  }
0x1179   :  { %6423 = vmatprep.subr.bf16.mxu1 %v7826_v1 }
0x117c   :  { %6424 = vmatpush3.bf16.msra.mxu1 %v7461_v55  ;;  %v7485_v55 = vld [vmem:[%s10592_s5 + $0xe0] sm:$0xff]  }
0x117d   :  { %6425 = vmatprep.subr.bf16.mxu1 %v7826_v1 }
0x1180   :  { %6426 = vmatpush3.bf16.msra.mxu1 %v7462_v57  ;;  %v7486_v57 = vld [vmem:[%s10592_s5 + $0xe8] sm:$0xff]  }
0x1181   :  { %6427 = vmatprep.subr.bf16.mxu1 %v7826_v1 }
0x1184   :  { %6428 = vmatpush3.bf16.msra.mxu1 %v7463_v58  ;;  %v7487_v58 = vld [vmem:[%s10592_s5 + $0xf0] sm:$0xff]  }
0x1185   :  { %6453 = vmatprep.subr.bf16.mxu1 %v7826_v1 }
0x123a   :  { %v2698_v63 = vpop.f32.mrb[40].mxu1 }
0x123b   :  { %v2699_v0 = vadd.f32 %v5351_v62, %v2698_v63  ;;  %v6391_v2 = vpop.f32.mrb[41].mxu1 }
0x123c   :  { %v2701_v3 = vpop.f32.mrb[42].mxu1 }
0x123d   :  { %v2705_v4 = vmax.f32 %v2699_v0, 0.0  ;;  %v2702_v5 = vadd.f32 %v5351_v62, %v2701_v3  ;;  %v6392_v6 = vpop.f32.mrb[43].mxu1 }
0x123f   :  { %v2706_v7 = vmax.f32 %v2702_v5, 0.0  ;;  %v8862_v8 = vadd.f32 %v2705_v4, %v8772_v29 }
0x1241   :  { %v8865_v9 = vadd.f32 %v2706_v7, %v8775_v30 }
0x1243   :  { %v2711_v10 = vpack.c.bf16 %v8865_v9, %v8862_v8 }
0x1245   :  { %6410 = vmatmul.mubr.bf16.vlgmr.msra.gmra.mrb[44].mxu0 %v2711_v10 }
0x1246   :  { %6434 = vmatpush3.bf16.msra.mxu0 %v7464_v11  ;;  %6449 = vmatprep.mubr.msk.bf16.mxu0 %vm7827_vm0, %v7826_v1  ;;  %v7490_v11 = vld [vmem:[%s10592_s5 + $0x100] sm:$0xff]  }
0x1247   :  { %6435 = vmatprep.subr.bf16.mxu0 %v7826_v1 }
0x124a   :  { %6436 = vmatpush3.bf16.msra.mxu0 %v7465_v12  ;;  %v7491_v12 = vld [vmem:[%s10592_s5 + $0x108] sm:$0xff]  }
0x124b   :  { %6437 = vmatprep.subr.bf16.mxu0 %v7826_v1 }
0x124e   :  { %6438 = vmatpush3.bf16.msra.mxu0 %v7466_v13  ;;  %v7492_v13 = vld [vmem:[%s10592_s5 + $0x110] sm:$0xff]  }
0x124f   :  { %6439 = vmatprep.subr.bf16.mxu0 %v7826_v1 }
0x1252   :  { %6440 = vmatpush3.bf16.msra.mxu0 %v7467_v14  ;;  %v7493_v14 = vld [vmem:[%s10592_s5 + $0x118] sm:$0xff]  }
0x1253   :  { %6441 = vmatprep.subr.bf16.mxu0 %v7826_v1 }
0x1256   :  { %6442 = vmatpush3.bf16.msra.mxu0 %v7468_v15  ;;  %v7494_v15 = vld [vmem:[%s10592_s5 + $0x120] sm:$0xff]  }
0x1257   :  { %6443 = vmatprep.subr.bf16.mxu0 %v7826_v1 }
0x125a   :  { %6444 = vmatpush3.bf16.msra.mxu0 %v7469_v16  ;;  %v7495_v16 = vld [vmem:[%s10592_s5 + $0x128] sm:$0xff]  }
0x125b   :  { %6445 = vmatprep.subr.bf16.mxu0 %v7826_v1 }
0x125e   :  { %6446 = vmatpush3.bf16.msra.mxu0 %v7470_v17  ;;  %v7496_v17 = vld [vmem:[%s10592_s5 + $0x130] sm:$0xff]  }
0x125f   :  { %6447 = vmatprep.subr.bf16.mxu0 %v7826_v1 }
0x1262   :  { %6448 = vmatpush3.bf16.msra.mxu0 %v7471_v18  ;;  %v7497_v18 = vld [vmem:[%s10592_s5 + $0x138] sm:$0xff]  }
0x1263   :  { %6473 = vmatprep.subr.bf16.mxu0 %v7826_v1 }
0x1318   :  { %v2794_v23 = vpop.f32.mrb[44].mxu0 }
0x1319   :  { %v2801_v24 = vadd.f32 %v2794_v23, %v8035_v54  ;;  %v6411_v25 = vpop.f32.mrb[45].mxu0 }
0x131a   :  { %v2797_v26 = vpop.f32.mrb[46].mxu0 }
0x131b   :  { %v2802_v27 = vadd.f32 %v2797_v26, %v8037_v56  ;;  %v6412_v28 = vpop.f32.mrb[47].mxu0  ;;  %v8911_v29 = vadd.f32 %v7825_v22, %v2801_v24 }
0x131d   :  { %v8913_v30 = vadd.f32 %v7825_v22, %v2802_v27  ;;  %v7498_v22 = vld [vmem:[%s10594_s6 + $0x2] ss:$0 sm:$0xff] }
0x131f   :  { %v2811_v31 = vpack.c.bf16 %v8913_v30, %v8911_v29 }
0x1321   :  { %6430 = vmatmul.mubr.bf16.vlgmr.msra.gmra.mrb[44].mxu1 %v2811_v31  ;;  %v7499_v31 = vld [vmem:[%s10592_s5 + $0x140] sm:$0xff]  }
0x1322   :  { %6454 = vmatpush3.bf16.msra.mxu1 %v7472_v32  ;;  %6469 = vmatprep.mubr.msk.bf16.mxu1 %vm7827_vm0, %v7826_v1  ;;  %v7500_v32 = vld [vmem:[%s10592_s5 + $0x148] sm:$0xff]  }
0x1323   :  { %6455 = vmatprep.subr.bf16.mxu1 %v7826_v1 }
0x1326   :  { %6456 = vmatpush3.bf16.msra.mxu1 %v7473_v33  ;;  %v7501_v33 = vld [vmem:[%s10592_s5 + $0x150] sm:$0xff]  }
0x1327   :  { %6457 = vmatprep.subr.bf16.mxu1 %v7826_v1 }
0x132a   :  { %6458 = vmatpush3.bf16.msra.mxu1 %v7474_v34  ;;  %v7502_v34 = vld [vmem:[%s10592_s5 + $0x158] sm:$0xff]  }
0x132b   :  { %6459 = vmatprep.subr.bf16.mxu1 %v7826_v1 }
0x132e   :  { %6460 = vmatpush3.bf16.msra.mxu1 %v7475_v35  ;;  %v7503_v35 = vld [vmem:[%s10592_s5 + $0x160] sm:$0xff]  }
0x132f   :  { %6461 = vmatprep.subr.bf16.mxu1 %v7826_v1 }
0x1332   :  { %6462 = vmatpush3.bf16.msra.mxu1 %v7476_v36  ;;  %v7504_v36 = vld [vmem:[%s10592_s5 + $0x168] sm:$0xff]  }
0x1333   :  { %6463 = vmatprep.subr.bf16.mxu1 %v7826_v1 }
0x1336   :  { %6464 = vmatpush3.bf16.msra.mxu1 %v7477_v37  ;;  %v7505_v37 = vld [vmem:[%s10592_s5 + $0x170] sm:$0xff]  }
0x1337   :  { %6465 = vmatprep.subr.bf16.mxu1 %v7826_v1 }
0x133a   :  { %6466 = vmatpush3.bf16.msra.mxu1 %v7478_v38  ;;  %v7506_v38 = vld [vmem:[%s10592_s5 + $0x178] sm:$0xff]  }
0x133b   :  { %6467 = vmatprep.subr.bf16.mxu1 %v7826_v1 }
0x133e   :  { %6468 = vmatpush3.bf16.msra.mxu1 %v7479_v39 }
0x133f   :  { %6493 = vmatprep.subr.bf16.mxu1 %v7826_v1 }
0x13f4   :  { %v2846_v40 = vpop.f32.mrb[44].mxu1 }
0x13f5   :  { %v2847_v42 = vadd.f32 %v7480_v41, %v2846_v40  ;;  %v6431_v43 = vpop.f32.mrb[45].mxu1  ;;  %v7507_v40 = vld [vmem:[%s10594_s6 + $0x3] ss:$0 sm:$0xff] }
0x13f6   :  { %v2849_v44 = vpop.f32.mrb[46].mxu1 }
0x13f7   :  { %v2850_v45 = vadd.f32 %v7480_v41, %v2849_v44  ;;  %v6432_v46 = vpop.f32.mrb[47].mxu1  ;;  %v2853_v47 = vmax.f32 %v2847_v42, 0.0 }
0x13f9   :  { %v2854_v48 = vmax.f32 %v2850_v45, 0.0 }
0x13fb   :  { %v2855_v49 = vpack.c.bf16 %v2854_v48, %v2853_v47 }
0x13fd   :  { %6450 = vmatmul.mubr.bf16.vlgmr.msra.gmra.mrb[48].mxu0 %v2855_v49 }
0x13fe   :  { %6474 = vmatpush3.bf16.msra.mxu0 %v7481_v50  ;;  %6489 = vmatprep.mubr.msk.bf16.mxu0 %vm7827_vm0, %v7826_v1 }
0x13ff   :  { %6475 = vmatprep.subr.bf16.mxu0 %v7826_v1 }
0x1402   :  { %6476 = vmatpush3.bf16.msra.mxu0 %v7482_v51  ;;  %v7508_v51 = vld [vmem:[%s10592_s5 + $0x180] sm:$0xff]  }
0x1403   :  { %6477 = vmatprep.subr.bf16.mxu0 %v7826_v1 }
0x1406   :  { %6478 = vmatpush3.bf16.msra.mxu0 %v7483_v52  ;;  %v7509_v52 = vld [vmem:[%s10592_s5 + $0x188] sm:$0xff]  }
0x1407   :  { %6479 = vmatprep.subr.bf16.mxu0 %v7826_v1 }
0x140a   :  { %6480 = vmatpush3.bf16.msra.mxu0 %v7484_v53  ;;  %v7510_v53 = vld [vmem:[%s10592_s5 + $0x190] sm:$0xff]  }
0x140b   :  { %6481 = vmatprep.subr.bf16.mxu0 %v7826_v1 }
0x140e   :  { %6482 = vmatpush3.bf16.msra.mxu0 %v7485_v55  ;;  %v7511_v55 = vld [vmem:[%s10592_s5 + $0x198] sm:$0xff]  }
0x140f   :  { %6483 = vmatprep.subr.bf16.mxu0 %v7826_v1 }
0x1412   :  { %6484 = vmatpush3.bf16.msra.mxu0 %v7486_v57  ;;  %v7512_v57 = vld [vmem:[%s10592_s5 + $0x1a0] sm:$0xff]  }
0x1413   :  { %6485 = vmatprep.subr.bf16.mxu0 %v7826_v1 }
0x1416   :  { %6486 = vmatpush3.bf16.msra.mxu0 %v7487_v58  ;;  %v7513_v58 = vld [vmem:[%s10592_s5 + $0x1a8] sm:$0xff]  }
0x1417   :  { %6487 = vmatprep.subr.bf16.mxu0 %v7826_v1 }
0x141a   :  { %6488 = vmatpush3.bf16.msra.mxu0 %v7488_v59  ;;  %v7514_v59 = vld [vmem:[%s10592_s5 + $0x1b0] sm:$0xff]  }
0x141b   :  { %6513 = vmatprep.subr.bf16.mxu0 %v7826_v1 }
0x14d0   :  { %v2890_v60 = vpop.f32.mrb[48].mxu0 }
0x14d1   :  { %v2891_v62 = vadd.f32 %v7489_v61, %v2890_v60  ;;  %v6451_v63 = vpop.f32.mrb[49].mxu0  ;;  %v7515_v60 = vld [vmem:[%s10592_s5 + $0x1b8] sm:$0xff]  }
0x14d2   :  { %v2893_v0 = vpop.f32.mrb[50].mxu0 }
0x14d3   :  { %v2897_v2 = vmax.f32 %v2891_v62, 0.0  ;;  %v2894_v3 = vadd.f32 %v7489_v61, %v2893_v0  ;;  %v6452_v4 = vpop.f32.mrb[51].mxu0  ;;  %v7516_v62 = vld [vmem:[%s10594_s6 + $0x4] ss:$0 sm:$0xff] }
0x14d5   :  { %v2898_v5 = vmax.f32 %v2894_v3, 0.0  ;;  %v8992_v6 = vadd.f32 %v2897_v2, %v8911_v29 }
0x14d7   :  { %v8995_v7 = vadd.f32 %v2898_v5, %v8913_v30 }
0x14d9   :  { %v2901_v10 = vpack.c.bf16 %v8995_v7, %v8992_v6 }
0x14db   :  { %6470 = vmatmul.mubr.bf16.vlgmr.msra.gmra.mrb[48].mxu1 %v2901_v10  ;;  %v7517_v10 = vld [vmem:[%s10592_s5 + $0x1c0] sm:$0xff]  }
0x14dc   :  { %6494 = vmatpush3.bf16.msra.mxu1 %v7490_v11  ;;  %6509 = vmatprep.mubr.msk.bf16.mxu1 %vm7827_vm0, %v7826_v1  ;;  %v7518_v11 = vld [vmem:[%s10592_s5 + $0x1c8] sm:$0xff]  }
0x14dd   :  { %6495 = vmatprep.subr.bf16.mxu1 %v7826_v1 }
0x14e0   :  { %6496 = vmatpush3.bf16.msra.mxu1 %v7491_v12  ;;  %v7519_v12 = vld [vmem:[%s10592_s5 + $0x1d0] sm:$0xff]  }
0x14e1   :  { %6497 = vmatprep.subr.bf16.mxu1 %v7826_v1 }
0x14e4   :  { %6498 = vmatpush3.bf16.msra.mxu1 %v7492_v13  ;;  %v7520_v13 = vld [vmem:[%s10592_s5 + $0x1d8] sm:$0xff]  }
0x14e5   :  { %6499 = vmatprep.subr.bf16.mxu1 %v7826_v1 }
0x14e8   :  { %6500 = vmatpush3.bf16.msra.mxu1 %v7493_v14  ;;  %v7521_v14 = vld [vmem:[%s10592_s5 + $0x1e0] sm:$0xff]  }
0x14e9   :  { %6501 = vmatprep.subr.bf16.mxu1 %v7826_v1 }
0x14ec   :  { %6502 = vmatpush3.bf16.msra.mxu1 %v7494_v15  ;;  %v7522_v15 = vld [vmem:[%s10592_s5 + $0x1e8] sm:$0xff]  }
0x14ed   :  { %6503 = vmatprep.subr.bf16.mxu1 %v7826_v1 }
0x14f0   :  { %6504 = vmatpush3.bf16.msra.mxu1 %v7495_v16  ;;  %v7523_v16 = vld [vmem:[%s10592_s5 + $0x1f0] sm:$0xff]  }
0x14f1   :  { %6505 = vmatprep.subr.bf16.mxu1 %v7826_v1 }
0x14f4   :  { %6506 = vmatpush3.bf16.msra.mxu1 %v7496_v17  ;;  %v7524_v17 = vld [vmem:[%s10592_s5 + $0x1f8] sm:$0xff]  }
0x14f5   :  { %6507 = vmatprep.subr.bf16.mxu1 %v7826_v1 }
0x14f8   :  { %6508 = vmatpush3.bf16.msra.mxu1 %v7497_v18 }
0x14f9   :  { %6533 = vmatprep.subr.bf16.mxu1 %v7826_v1 }
0x15ae   :  { %v2936_v19 = vpop.f32.mrb[48].mxu1 }
0x15af   :  { %v2937_v23 = vadd.f32 %v7498_v22, %v2936_v19  ;;  %v6471_v24 = vpop.f32.mrb[49].mxu1  ;;  %v7525_v19 = vld [vmem:[%s10594_s6 + $0x5] ss:$0 sm:$0xff] }
0x15b0   :  { %v2939_v25 = vpop.f32.mrb[50].mxu1 }
0x15b1   :  { %v2940_v26 = vadd.f32 %v7498_v22, %v2939_v25  ;;  %v6472_v27 = vpop.f32.mrb[51].mxu1  ;;  %v2943_v28 = vmax.f32 %v2937_v23, 0.0 }
0x15b3   :  { %v2944_v29 = vmax.f32 %v2940_v26, 0.0 }
0x15b5   :  { %v2945_v30 = vpack.c.bf16 %v2944_v29, %v2943_v28 }
0x15b7   :  { %6490 = vmatmul.mubr.bf16.vlgmr.msra.gmra.mrb[52].mxu0 %v2945_v30 }
0x15b8   :  { %6514 = vmatpush3.bf16.msra.mxu0 %v7499_v31  ;;  %6529 = vmatprep.mubr.msk.bf16.mxu0 %vm7827_vm0, %v7826_v1 }
0x15b9   :  { %6515 = vmatprep.subr.bf16.mxu0 %v7826_v1 }
0x15bc   :  { %6516 = vmatpush3.bf16.msra.mxu0 %v7500_v32  ;;  %v7526_v32 = vld [vmem:[%s10592_s5 + $0x200] sm:$0xff]  }
0x15bd   :  { %6517 = vmatprep.subr.bf16.mxu0 %v7826_v1 }
0x15c0   :  { %6518 = vmatpush3.bf16.msra.mxu0 %v7501_v33  ;;  %v7527_v33 = vld [vmem:[%s10592_s5 + $0x208] sm:$0xff]  }
0x15c1   :  { %6519 = vmatprep.subr.bf16.mxu0 %v7826_v1 }
0x15c4   :  { %6520 = vmatpush3.bf16.msra.mxu0 %v7502_v34  ;;  %v7528_v34 = vld [vmem:[%s10592_s5 + $0x210] sm:$0xff]  }
0x15c5   :  { %6521 = vmatprep.subr.bf16.mxu0 %v7826_v1 }
0x15c8   :  { %6522 = vmatpush3.bf16.msra.mxu0 %v7503_v35  ;;  %v7529_v35 = vld [vmem:[%s10592_s5 + $0x218] sm:$0xff]  }
0x15c9   :  { %6523 = vmatprep.subr.bf16.mxu0 %v7826_v1 }
0x15cc   :  { %6524 = vmatpush3.bf16.msra.mxu0 %v7504_v36  ;;  %v7530_v36 = vld [vmem:[%s10592_s5 + $0x220] sm:$0xff]  }
0x15cd   :  { %6525 = vmatprep.subr.bf16.mxu0 %v7826_v1 }
0x15d0   :  { %6526 = vmatpush3.bf16.msra.mxu0 %v7505_v37  ;;  %v7531_v37 = vld [vmem:[%s10592_s5 + $0x228] sm:$0xff]  }
0x15d1   :  { %6527 = vmatprep.subr.bf16.mxu0 %v7826_v1 }
0x15d4   :  { %6528 = vmatpush3.bf16.msra.mxu0 %v7506_v38  ;;  %v7532_v38 = vld [vmem:[%s10592_s5 + $0x230] sm:$0xff]  }
0x15d5   :  { %6553 = vmatprep.subr.bf16.mxu0 %v7826_v1 }
0x168a   :  { %v2980_v39 = vpop.f32.mrb[52].mxu0 }
0x168b   :  { %v2981_v41 = vadd.f32 %v7507_v40, %v2980_v39  ;;  %v6491_v42 = vpop.f32.mrb[53].mxu0  ;;  %v7533_v39 = vld [vmem:[%s10592_s5 + $0x238] sm:$0xff]  }
0x168c   :  { %v2983_v43 = vpop.f32.mrb[54].mxu0 }
0x168d   :  { %v2987_v44 = vmax.f32 %v2981_v41, 0.0  ;;  %v2984_v45 = vadd.f32 %v7507_v40, %v2983_v43  ;;  %v6492_v46 = vpop.f32.mrb[55].mxu0  ;;  %v7534_v41 = vld [vmem:[%s10594_s6 + $0x6] ss:$0 sm:$0xff] }
0x168f   :  { %v2988_v47 = vmax.f32 %v2984_v45, 0.0  ;;  %v9074_v48 = vadd.f32 %v2987_v44, %v8992_v6 }
0x1691   :  { %v9077_v49 = vadd.f32 %v2988_v47, %v8995_v7 }
0x1693   :  { %v2991_v50 = vpack.c.bf16 %v9077_v49, %v9074_v48 }
0x1695   :  { %6510 = vmatmul.mubr.bf16.vlgmr.msra.gmra.mrb[52].mxu1 %v2991_v50  ;;  %v7535_v50 = vld [vmem:[%s10592_s5 + $0x240] sm:$0xff]  }
0x1696   :  { %6534 = vmatpush3.bf16.msra.mxu1 %v7508_v51  ;;  %6549 = vmatprep.mubr.msk.bf16.mxu1 %vm7827_vm0, %v7826_v1  ;;  %v7536_v51 = vld [vmem:[%s10592_s5 + $0x248] sm:$0xff]  }
0x1697   :  { %6535 = vmatprep.subr.bf16.mxu1 %v7826_v1 }
0x169a   :  { %6536 = vmatpush3.bf16.msra.mxu1 %v7509_v52  ;;  %v7537_v52 = vld [vmem:[%s10592_s5 + $0x250] sm:$0xff]  }
0x169b   :  { %6537 = vmatprep.subr.bf16.mxu1 %v7826_v1 }
0x169e   :  { %6538 = vmatpush3.bf16.msra.mxu1 %v7510_v53  ;;  %v7538_v53 = vld [vmem:[%s10592_s5 + $0x258] sm:$0xff]  }
0x169f   :  { %6539 = vmatprep.subr.bf16.mxu1 %v7826_v1 }
0x16a2   :  { %6540 = vmatpush3.bf16.msra.mxu1 %v7511_v55  ;;  %v7539_v55 = vld [vmem:[%s10592_s5 + $0x260] sm:$0xff]  }
0x16a3   :  { %6541 = vmatprep.subr.bf16.mxu1 %v7826_v1 }
0x16a6   :  { %6542 = vmatpush3.bf16.msra.mxu1 %v7512_v57  ;;  %v7540_v57 = vld [vmem:[%s10592_s5 + $0x268] sm:$0xff]  }
0x16a7   :  { %6543 = vmatprep.subr.bf16.mxu1 %v7826_v1 }
0x16aa   :  { %6544 = vmatpush3.bf16.msra.mxu1 %v7513_v58  ;;  %v7541_v58 = vld [vmem:[%s10592_s5 + $0x270] sm:$0xff]  }
0x16ab   :  { %6545 = vmatprep.subr.bf16.mxu1 %v7826_v1 }
0x16ae   :  { %6546 = vmatpush3.bf16.msra.mxu1 %v7514_v59  ;;  %v7542_v59 = vld [vmem:[%s10592_s5 + $0x278] sm:$0xff]  }
0x16af   :  { %6547 = vmatprep.subr.bf16.mxu1 %v7826_v1 }
0x16b2   :  { %6548 = vmatpush3.bf16.msra.mxu1 %v7515_v60 }
0x16b3   :  { %6573 = vmatprep.subr.bf16.mxu1 %v7826_v1 }
0x1768   :  { %v3026_v61 = vpop.f32.mrb[52].mxu1 }
0x1769   :  { %v3027_v63 = vadd.f32 %v7516_v62, %v3026_v61  ;;  %v6511_v0 = vpop.f32.mrb[53].mxu1  ;;  %v7543_v61 = vld [vmem:[%s10594_s6 + $0x7] ss:$0 sm:$0xff] }
0x176a   :  { %v3029_v2 = vpop.f32.mrb[54].mxu1 }
0x176b   :  { %v3030_v3 = vadd.f32 %v7516_v62, %v3029_v2  ;;  %v6512_v4 = vpop.f32.mrb[55].mxu1  ;;  %v3033_v5 = vmax.f32 %v3027_v63, 0.0 }
0x176d   :  { %v3034_v6 = vmax.f32 %v3030_v3, 0.0 }
0x176f   :  { %v3035_v7 = vpack.c.bf16 %v3034_v6, %v3033_v5 }
0x1771   :  { %6530 = vmatmul.mubr.bf16.vlgmr.msra.gmra.mrb[56].mxu0 %v3035_v7 }
0x1772   :  { %6554 = vmatpush3.bf16.msra.mxu0 %v7517_v10  ;;  %6569 = vmatprep.mubr.msk.bf16.mxu0 %vm7827_vm0, %v7826_v1 }
0x1773   :  { %6555 = vmatprep.subr.bf16.mxu0 %v7826_v1 }
0x1776   :  { %6556 = vmatpush3.bf16.msra.mxu0 %v7518_v11  ;;  %v7544_v11 = vld [vmem:[%s10592_s5 + $0x280] sm:$0xff]  }
0x1777   :  { %6557 = vmatprep.subr.bf16.mxu0 %v7826_v1 }
0x177a   :  { %6558 = vmatpush3.bf16.msra.mxu0 %v7519_v12  ;;  %v7545_v12 = vld [vmem:[%s10592_s5 + $0x288] sm:$0xff]  }
0x177b   :  { %6559 = vmatprep.subr.bf16.mxu0 %v7826_v1 }
0x177e   :  { %6560 = vmatpush3.bf16.msra.mxu0 %v7520_v13  ;;  %v7546_v13 = vld [vmem:[%s10592_s5 + $0x290] sm:$0xff]  }
0x177f   :  { %6561 = vmatprep.subr.bf16.mxu0 %v7826_v1 }
0x1782   :  { %6562 = vmatpush3.bf16.msra.mxu0 %v7521_v14  ;;  %v7547_v14 = vld [vmem:[%s10592_s5 + $0x298] sm:$0xff]  }
0x1783   :  { %6563 = vmatprep.subr.bf16.mxu0 %v7826_v1 }
0x1786   :  { %6564 = vmatpush3.bf16.msra.mxu0 %v7522_v15  ;;  %v7548_v15 = vld [vmem:[%s10592_s5 + $0x2a0] sm:$0xff]  }
0x1787   :  { %6565 = vmatprep.subr.bf16.mxu0 %v7826_v1 }
0x178a   :  { %6566 = vmatpush3.bf16.msra.mxu0 %v7523_v16  ;;  %v7549_v16 = vld [vmem:[%s10592_s5 + $0x2a8] sm:$0xff]  }
0x178b   :  { %6567 = vmatprep.subr.bf16.mxu0 %v7826_v1 }
0x178e   :  { %6568 = vmatpush3.bf16.msra.mxu0 %v7524_v17  ;;  %v7550_v17 = vld [vmem:[%s10592_s5 + $0x2b0] sm:$0xff]  }
0x178f   :  { %6593 = vmatprep.subr.bf16.mxu0 %v7826_v1 }
0x1844   :  { %v3070_v18 = vpop.f32.mrb[56].mxu0 }
0x1845   :  { %v3071_v22 = vadd.f32 %v7525_v19, %v3070_v18  ;;  %v6531_v23 = vpop.f32.mrb[57].mxu0  ;;  %v7551_v18 = vld [vmem:[%s10592_s5 + $0x2b8] sm:$0xff]  }
0x1846   :  { %v3073_v24 = vpop.f32.mrb[58].mxu0 }
0x1847   :  { %v3077_v25 = vmax.f32 %v3071_v22, 0.0  ;;  %v3074_v26 = vadd.f32 %v7525_v19, %v3073_v24  ;;  %v6532_v27 = vpop.f32.mrb[59].mxu0  ;;  %v7552_v22 = vld [vmem:[%s10594_s6 + $0x8] ss:$0 sm:$0xff] }
0x1849   :  { %v3078_v28 = vmax.f32 %v3074_v26, 0.0  ;;  %v9156_v29 = vadd.f32 %v3077_v25, %v9074_v48 }
0x184b   :  { %v9159_v30 = vadd.f32 %v3078_v28, %v9077_v49 }
0x184d   :  { %v3081_v31 = vpack.c.bf16 %v9159_v30, %v9156_v29 }
0x184f   :  { %6550 = vmatmul.mubr.bf16.vlgmr.msra.gmra.mrb[56].mxu1 %v3081_v31  ;;  %v7553_v31 = vld [vmem:[%s10592_s5 + $0x2c0] sm:$0xff]  }
0x1850   :  { %6574 = vmatpush3.bf16.msra.mxu1 %v7526_v32  ;;  %6589 = vmatprep.mubr.msk.bf16.mxu1 %vm7827_vm0, %v7826_v1  ;;  %v7554_v32 = vld [vmem:[%s10592_s5 + $0x2c8] sm:$0xff]  }
0x1851   :  { %6575 = vmatprep.subr.bf16.mxu1 %v7826_v1 }
0x1854   :  { %6576 = vmatpush3.bf16.msra.mxu1 %v7527_v33  ;;  %v7555_v33 = vld [vmem:[%s10592_s5 + $0x2d0] sm:$0xff]  }
0x1855   :  { %6577 = vmatprep.subr.bf16.mxu1 %v7826_v1 }
0x1858   :  { %6578 = vmatpush3.bf16.msra.mxu1 %v7528_v34  ;;  %v7556_v34 = vld [vmem:[%s10592_s5 + $0x2d8] sm:$0xff]  }
0x1859   :  { %6579 = vmatprep.subr.bf16.mxu1 %v7826_v1 }
0x185c   :  { %6580 = vmatpush3.bf16.msra.mxu1 %v7529_v35  ;;  %v7557_v35 = vld [vmem:[%s10592_s5 + $0x2e0] sm:$0xff]  }
0x185d   :  { %6581 = vmatprep.subr.bf16.mxu1 %v7826_v1 }
0x1860   :  { %6582 = vmatpush3.bf16.msra.mxu1 %v7530_v36  ;;  %v7558_v36 = vld [vmem:[%s10592_s5 + $0x2e8] sm:$0xff]  }
0x1861   :  { %6583 = vmatprep.subr.bf16.mxu1 %v7826_v1 }
0x1864   :  { %6584 = vmatpush3.bf16.msra.mxu1 %v7531_v37  ;;  %v7559_v37 = vld [vmem:[%s10592_s5 + $0x2f0] sm:$0xff]  }
0x1865   :  { %6585 = vmatprep.subr.bf16.mxu1 %v7826_v1 }
0x1868   :  { %6586 = vmatpush3.bf16.msra.mxu1 %v7532_v38  ;;  %v7560_v38 = vld [vmem:[%s10592_s5 + $0x2f8] sm:$0xff]  }
0x1869   :  { %6587 = vmatprep.subr.bf16.mxu1 %v7826_v1 }
0x186c   :  { %6588 = vmatpush3.bf16.msra.mxu1 %v7533_v39 }
0x186d   :  { %6613 = vmatprep.subr.bf16.mxu1 %v7826_v1 }
0x1922   :  { %v3116_v40 = vpop.f32.mrb[56].mxu1 }
0x1923   :  { %v3117_v42 = vadd.f32 %v7534_v41, %v3116_v40  ;;  %v6551_v43 = vpop.f32.mrb[57].mxu1  ;;  %v7561_v40 = vld [vmem:[%s10594_s6 + $0x9] ss:$0 sm:$0xff] }
0x1924   :  { %v3119_v44 = vpop.f32.mrb[58].mxu1 }
0x1925   :  { %v3120_v45 = vadd.f32 %v7534_v41, %v3119_v44  ;;  %v6552_v46 = vpop.f32.mrb[59].mxu1  ;;  %v3123_v47 = vmax.f32 %v3117_v42, 0.0 }
0x1927   :  { %v3124_v48 = vmax.f32 %v3120_v45, 0.0 }
0x1929   :  { %v3125_v49 = vpack.c.bf16 %v3124_v48, %v3123_v47 }
0x192b   :  { %6570 = vmatmul.mubr.bf16.vlgmr.msra.gmra.mrb[60].mxu0 %v3125_v49 }
0x192c   :  { %6594 = vmatpush3.bf16.msra.mxu0 %v7535_v50  ;;  %6609 = vmatprep.mubr.msk.bf16.mxu0 %vm7827_vm0, %v7826_v1 }
0x192d   :  { %6595 = vmatprep.subr.bf16.mxu0 %v7826_v1 }
0x1930   :  { %6596 = vmatpush3.bf16.msra.mxu0 %v7536_v51  ;;  %v7562_v51 = vld [vmem:[%s10592_s5 + $0x300] sm:$0xff]  }
0x1931   :  { %6597 = vmatprep.subr.bf16.mxu0 %v7826_v1 }
0x1934   :  { %6598 = vmatpush3.bf16.msra.mxu0 %v7537_v52  ;;  %v7563_v52 = vld [vmem:[%s10592_s5 + $0x308] sm:$0xff]  }
0x1935   :  { %6599 = vmatprep.subr.bf16.mxu0 %v7826_v1 }
0x1938   :  { %6600 = vmatpush3.bf16.msra.mxu0 %v7538_v53  ;;  %v7564_v53 = vld [vmem:[%s10592_s5 + $0x310] sm:$0xff]  }
0x1939   :  { %6601 = vmatprep.subr.bf16.mxu0 %v7826_v1 }
0x193c   :  { %6602 = vmatpush3.bf16.msra.mxu0 %v7539_v55  ;;  %v7565_v55 = vld [vmem:[%s10592_s5 + $0x318] sm:$0xff]  }
0x193d   :  { %6603 = vmatprep.subr.bf16.mxu0 %v7826_v1 }
0x1940   :  { %6604 = vmatpush3.bf16.msra.mxu0 %v7540_v57  ;;  %v7566_v57 = vld [vmem:[%s10592_s5 + $0x320] sm:$0xff]  }
0x1941   :  { %6605 = vmatprep.subr.bf16.mxu0 %v7826_v1 }
0x1944   :  { %6606 = vmatpush3.bf16.msra.mxu0 %v7541_v58  ;;  %v7567_v58 = vld [vmem:[%s10592_s5 + $0x328] sm:$0xff]  }
0x1945   :  { %6607 = vmatprep.subr.bf16.mxu0 %v7826_v1 }
0x1948   :  { %6608 = vmatpush3.bf16.msra.mxu0 %v7542_v59  ;;  %v7568_v59 = vld [vmem:[%s10592_s5 + $0x330] sm:$0xff]  }
0x1949   :  { %6633 = vmatprep.subr.bf16.mxu0 %v7826_v1 }
0x19fe   :  { %v3160_v60 = vpop.f32.mrb[60].mxu0 }
0x19ff   :  { %v3161_v62 = vadd.f32 %v7543_v61, %v3160_v60  ;;  %v6571_v63 = vpop.f32.mrb[61].mxu0  ;;  %v7569_v60 = vld [vmem:[%s10592_s5 + $0x338] sm:$0xff]  }
0x1a00   :  { %v3163_v0 = vpop.f32.mrb[62].mxu0 }
0x1a01   :  { %v3167_v2 = vmax.f32 %v3161_v62, 0.0  ;;  %v3164_v3 = vadd.f32 %v7543_v61, %v3163_v0  ;;  %v6572_v4 = vpop.f32.mrb[63].mxu0  ;;  %v7570_v62 = vld [vmem:[%s10594_s6 + $0xa] ss:$0 sm:$0xff] }
0x1a03   :  { %v3168_v5 = vmax.f32 %v3164_v3, 0.0  ;;  %v9238_v6 = vadd.f32 %v3167_v2, %v9156_v29 }
0x1a05   :  { %v9241_v7 = vadd.f32 %v3168_v5, %v9159_v30 }
0x1a07   :  { %v3171_v10 = vpack.c.bf16 %v9241_v7, %v9238_v6 }
0x1a09   :  { %6590 = vmatmul.mubr.bf16.vlgmr.msra.gmra.mrb[60].mxu1 %v3171_v10  ;;  %v7571_v10 = vld [vmem:[%s10592_s5 + $0x340] sm:$0xff]  }
0x1a0a   :  { %6614 = vmatpush3.bf16.msra.mxu1 %v7544_v11  ;;  %6629 = vmatprep.mubr.msk.bf16.mxu1 %vm7827_vm0, %v7826_v1  ;;  %v7572_v11 = vld [vmem:[%s10592_s5 + $0x348] sm:$0xff]  }
0x1a0b   :  { %6615 = vmatprep.subr.bf16.mxu1 %v7826_v1 }
0x1a0e   :  { %6616 = vmatpush3.bf16.msra.mxu1 %v7545_v12  ;;  %v7573_v12 = vld [vmem:[%s10592_s5 + $0x350] sm:$0xff]  }
0x1a0f   :  { %6617 = vmatprep.subr.bf16.mxu1 %v7826_v1 }
0x1a12   :  { %6618 = vmatpush3.bf16.msra.mxu1 %v7546_v13  ;;  %v7574_v13 = vld [vmem:[%s10592_s5 + $0x358] sm:$0xff]  }
0x1a13   :  { %6619 = vmatprep.subr.bf16.mxu1 %v7826_v1 }
0x1a16   :  { %6620 = vmatpush3.bf16.msra.mxu1 %v7547_v14  ;;  %v7575_v14 = vld [vmem:[%s10592_s5 + $0x360] sm:$0xff]  }
0x1a17   :  { %6621 = vmatprep.subr.bf16.mxu1 %v7826_v1 }
0x1a1a   :  { %6622 = vmatpush3.bf16.msra.mxu1 %v7548_v15  ;;  %v7576_v15 = vld [vmem:[%s10592_s5 + $0x368] sm:$0xff]  }
0x1a1b   :  { %6623 = vmatprep.subr.bf16.mxu1 %v7826_v1 }
0x1a1e   :  { %6624 = vmatpush3.bf16.msra.mxu1 %v7549_v16  ;;  %v7577_v16 = vld [vmem:[%s10592_s5 + $0x370] sm:$0xff]  }
0x1a1f   :  { %6625 = vmatprep.subr.bf16.mxu1 %v7826_v1 }
0x1a22   :  { %6626 = vmatpush3.bf16.msra.mxu1 %v7550_v17  ;;  %v7578_v17 = vld [vmem:[%s10592_s5 + $0x378] sm:$0xff]  }
0x1a23   :  { %6627 = vmatprep.subr.bf16.mxu1 %v7826_v1 }
0x1a26   :  { %6628 = vmatpush3.bf16.msra.mxu1 %v7551_v18 }
0x1a27   :  { %6653 = vmatprep.subr.bf16.mxu1 %v7826_v1 }
0x1adc   :  { %v3206_v19 = vpop.f32.mrb[60].mxu1 }
0x1add   :  { %v3207_v23 = vadd.f32 %v7552_v22, %v3206_v19  ;;  %v6591_v24 = vpop.f32.mrb[61].mxu1  ;;  %v7579_v19 = vld [vmem:[%s10594_s6 + $0xb] ss:$0 sm:$0xff] }
0x1ade   :  { %v3209_v25 = vpop.f32.mrb[62].mxu1 }
0x1adf   :  { %v3210_v26 = vadd.f32 %v7552_v22, %v3209_v25  ;;  %v6592_v27 = vpop.f32.mrb[63].mxu1  ;;  %v3213_v28 = vmax.f32 %v3207_v23, 0.0 }
0x1ae1   :  { %v3214_v29 = vmax.f32 %v3210_v26, 0.0 }
0x1ae3   :  { %v3215_v30 = vpack.c.bf16 %v3214_v29, %v3213_v28 }
0x1ae5   :  { %6610 = vmatmul.mubr.bf16.vlgmr.msra.gmra.mrb[64].mxu0 %v3215_v30 }
0x1ae6   :  { %6634 = vmatpush3.bf16.msra.mxu0 %v7553_v31  ;;  %6649 = vmatprep.mubr.msk.bf16.mxu0 %vm7827_vm0, %v7826_v1 }
0x1ae7   :  { %6635 = vmatprep.subr.bf16.mxu0 %v7826_v1 }
0x1aea   :  { %6636 = vmatpush3.bf16.msra.mxu0 %v7554_v32  ;;  %v7580_v32 = vld [vmem:[%s10592_s5 + $0x380] sm:$0xff]  }
0x1aeb   :  { %6637 = vmatprep.subr.bf16.mxu0 %v7826_v1 }
0x1aee   :  { %6638 = vmatpush3.bf16.msra.mxu0 %v7555_v33  ;;  %v7581_v33 = vld [vmem:[%s10592_s5 + $0x388] sm:$0xff]  }
0x1aef   :  { %6639 = vmatprep.subr.bf16.mxu0 %v7826_v1 }
0x1af2   :  { %6640 = vmatpush3.bf16.msra.mxu0 %v7556_v34  ;;  %v7582_v34 = vld [vmem:[%s10592_s5 + $0x390] sm:$0xff]  }
0x1af3   :  { %6641 = vmatprep.subr.bf16.mxu0 %v7826_v1 }
0x1af6   :  { %6642 = vmatpush3.bf16.msra.mxu0 %v7557_v35  ;;  %v7583_v35 = vld [vmem:[%s10592_s5 + $0x398] sm:$0xff]  }
0x1af7   :  { %6643 = vmatprep.subr.bf16.mxu0 %v7826_v1 }
0x1afa   :  { %6644 = vmatpush3.bf16.msra.mxu0 %v7558_v36  ;;  %v7584_v36 = vld [vmem:[%s10592_s5 + $0x3a0] sm:$0xff]  }
0x1afb   :  { %6645 = vmatprep.subr.bf16.mxu0 %v7826_v1 }
0x1afe   :  { %6646 = vmatpush3.bf16.msra.mxu0 %v7559_v37  ;;  %v7585_v37 = vld [vmem:[%s10592_s5 + $0x3a8] sm:$0xff]  }
0x1aff   :  { %6647 = vmatprep.subr.bf16.mxu0 %v7826_v1 }
0x1b02   :  { %6648 = vmatpush3.bf16.msra.mxu0 %v7560_v38  ;;  %v7586_v38 = vld [vmem:[%s10592_s5 + $0x3b0] sm:$0xff]  }
0x1b03   :  { %6673 = vmatprep.subr.bf16.mxu0 %v7826_v1 }
0x1bb8   :  { %v3250_v39 = vpop.f32.mrb[64].mxu0 }
0x1bb9   :  { %v3251_v41 = vadd.f32 %v7561_v40, %v3250_v39  ;;  %v6611_v42 = vpop.f32.mrb[65].mxu0  ;;  %v7587_v39 = vld [vmem:[%s10592_s5 + $0x3b8] sm:$0xff]  }
0x1bba   :  { %v3253_v43 = vpop.f32.mrb[66].mxu0 }
0x1bbb   :  { %v3257_v44 = vmax.f32 %v3251_v41, 0.0  ;;  %v3254_v45 = vadd.f32 %v7561_v40, %v3253_v43  ;;  %v6612_v46 = vpop.f32.mrb[67].mxu0  ;;  %v7588_v41 = vld [vmem:[%s10594_s6 + $0xc] ss:$0 sm:$0xff] }
0x1bbd   :  { %v3258_v47 = vmax.f32 %v3254_v45, 0.0  ;;  %v9320_v48 = vadd.f32 %v3257_v44, %v9238_v6 }
0x1bbf   :  { %v9323_v49 = vadd.f32 %v3258_v47, %v9241_v7 }
0x1bc1   :  { %v3261_v50 = vpack.c.bf16 %v9323_v49, %v9320_v48 }
0x1bc3   :  { %6630 = vmatmul.mubr.bf16.vlgmr.msra.gmra.mrb[64].mxu1 %v3261_v50  ;;  %v7589_v50 = vld [vmem:[%s10592_s5 + $0x3c0] sm:$0xff]  }
0x1bc4   :  { %6654 = vmatpush3.bf16.msra.mxu1 %v7562_v51  ;;  %6669 = vmatprep.mubr.msk.bf16.mxu1 %vm7827_vm0, %v7826_v1  ;;  %v7590_v51 = vld [vmem:[%s10592_s5 + $0x3c8] sm:$0xff]  }
0x1bc5   :  { %6655 = vmatprep.subr.bf16.mxu1 %v7826_v1 }
0x1bc8   :  { %6656 = vmatpush3.bf16.msra.mxu1 %v7563_v52  ;;  %v7591_v52 = vld [vmem:[%s10592_s5 + $0x3d0] sm:$0xff]  }
0x1bc9   :  { %6657 = vmatprep.subr.bf16.mxu1 %v7826_v1 }
0x1bcc   :  { %6658 = vmatpush3.bf16.msra.mxu1 %v7564_v53  ;;  %v7592_v53 = vld [vmem:[%s10592_s5 + $0x3d8] sm:$0xff]  }
0x1bcd   :  { %6659 = vmatprep.subr.bf16.mxu1 %v7826_v1 }
0x1bd0   :  { %6660 = vmatpush3.bf16.msra.mxu1 %v7565_v55  ;;  %v7593_v55 = vld [vmem:[%s10592_s5 + $0x3e0] sm:$0xff]  }
0x1bd1   :  { %6661 = vmatprep.subr.bf16.mxu1 %v7826_v1 }
0x1bd4   :  { %6662 = vmatpush3.bf16.msra.mxu1 %v7566_v57  ;;  %v7594_v57 = vld [vmem:[%s10592_s5 + $0x3e8] sm:$0xff]  }
0x1bd5   :  { %6663 = vmatprep.subr.bf16.mxu1 %v7826_v1 }
0x1bd8   :  { %6664 = vmatpush3.bf16.msra.mxu1 %v7567_v58  ;;  %v7595_v58 = vld [vmem:[%s10592_s5 + $0x3f0] sm:$0xff]  }
0x1bd9   :  { %6665 = vmatprep.subr.bf16.mxu1 %v7826_v1 }
0x1bdc   :  { %6666 = vmatpush3.bf16.msra.mxu1 %v7568_v59  ;;  %v7596_v59 = vld [vmem:[%s10592_s5 + $0x3f8] sm:$0xff]  }
0x1bdd   :  { %6667 = vmatprep.subr.bf16.mxu1 %v7826_v1 }
0x1be0   :  { %6668 = vmatpush3.bf16.msra.mxu1 %v7569_v60 }
0x1be1   :  { %6693 = vmatprep.subr.bf16.mxu1 %v7826_v1 }
0x1c96   :  { %v3296_v61 = vpop.f32.mrb[64].mxu1 }
0x1c97   :  { %v3297_v63 = vadd.f32 %v7570_v62, %v3296_v61  ;;  %v6631_v0 = vpop.f32.mrb[65].mxu1  ;;  %v7597_v61 = vld [vmem:[%s10594_s6 + $0xd] ss:$0 sm:$0xff] }
0x1c98   :  { %v3299_v2 = vpop.f32.mrb[66].mxu1 }
0x1c99   :  { %v3300_v3 = vadd.f32 %v7570_v62, %v3299_v2  ;;  %v6632_v4 = vpop.f32.mrb[67].mxu1  ;;  %v3303_v5 = vmax.f32 %v3297_v63, 0.0 }
0x1c9b   :  { %v3304_v6 = vmax.f32 %v3300_v3, 0.0 }
0x1c9d   :  { %v3305_v7 = vpack.c.bf16 %v3304_v6, %v3303_v5 }
0x1c9f   :  { %6650 = vmatmul.mubr.bf16.vlgmr.msra.gmra.mrb[68].mxu0 %v3305_v7 }
0x1ca0   :  { %6674 = vmatpush3.bf16.msra.mxu0 %v7571_v10  ;;  %6689 = vmatprep.mubr.msk.bf16.mxu0 %vm7827_vm0, %v7826_v1 }
0x1ca1   :  { %6675 = vmatprep.subr.bf16.mxu0 %v7826_v1 }
0x1ca4   :  { %6676 = vmatpush3.bf16.msra.mxu0 %v7572_v11  ;;  %v7598_v11 = vld [vmem:[%s10592_s5 + $0x400] sm:$0xff]  }
0x1ca5   :  { %6677 = vmatprep.subr.bf16.mxu0 %v7826_v1 }
0x1ca8   :  { %6678 = vmatpush3.bf16.msra.mxu0 %v7573_v12  ;;  %v7599_v12 = vld [vmem:[%s10592_s5 + $0x408] sm:$0xff]  }
0x1ca9   :  { %6679 = vmatprep.subr.bf16.mxu0 %v7826_v1 }
0x1cac   :  { %6680 = vmatpush3.bf16.msra.mxu0 %v7574_v13  ;;  %v7600_v13 = vld [vmem:[%s10592_s5 + $0x410] sm:$0xff]  }
0x1cad   :  { %6681 = vmatprep.subr.bf16.mxu0 %v7826_v1 }
0x1cb0   :  { %6682 = vmatpush3.bf16.msra.mxu0 %v7575_v14  ;;  %v7601_v14 = vld [vmem:[%s10592_s5 + $0x418] sm:$0xff]  }
0x1cb1   :  { %6683 = vmatprep.subr.bf16.mxu0 %v7826_v1 }
0x1cb4   :  { %6684 = vmatpush3.bf16.msra.mxu0 %v7576_v15  ;;  %v7602_v15 = vld [vmem:[%s10592_s5 + $0x420] sm:$0xff]  }
0x1cb5   :  { %6685 = vmatprep.subr.bf16.mxu0 %v7826_v1 }
0x1cb8   :  { %6686 = vmatpush3.bf16.msra.mxu0 %v7577_v16  ;;  %v7603_v16 = vld [vmem:[%s10592_s5 + $0x428] sm:$0xff]  }
0x1cb9   :  { %6687 = vmatprep.subr.bf16.mxu0 %v7826_v1 }
0x1cbc   :  { %6688 = vmatpush3.bf16.msra.mxu0 %v7578_v17  ;;  %v7604_v17 = vld [vmem:[%s10592_s5 + $0x430] sm:$0xff]  }
0x1cbd   :  { %6713 = vmatprep.subr.bf16.mxu0 %v7826_v1 }
0x1d72   :  { %v3340_v18 = vpop.f32.mrb[68].mxu0 }
0x1d73   :  { %v3341_v22 = vadd.f32 %v7579_v19, %v3340_v18  ;;  %v6651_v23 = vpop.f32.mrb[69].mxu0  ;;  %v7605_v18 = vld [vmem:[%s10592_s5 + $0x438] sm:$0xff]  }
0x1d74   :  { %v3343_v24 = vpop.f32.mrb[70].mxu0 }
0x1d75   :  { %v3347_v25 = vmax.f32 %v3341_v22, 0.0  ;;  %v3344_v26 = vadd.f32 %v7579_v19, %v3343_v24  ;;  %v6652_v27 = vpop.f32.mrb[71].mxu0  ;;  %v7606_v22 = vld [vmem:[%s10594_s6 + $0xe] ss:$0 sm:$0xff] }
0x1d77   :  { %v3348_v28 = vmax.f32 %v3344_v26, 0.0  ;;  %v9402_v29 = vadd.f32 %v3347_v25, %v9320_v48 }
0x1d79   :  { %v9405_v30 = vadd.f32 %v3348_v28, %v9323_v49 }
0x1d7b   :  { %v3351_v31 = vpack.c.bf16 %v9405_v30, %v9402_v29 }
0x1d7d   :  { %6670 = vmatmul.mubr.bf16.vlgmr.msra.gmra.mrb[68].mxu1 %v3351_v31  ;;  %v7607_v31 = vld [vmem:[%s10592_s5 + $0x440] sm:$0xff]  }
0x1d7e   :  { %6694 = vmatpush3.bf16.msra.mxu1 %v7580_v32  ;;  %6709 = vmatprep.mubr.msk.bf16.mxu1 %vm7827_vm0, %v7826_v1  ;;  %v7608_v32 = vld [vmem:[%s10592_s5 + $0x448] sm:$0xff]  }
0x1d7f   :  { %6695 = vmatprep.subr.bf16.mxu1 %v7826_v1 }
0x1d82   :  { %6696 = vmatpush3.bf16.msra.mxu1 %v7581_v33  ;;  %v7609_v33 = vld [vmem:[%s10592_s5 + $0x450] sm:$0xff]  }
0x1d83   :  { %6697 = vmatprep.subr.bf16.mxu1 %v7826_v1 }
0x1d86   :  { %6698 = vmatpush3.bf16.msra.mxu1 %v7582_v34  ;;  %v7610_v34 = vld [vmem:[%s10592_s5 + $0x458] sm:$0xff]  }
0x1d87   :  { %6699 = vmatprep.subr.bf16.mxu1 %v7826_v1 }
0x1d8a   :  { %6700 = vmatpush3.bf16.msra.mxu1 %v7583_v35  ;;  %v7611_v35 = vld [vmem:[%s10592_s5 + $0x460] sm:$0xff]  }
0x1d8b   :  { %6701 = vmatprep.subr.bf16.mxu1 %v7826_v1 }
0x1d8e   :  { %6702 = vmatpush3.bf16.msra.mxu1 %v7584_v36  ;;  %v7612_v36 = vld [vmem:[%s10592_s5 + $0x468] sm:$0xff]  }
0x1d8f   :  { %6703 = vmatprep.subr.bf16.mxu1 %v7826_v1 }
0x1d92   :  { %6704 = vmatpush3.bf16.msra.mxu1 %v7585_v37  ;;  %v7613_v37 = vld [vmem:[%s10592_s5 + $0x470] sm:$0xff]  }
0x1d93   :  { %6705 = vmatprep.subr.bf16.mxu1 %v7826_v1 }
0x1d96   :  { %6706 = vmatpush3.bf16.msra.mxu1 %v7586_v38  ;;  %v7614_v38 = vld [vmem:[%s10592_s5 + $0x478] sm:$0xff]  }
0x1d97   :  { %6707 = vmatprep.subr.bf16.mxu1 %v7826_v1 }
0x1d9a   :  { %6708 = vmatpush3.bf16.msra.mxu1 %v7587_v39 }
0x1d9b   :  { %6733 = vmatprep.subr.bf16.mxu1 %v7826_v1 }
0x1e50   :  { %v3386_v40 = vpop.f32.mrb[68].mxu1 }
0x1e51   :  { %v3387_v42 = vadd.f32 %v7588_v41, %v3386_v40  ;;  %v6671_v43 = vpop.f32.mrb[69].mxu1  ;;  %v7615_v40 = vld [vmem:[%s10594_s6 + $0xf] ss:$0 sm:$0xff] }
0x1e52   :  { %v3389_v44 = vpop.f32.mrb[70].mxu1 }
0x1e53   :  { %v3390_v45 = vadd.f32 %v7588_v41, %v3389_v44  ;;  %v6672_v46 = vpop.f32.mrb[71].mxu1  ;;  %v3393_v47 = vmax.f32 %v3387_v42, 0.0 }
0x1e55   :  { %v3394_v48 = vmax.f32 %v3390_v45, 0.0 }
0x1e57   :  { %v3395_v49 = vpack.c.bf16 %v3394_v48, %v3393_v47 }
0x1e59   :  { %6690 = vmatmul.mubr.bf16.vlgmr.msra.gmra.mrb[72].mxu0 %v3395_v49 }
0x1e5a   :  { %6714 = vmatpush3.bf16.msra.mxu0 %v7589_v50  ;;  %6729 = vmatprep.mubr.msk.bf16.mxu0 %vm7827_vm0, %v7826_v1 }
0x1e5b   :  { %6715 = vmatprep.subr.bf16.mxu0 %v7826_v1 }
0x1e5e   :  { %6716 = vmatpush3.bf16.msra.mxu0 %v7590_v51  ;;  %v7616_v51 = vld [vmem:[%s10592_s5 + $0x480] sm:$0xff]  }
0x1e5f   :  { %6717 = vmatprep.subr.bf16.mxu0 %v7826_v1 }
0x1e62   :  { %6718 = vmatpush3.bf16.msra.mxu0 %v7591_v52  ;;  %v7617_v52 = vld [vmem:[%s10592_s5 + $0x488] sm:$0xff]  }
0x1e63   :  { %6719 = vmatprep.subr.bf16.mxu0 %v7826_v1 }
0x1e66   :  { %6720 = vmatpush3.bf16.msra.mxu0 %v7592_v53  ;;  %v7618_v53 = vld [vmem:[%s10592_s5 + $0x490] sm:$0xff]  }
0x1e67   :  { %6721 = vmatprep.subr.bf16.mxu0 %v7826_v1 }
0x1e6a   :  { %6722 = vmatpush3.bf16.msra.mxu0 %v7593_v55  ;;  %v7619_v55 = vld [vmem:[%s10592_s5 + $0x498] sm:$0xff]  }
0x1e6b   :  { %6723 = vmatprep.subr.bf16.mxu0 %v7826_v1 }
0x1e6e   :  { %6724 = vmatpush3.bf16.msra.mxu0 %v7594_v57  ;;  %v7620_v57 = vld [vmem:[%s10592_s5 + $0x4a0] sm:$0xff]  }
0x1e6f   :  { %6725 = vmatprep.subr.bf16.mxu0 %v7826_v1 }
0x1e72   :  { %6726 = vmatpush3.bf16.msra.mxu0 %v7595_v58  ;;  %v7621_v58 = vld [vmem:[%s10592_s5 + $0x4a8] sm:$0xff]  }
0x1e73   :  { %6727 = vmatprep.subr.bf16.mxu0 %v7826_v1 }
0x1e76   :  { %6728 = vmatpush3.bf16.msra.mxu0 %v7596_v59  ;;  %v7622_v59 = vld [vmem:[%s10592_s5 + $0x4b0] sm:$0xff]  }
0x1e77   :  { %6753 = vmatprep.subr.bf16.mxu0 %v7826_v1 }
0x1f2c   :  { %v3430_v60 = vpop.f32.mrb[72].mxu0 }
0x1f2d   :  { %v3431_v62 = vadd.f32 %v7597_v61, %v3430_v60  ;;  %v6691_v63 = vpop.f32.mrb[73].mxu0  ;;  %v7623_v60 = vld [vmem:[%s10592_s5 + $0x4b8] sm:$0xff]  }
0x1f2e   :  { %v3433_v0 = vpop.f32.mrb[74].mxu0 }
0x1f2f   :  { %v3437_v2 = vmax.f32 %v3431_v62, 0.0  ;;  %v3434_v3 = vadd.f32 %v7597_v61, %v3433_v0  ;;  %v6692_v4 = vpop.f32.mrb[75].mxu0  ;;  %v7624_v62 = vld [vmem:[%s10594_s6 + $0x10] ss:$0 sm:$0xff] }
0x1f31   :  { %v3438_v5 = vmax.f32 %v3434_v3, 0.0  ;;  %v9484_v6 = vadd.f32 %v3437_v2, %v9402_v29 }
0x1f33   :  { %v9487_v7 = vadd.f32 %v3438_v5, %v9405_v30 }
0x1f35   :  { %v3441_v10 = vpack.c.bf16 %v9487_v7, %v9484_v6 }
0x1f37   :  { %6710 = vmatmul.mubr.bf16.vlgmr.msra.gmra.mrb[72].mxu1 %v3441_v10  ;;  %v7625_v10 = vld [vmem:[%s10592_s5 + $0x4c0] sm:$0xff]  }
0x1f38   :  { %6734 = vmatpush3.bf16.msra.mxu1 %v7598_v11  ;;  %6749 = vmatprep.mubr.msk.bf16.mxu1 %vm7827_vm0, %v7826_v1  ;;  %v7626_v11 = vld [vmem:[%s10592_s5 + $0x4c8] sm:$0xff]  }
0x1f39   :  { %6735 = vmatprep.subr.bf16.mxu1 %v7826_v1 }
0x1f3c   :  { %6736 = vmatpush3.bf16.msra.mxu1 %v7599_v12  ;;  %v7627_v12 = vld [vmem:[%s10592_s5 + $0x4d0] sm:$0xff]  }
0x1f3d   :  { %6737 = vmatprep.subr.bf16.mxu1 %v7826_v1 }
0x1f40   :  { %6738 = vmatpush3.bf16.msra.mxu1 %v7600_v13  ;;  %v7628_v13 = vld [vmem:[%s10592_s5 + $0x4d8] sm:$0xff]  }
0x1f41   :  { %6739 = vmatprep.subr.bf16.mxu1 %v7826_v1 }
0x1f44   :  { %6740 = vmatpush3.bf16.msra.mxu1 %v7601_v14  ;;  %v7629_v14 = vld [vmem:[%s10592_s5 + $0x4e0] sm:$0xff]  }
0x1f45   :  { %6741 = vmatprep.subr.bf16.mxu1 %v7826_v1 }
0x1f48   :  { %6742 = vmatpush3.bf16.msra.mxu1 %v7602_v15  ;;  %v7630_v15 = vld [vmem:[%s10592_s5 + $0x4e8] sm:$0xff]  }
0x1f49   :  { %6743 = vmatprep.subr.bf16.mxu1 %v7826_v1 }
0x1f4c   :  { %6744 = vmatpush3.bf16.msra.mxu1 %v7603_v16  ;;  %v7631_v16 = vld [vmem:[%s10592_s5 + $0x4f0] sm:$0xff]  }
0x1f4d   :  { %6745 = vmatprep.subr.bf16.mxu1 %v7826_v1 }
0x1f50   :  { %6746 = vmatpush3.bf16.msra.mxu1 %v7604_v17  ;;  %v7632_v17 = vld [vmem:[%s10592_s5 + $0x4f8] sm:$0xff]  }
0x1f51   :  { %6747 = vmatprep.subr.bf16.mxu1 %v7826_v1 }
0x1f54   :  { %6748 = vmatpush3.bf16.msra.mxu1 %v7605_v18 }
0x1f55   :  { %6773 = vmatprep.subr.bf16.mxu1 %v7826_v1 }
0x200a   :  { %v3476_v19 = vpop.f32.mrb[72].mxu1 }
0x200b   :  { %v3477_v23 = vadd.f32 %v7606_v22, %v3476_v19  ;;  %v6711_v24 = vpop.f32.mrb[73].mxu1  ;;  %v7633_v19 = vld [vmem:[%s10594_s6 + $0x11] ss:$0 sm:$0xff] }
0x200c   :  { %v3479_v25 = vpop.f32.mrb[74].mxu1 }
0x200d   :  { %v3480_v26 = vadd.f32 %v7606_v22, %v3479_v25  ;;  %v6712_v27 = vpop.f32.mrb[75].mxu1  ;;  %v3483_v28 = vmax.f32 %v3477_v23, 0.0 }
0x200f   :  { %v3484_v29 = vmax.f32 %v3480_v26, 0.0 }
0x2011   :  { %v3485_v30 = vpack.c.bf16 %v3484_v29, %v3483_v28 }
0x2013   :  { %6730 = vmatmul.mubr.bf16.vlgmr.msra.gmra.mrb[76].mxu0 %v3485_v30 }
0x2014   :  { %6754 = vmatpush3.bf16.msra.mxu0 %v7607_v31  ;;  %6769 = vmatprep.mubr.msk.bf16.mxu0 %vm7827_vm0, %v7826_v1 }
0x2015   :  { %6755 = vmatprep.subr.bf16.mxu0 %v7826_v1 }
0x2018   :  { %6756 = vmatpush3.bf16.msra.mxu0 %v7608_v32  ;;  %v7634_v32 = vld [vmem:[%s10595_s3] sm:$0xff]  }
0x2019   :  { %6757 = vmatprep.subr.bf16.mxu0 %v7826_v1 }
0x201c   :  { %6758 = vmatpush3.bf16.msra.mxu0 %v7609_v33  ;;  %v7635_v33 = vld [vmem:[%s10595_s3 + $0x8] sm:$0xff]  }
0x201d   :  { %6759 = vmatprep.subr.bf16.mxu0 %v7826_v1 }
0x2020   :  { %6760 = vmatpush3.bf16.msra.mxu0 %v7610_v34  ;;  %v7636_v34 = vld [vmem:[%s10595_s3 + $0x10] sm:$0xff]  }
0x2021   :  { %6761 = vmatprep.subr.bf16.mxu0 %v7826_v1 }
0x2024   :  { %6762 = vmatpush3.bf16.msra.mxu0 %v7611_v35  ;;  %v7637_v35 = vld [vmem:[%s10595_s3 + $0x18] sm:$0xff]  }
0x2025   :  { %6763 = vmatprep.subr.bf16.mxu0 %v7826_v1 }
0x2028   :  { %6764 = vmatpush3.bf16.msra.mxu0 %v7612_v36  ;;  %v7638_v36 = vld [vmem:[%s10595_s3 + $0x20] sm:$0xff]  }
0x2029   :  { %6765 = vmatprep.subr.bf16.mxu0 %v7826_v1 }
0x202c   :  { %6766 = vmatpush3.bf16.msra.mxu0 %v7613_v37  ;;  %v7639_v37 = vld [vmem:[%s10595_s3 + $0x28] sm:$0xff]  }
0x202d   :  { %6767 = vmatprep.subr.bf16.mxu0 %v7826_v1 }
0x2030   :  { %6768 = vmatpush3.bf16.msra.mxu0 %v7614_v38  ;;  %v7640_v38 = vld [vmem:[%s10595_s3 + $0x30] sm:$0xff]  }
0x2031   :  { %6793 = vmatprep.subr.bf16.mxu0 %v7826_v1 }
0x20e6   :  { %v3520_v39 = vpop.f32.mrb[76].mxu0 }
0x20e7   :  { %v3521_v41 = vadd.f32 %v7615_v40, %v3520_v39  ;;  %v6731_v42 = vpop.f32.mrb[77].mxu0  ;;  %v7641_v39 = vld [vmem:[%s10595_s3 + $0x38] sm:$0xff]  }
0x20e8   :  { %v3523_v43 = vpop.f32.mrb[78].mxu0 }
0x20e9   :  { %v3527_v44 = vmax.f32 %v3521_v41, 0.0  ;;  %v3524_v45 = vadd.f32 %v7615_v40, %v3523_v43  ;;  %v6732_v46 = vpop.f32.mrb[79].mxu0  ;;  %v7642_v41 = vld [vmem:[%s10594_s6 + $0x12] ss:$0 sm:$0xff] }
0x20eb   :  { %v3528_v47 = vmax.f32 %v3524_v45, 0.0  ;;  %v9566_v48 = vadd.f32 %v3527_v44, %v9484_v6 }
0x20ed   :  { %v9569_v49 = vadd.f32 %v3528_v47, %v9487_v7 }
0x20ef   :  { %v3531_v50 = vpack.c.bf16 %v9569_v49, %v9566_v48 }
0x20f1   :  { %6750 = vmatmul.mubr.bf16.vlgmr.msra.gmra.mrb[76].mxu1 %v3531_v50  ;;  %v7643_v50 = vld [vmem:[%s10592_s5] sm:$0xff]  }
0x20f2   :  { %6774 = vmatpush3.bf16.msra.mxu1 %v7616_v51  ;;  %6789 = vmatprep.mubr.msk.bf16.mxu1 %vm7827_vm0, %v7826_v1  ;;  %v7644_v51 = vld [vmem:[%s10592_s5 + $0x8] sm:$0xff]  }
0x20f3   :  { %6775 = vmatprep.subr.bf16.mxu1 %v7826_v1 }
0x20f6   :  { %6776 = vmatpush3.bf16.msra.mxu1 %v7617_v52  ;;  %v7645_v52 = vld [vmem:[%s10592_s5 + $0x10] sm:$0xff]  }
0x20f7   :  { %6777 = vmatprep.subr.bf16.mxu1 %v7826_v1 }
0x20fa   :  { %6778 = vmatpush3.bf16.msra.mxu1 %v7618_v53  ;;  %v7646_v53 = vld [vmem:[%s10592_s5 + $0x18] sm:$0xff]  }
0x20fb   :  { %6779 = vmatprep.subr.bf16.mxu1 %v7826_v1 }
0x20fe   :  { %6780 = vmatpush3.bf16.msra.mxu1 %v7619_v55  ;;  %v7647_v55 = vld [vmem:[%s10592_s5 + $0x20] sm:$0xff]  }
0x20ff   :  { %6781 = vmatprep.subr.bf16.mxu1 %v7826_v1 }
0x2102   :  { %6782 = vmatpush3.bf16.msra.mxu1 %v7620_v57  ;;  %v7648_v57 = vld [vmem:[%s10592_s5 + $0x28] sm:$0xff]  }
0x2103   :  { %6783 = vmatprep.subr.bf16.mxu1 %v7826_v1 }
0x2106   :  { %6784 = vmatpush3.bf16.msra.mxu1 %v7621_v58  ;;  %v7649_v58 = vld [vmem:[%s10592_s5 + $0x30] sm:$0xff]  }
0x2107   :  { %6785 = vmatprep.subr.bf16.mxu1 %v7826_v1 }
0x210a   :  { %6786 = vmatpush3.bf16.msra.mxu1 %v7622_v59  ;;  %v7650_v59 = vld [vmem:[%s10592_s5 + $0x38] sm:$0xff]  }
0x210b   :  { %6787 = vmatprep.subr.bf16.mxu1 %v7826_v1 }
0x210e   :  { %6788 = vmatpush3.bf16.msra.mxu1 %v7623_v60 }
0x210f   :  { %6813 = vmatprep.subr.bf16.mxu1 %v7826_v1 }
0x21c4   :  { %v3566_v61 = vpop.f32.mrb[76].mxu1 }
0x21c5   :  { %v3567_v63 = vadd.f32 %v7624_v62, %v3566_v61  ;;  %v6751_v0 = vpop.f32.mrb[77].mxu1  ;;  %v7651_v61 = vld [vmem:[%s10594_s6 + $0x13] ss:$0 sm:$0xff] }
0x21c6   :  { %v3569_v2 = vpop.f32.mrb[78].mxu1 }
0x21c7   :  { %v3570_v3 = vadd.f32 %v7624_v62, %v3569_v2  ;;  %v6752_v4 = vpop.f32.mrb[79].mxu1  ;;  %v3573_v5 = vmax.f32 %v3567_v63, 0.0 }
0x21c9   :  { %v3574_v6 = vmax.f32 %v3570_v3, 0.0 }
0x21cb   :  { %v3575_v7 = vpack.c.bf16 %v3574_v6, %v3573_v5 }
0x21cd   :  { %6770 = vmatmul.mubr.bf16.vlgmr.msra.gmra.mrb[80].mxu0 %v3575_v7 }
0x21ce   :  { %6794 = vmatpush3.bf16.msra.mxu0 %v7625_v10  ;;  %6809 = vmatprep.mubr.msk.bf16.mxu0 %vm7827_vm0, %v7826_v1 }
0x21cf   :  { %6795 = vmatprep.subr.bf16.mxu0 %v7826_v1 }
0x21d2   :  { %6796 = vmatpush3.bf16.msra.mxu0 %v7626_v11 }
0x21d3   :  { %6797 = vmatprep.subr.bf16.mxu0 %v7826_v1 }
0x21d6   :  { %6798 = vmatpush3.bf16.msra.mxu0 %v7627_v12 }
0x21d7   :  { %6799 = vmatprep.subr.bf16.mxu0 %v7826_v1 }
0x21da   :  { %6800 = vmatpush3.bf16.msra.mxu0 %v7628_v13  ;;  %v7652_v13 = vld [vmem:[%s10592_s5 + $0x40] sm:$0xff]  }
0x21db   :  { %6801 = vmatprep.subr.bf16.mxu0 %v7826_v1 }
0x21de   :  { %6802 = vmatpush3.bf16.msra.mxu0 %v7629_v14  ;;  %v7655_v14 = vld [vmem:[%s10592_s5 + $0x58] sm:$0xff]  }
0x21df   :  { %6803 = vmatprep.subr.bf16.mxu0 %v7826_v1 }
0x21e2   :  { %6804 = vmatpush3.bf16.msra.mxu0 %v7630_v15  ;;  %v7656_v15 = vld [vmem:[%s10592_s5 + $0x60] sm:$0xff]  }
0x21e3   :  { %6805 = vmatprep.subr.bf16.mxu0 %v7826_v1 }
0x21e6   :  { %6806 = vmatpush3.bf16.msra.mxu0 %v7631_v16  ;;  %v7657_v16 = vld [vmem:[%s10592_s5 + $0x68] sm:$0xff]  }
0x21e7   :  { %6807 = vmatprep.subr.bf16.mxu0 %v7826_v1 }
0x21ea   :  { %6808 = vmatpush3.bf16.msra.mxu0 %v7632_v17  ;;  %v7658_v17 = vld [vmem:[%s10592_s5 + $0x70] sm:$0xff]  }
0x21eb   :  { %6833 = vmatprep.subr.bf16.mxu0 %v7826_v1 }
0x22a0   :  { %v3610_v18 = vpop.f32.mrb[80].mxu0 }
0x22a1   :  { %v3611_v22 = vadd.f32 %v7633_v19, %v3610_v18  ;;  %v6771_v23 = vpop.f32.mrb[81].mxu0  ;;  %v7659_v18 = vld [vmem:[%s10592_s5 + $0x78] sm:$0xff]  }
0x22a2   :  { %v3613_v24 = vpop.f32.mrb[82].mxu0 }
0x22a3   :  { %v3617_v25 = vmax.f32 %v3611_v22, 0.0  ;;  %v3614_v26 = vadd.f32 %v7633_v19, %v3613_v24  ;;  %v6772_v27 = vpop.f32.mrb[83].mxu0  ;;  %v7660_v19 = vld [vmem:[%s10596_s4] sm:$0x1] }
0x22a4   :  { %v3757_v22 = vmul.f32 2.0, %v7660_v19  ;;  %v7687_v19 = vld [vmem:[%s10594_s6 + $0x2] ss:$0 sm:$0xff] }
0x22a5   :  { %v3618_v28 = vmax.f32 %v3614_v26, 0.0  ;;  %v9648_v29 = vadd.f32 %v3617_v25, %v9566_v48 }
0x22a6   :  { %v3762_v25 = vrot.slane %v3757_v22, %v2806_v21 }
0x22a7   :  { %v9651_v30 = vadd.f32 %v3618_v28, %v9569_v49 }
0x22a9   :  { %v3621_v31 = vpack.c.bf16 %v9651_v30, %v9648_v29 }
0x22ab   :  { %6790 = vmatmul.mubr.bf16.vlgmr.msra.gmra.mrb[80].mxu1 %v3621_v31 }
0x22ac   :  { %6814 = vmatpush3.bf16.msra.mxu1 %v7634_v32  ;;  %6829 = vmatprep.mubr.msk.bf16.mxu1 %vm7827_vm0, %v7826_v1 }
0x22ad   :  { %6815 = vmatprep.subr.bf16.mxu1 %v7826_v1 }
0x22b0   :  { %6816 = vmatpush3.bf16.msra.mxu1 %v7635_v33  ;;  %v7663_v33 = vld [vmem:[%s10592_s5 + $0x90] sm:$0xff]  }
0x22b1   :  { %6817 = vmatprep.subr.bf16.mxu1 %v7826_v1 }
0x22b4   :  { %6818 = vmatpush3.bf16.msra.mxu1 %v7636_v34  ;;  %v7664_v34 = vld [vmem:[%s10592_s5 + $0x98] sm:$0xff]  }
0x22b5   :  { %6819 = vmatprep.subr.bf16.mxu1 %v7826_v1 }
0x22b8   :  { %6820 = vmatpush3.bf16.msra.mxu1 %v7637_v35  ;;  %v7665_v35 = vld [vmem:[%s10592_s5 + $0xa0] sm:$0xff]  }
0x22b9   :  { %6821 = vmatprep.subr.bf16.mxu1 %v7826_v1 }
0x22bc   :  { %6822 = vmatpush3.bf16.msra.mxu1 %v7638_v36  ;;  %v7666_v36 = vld [vmem:[%s10592_s5 + $0xa8] sm:$0xff]  }
0x22bd   :  { %6823 = vmatprep.subr.bf16.mxu1 %v7826_v1 }
0x22c0   :  { %6824 = vmatpush3.bf16.msra.mxu1 %v7639_v37  ;;  %v7667_v37 = vld [vmem:[%s10592_s5 + $0xb0] sm:$0xff]  }
0x22c1   :  { %6825 = vmatprep.subr.bf16.mxu1 %v7826_v1 }
0x22c4   :  { %6826 = vmatpush3.bf16.msra.mxu1 %v7640_v38  ;;  %v7668_v38 = vld [vmem:[%s10592_s5 + $0xb8] sm:$0xff]  }
0x22c5   :  { %6827 = vmatprep.subr.bf16.mxu1 %v7826_v1 }
0x22c8   :  { %6828 = vmatpush3.bf16.msra.mxu1 %v7641_v39 }
0x22c9   :  { %6853 = vmatprep.subr.bf16.mxu1 %v7826_v1 }
0x237e   :  { %v3656_v40 = vpop.f32.mrb[80].mxu1 }
0x237f   :  { %v3657_v42 = vadd.f32 %v7642_v41, %v3656_v40  ;;  %v6791_v43 = vpop.f32.mrb[81].mxu1  ;;  %v7669_v40 = vld [vmem:[%s10594_s6] ss:$0 sm:$0xff] }
0x2380   :  { %v3659_v44 = vpop.f32.mrb[82].mxu1 }
0x2381   :  { %v3660_v45 = vadd.f32 %v7642_v41, %v3659_v44  ;;  %v6792_v46 = vpop.f32.mrb[83].mxu1  ;;  %v3663_v47 = vmax.f32 %v3657_v42, 0.0 }
0x2383   :  { %v3664_v48 = vmax.f32 %v3660_v45, 0.0 }
0x2385   :  { %v3665_v49 = vpack.c.bf16 %v3664_v48, %v3663_v47 }
0x2387   :  { %6810 = vmatmul.mubr.bf16.vlgmr.msra.gmra.mrb[84].mxu0 %v3665_v49  ;;  %v7670_v49 = vld [vmem:[%s10592_s5 + $0xc0] sm:$0xff]  }
0x2388   :  { %6834 = vmatpush3.bf16.msra.mxu0 %v7643_v50  ;;  %6849 = vmatprep.mubr.msk.bf16.mxu0 %vm7827_vm0, %v7826_v1  ;;  %v7671_v50 = vld [vmem:[%s10592_s5 + $0xc8] sm:$0xff]  }
0x2389   :  { %6835 = vmatprep.subr.bf16.mxu0 %v7826_v1 }
0x238c   :  { %6836 = vmatpush3.bf16.msra.mxu0 %v7644_v51  ;;  %v7672_v51 = vld [vmem:[%s10592_s5 + $0xd0] sm:$0xff]  }
0x238d   :  { %6837 = vmatprep.subr.bf16.mxu0 %v7826_v1 }
0x2390   :  { %6838 = vmatpush3.bf16.msra.mxu0 %v7645_v52  ;;  %v7673_v52 = vld [vmem:[%s10592_s5 + $0xd8] sm:$0xff]  }
0x2391   :  { %6839 = vmatprep.subr.bf16.mxu0 %v7826_v1 }
0x2394   :  { %6840 = vmatpush3.bf16.msra.mxu0 %v7646_v53  ;;  %v7674_v53 = vld [vmem:[%s10592_s5 + $0xe0] sm:$0xff]  }
0x2395   :  { %6841 = vmatprep.subr.bf16.mxu0 %v7826_v1 }
0x2398   :  { %6842 = vmatpush3.bf16.msra.mxu0 %v7647_v55  ;;  %v7675_v55 = vld [vmem:[%s10592_s5 + $0xe8] sm:$0xff]  }
0x2399   :  { %6843 = vmatprep.subr.bf16.mxu0 %v7826_v1 }
0x239c   :  { %6844 = vmatpush3.bf16.msra.mxu0 %v7648_v57  ;;  %v7676_v57 = vld [vmem:[%s10592_s5 + $0xf0] sm:$0xff]  }
0x239d   :  { %6845 = vmatprep.subr.bf16.mxu0 %v7826_v1 }
0x23a0   :  { %6846 = vmatpush3.bf16.msra.mxu0 %v7649_v58  ;;  %v7677_v58 = vld [vmem:[%s10592_s5 + $0xf8] sm:$0xff]  }
0x23a1   :  { %6847 = vmatprep.subr.bf16.mxu0 %v7826_v1 }
0x23a4   :  { %6848 = vmatpush3.bf16.msra.mxu0 %v7650_v59 }
0x23a5   :  { %6873 = vmatprep.subr.bf16.mxu0 %v7826_v1 }
0x245a   :  { %v3700_v60 = vpop.f32.mrb[84].mxu0 }
0x245b   :  { %v3701_v62 = vadd.f32 %v7651_v61, %v3700_v60  ;;  %v6811_v63 = vpop.f32.mrb[85].mxu0  ;;  %v7678_v60 = vld [vmem:[%s10594_s6 + $0x1] ss:$0 sm:$0xff] }
0x245c   :  { %v3703_v0 = vpop.f32.mrb[86].mxu0 }
0x245d   :  { %v3707_v2 = vmax.f32 %v3701_v62, 0.0  ;;  %v3704_v3 = vadd.f32 %v7651_v61, %v3703_v0  ;;  %v6812_v4 = vpop.f32.mrb[87].mxu0 }
0x245f   :  { %v3709_v5 = vadd.f32 %v3707_v2, %v9648_v29  ;;  %v3708_v6 = vmax.f32 %v3704_v3, 0.0 }
0x2461   :  { %v3710_v7 = vadd.f32 %v3708_v6, %v9651_v30  ;;  %v9732_v10 = vadd.f32 %v3709_v5, %v8862_v8  ;;  %v7653_v8 = vld [vmem:[%s10592_s5 + $0x48] sm:$0xff]  }
0x2463   :  { %v9735_v11 = vadd.f32 %v3710_v7, %v8865_v9  ;;  %v7654_v9 = vld [vmem:[%s10592_s5 + $0x50] sm:$0xff]  }
0x2465   :  { %v3713_v12 = vpack.c.bf16 %v9735_v11, %v9732_v10 }
0x2467   :  { %6830 = vmatmul.mubr.bf16.vlgmr.msra.gmra.mrb[84].mxu1 %v3713_v12  ;;  %v7679_v12 = vld [vmem:[%s10592_s5 + $0x100] sm:$0xff]  }
0x2468   :  { %6854 = vmatpush3.bf16.msra.mxu1 %v7652_v13  ;;  %6869 = vmatprep.mubr.msk.bf16.mxu1 %vm7827_vm0, %v7826_v1  ;;  %v7680_v13 = vld [vmem:[%s10592_s5 + $0x108] sm:$0xff]  }
0x2469   :  { %6855 = vmatprep.subr.bf16.mxu1 %v7826_v1 }
0x246c   :  { %6856 = vmatpush3.bf16.msra.mxu1 %v7653_v8  ;;  %v7681_v8 = vld [vmem:[%s10592_s5 + $0x110] sm:$0xff]  }
0x246d   :  { %6857 = vmatprep.subr.bf16.mxu1 %v7826_v1 }
0x2470   :  { %6858 = vmatpush3.bf16.msra.mxu1 %v7654_v9  ;;  %v7682_v9 = vld [vmem:[%s10592_s5 + $0x118] sm:$0xff]  }
0x2471   :  { %6859 = vmatprep.subr.bf16.mxu1 %v7826_v1 }
0x2474   :  { %6860 = vmatpush3.bf16.msra.mxu1 %v7655_v14  ;;  %v7683_v14 = vld [vmem:[%s10592_s5 + $0x120] sm:$0xff]  }
0x2475   :  { %6861 = vmatprep.subr.bf16.mxu1 %v7826_v1 }
0x2478   :  { %6862 = vmatpush3.bf16.msra.mxu1 %v7656_v15  ;;  %v7684_v15 = vld [vmem:[%s10592_s5 + $0x128] sm:$0xff]  }
0x2479   :  { %6863 = vmatprep.subr.bf16.mxu1 %v7826_v1 }
0x247c   :  { %6864 = vmatpush3.bf16.msra.mxu1 %v7657_v16  ;;  %v7685_v16 = vld [vmem:[%s10592_s5 + $0x130] sm:$0xff]  }
0x247d   :  { %6865 = vmatprep.subr.bf16.mxu1 %v7826_v1 }
0x2480   :  { %6866 = vmatpush3.bf16.msra.mxu1 %v7658_v17  ;;  %v7686_v17 = vld [vmem:[%s10592_s5 + $0x138] sm:$0xff]  }
0x2481   :  { %6867 = vmatprep.subr.bf16.mxu1 %v7826_v1 }
0x2484   :  { %6868 = vmatpush3.bf16.msra.mxu1 %v7659_v18 }
0x2485   :  { %6893 = vmatprep.subr.bf16.mxu1 %v7826_v1 }
0x253a   :  { %v3748_v23 = vpop.f32.mrb[84].mxu1 }
0x253b   :  { %v3755_v24 = vadd.f32 %v3748_v23, %v8035_v54  ;;  %v6831_v26 = vpop.f32.mrb[85].mxu1  ;;  %v7661_v54 = vld [vmem:[%s10592_s5 + $0x80] sm:$0xff]  }
0x253c   :  { %v3751_v27 = vpop.f32.mrb[86].mxu1 }
0x253d   :  { %v3756_v28 = vadd.f32 %v3751_v27, %v8037_v56  ;;  %v6832_v29 = vpop.f32.mrb[87].mxu1  ;;  %v9780_v30 = vadd.f32 %v3762_v25, %v3755_v24  ;;  %v7662_v56 = vld [vmem:[%s10592_s5 + $0x88] sm:$0xff]  }
0x253f   :  { %v9782_v31 = vadd.f32 %v3762_v25, %v3756_v28 }
0x2541   :  { %v3766_v32 = vpack.c.bf16 %v9782_v31, %v9780_v30 }
0x2543   :  { %6850 = vmatmul.mubr.bf16.vlgmr.msra.gmra.mrb[88].mxu0 %v3766_v32  ;;  %v7690_v32 = vld [vmem:[%s10592_s5 + $0x150] sm:$0xff]  }
0x2544   :  { %6874 = vmatpush3.bf16.msra.mxu0 %v7661_v54  ;;  %6889 = vmatprep.mubr.msk.bf16.mxu0 %vm7827_vm0, %v7826_v1  ;;  %v7691_v54 = vld [vmem:[%s10592_s5 + $0x158] sm:$0xff]  }
0x2545   :  { %6875 = vmatprep.subr.bf16.mxu0 %v7826_v1 }
0x2548   :  { %6876 = vmatpush3.bf16.msra.mxu0 %v7662_v56  ;;  %v7692_v56 = vld [vmem:[%s10592_s5 + $0x160] sm:$0xff]  }
0x2549   :  { %6877 = vmatprep.subr.bf16.mxu0 %v7826_v1 }
0x254c   :  { %6878 = vmatpush3.bf16.msra.mxu0 %v7663_v33  ;;  %v7693_v33 = vld [vmem:[%s10592_s5 + $0x168] sm:$0xff]  }
0x254d   :  { %6879 = vmatprep.subr.bf16.mxu0 %v7826_v1 }
0x2550   :  { %6880 = vmatpush3.bf16.msra.mxu0 %v7664_v34  ;;  %v7694_v34 = vld [vmem:[%s10592_s5 + $0x170] sm:$0xff]  }
0x2551   :  { %6881 = vmatprep.subr.bf16.mxu0 %v7826_v1 }
0x2554   :  { %6882 = vmatpush3.bf16.msra.mxu0 %v7665_v35  ;;  %v7695_v35 = vld [vmem:[%s10592_s5 + $0x178] sm:$0xff]  }
0x2555   :  { %6883 = vmatprep.subr.bf16.mxu0 %v7826_v1 }
0x2558   :  { %6884 = vmatpush3.bf16.msra.mxu0 %v7666_v36 }
0x2559   :  { %6885 = vmatprep.subr.bf16.mxu0 %v7826_v1 }
0x255c   :  { %6886 = vmatpush3.bf16.msra.mxu0 %v7667_v37  ;;  %v7696_v37 = vld [vmem:[%s10594_s6 + $0x3] ss:$0 sm:$0xff] }
0x255d   :  { %6887 = vmatprep.subr.bf16.mxu0 %v7826_v1 }
0x2560   :  { %6888 = vmatpush3.bf16.msra.mxu0 %v7668_v38 }
0x2561   :  { %6913 = vmatprep.subr.bf16.mxu0 %v7826_v1 }
0x2616   :  { %v3801_v39 = vpop.f32.mrb[88].mxu0 }
0x2617   :  { %v3802_v41 = vadd.f32 %v7669_v40, %v3801_v39  ;;  %v6851_v42 = vpop.f32.mrb[89].mxu0 }
0x2618   :  { %v3804_v43 = vpop.f32.mrb[90].mxu0 }
0x2619   :  { %v3805_v44 = vadd.f32 %v7669_v40, %v3804_v43  ;;  %v6852_v45 = vpop.f32.mrb[91].mxu0  ;;  %v3808_v46 = vmax.f32 %v3802_v41, 0.0 }
0x261b   :  { %v3809_v47 = vmax.f32 %v3805_v44, 0.0 }
0x261d   :  { %v3810_v48 = vpack.c.bf16 %v3809_v47, %v3808_v46 }
0x261f   :  { %6870 = vmatmul.mubr.bf16.vlgmr.msra.gmra.mrb[88].mxu1 %v3810_v48  ;;  %v7697_v48 = vld [vmem:[%s10592_s5 + $0x180] sm:$0xff]  }
0x2620   :  { %6894 = vmatpush3.bf16.msra.mxu1 %v7670_v49  ;;  %6909 = vmatprep.mubr.msk.bf16.mxu1 %vm7827_vm0, %v7826_v1  ;;  %v7698_v49 = vld [vmem:[%s10592_s5 + $0x188] sm:$0xff]  }
0x2621   :  { %6895 = vmatprep.subr.bf16.mxu1 %v7826_v1 }
0x2624   :  { %6896 = vmatpush3.bf16.msra.mxu1 %v7671_v50  ;;  %v7699_v50 = vld [vmem:[%s10592_s5 + $0x190] sm:$0xff]  }
0x2625   :  { %6897 = vmatprep.subr.bf16.mxu1 %v7826_v1 }
0x2628   :  { %6898 = vmatpush3.bf16.msra.mxu1 %v7672_v51  ;;  %v7700_v51 = vld [vmem:[%s10592_s5 + $0x198] sm:$0xff]  }
0x2629   :  { %6899 = vmatprep.subr.bf16.mxu1 %v7826_v1 }
0x262c   :  { %6900 = vmatpush3.bf16.msra.mxu1 %v7673_v52  ;;  %v7701_v52 = vld [vmem:[%s10592_s5 + $0x1a0] sm:$0xff]  }
0x262d   :  { %6901 = vmatprep.subr.bf16.mxu1 %v7826_v1 }
0x2630   :  { %6902 = vmatpush3.bf16.msra.mxu1 %v7674_v53  ;;  %v7702_v53 = vld [vmem:[%s10592_s5 + $0x1a8] sm:$0xff]  }
0x2631   :  { %6903 = vmatprep.subr.bf16.mxu1 %v7826_v1 }
0x2634   :  { %6904 = vmatpush3.bf16.msra.mxu1 %v7675_v55  ;;  %v7703_v55 = vld [vmem:[%s10592_s5 + $0x1b0] sm:$0xff]  }
0x2635   :  { %6905 = vmatprep.subr.bf16.mxu1 %v7826_v1 }
0x2638   :  { %6906 = vmatpush3.bf16.msra.mxu1 %v7676_v57  ;;  %v7704_v57 = vld [vmem:[%s10592_s5 + $0x1b8] sm:$0xff]  }
0x2639   :  { %6907 = vmatprep.subr.bf16.mxu1 %v7826_v1 }
0x263c   :  { %6908 = vmatpush3.bf16.msra.mxu1 %v7677_v58 }
0x263d   :  { %6933 = vmatprep.subr.bf16.mxu1 %v7826_v1 }
0x26f2   :  { %v3845_v59 = vpop.f32.mrb[88].mxu1 }
0x26f3   :  { %v3846_v61 = vadd.f32 %v7678_v60, %v3845_v59  ;;  %v6871_v62 = vpop.f32.mrb[89].mxu1  ;;  %v7705_v59 = vld [vmem:[%s10594_s6 + $0x4] ss:$0 sm:$0xff] }
0x26f4   :  { %v3848_v63 = vpop.f32.mrb[90].mxu1 }
0x26f5   :  { %v3852_v0 = vmax.f32 %v3846_v61, 0.0  ;;  %v3849_v2 = vadd.f32 %v7678_v60, %v3848_v63  ;;  %v6872_v3 = vpop.f32.mrb[91].mxu1 }
0x26f7   :  { %v3853_v4 = vmax.f32 %v3849_v2, 0.0  ;;  %v9861_v5 = vadd.f32 %v3852_v0, %v9780_v30  ;;  %v7688_v30 = vld [vmem:[%s10592_s5 + $0x140] sm:$0xff]  }
0x26f9   :  { %v9864_v6 = vadd.f32 %v3853_v4, %v9782_v31  ;;  %v7689_v31 = vld [vmem:[%s10592_s5 + $0x148] sm:$0xff]  }
0x26fb   :  { %v3856_v7 = vpack.c.bf16 %v9864_v6, %v9861_v5 }
0x26fd   :  { %6890 = vmatmul.mubr.bf16.vlgmr.msra.gmra.mrb[92].mxu0 %v3856_v7  ;;  %v7708_v7 = vld [vmem:[%s10592_s5 + $0x1d0] sm:$0xff]  }
0x26fe   :  { %6914 = vmatpush3.bf16.msra.mxu0 %v7679_v12  ;;  %6929 = vmatprep.mubr.msk.bf16.mxu0 %vm7827_vm0, %v7826_v1  ;;  %v7709_v12 = vld [vmem:[%s10592_s5 + $0x1d8] sm:$0xff]  }
0x26ff   :  { %6915 = vmatprep.subr.bf16.mxu0 %v7826_v1 }
0x2702   :  { %6916 = vmatpush3.bf16.msra.mxu0 %v7680_v13  ;;  %v7710_v13 = vld [vmem:[%s10592_s5 + $0x1e0] sm:$0xff]  }
0x2703   :  { %6917 = vmatprep.subr.bf16.mxu0 %v7826_v1 }
0x2706   :  { %6918 = vmatpush3.bf16.msra.mxu0 %v7681_v8  ;;  %v7711_v8 = vld [vmem:[%s10592_s5 + $0x1e8] sm:$0xff]  }
0x2707   :  { %6919 = vmatprep.subr.bf16.mxu0 %v7826_v1 }
0x270a   :  { %6920 = vmatpush3.bf16.msra.mxu0 %v7682_v9  ;;  %v7712_v9 = vld [vmem:[%s10592_s5 + $0x1f0] sm:$0xff]  }
0x270b   :  { %6921 = vmatprep.subr.bf16.mxu0 %v7826_v1 }
0x270e   :  { %6922 = vmatpush3.bf16.msra.mxu0 %v7683_v14  ;;  %v7713_v14 = vld [vmem:[%s10592_s5 + $0x1f8] sm:$0xff]  }
0x270f   :  { %6923 = vmatprep.subr.bf16.mxu0 %v7826_v1 }
0x2712   :  { %6924 = vmatpush3.bf16.msra.mxu0 %v7684_v15 }
0x2713   :  { %6925 = vmatprep.subr.bf16.mxu0 %v7826_v1 }
0x2716   :  { %6926 = vmatpush3.bf16.msra.mxu0 %v7685_v16  ;;  %v7714_v16 = vld [vmem:[%s10594_s6 + $0x5] ss:$0 sm:$0xff] }
0x2717   :  { %6927 = vmatprep.subr.bf16.mxu0 %v7826_v1 }
0x271a   :  { %6928 = vmatpush3.bf16.msra.mxu0 %v7686_v17 }
0x271b   :  { %6953 = vmatprep.subr.bf16.mxu0 %v7826_v1 }
0x27d0   :  { %v3891_v18 = vpop.f32.mrb[92].mxu0 }
0x27d1   :  { %v3892_v22 = vadd.f32 %v7687_v19, %v3891_v18  ;;  %v6891_v23 = vpop.f32.mrb[93].mxu0 }
0x27d2   :  { %v3894_v24 = vpop.f32.mrb[94].mxu0 }
0x27d3   :  { %v3895_v25 = vadd.f32 %v7687_v19, %v3894_v24  ;;  %v6892_v26 = vpop.f32.mrb[95].mxu0  ;;  %v3898_v27 = vmax.f32 %v3892_v22, 0.0 }
0x27d5   :  { %v3899_v28 = vmax.f32 %v3895_v25, 0.0 }
0x27d7   :  { %v3900_v29 = vpack.c.bf16 %v3899_v28, %v3898_v27 }
0x27d9   :  { %6910 = vmatmul.mubr.bf16.vlgmr.msra.gmra.mrb[92].mxu1 %v3900_v29  ;;  %v7715_v29 = vld [vmem:[%s10592_s5 + $0x200] sm:$0xff]  }
0x27da   :  { %6934 = vmatpush3.bf16.msra.mxu1 %v7688_v30  ;;  %6949 = vmatprep.mubr.msk.bf16.mxu1 %vm7827_vm0, %v7826_v1  ;;  %v7716_v30 = vld [vmem:[%s10592_s5 + $0x208] sm:$0xff]  }
0x27db   :  { %6935 = vmatprep.subr.bf16.mxu1 %v7826_v1 }
0x27de   :  { %6936 = vmatpush3.bf16.msra.mxu1 %v7689_v31  ;;  %v7717_v31 = vld [vmem:[%s10592_s5 + $0x210] sm:$0xff]  }
0x27df   :  { %6937 = vmatprep.subr.bf16.mxu1 %v7826_v1 }
0x27e2   :  { %6938 = vmatpush3.bf16.msra.mxu1 %v7690_v32  ;;  %v7718_v32 = vld [vmem:[%s10592_s5 + $0x218] sm:$0xff]  }
0x27e3   :  { %6939 = vmatprep.subr.bf16.mxu1 %v7826_v1 }
0x27e6   :  { %6940 = vmatpush3.bf16.msra.mxu1 %v7691_v54  ;;  %v7719_v54 = vld [vmem:[%s10592_s5 + $0x220] sm:$0xff]  }
0x27e7   :  { %6941 = vmatprep.subr.bf16.mxu1 %v7826_v1 }
0x27ea   :  { %6942 = vmatpush3.bf16.msra.mxu1 %v7692_v56  ;;  %v7720_v56 = vld [vmem:[%s10592_s5 + $0x228] sm:$0xff]  }
0x27eb   :  { %6943 = vmatprep.subr.bf16.mxu1 %v7826_v1 }
0x27ee   :  { %6944 = vmatpush3.bf16.msra.mxu1 %v7693_v33  ;;  %v7721_v33 = vld [vmem:[%s10592_s5 + $0x230] sm:$0xff]  }
0x27ef   :  { %6945 = vmatprep.subr.bf16.mxu1 %v7826_v1 }
0x27f2   :  { %6946 = vmatpush3.bf16.msra.mxu1 %v7694_v34  ;;  %v7722_v34 = vld [vmem:[%s10592_s5 + $0x238] sm:$0xff]  }
0x27f3   :  { %6947 = vmatprep.subr.bf16.mxu1 %v7826_v1 }
0x27f6   :  { %6948 = vmatpush3.bf16.msra.mxu1 %v7695_v35 }
0x27f7   :  { %6973 = vmatprep.subr.bf16.mxu1 %v7826_v1 }
0x28ac   :  { %v3935_v36 = vpop.f32.mrb[92].mxu1 }
0x28ad   :  { %v3936_v38 = vadd.f32 %v7696_v37, %v3935_v36  ;;  %v6911_v39 = vpop.f32.mrb[93].mxu1  ;;  %v7723_v36 = vld [vmem:[%s10594_s6 + $0x6] ss:$0 sm:$0xff] }
0x28ae   :  { %v3938_v40 = vpop.f32.mrb[94].mxu1 }
0x28af   :  { %v3942_v41 = vmax.f32 %v3936_v38, 0.0  ;;  %v3939_v42 = vadd.f32 %v7696_v37, %v3938_v40  ;;  %v6912_v43 = vpop.f32.mrb[95].mxu1 }
0x28b1   :  { %v3943_v44 = vmax.f32 %v3939_v42, 0.0  ;;  %v9943_v45 = vadd.f32 %v3942_v41, %v9861_v5  ;;  %v7706_v5 = vld [vmem:[%s10592_s5 + $0x1c0] sm:$0xff]  }
0x28b3   :  { %v9946_v46 = vadd.f32 %v3943_v44, %v9864_v6  ;;  %v7707_v6 = vld [vmem:[%s10592_s5 + $0x1c8] sm:$0xff]  }
0x28b5   :  { %v3946_v47 = vpack.c.bf16 %v9946_v46, %v9943_v45 }
0x28b7   :  { %6930 = vmatmul.mubr.bf16.vlgmr.msra.gmra.mrb[96].mxu0 %v3946_v47  ;;  %v7726_v47 = vld [vmem:[%s10592_s5 + $0x250] sm:$0xff]  }
0x28b8   :  { %6954 = vmatpush3.bf16.msra.mxu0 %v7697_v48  ;;  %6969 = vmatprep.mubr.msk.bf16.mxu0 %vm7827_vm0, %v7826_v1  ;;  %v7727_v48 = vld [vmem:[%s10592_s5 + $0x258] sm:$0xff]  }
0x28b9   :  { %6955 = vmatprep.subr.bf16.mxu0 %v7826_v1 }
0x28bc   :  { %6956 = vmatpush3.bf16.msra.mxu0 %v7698_v49  ;;  %v7728_v49 = vld [vmem:[%s10592_s5 + $0x260] sm:$0xff]  }
0x28bd   :  { %6957 = vmatprep.subr.bf16.mxu0 %v7826_v1 }
0x28c0   :  { %6958 = vmatpush3.bf16.msra.mxu0 %v7699_v50  ;;  %v7729_v50 = vld [vmem:[%s10592_s5 + $0x268] sm:$0xff]  }
0x28c1   :  { %6959 = vmatprep.subr.bf16.mxu0 %v7826_v1 }
0x28c4   :  { %6960 = vmatpush3.bf16.msra.mxu0 %v7700_v51  ;;  %v7730_v51 = vld [vmem:[%s10592_s5 + $0x270] sm:$0xff]  }
0x28c5   :  { %6961 = vmatprep.subr.bf16.mxu0 %v7826_v1 }
0x28c8   :  { %6962 = vmatpush3.bf16.msra.mxu0 %v7701_v52  ;;  %v7731_v52 = vld [vmem:[%s10592_s5 + $0x278] sm:$0xff]  }
0x28c9   :  { %6963 = vmatprep.subr.bf16.mxu0 %v7826_v1 }
0x28cc   :  { %6964 = vmatpush3.bf16.msra.mxu0 %v7702_v53 }
0x28cd   :  { %6965 = vmatprep.subr.bf16.mxu0 %v7826_v1 }
0x28d0   :  { %6966 = vmatpush3.bf16.msra.mxu0 %v7703_v55  ;;  %v7732_v55 = vld [vmem:[%s10594_s6 + $0x7] ss:$0 sm:$0xff] }
0x28d1   :  { %6967 = vmatprep.subr.bf16.mxu0 %v7826_v1 }
0x28d4   :  { %6968 = vmatpush3.bf16.msra.mxu0 %v7704_v57 }
0x28d5   :  { %6993 = vmatprep.subr.bf16.mxu0 %v7826_v1 }
0x298a   :  { %v3981_v58 = vpop.f32.mrb[96].mxu0 }
0x298b   :  { %v3982_v60 = vadd.f32 %v7705_v59, %v3981_v58  ;;  %v6931_v61 = vpop.f32.mrb[97].mxu0 }
0x298c   :  { %v3984_v62 = vpop.f32.mrb[98].mxu0 }
0x298d   :  { %v3985_v63 = vadd.f32 %v7705_v59, %v3984_v62  ;;  %v6932_v0 = vpop.f32.mrb[99].mxu0  ;;  %v3988_v2 = vmax.f32 %v3982_v60, 0.0 }
0x298f   :  { %v3989_v3 = vmax.f32 %v3985_v63, 0.0 }
0x2991   :  { %v3990_v4 = vpack.c.bf16 %v3989_v3, %v3988_v2 }
0x2993   :  { %6950 = vmatmul.mubr.bf16.vlgmr.msra.gmra.mrb[96].mxu1 %v3990_v4  ;;  %v7733_v4 = vld [vmem:[%s10592_s5 + $0x280] sm:$0xff]  }
0x2994   :  { %6974 = vmatpush3.bf16.msra.mxu1 %v7706_v5  ;;  %6989 = vmatprep.mubr.msk.bf16.mxu1 %vm7827_vm0, %v7826_v1  ;;  %v7734_v5 = vld [vmem:[%s10592_s5 + $0x288] sm:$0xff]  }
0x2995   :  { %6975 = vmatprep.subr.bf16.mxu1 %v7826_v1 }
0x2998   :  { %6976 = vmatpush3.bf16.msra.mxu1 %v7707_v6  ;;  %v7735_v6 = vld [vmem:[%s10592_s5 + $0x290] sm:$0xff]  }
0x2999   :  { %6977 = vmatprep.subr.bf16.mxu1 %v7826_v1 }
0x299c   :  { %6978 = vmatpush3.bf16.msra.mxu1 %v7708_v7  ;;  %v7736_v7 = vld [vmem:[%s10592_s5 + $0x298] sm:$0xff]  }
0x299d   :  { %6979 = vmatprep.subr.bf16.mxu1 %v7826_v1 }
0x29a0   :  { %6980 = vmatpush3.bf16.msra.mxu1 %v7709_v12  ;;  %v7737_v12 = vld [vmem:[%s10592_s5 + $0x2a0] sm:$0xff]  }
0x29a1   :  { %6981 = vmatprep.subr.bf16.mxu1 %v7826_v1 }
0x29a4   :  { %6982 = vmatpush3.bf16.msra.mxu1 %v7710_v13  ;;  %v7738_v13 = vld [vmem:[%s10592_s5 + $0x2a8] sm:$0xff]  }
0x29a5   :  { %6983 = vmatprep.subr.bf16.mxu1 %v7826_v1 }
0x29a8   :  { %6984 = vmatpush3.bf16.msra.mxu1 %v7711_v8  ;;  %v7739_v8 = vld [vmem:[%s10592_s5 + $0x2b0] sm:$0xff]  }
0x29a9   :  { %6985 = vmatprep.subr.bf16.mxu1 %v7826_v1 }
0x29ac   :  { %6986 = vmatpush3.bf16.msra.mxu1 %v7712_v9  ;;  %v7740_v9 = vld [vmem:[%s10592_s5 + $0x2b8] sm:$0xff]  }
0x29ad   :  { %6987 = vmatprep.subr.bf16.mxu1 %v7826_v1 }
0x29b0   :  { %6988 = vmatpush3.bf16.msra.mxu1 %v7713_v14 }
0x29b1   :  { %7013 = vmatprep.subr.bf16.mxu1 %v7826_v1 }
0x2a66   :  { %v4025_v15 = vpop.f32.mrb[96].mxu1 }
0x2a67   :  { %v4026_v17 = vadd.f32 %v7714_v16, %v4025_v15  ;;  %v6951_v18 = vpop.f32.mrb[97].mxu1  ;;  %v7741_v15 = vld [vmem:[%s10594_s6 + $0x8] ss:$0 sm:$0xff] }
0x2a68   :  { %v4028_v19 = vpop.f32.mrb[98].mxu1 }
0x2a69   :  { %v4032_v22 = vmax.f32 %v4026_v17, 0.0  ;;  %v4029_v23 = vadd.f32 %v7714_v16, %v4028_v19  ;;  %v6952_v24 = vpop.f32.mrb[99].mxu1 }
0x2a6b   :  { %v4033_v25 = vmax.f32 %v4029_v23, 0.0  ;;  %v10025_v26 = vadd.f32 %v4032_v22, %v9943_v45  ;;  %v7724_v45 = vld [vmem:[%s10592_s5 + $0x240] sm:$0xff]  }
0x2a6d   :  { %v10028_v27 = vadd.f32 %v4033_v25, %v9946_v46  ;;  %v7725_v46 = vld [vmem:[%s10592_s5 + $0x248] sm:$0xff]  }
0x2a6f   :  { %v4036_v28 = vpack.c.bf16 %v10028_v27, %v10025_v26 }
0x2a71   :  { %6970 = vmatmul.mubr.bf16.vlgmr.msra.gmra.mrb[100].mxu0 %v4036_v28  ;;  %v7744_v28 = vld [vmem:[%s10592_s5 + $0x2d0] sm:$0xff]  }
0x2a72   :  { %6994 = vmatpush3.bf16.msra.mxu0 %v7715_v29  ;;  %7009 = vmatprep.mubr.msk.bf16.mxu0 %vm7827_vm0, %v7826_v1  ;;  %v7745_v29 = vld [vmem:[%s10592_s5 + $0x2d8] sm:$0xff]  }
0x2a73   :  { %6995 = vmatprep.subr.bf16.mxu0 %v7826_v1 }
0x2a76   :  { %6996 = vmatpush3.bf16.msra.mxu0 %v7716_v30  ;;  %v7746_v30 = vld [vmem:[%s10592_s5 + $0x2e0] sm:$0xff]  }
0x2a77   :  { %6997 = vmatprep.subr.bf16.mxu0 %v7826_v1 }
0x2a7a   :  { %6998 = vmatpush3.bf16.msra.mxu0 %v7717_v31  ;;  %v7747_v31 = vld [vmem:[%s10592_s5 + $0x2e8] sm:$0xff]  }
0x2a7b   :  { %6999 = vmatprep.subr.bf16.mxu0 %v7826_v1 }
0x2a7e   :  { %7000 = vmatpush3.bf16.msra.mxu0 %v7718_v32  ;;  %v7748_v32 = vld [vmem:[%s10592_s5 + $0x2f0] sm:$0xff]  }
0x2a7f   :  { %7001 = vmatprep.subr.bf16.mxu0 %v7826_v1 }
0x2a82   :  { %7002 = vmatpush3.bf16.msra.mxu0 %v7719_v54  ;;  %v7749_v54 = vld [vmem:[%s10592_s5 + $0x2f8] sm:$0xff]  }
0x2a83   :  { %7003 = vmatprep.subr.bf16.mxu0 %v7826_v1 }
0x2a86   :  { %7004 = vmatpush3.bf16.msra.mxu0 %v7720_v56 }
0x2a87   :  { %7005 = vmatprep.subr.bf16.mxu0 %v7826_v1 }
0x2a8a   :  { %7006 = vmatpush3.bf16.msra.mxu0 %v7721_v33  ;;  %v7750_v33 = vld [vmem:[%s10594_s6 + $0x9] ss:$0 sm:$0xff] }
0x2a8b   :  { %7007 = vmatprep.subr.bf16.mxu0 %v7826_v1 }
0x2a8e   :  { %7008 = vmatpush3.bf16.msra.mxu0 %v7722_v34 }
0x2a8f   :  { %7033 = vmatprep.subr.bf16.mxu0 %v7826_v1 }
0x2b44   :  { %v4071_v35 = vpop.f32.mrb[100].mxu0 }
0x2b45   :  { %v4072_v37 = vadd.f32 %v7723_v36, %v4071_v35  ;;  %v6971_v38 = vpop.f32.mrb[101].mxu0 }
0x2b46   :  { %v4074_v39 = vpop.f32.mrb[102].mxu0 }
0x2b47   :  { %v4075_v40 = vadd.f32 %v7723_v36, %v4074_v39  ;;  %v6972_v41 = vpop.f32.mrb[103].mxu0  ;;  %v4078_v42 = vmax.f32 %v4072_v37, 0.0 }
0x2b49   :  { %v4079_v43 = vmax.f32 %v4075_v40, 0.0 }
0x2b4b   :  { %v4080_v44 = vpack.c.bf16 %v4079_v43, %v4078_v42 }
0x2b4d   :  { %6990 = vmatmul.mubr.bf16.vlgmr.msra.gmra.mrb[100].mxu1 %v4080_v44  ;;  %v7751_v44 = vld [vmem:[%s10592_s5 + $0x300] sm:$0xff]  }
0x2b4e   :  { %7014 = vmatpush3.bf16.msra.mxu1 %v7724_v45  ;;  %7029 = vmatprep.mubr.msk.bf16.mxu1 %vm7827_vm0, %v7826_v1  ;;  %v7752_v45 = vld [vmem:[%s10592_s5 + $0x308] sm:$0xff]  }
0x2b4f   :  { %7015 = vmatprep.subr.bf16.mxu1 %v7826_v1 }
0x2b52   :  { %7016 = vmatpush3.bf16.msra.mxu1 %v7725_v46  ;;  %v7753_v46 = vld [vmem:[%s10592_s5 + $0x310] sm:$0xff]  }
0x2b53   :  { %7017 = vmatprep.subr.bf16.mxu1 %v7826_v1 }
0x2b56   :  { %7018 = vmatpush3.bf16.msra.mxu1 %v7726_v47  ;;  %v7754_v47 = vld [vmem:[%s10592_s5 + $0x318] sm:$0xff]  }
0x2b57   :  { %7019 = vmatprep.subr.bf16.mxu1 %v7826_v1 }
0x2b5a   :  { %7020 = vmatpush3.bf16.msra.mxu1 %v7727_v48  ;;  %v7755_v48 = vld [vmem:[%s10592_s5 + $0x320] sm:$0xff]  }
0x2b5b   :  { %7021 = vmatprep.subr.bf16.mxu1 %v7826_v1 }
0x2b5e   :  { %7022 = vmatpush3.bf16.msra.mxu1 %v7728_v49  ;;  %v7756_v49 = vld [vmem:[%s10592_s5 + $0x328] sm:$0xff]  }
0x2b5f   :  { %7023 = vmatprep.subr.bf16.mxu1 %v7826_v1 }
0x2b62   :  { %7024 = vmatpush3.bf16.msra.mxu1 %v7729_v50  ;;  %v7757_v50 = vld [vmem:[%s10592_s5 + $0x330] sm:$0xff]  }
0x2b63   :  { %7025 = vmatprep.subr.bf16.mxu1 %v7826_v1 }
0x2b66   :  { %7026 = vmatpush3.bf16.msra.mxu1 %v7730_v51  ;;  %v7758_v51 = vld [vmem:[%s10592_s5 + $0x338] sm:$0xff]  }
0x2b67   :  { %7027 = vmatprep.subr.bf16.mxu1 %v7826_v1 }
0x2b6a   :  { %7028 = vmatpush3.bf16.msra.mxu1 %v7731_v52 }
0x2b6b   :  { %7053 = vmatprep.subr.bf16.mxu1 %v7826_v1 }
0x2c20   :  { %v4115_v53 = vpop.f32.mrb[100].mxu1 }
0x2c21   :  { %v4116_v57 = vadd.f32 %v7732_v55, %v4115_v53  ;;  %v6991_v58 = vpop.f32.mrb[101].mxu1  ;;  %v7759_v53 = vld [vmem:[%s10594_s6 + $0xa] ss:$0 sm:$0xff] }
0x2c22   :  { %v4118_v59 = vpop.f32.mrb[102].mxu1 }
0x2c23   :  { %v4122_v60 = vmax.f32 %v4116_v57, 0.0  ;;  %v4119_v61 = vadd.f32 %v7732_v55, %v4118_v59  ;;  %v6992_v62 = vpop.f32.mrb[103].mxu1 }
0x2c25   :  { %v4123_v63 = vmax.f32 %v4119_v61, 0.0  ;;  %v10107_v0 = vadd.f32 %v4122_v60, %v10025_v26  ;;  %v7742_v26 = vld [vmem:[%s10592_s5 + $0x2c0] sm:$0xff]  }
0x2c27   :  { %v10110_v2 = vadd.f32 %v4123_v63, %v10028_v27  ;;  %v7743_v27 = vld [vmem:[%s10592_s5 + $0x2c8] sm:$0xff]  }
0x2c29   :  { %v4126_v3 = vpack.c.bf16 %v10110_v2, %v10107_v0 }
0x2c2b   :  { %7010 = vmatmul.mubr.bf16.vlgmr.msra.gmra.mrb[104].mxu0 %v4126_v3  ;;  %v7762_v3 = vld [vmem:[%s10592_s5 + $0x350] sm:$0xff]  }
0x2c2c   :  { %7034 = vmatpush3.bf16.msra.mxu0 %v7733_v4  ;;  %7049 = vmatprep.mubr.msk.bf16.mxu0 %vm7827_vm0, %v7826_v1  ;;  %v7763_v4 = vld [vmem:[%s10592_s5 + $0x358] sm:$0xff]  }
0x2c2d   :  { %7035 = vmatprep.subr.bf16.mxu0 %v7826_v1 }
0x2c30   :  { %7036 = vmatpush3.bf16.msra.mxu0 %v7734_v5  ;;  %v7764_v5 = vld [vmem:[%s10592_s5 + $0x360] sm:$0xff]  }
0x2c31   :  { %7037 = vmatprep.subr.bf16.mxu0 %v7826_v1 }
0x2c34   :  { %7038 = vmatpush3.bf16.msra.mxu0 %v7735_v6  ;;  %v7765_v6 = vld [vmem:[%s10592_s5 + $0x368] sm:$0xff]  }
0x2c35   :  { %7039 = vmatprep.subr.bf16.mxu0 %v7826_v1 }
0x2c38   :  { %7040 = vmatpush3.bf16.msra.mxu0 %v7736_v7  ;;  %v7766_v7 = vld [vmem:[%s10592_s5 + $0x370] sm:$0xff]  }
0x2c39   :  { %7041 = vmatprep.subr.bf16.mxu0 %v7826_v1 }
0x2c3c   :  { %7042 = vmatpush3.bf16.msra.mxu0 %v7737_v12  ;;  %v7767_v12 = vld [vmem:[%s10592_s5 + $0x378] sm:$0xff]  }
0x2c3d   :  { %7043 = vmatprep.subr.bf16.mxu0 %v7826_v1 }
0x2c40   :  { %7044 = vmatpush3.bf16.msra.mxu0 %v7738_v13 }
0x2c41   :  { %7045 = vmatprep.subr.bf16.mxu0 %v7826_v1 }
0x2c44   :  { %7046 = vmatpush3.bf16.msra.mxu0 %v7739_v8  ;;  %v7768_v8 = vld [vmem:[%s10594_s6 + $0xb] ss:$0 sm:$0xff] }
0x2c45   :  { %7047 = vmatprep.subr.bf16.mxu0 %v7826_v1 }
0x2c48   :  { %7048 = vmatpush3.bf16.msra.mxu0 %v7740_v9 }
0x2c49   :  { %7073 = vmatprep.subr.bf16.mxu0 %v7826_v1 }
0x2cfe   :  { %v4161_v14 = vpop.f32.mrb[104].mxu0 }
0x2cff   :  { %v4162_v16 = vadd.f32 %v7741_v15, %v4161_v14  ;;  %v7011_v17 = vpop.f32.mrb[105].mxu0 }
0x2d00   :  { %v4164_v18 = vpop.f32.mrb[106].mxu0 }
0x2d01   :  { %v4165_v19 = vadd.f32 %v7741_v15, %v4164_v18  ;;  %v7012_v22 = vpop.f32.mrb[107].mxu0  ;;  %v4168_v23 = vmax.f32 %v4162_v16, 0.0 }
0x2d03   :  { %v4169_v24 = vmax.f32 %v4165_v19, 0.0 }
0x2d05   :  { %v4170_v25 = vpack.c.bf16 %v4169_v24, %v4168_v23 }
0x2d07   :  { %7030 = vmatmul.mubr.bf16.vlgmr.msra.gmra.mrb[104].mxu1 %v4170_v25  ;;  %v7769_v25 = vld [vmem:[%s10592_s5 + $0x380] sm:$0xff]  }
0x2d08   :  { %7054 = vmatpush3.bf16.msra.mxu1 %v7742_v26  ;;  %7069 = vmatprep.mubr.msk.bf16.mxu1 %vm7827_vm0, %v7826_v1  ;;  %v7770_v26 = vld [vmem:[%s10592_s5 + $0x388] sm:$0xff]  }
0x2d09   :  { %7055 = vmatprep.subr.bf16.mxu1 %v7826_v1 }
0x2d0c   :  { %7056 = vmatpush3.bf16.msra.mxu1 %v7743_v27  ;;  %v7771_v27 = vld [vmem:[%s10592_s5 + $0x390] sm:$0xff]  }
0x2d0d   :  { %7057 = vmatprep.subr.bf16.mxu1 %v7826_v1 }
0x2d10   :  { %7058 = vmatpush3.bf16.msra.mxu1 %v7744_v28  ;;  %v7772_v28 = vld [vmem:[%s10592_s5 + $0x398] sm:$0xff]  }
0x2d11   :  { %7059 = vmatprep.subr.bf16.mxu1 %v7826_v1 }
0x2d14   :  { %7060 = vmatpush3.bf16.msra.mxu1 %v7745_v29  ;;  %v7773_v29 = vld [vmem:[%s10592_s5 + $0x3a0] sm:$0xff]  }
0x2d15   :  { %7061 = vmatprep.subr.bf16.mxu1 %v7826_v1 }
0x2d18   :  { %7062 = vmatpush3.bf16.msra.mxu1 %v7746_v30  ;;  %v7774_v30 = vld [vmem:[%s10592_s5 + $0x3a8] sm:$0xff]  }
0x2d19   :  { %7063 = vmatprep.subr.bf16.mxu1 %v7826_v1 }
0x2d1c   :  { %7064 = vmatpush3.bf16.msra.mxu1 %v7747_v31  ;;  %v7775_v31 = vld [vmem:[%s10592_s5 + $0x3b0] sm:$0xff]  }
0x2d1d   :  { %7065 = vmatprep.subr.bf16.mxu1 %v7826_v1 }
0x2d20   :  { %7066 = vmatpush3.bf16.msra.mxu1 %v7748_v32  ;;  %v7776_v32 = vld [vmem:[%s10592_s5 + $0x3b8] sm:$0xff]  }
0x2d21   :  { %7067 = vmatprep.subr.bf16.mxu1 %v7826_v1 }
0x2d24   :  { %7068 = vmatpush3.bf16.msra.mxu1 %v7749_v54 }
0x2d25   :  { %7093 = vmatprep.subr.bf16.mxu1 %v7826_v1 }
0x2dda   :  { %v4205_v56 = vpop.f32.mrb[104].mxu1 }
0x2ddb   :  { %v4206_v34 = vadd.f32 %v7750_v33, %v4205_v56  ;;  %v7031_v35 = vpop.f32.mrb[105].mxu1  ;;  %v7777_v56 = vld [vmem:[%s10594_s6 + $0xc] ss:$0 sm:$0xff] }
0x2ddc   :  { %v4208_v36 = vpop.f32.mrb[106].mxu1 }
0x2ddd   :  { %v4212_v37 = vmax.f32 %v4206_v34, 0.0  ;;  %v4209_v38 = vadd.f32 %v7750_v33, %v4208_v36  ;;  %v7032_v39 = vpop.f32.mrb[107].mxu1 }
0x2ddf   :  { %v4213_v40 = vmax.f32 %v4209_v38, 0.0  ;;  %v10189_v41 = vadd.f32 %v4212_v37, %v10107_v0  ;;  %v7760_v0 = vld [vmem:[%s10592_s5 + $0x340] sm:$0xff]  }
0x2de1   :  { %v10192_v42 = vadd.f32 %v4213_v40, %v10110_v2  ;;  %v7761_v2 = vld [vmem:[%s10592_s5 + $0x348] sm:$0xff]  }
0x2de3   :  { %v4216_v43 = vpack.c.bf16 %v10192_v42, %v10189_v41 }
0x2de5   :  { %7050 = vmatmul.mubr.bf16.vlgmr.msra.gmra.mrb[108].mxu0 %v4216_v43  ;;  %v7780_v43 = vld [vmem:[%s10592_s5 + $0x3d0] sm:$0xff]  }
0x2de6   :  { %7074 = vmatpush3.bf16.msra.mxu0 %v7751_v44  ;;  %7089 = vmatprep.mubr.msk.bf16.mxu0 %vm7827_vm0, %v7826_v1  ;;  %v7781_v44 = vld [vmem:[%s10592_s5 + $0x3d8] sm:$0xff]  }
0x2de7   :  { %7075 = vmatprep.subr.bf16.mxu0 %v7826_v1 }
0x2dea   :  { %7076 = vmatpush3.bf16.msra.mxu0 %v7752_v45  ;;  %v7782_v45 = vld [vmem:[%s10592_s5 + $0x3e0] sm:$0xff]  }
0x2deb   :  { %7077 = vmatprep.subr.bf16.mxu0 %v7826_v1 }
0x2dee   :  { %7078 = vmatpush3.bf16.msra.mxu0 %v7753_v46  ;;  %v7783_v46 = vld [vmem:[%s10592_s5 + $0x3e8] sm:$0xff]  }
0x2def   :  { %7079 = vmatprep.subr.bf16.mxu0 %v7826_v1 }
0x2df2   :  { %7080 = vmatpush3.bf16.msra.mxu0 %v7754_v47  ;;  %v7784_v47 = vld [vmem:[%s10592_s5 + $0x3f0] sm:$0xff]  }
0x2df3   :  { %7081 = vmatprep.subr.bf16.mxu0 %v7826_v1 }
0x2df6   :  { %7082 = vmatpush3.bf16.msra.mxu0 %v7755_v48  ;;  %v7785_v48 = vld [vmem:[%s10592_s5 + $0x3f8] sm:$0xff]  }
0x2df7   :  { %7083 = vmatprep.subr.bf16.mxu0 %v7826_v1 }
0x2dfa   :  { %7084 = vmatpush3.bf16.msra.mxu0 %v7756_v49 }
0x2dfb   :  { %7085 = vmatprep.subr.bf16.mxu0 %v7826_v1 }
0x2dfe   :  { %7086 = vmatpush3.bf16.msra.mxu0 %v7757_v50  ;;  %v7786_v50 = vld [vmem:[%s10594_s6 + $0xd] ss:$0 sm:$0xff] }
0x2dff   :  { %7087 = vmatprep.subr.bf16.mxu0 %v7826_v1 }
0x2e02   :  { %7088 = vmatpush3.bf16.msra.mxu0 %v7758_v51 }
0x2e03   :  { %7113 = vmatprep.subr.bf16.mxu0 %v7826_v1 }
0x2eb8   :  { %v4251_v52 = vpop.f32.mrb[108].mxu0 }
0x2eb9   :  { %v4252_v55 = vadd.f32 %v7759_v53, %v4251_v52  ;;  %v7051_v57 = vpop.f32.mrb[109].mxu0 }
0x2eba   :  { %v4254_v58 = vpop.f32.mrb[110].mxu0 }
0x2ebb   :  { %v4255_v59 = vadd.f32 %v7759_v53, %v4254_v58  ;;  %v7052_v60 = vpop.f32.mrb[111].mxu0  ;;  %v4258_v61 = vmax.f32 %v4252_v55, 0.0 }
0x2ebd   :  { %v4259_v62 = vmax.f32 %v4255_v59, 0.0 }
0x2ebf   :  { %v4260_v63 = vpack.c.bf16 %v4259_v62, %v4258_v61 }
0x2ec1   :  { %7070 = vmatmul.mubr.bf16.vlgmr.msra.gmra.mrb[108].mxu1 %v4260_v63  ;;  %v7787_v63 = vld [vmem:[%s10592_s5 + $0x400] sm:$0xff]  }
0x2ec2   :  { %7094 = vmatpush3.bf16.msra.mxu1 %v7760_v0  ;;  %7109 = vmatprep.mubr.msk.bf16.mxu1 %vm7827_vm0, %v7826_v1  ;;  %v7788_v0 = vld [vmem:[%s10592_s5 + $0x408] sm:$0xff]  }
0x2ec3   :  { %7095 = vmatprep.subr.bf16.mxu1 %v7826_v1 }
0x2ec6   :  { %7096 = vmatpush3.bf16.msra.mxu1 %v7761_v2  ;;  %v7789_v2 = vld [vmem:[%s10592_s5 + $0x410] sm:$0xff]  }
0x2ec7   :  { %7097 = vmatprep.subr.bf16.mxu1 %v7826_v1 }
0x2eca   :  { %7098 = vmatpush3.bf16.msra.mxu1 %v7762_v3  ;;  %v7790_v3 = vld [vmem:[%s10592_s5 + $0x418] sm:$0xff]  }
0x2ecb   :  { %7099 = vmatprep.subr.bf16.mxu1 %v7826_v1 }
0x2ece   :  { %7100 = vmatpush3.bf16.msra.mxu1 %v7763_v4  ;;  %v7791_v4 = vld [vmem:[%s10592_s5 + $0x420] sm:$0xff]  }
0x2ecf   :  { %7101 = vmatprep.subr.bf16.mxu1 %v7826_v1 }
0x2ed2   :  { %7102 = vmatpush3.bf16.msra.mxu1 %v7764_v5  ;;  %v7792_v5 = vld [vmem:[%s10592_s5 + $0x428] sm:$0xff]  }
0x2ed3   :  { %7103 = vmatprep.subr.bf16.mxu1 %v7826_v1 }
0x2ed6   :  { %7104 = vmatpush3.bf16.msra.mxu1 %v7765_v6  ;;  %v7793_v6 = vld [vmem:[%s10592_s5 + $0x430] sm:$0xff]  }
0x2ed7   :  { %7105 = vmatprep.subr.bf16.mxu1 %v7826_v1 }
0x2eda   :  { %7106 = vmatpush3.bf16.msra.mxu1 %v7766_v7  ;;  %v7794_v7 = vld [vmem:[%s10592_s5 + $0x438] sm:$0xff]  }
0x2edb   :  { %7107 = vmatprep.subr.bf16.mxu1 %v7826_v1 }
0x2ede   :  { %7108 = vmatpush3.bf16.msra.mxu1 %v7767_v12 }
0x2edf   :  { %7133 = vmatprep.subr.bf16.mxu1 %v7826_v1 }
0x2f94   :  { %v4295_v13 = vpop.f32.mrb[108].mxu1 }
0x2f95   :  { %v4296_v9 = vadd.f32 %v7768_v8, %v4295_v13  ;;  %v7071_v14 = vpop.f32.mrb[109].mxu1  ;;  %v7795_v13 = vld [vmem:[%s10594_s6 + $0xe] ss:$0 sm:$0xff] }
0x2f96   :  { %v4298_v15 = vpop.f32.mrb[110].mxu1 }
0x2f97   :  { %v4302_v16 = vmax.f32 %v4296_v9, 0.0  ;;  %v4299_v17 = vadd.f32 %v7768_v8, %v4298_v15  ;;  %v7072_v18 = vpop.f32.mrb[111].mxu1 }
0x2f99   :  { %v4303_v19 = vmax.f32 %v4299_v17, 0.0  ;;  %v10271_v22 = vadd.f32 %v4302_v16, %v10189_v41  ;;  %v7778_v41 = vld [vmem:[%s10592_s5 + $0x3c0] sm:$0xff]  }
0x2f9b   :  { %v10274_v23 = vadd.f32 %v4303_v19, %v10192_v42  ;;  %v7779_v42 = vld [vmem:[%s10592_s5 + $0x3c8] sm:$0xff]  }
0x2f9d   :  { %v4306_v24 = vpack.c.bf16 %v10274_v23, %v10271_v22 }
0x2f9f   :  { %7090 = vmatmul.mubr.bf16.vlgmr.msra.gmra.mrb[112].mxu0 %v4306_v24  ;;  %v7798_v24 = vld [vmem:[%s10592_s5 + $0x450] sm:$0xff]  }
0x2fa0   :  { %7114 = vmatpush3.bf16.msra.mxu0 %v7769_v25  ;;  %7129 = vmatprep.mubr.msk.bf16.mxu0 %vm7827_vm0, %v7826_v1  ;;  %v7799_v25 = vld [vmem:[%s10592_s5 + $0x458] sm:$0xff]  }
0x2fa1   :  { %7115 = vmatprep.subr.bf16.mxu0 %v7826_v1 }
0x2fa4   :  { %7116 = vmatpush3.bf16.msra.mxu0 %v7770_v26  ;;  %v7800_v26 = vld [vmem:[%s10592_s5 + $0x460] sm:$0xff]  }
0x2fa5   :  { %7117 = vmatprep.subr.bf16.mxu0 %v7826_v1 }
0x2fa8   :  { %7118 = vmatpush3.bf16.msra.mxu0 %v7771_v27  ;;  %v7801_v27 = vld [vmem:[%s10592_s5 + $0x468] sm:$0xff]  }
0x2fa9   :  { %7119 = vmatprep.subr.bf16.mxu0 %v7826_v1 }
0x2fac   :  { %7120 = vmatpush3.bf16.msra.mxu0 %v7772_v28  ;;  %v7802_v28 = vld [vmem:[%s10592_s5 + $0x470] sm:$0xff]  }
0x2fad   :  { %7121 = vmatprep.subr.bf16.mxu0 %v7826_v1 }
0x2fb0   :  { %7122 = vmatpush3.bf16.msra.mxu0 %v7773_v29  ;;  %v7803_v29 = vld [vmem:[%s10592_s5 + $0x478] sm:$0xff]  }
0x2fb1   :  { %7123 = vmatprep.subr.bf16.mxu0 %v7826_v1 }
0x2fb4   :  { %7124 = vmatpush3.bf16.msra.mxu0 %v7774_v30 }
0x2fb5   :  { %7125 = vmatprep.subr.bf16.mxu0 %v7826_v1 }
0x2fb8   :  { %7126 = vmatpush3.bf16.msra.mxu0 %v7775_v31  ;;  %v7804_v31 = vld [vmem:[%s10594_s6 + $0xf] ss:$0 sm:$0xff] }
0x2fb9   :  { %7127 = vmatprep.subr.bf16.mxu0 %v7826_v1 }
0x2fbc   :  { %7128 = vmatpush3.bf16.msra.mxu0 %v7776_v32 }
0x2fbd   :  { %7153 = vmatprep.subr.bf16.mxu0 %v7826_v1 }
0x3072   :  { %v4341_v54 = vpop.f32.mrb[112].mxu0 }
0x3073   :  { %v4342_v33 = vadd.f32 %v7777_v56, %v4341_v54  ;;  %v7091_v34 = vpop.f32.mrb[113].mxu0 }
0x3074   :  { %v4344_v35 = vpop.f32.mrb[114].mxu0 }
0x3075   :  { %v4345_v36 = vadd.f32 %v7777_v56, %v4344_v35  ;;  %v7092_v37 = vpop.f32.mrb[115].mxu0  ;;  %v4348_v38 = vmax.f32 %v4342_v33, 0.0 }
0x3077   :  { %v4349_v39 = vmax.f32 %v4345_v36, 0.0 }
0x3079   :  { %v4350_v40 = vpack.c.bf16 %v4349_v39, %v4348_v38 }
0x307b   :  { %7110 = vmatmul.mubr.bf16.vlgmr.msra.gmra.mrb[112].mxu1 %v4350_v40  ;;  %v7805_v40 = vld [vmem:[%s10592_s5 + $0x480] sm:$0xff]  }
0x307c   :  { %7134 = vmatpush3.bf16.msra.mxu1 %v7778_v41  ;;  %7149 = vmatprep.mubr.msk.bf16.mxu1 %vm7827_vm0, %v7826_v1  ;;  %v7806_v41 = vld [vmem:[%s10592_s5 + $0x488] sm:$0xff]  }
0x307d   :  { %7135 = vmatprep.subr.bf16.mxu1 %v7826_v1 }
0x3080   :  { %7136 = vmatpush3.bf16.msra.mxu1 %v7779_v42  ;;  %v7807_v42 = vld [vmem:[%s10592_s5 + $0x490] sm:$0xff]  }
0x3081   :  { %7137 = vmatprep.subr.bf16.mxu1 %v7826_v1 }
0x3084   :  { %7138 = vmatpush3.bf16.msra.mxu1 %v7780_v43  ;;  %v7808_v43 = vld [vmem:[%s10592_s5 + $0x498] sm:$0xff]  }
0x3085   :  { %7139 = vmatprep.subr.bf16.mxu1 %v7826_v1 }
0x3088   :  { %7140 = vmatpush3.bf16.msra.mxu1 %v7781_v44  ;;  %v7809_v44 = vld [vmem:[%s10592_s5 + $0x4a0] sm:$0xff]  }
0x3089   :  { %7141 = vmatprep.subr.bf16.mxu1 %v7826_v1 }
0x308c   :  { %7142 = vmatpush3.bf16.msra.mxu1 %v7782_v45  ;;  %v7810_v45 = vld [vmem:[%s10592_s5 + $0x4a8] sm:$0xff]  }
0x308d   :  { %7143 = vmatprep.subr.bf16.mxu1 %v7826_v1 }
0x3090   :  { %7144 = vmatpush3.bf16.msra.mxu1 %v7783_v46  ;;  %v7811_v46 = vld [vmem:[%s10592_s5 + $0x4b0] sm:$0xff]  }
0x3091   :  { %7145 = vmatprep.subr.bf16.mxu1 %v7826_v1 }
0x3094   :  { %7146 = vmatpush3.bf16.msra.mxu1 %v7784_v47  ;;  %v7812_v47 = vld [vmem:[%s10592_s5 + $0x4b8] sm:$0xff]  }
0x3095   :  { %7147 = vmatprep.subr.bf16.mxu1 %v7826_v1 }
0x3098   :  { %7148 = vmatpush3.bf16.msra.mxu1 %v7785_v48 }
0x3099   :  { %7173 = vmatprep.subr.bf16.mxu1 %v7826_v1 }
0x314e   :  { %v4385_v49 = vpop.f32.mrb[112].mxu1 }
0x314f   :  { %v4386_v51 = vadd.f32 %v7786_v50, %v4385_v49  ;;  %v7111_v52 = vpop.f32.mrb[113].mxu1  ;;  %v7813_v49 = vld [vmem:[%s10594_s6 + $0x10] ss:$0 sm:$0xff] }
0x3150   :  { %v4388_v53 = vpop.f32.mrb[114].mxu1 }
0x3151   :  { %v4392_v55 = vmax.f32 %v4386_v51, 0.0  ;;  %v4389_v57 = vadd.f32 %v7786_v50, %v4388_v53  ;;  %v7112_v58 = vpop.f32.mrb[115].mxu1 }
0x3153   :  { %v4393_v59 = vmax.f32 %v4389_v57, 0.0  ;;  %v10353_v60 = vadd.f32 %v4392_v55, %v10271_v22  ;;  %v7796_v22 = vld [vmem:[%s10592_s5 + $0x440] sm:$0xff]  }
0x3155   :  { %v10356_v61 = vadd.f32 %v4393_v59, %v10274_v23  ;;  %v7797_v23 = vld [vmem:[%s10592_s5 + $0x448] sm:$0xff]  }
0x3157   :  { %v4396_v62 = vpack.c.bf16 %v10356_v61, %v10353_v60 }
0x3159   :  { %7130 = vmatmul.mubr.bf16.vlgmr.msra.gmra.mrb[116].mxu0 %v4396_v62  ;;  %v7816_v62 = vld [vmem:[%s10592_s5 + $0x4d0] sm:$0xff]  }
0x315a   :  { %7154 = vmatpush3.bf16.msra.mxu0 %v7787_v63  ;;  %7169 = vmatprep.mubr.msk.bf16.mxu0 %vm7827_vm0, %v7826_v1  ;;  %v7817_v63 = vld [vmem:[%s10592_s5 + $0x4d8] sm:$0xff]  }
0x315b   :  { %7155 = vmatprep.subr.bf16.mxu0 %v7826_v1 }
0x315e   :  { %7156 = vmatpush3.bf16.msra.mxu0 %v7788_v0  ;;  %v7818_v0 = vld [vmem:[%s10592_s5 + $0x4e0] sm:$0xff]  }
0x315f   :  { %7157 = vmatprep.subr.bf16.mxu0 %v7826_v1 }
0x3162   :  { %7158 = vmatpush3.bf16.msra.mxu0 %v7789_v2  ;;  %v7819_v2 = vld [vmem:[%s10592_s5 + $0x4e8] sm:$0xff]  }
0x3163   :  { %7159 = vmatprep.subr.bf16.mxu0 %v7826_v1 }
0x3166   :  { %7160 = vmatpush3.bf16.msra.mxu0 %v7790_v3  ;;  %v7820_v3 = vld [vmem:[%s10592_s5 + $0x4f0] sm:$0xff]  }
0x3167   :  { %7161 = vmatprep.subr.bf16.mxu0 %v7826_v1 }
0x316a   :  { %7162 = vmatpush3.bf16.msra.mxu0 %v7791_v4  ;;  %v7821_v4 = vld [vmem:[%s10592_s5 + $0x4f8] sm:$0xff]  }
0x316b   :  { %7163 = vmatprep.subr.bf16.mxu0 %v7826_v1 }
0x316e   :  { %7164 = vmatpush3.bf16.msra.mxu0 %v7792_v5 }
0x316f   :  { %7165 = vmatprep.subr.bf16.mxu0 %v7826_v1 }
0x3172   :  { %7166 = vmatpush3.bf16.msra.mxu0 %v7793_v6  ;;  %v7822_v6 = vld [vmem:[%s10594_s6 + $0x11] ss:$0 sm:$0xff] }
0x3173   :  { %7167 = vmatprep.subr.bf16.mxu0 %v7826_v1 }
0x3176   :  { %7168 = vmatpush3.bf16.msra.mxu0 %v7794_v7 }
0x3177   :  { %7193 = vmatprep.subr.bf16.mxu0 %v7826_v1 }
0x322c   :  { %v4431_v12 = vpop.f32.mrb[116].mxu0 }
0x322d   :  { %v4432_v8 = vadd.f32 %v7795_v13, %v4431_v12  ;;  %v7131_v9 = vpop.f32.mrb[117].mxu0 }
0x322e   :  { %v4434_v14 = vpop.f32.mrb[118].mxu0 }
0x322f   :  { %v4435_v15 = vadd.f32 %v7795_v13, %v4434_v14  ;;  %v7132_v16 = vpop.f32.mrb[119].mxu0  ;;  %v4438_v17 = vmax.f32 %v4432_v8, 0.0 }
0x3231   :  { %v4439_v18 = vmax.f32 %v4435_v15, 0.0 }
0x3233   :  { %v4440_v19 = vpack.c.bf16 %v4439_v18, %v4438_v17  ;;  %v7432_v18 = vld [vmem:[%s10597_s7] ss:$8 sps:$4 sm:$0xff]  }
0x3235   :  { %7150 = vmatmul.mubr.bf16.vlgmr.msra.gmra.mrb[116].mxu1 %v4440_v19  ;;  %v7434_v19 = vld [vmem:[%s10597_s7 + $0x4] ss:$8 sps:$4 sm:$0xff]  }
0x3236   :  { %7174 = vmatpush3.bf16.msra.mxu1 %v7796_v22  ;;  %7189 = vmatprep.mubr.msk.bf16.mxu1 %vm7827_vm0, %v7826_v1  ;;  %v7437_v22 = vld [vmem:[%s10597_s7 + $0x14] ss:$8 sps:$4 sm:$0xff]  }
0x3237   :  { %7175 = vmatprep.subr.bf16.mxu1 %v7826_v1 }
0x323a   :  { %7176 = vmatpush3.bf16.msra.mxu1 %v7797_v23  ;;  %v7435_v23 = vld [vmem:[%s10597_s7 + $0x10] ss:$8 sps:$4 sm:$0xff]  }
0x323b   :  { %7177 = vmatprep.subr.bf16.mxu1 %v7826_v1 }
0x323e   :  { %7178 = vmatpush3.bf16.msra.mxu1 %v7798_v24  ;;  %v7440_v24 = vld [vmem:[%s10597_s7 + $0x24] ss:$8 sps:$4 sm:$0xff]  }
0x323f   :  { %7179 = vmatprep.subr.bf16.mxu1 %v7826_v1 }
0x3242   :  { %7180 = vmatpush3.bf16.msra.mxu1 %v7799_v25  ;;  %v7438_v25 = vld [vmem:[%s10597_s7 + $0x20] ss:$8 sps:$4 sm:$0xff]  }
0x3243   :  { %7181 = vmatprep.subr.bf16.mxu1 %v7826_v1 }
0x3246   :  { %7182 = vmatpush3.bf16.msra.mxu1 %v7800_v26  ;;  %v7443_v26 = vld [vmem:[%s10597_s7 + $0x34] ss:$8 sps:$4 sm:$0xff]  }
0x3247   :  { %7183 = vmatprep.subr.bf16.mxu1 %v7826_v1 }
0x324a   :  { %7184 = vmatpush3.bf16.msra.mxu1 %v7801_v27  ;;  %v7441_v27 = vld [vmem:[%s10597_s7 + $0x30] ss:$8 sps:$4 sm:$0xff]  }
0x324b   :  { %7185 = vmatprep.subr.bf16.mxu1 %v7826_v1 }
0x324e   :  { %7186 = vmatpush3.bf16.msra.mxu1 %v7802_v28  ;;  %v7446_v28 = vld [vmem:[%s10597_s7 + $0x44] ss:$8 sps:$4 sm:$0xff]  }
0x324f   :  { %7187 = vmatprep.subr.bf16.mxu1 %v7826_v1 }
0x3252   :  { %7188 = vmatpush3.bf16.msra.mxu1 %v7803_v29  ;;  %v7444_v29 = vld [vmem:[%s10597_s7 + $0x40] ss:$8 sps:$4 sm:$0xff]  }
0x3253   :  { %7213 = vmatprep.subr.bf16.mxu1 %v7826_v1 }
0x3308   :  { %v4475_v30 = vpop.f32.mrb[116].mxu1 }
0x3309   :  { %v4476_v32 = vadd.f32 %v7804_v31, %v4475_v30  ;;  %v7151_v54 = vpop.f32.mrb[117].mxu1 }
0x330a   :  { %v4478_v56 = vpop.f32.mrb[118].mxu1 }
0x330b   :  { %v4482_v33 = vmax.f32 %v4476_v32, 0.0  ;;  %v4479_v34 = vadd.f32 %v7804_v31, %v4478_v56  ;;  %v7152_v35 = vpop.f32.mrb[119].mxu1  ;;  %v7823_v31 = vld [vmem:[%s10594_s6 + $0x12] ss:$0 sm:$0xff] }
0x330d   :  { %v4483_v36 = vmax.f32 %v4479_v34, 0.0  ;;  %v10435_v37 = vadd.f32 %v4482_v33, %v10353_v60  ;;  %v7814_v60 = vld [vmem:[%s10592_s5 + $0x4c0] sm:$0xff]  }
0x330f   :  { %v10438_v38 = vadd.f32 %v4483_v36, %v10356_v61  ;;  %v7815_v61 = vld [vmem:[%s10592_s5 + $0x4c8] sm:$0xff]  }
0x3311   :  { %v4486_v39 = vpack.c.bf16 %v10438_v38, %v10435_v37 }
0x3313   :  { %7170 = vmatmul.mubr.bf16.vlgmr.msra.gmra.mrb[120].mxu0 %v4486_v39  ;;  %v7447_v39 = vld [vmem:[%s10597_s7 + $0x50] ss:$8 sps:$4 sm:$0xff]  }
0x3314   :  { %7194 = vmatpush3.bf16.msra.mxu0 %v7805_v40  ;;  %7209 = vmatprep.mubr.msk.bf16.mxu0 %vm7827_vm0, %v7826_v1  ;;  %v7452_v40 = vld [vmem:[%s10597_s7 + $0x64] ss:$8 sps:$4 sm:$0xff]  }
0x3315   :  { %7195 = vmatprep.subr.bf16.mxu0 %v7826_v1 }
0x3318   :  { %7196 = vmatpush3.bf16.msra.mxu0 %v7806_v41  ;;  %v7450_v41 = vld [vmem:[%s10597_s7 + $0x60] ss:$8 sps:$4 sm:$0xff]  }
0x3319   :  { %7197 = vmatprep.subr.bf16.mxu0 %v7826_v1 }
0x331c   :  { %7198 = vmatpush3.bf16.msra.mxu0 %v7807_v42  ;;  %v7455_v42 = vld [vmem:[%s10597_s7 + $0x74] ss:$8 sps:$4 sm:$0xff]  }
0x331d   :  { %7199 = vmatprep.subr.bf16.mxu0 %v7826_v1 }
0x3320   :  { %7200 = vmatpush3.bf16.msra.mxu0 %v7808_v43  ;;  %v7453_v43 = vld [vmem:[%s10597_s7 + $0x70] ss:$8 sps:$4 sm:$0xff]  }
0x3321   :  { %7201 = vmatprep.subr.bf16.mxu0 %v7826_v1 }
0x3324   :  { %7202 = vmatpush3.bf16.msra.mxu0 %v7809_v44  ;;  %v7828_v44 = vmov 0  }
0x3325   :  { %7203 = vmatprep.subr.bf16.mxu0 %v7826_v1 }
0x3328   :  { %7204 = vmatpush3.bf16.msra.mxu0 %v7810_v45 }
0x3329   :  { %7205 = vmatprep.subr.bf16.mxu0 %v7826_v1 }
0x332c   :  { %7206 = vmatpush3.bf16.msra.mxu0 %v7811_v46  ;;  %v7824_v46 = vld [vmem:[%s10594_s6 + $0x13] ss:$0 sm:$0xff] }
0x332d   :  { %7207 = vmatprep.subr.bf16.mxu0 %v7826_v1 }
0x3330   :  { %7208 = vmatpush3.bf16.msra.mxu0 %v7812_v47 }
0x3331   :  { %4778 = vmatprep.subr.bf16.mxu0 %v7434_v19 }
0x33e6   :  { %v4521_v48 = vpop.f32.mrb[120].mxu0 }
0x33e7   :  { %v4522_v50 = vadd.f32 %v7813_v49, %v4521_v48  ;;  %v7171_v51 = vpop.f32.mrb[121].mxu0 }
0x33e8   :  { %v4524_v52 = vpop.f32.mrb[122].mxu0 }
0x33e9   :  { %v4525_v53 = vadd.f32 %v7813_v49, %v4524_v52  ;;  %v7172_v55 = vpop.f32.mrb[123].mxu0  ;;  %v4528_v57 = vmax.f32 %v4522_v50, 0.0 }
0x33eb   :  { %v4529_v58 = vmax.f32 %v4525_v53, 0.0 }
0x33ed   :  { %v4530_v59 = vpack.c.bf16 %v4529_v58, %v4528_v57 }
0x33ef   :  { %7190 = vmatmul.mubr.bf16.vlgmr.msra.gmra.mrb[120].mxu1 %v4530_v59 }
0x33f0   :  { %7214 = vmatpush3.bf16.msra.mxu1 %v7814_v60  ;;  %7229 = vmatprep.mubr.msk.bf16.mxu1 %vm7827_vm0, %v7826_v1 }
0x33f1   :  { %7215 = vmatprep.subr.bf16.mxu1 %v7826_v1 }
0x33f4   :  { %7216 = vmatpush3.bf16.msra.mxu1 %v7815_v61  ;;  %v4685_v61 = vld [vmem:[%s10598_s8] sm:$0x3] }
0x33f5   :  { %7217 = vmatprep.subr.bf16.mxu1 %v7826_v1 }
0x33f8   :  { %7218 = vmatpush3.bf16.msra.mxu1 %v7816_v62  ;;  %v4686_v62 = vmul.f32 3.0, %v4685_v61 }
0x33f9   :  { %7219 = vmatprep.subr.bf16.mxu1 %v7826_v1 }
0x33fc   :  { %7220 = vmatpush3.bf16.msra.mxu1 %v7817_v63  ;;  %v4694_v63 = vsub.s32 1, %v8903_v20 }
0x33fd   :  { %7221 = vmatprep.subr.bf16.mxu1 %v7826_v1 }
0x3400   :  { %7222 = vmatpush3.bf16.msra.mxu1 %v7818_v0  ;;  %v4691_v0 = vrot.slane %v4686_v62, %v2806_v21 }
0x3401   :  { %7223 = vmatprep.subr.bf16.mxu1 %v7826_v1 }
0x3404   :  { %7224 = vmatpush3.bf16.msra.mxu1 %v7819_v2  ;;  %v4695_v2 = vrot.slane %v4686_v62, %v4694_v63 }
0x3405   :  { %7225 = vmatprep.subr.bf16.mxu1 %v7826_v1 }
0x3408   :  { %7226 = vmatpush3.bf16.msra.mxu1 %v7820_v3 }
0x3409   :  { %7227 = vmatprep.subr.bf16.mxu1 %v7826_v1 }
0x340c   :  { %7228 = vmatpush3.bf16.msra.mxu1 %v7821_v4 }
0x34c2   :  { %v4565_v5 = vpop.f32.mrb[120].mxu1 }
0x34c3   :  { %v4566_v7 = vadd.f32 %v7822_v6, %v4565_v5  ;;  %v7191_v12 = vpop.f32.mrb[121].mxu1 }
0x34c4   :  { %v4568_v13 = vpop.f32.mrb[122].mxu1 }
0x34c5   :  { %v4572_v8 = vmax.f32 %v4566_v7, 0.0  ;;  %v4569_v9 = vadd.f32 %v7822_v6, %v4568_v13  ;;  %v7192_v14 = vpop.f32.mrb[123].mxu1 }
0x34c7   :  { %v4573_v15 = vmax.f32 %v4569_v9, 0.0  ;;  %v4574_v16 = vadd.f32 %v4572_v8, %v10435_v37 }
0x34c9   :  { %v4575_v1 = vadd.f32 %v4573_v15, %v10438_v38  ;;  %v7449_v38 = vld [vmem:[%s10597_s7 + $0x54] ss:$8 sps:$4 sm:$0xff]  }
0x34cb   :  { %v4576_v17 = vpack.c.bf16 %v4575_v1, %v4574_v16 }
0x34cd   :  { %7210 = vmatmul.mubr.bf16.vlgmr.msra.gmra.mrb[124].mxu0 %v4576_v17 }
0x34ce   :  { %4779 = vmatpush1.bf16.msra.mxu0 %v7432_v18  ;;  %4810 = vmatprep.mubr.bf16.mxu0 %v7828_v44 }
0x34cf   :  { %4780 = vmatprep.subr.bf16.mxu0 %v7437_v22 }
0x34d2   :  { %4781 = vmatpush1.bf16.msra.mxu0 %v7435_v23 }
0x34d3   :  { %4782 = vmatprep.subr.bf16.mxu0 %v7440_v24 }
0x34d6   :  { %4783 = vmatpush1.bf16.msra.mxu0 %v7438_v25 }
0x34d7   :  { %4784 = vmatprep.subr.bf16.mxu0 %v7443_v26 }
0x34da   :  { %4785 = vmatpush1.bf16.msra.mxu0 %v7441_v27 }
0x34db   :  { %4786 = vmatprep.subr.bf16.mxu0 %v7446_v28 }
0x34de   :  { %4787 = vmatpush1.bf16.msra.mxu0 %v7444_v29 }
0x34df   :  { %4788 = vmatprep.subr.bf16.mxu0 %v7449_v38 }
0x34e2   :  { %4789 = vmatpush1.bf16.msra.mxu0 %v7447_v39 }
0x34e3   :  { %4790 = vmatprep.subr.bf16.mxu0 %v7452_v40 }
0x34e6   :  { %4791 = vmatpush1.bf16.msra.mxu0 %v7450_v41 }
0x34e7   :  { %4792 = vmatprep.subr.bf16.mxu0 %v7455_v42 }
0x34ea   :  { %4793 = vmatpush1.bf16.msra.mxu0 %v7453_v43 }
0x35a0   :  { %v4611_v30 = vpop.f32.mrb[124].mxu0 }
0x35a1   :  { %v4612_v32 = vadd.f32 %v7823_v31, %v4611_v30  ;;  %v7211_v54 = vpop.f32.mrb[125].mxu0 }
0x35a2   :  { %v4614_v56 = vpop.f32.mrb[126].mxu0 }
0x35a3   :  { %v4615_v33 = vadd.f32 %v7823_v31, %v4614_v56  ;;  %v7212_v34 = vpop.f32.mrb[127].mxu0  ;;  %v4618_v35 = vmax.f32 %v4612_v32, 0.0 }
0x35a5   :  { %v4619_v36 = vmax.f32 %v4615_v33, 0.0 }
0x35a7   :  { %v4620_v37 = vpack.c.bf16 %v4619_v36, %v4618_v35 }
0x35a9   :  { %7230 = vmatmul.mubr.bf16.vlgmr.msra.gmra.mrb[124].mxu1 %v4620_v37 }
0x367c   :  { %v4655_v45 = vpop.f32.mrb[124].mxu1 }
0x367d   :  { %v4656_v47 = vadd.f32 %v7824_v46, %v4655_v45  ;;  %v7231_v48 = vpop.f32.mrb[125].mxu1 }
0x367e   :  { %v4658_v49 = vpop.f32.mrb[126].mxu1 }
0x367f   :  { %v4662_v50 = vmax.f32 %v4656_v47, 0.0  ;;  %v4659_v51 = vadd.f32 %v7824_v46, %v4658_v49  ;;  %v7232_v52 = vpop.f32.mrb[127].mxu1 }
0x3681   :  { %v4664_v53 = vadd.f32 %v4662_v50, %v4574_v16  ;;  %v4663_v55 = vmax.f32 %v4659_v51, 0.0 }
0x3683   :  { %v4665_v57 = vadd.f32 %v4663_v55, %v4575_v1  ;;  %v4666_v58 = vadd.f32 %v4664_v53, %v9732_v10 }
0x3685   :  { %v4667_v59 = vadd.f32 %v4665_v57, %v9735_v11 }
0x3687   :  { %v4668_v60 = vpack.c.bf16 %v4667_v59, %v4666_v58 }
0x3689   :  { %4811 = vmatmul.mubr.bf16.vlgmr.msra.gmra.mrb[128].mxu0 %v4668_v60 }
0x375c   :  { %v4812_v3 = vpop.f32.mrb[128].mxu0 }
0x375d   :  { %v4813_v4 = vadd.f32 %v4812_v3, %v4691_v0  ;;  %v4814_v5 = vpop.f32.mrb[129].mxu0 }
0x375e   :  { %v4815_v6 = vadd.f32 %v4814_v5, %v4695_v2  ;;  %v4816_v10 = vpop.f32.mrb[130].mxu0 }
0x375f   :  { %4821 = vst [vmem:[%s10599_s9] sm:$0xff] %v4813_v4  ;;  %v4817_v11 = vadd.f32 %v4816_v10, %v4691_v0  ;;  %v4818_v7 = vpop.f32.mrb[131].mxu0 }
0x3760   :  { %4822 = vst [vmem:[%s10599_s9 + $0x8] sm:$0xff] %v4815_v6  ;;  %v4819_v12 = vadd.f32 %v4818_v7, %v4695_v2 }
0x3761   :  { %4823 = vst [vmem:[%s10599_s9 + $0x10] sm:$0xff] %v4817_v11 }
0x3762   :  { %4824 = vst [vmem:[%s10599_s9 + $0x18] sm:$0xff] %v4819_v12 }

</bundles_post_ra>
